<compile_context>
chip_gen: v6e
topology: v6e:2x2x1
jax: 0.10.0
libtpu: 0.0.40
codegen_flags: <defaults>
</compile_context>

<pallas_src>
import numpy as np
import jax
import jax.numpy as jnp
from jax.experimental import pallas as pl
from jax.experimental.pallas import tpu as pltpu

H = W = 14          # input spatial size implied by Linear(2048, ...)
PO = 4              # pooled spatial size (4x4)
K_POOL = 5          # AvgPool2d kernel
S_POOL = 3          # AvgPool2d stride
CONV_OUT = 128
FC1_IN = 2048       # 128 * 4 * 4
FC1_OUT = 1024
NUM_CLASSES = 6
OUT_PAD = 128       # final projection padded to a full 128-lane output


def aux_block_kernel(x_ref, wc_ref, bc_ref, w1_ref, b1_ref, w2_ref, b2_ref,
                     out_ref, pooled_ref, act_ref):
    n_win = PO * PO
    tb = act_ref.shape[0]
    c = pooled_ref.shape[-1]
    inv_area = 1.0 / (K_POOL * K_POOL)

    def h_row(i):
        # One input H-row as (TB, W, C) f32; slice-only ref access (bf16 load,
        # f32 upcast for accumulation).
        return x_ref[:, i:i + 1, :, :][:, 0].astype(jnp.float32)

    # --- AvgPool2d(5, 3, 0): separable, f32 accumulation --------------------
    for oh in range(PO):
        rows = h_row(oh * S_POOL)                       # (TB, W, C) f32
        for dh in range(1, K_POOL):
            rows = rows + h_row(oh * S_POOL + dh)
        for ow in range(PO):
            s = rows[:, ow * S_POOL, :]                 # (TB, C) f32
            for dw in range(1, K_POOL):
                s = s + rows[:, ow * S_POOL + dw, :]
            pooled_ref[oh * PO + ow] = (s * inv_area).astype(jnp.bfloat16)

    # --- 1x1 Conv + ReLU: ONE (16*TB, C) @ (C, 128) MXU matmul --------------
    p2 = pooled_ref[...].reshape(n_win * tb, c)         # free major-dim merge
    y = jnp.dot(p2, wc_ref[...],
                preferred_element_type=jnp.float32) + bc_ref[...]
    y = jnp.maximum(y, 0.0).astype(jnp.bfloat16)
    y = y.reshape(n_win, tb, CONV_OUT)                  # free major-dim split
    # Scatter the 16 windows into the flattened activation layout
    # (k = hw*128 + c) with aligned, full-width 128-lane stores.
    for hw in range(n_win):
        act_ref[:, hw * CONV_OUT:(hw + 1) * CONV_OUT] = y[hw]

    # --- Linear(2048, 1024) + ReLU: single K=2048 bf16 matmul ---------------
    z = jnp.dot(act_ref[...], w1_ref[...], preferred_element_type=jnp.float32)
    z = jnp.maximum(z + b1_ref[...], 0.0).astype(jnp.bfloat16)   # (TB, 1024)

    # Dropout(0.5): identity in eval/inference mode.
    # TODO(synk): training-mode dropout (RNG mask + 1/keep scaling) not applied.

    # --- Linear(1024, 6) padded to 128 lanes (wrapper slices [:, :6]) -------
    out_ref[...] = jnp.dot(z, w2_ref[...],
                           preferred_element_type=jnp.float32) + b2_ref[...]


def _round_up(n, m):
    return ((n + m - 1) // m) * m


def _vmem_capacity_bytes():
    """Per-core VMEM capacity; conservative fallback (v7x) if query fails."""
    try:
        info = pltpu.get_tpu_info()
        for attr in ("vmem_capacity_bytes", "vmem_bytes"):
            v = getattr(info, attr, None)
            if v:
                return int(v)
    except Exception:
        pass
    return 64 * 1024 * 1024


def _pick_tiling(B, C, batch_tile):
    """Derive (TB, padded batch, vmem_limit_bytes) from the real footprint."""
    cap = _vmem_capacity_bytes()
    # Weight footprint.  Conservatively assume the pipeline double-buffers the
    # weight blocks even though their index_maps are constant (pl.Buffered(1)
    # would reclaim this; we budget for the worst case instead).
    fixed = 2 * (C * CONV_OUT * 2                # wc  (bf16)
                 + FC1_IN * FC1_OUT * 2          # w1  (bf16, 4 MiB)
                 + FC1_OUT * OUT_PAD * 2         # w2  (bf16)
                 + (CONV_OUT + FC1_OUT + OUT_PAD) * 4)   # biases (f32)
    per_row = (2 * H * W * C * 2                 # x block (bf16), double-buffered
               + PO * PO * C * 2                 # pooled scratch (bf16)
               + FC1_IN * 2                      # act scratch (bf16)
               + 2 * OUT_PAD * 4)                # out block (f32), double-buffered
    headroom = 8 << 20                           # in-kernel temps (row sums, conv result)
    avail = int(cap * 0.75) - fixed - headroom
    tb_cap = max(8, min(256, (avail // per_row) // 8 * 8))
    if batch_tile is not None:
        tb = batch_tile
    else:
        # Keep >= 2 grid steps when the batch allows it (2 TensorCores on v7x).
        tb = max(8, min(tb_cap, _round_up(-(-B // 2), 8)))
    b_pad = _round_up(B, tb)
    vmem_limit = fixed + tb * per_row + headroom
    vmem_limit = int(min(cap, max(vmem_limit, 16 << 20)))
    return tb, b_pad, vmem_limit


def aux_block_forward(x_nchw, pt_params, *, batch_tile=None):
    """Run AuxBlock forward with the Pallas kernel. x_nchw: (B, C, 14, 14)."""
    wc_pt, bc_pt, w1_pt, b1_pt, w2_pt, b2_pt = pt_params
    B, C, h, w = x_nchw.shape
    assert (h, w) == (H, W), "Linear(2048, ...) requires 14x14 input maps"

    TB, B_pad, vmem_limit = _pick_tiling(B, C, batch_tile)

    # ---- layout glue: NCHW -> NHWC fused with the bf16 downcast (ONE pass) ----
    # TODO(synk): accept NHWC bf16 activations upstream to drop this pass entirely.
    x_nhwc = jnp.transpose(x_nchw, (0, 2, 3, 1)).astype(jnp.bfloat16)
    if B_pad != B:
        x_nhwc = jnp.pad(x_nhwc, ((0, B_pad - B), (0, 0), (0, 0), (0, 0)))

    # ---- parameter packing: bf16 weights, f32 biases ----
    wc = wc_pt.T.astype(jnp.bfloat16)                      # (C, 128)
    bc = bc_pt.reshape(1, CONV_OUT).astype(jnp.float32)
    # PyTorch flatten index is k = c*16 + hw; repack fc1 weights to
    # k' = hw*128 + c so the kernel's (TB, 2048) scratch multiplies directly.
    w1 = (w1_pt.reshape(FC1_OUT, CONV_OUT, PO * PO)        # [o, c, hw]
          .transpose(2, 1, 0)                              # [hw, c, o]
          .reshape(FC1_IN, FC1_OUT)
          .astype(jnp.bfloat16))                           # (2048, 1024)
    b1 = b1_pt.reshape(1, FC1_OUT).astype(jnp.float32)
    w2 = jnp.zeros((FC1_OUT, OUT_PAD), jnp.bfloat16)
    w2 = w2.at[:, :NUM_CLASSES].set(w2_pt.T.astype(jnp.bfloat16))
    b2 = jnp.zeros((1, OUT_PAD), jnp.float32)
    b2 = b2.at[:, :NUM_CLASSES].set(b2_pt.reshape(1, NUM_CLASSES))

    grid_spec = pltpu.PrefetchScalarGridSpec(
        num_scalar_prefetch=0,
        grid=(B_pad // TB,),
        in_specs=[
            # activation stream: batch-tiled, bf16
            pl.BlockSpec((TB, H, W, C), lambda i: (i, 0, 0, 0)),
            # weights / biases: constant index_map -> resident across steps
            pl.BlockSpec((C, CONV_OUT), lambda i: (0, 0)),
            pl.BlockSpec((1, CONV_OUT), lambda i: (0, 0)),
            pl.BlockSpec((FC1_IN, FC1_OUT), lambda i: (0, 0)),
            pl.BlockSpec((1, FC1_OUT), lambda i: (0, 0)),
            pl.BlockSpec((FC1_OUT, OUT_PAD), lambda i: (0, 0)),
            pl.BlockSpec((1, OUT_PAD), lambda i: (0, 0)),
        ],
        out_specs=pl.BlockSpec((TB, OUT_PAD), lambda i: (i, 0)),
        scratch_shapes=[
            pltpu.VMEM((PO * PO, TB, C), jnp.bfloat16),    # pooled windows
            pltpu.VMEM((TB, FC1_IN), jnp.bfloat16),        # flattened activations
        ],
    )
    out = pl.pallas_call(
        aux_block_kernel,
        out_shape=jax.ShapeDtypeStruct((B_pad, OUT_PAD), jnp.float32),
        grid_spec=grid_spec,
        compiler_params=pltpu.CompilerParams(
            dimension_semantics=("parallel",),
            vmem_limit_bytes=vmem_limit,
        ),
    )(x_nhwc, wc, bc, w1, b1, w2, b2)
    return out[:B, :NUM_CLASSES]


def init_params(key, in_chnl):
    """Deterministic synthetic parameters in PyTorch layouts."""
    ks = jax.random.split(key, 6)
    wc_pt = 0.1 * jax.random.normal(ks[0], (CONV_OUT, in_chnl), jnp.float32)
    bc_pt = 0.1 * jax.random.normal(ks[1], (CONV_OUT,), jnp.float32)
    w1_pt = 0.05 * jax.random.normal(ks[2], (FC1_OUT, FC1_IN), jnp.float32)
    b1_pt = 0.05 * jax.random.normal(ks[3], (FC1_OUT,), jnp.float32)
    w2_pt = 0.05 * jax.random.normal(ks[4], (NUM_CLASSES, FC1_OUT), jnp.float32)
    b2_pt = 0.05 * jax.random.normal(ks[5], (NUM_CLASSES,), jnp.float32)
    return wc_pt, bc_pt, w1_pt, b1_pt, w2_pt, b2_pt


def reference_forward(x_nchw, pt_params):
    """Plain-JAX f32 NCHW reference mirroring the PyTorch module (eval mode)."""
    wc_pt, bc_pt, w1_pt, b1_pt, w2_pt, b2_pt = pt_params
    B = x_nchw.shape[0]
    pooled = jax.lax.reduce_window(
        x_nchw, 0.0, jax.lax.add,
        window_dimensions=(1, 1, K_POOL, K_POOL),
        window_strides=(1, 1, S_POOL, S_POOL),
        padding="VALID") / float(K_POOL * K_POOL)            # (B, C, 4, 4)
    y = jnp.einsum("oc,bchw->bohw", wc_pt, pooled) + bc_pt[None, :, None, None]
    y = jnp.maximum(y, 0.0)
    yf = y.reshape(B, -1)                                    # (B, 2048) channel-major
    z = jnp.maximum(yf @ w1_pt.T + b1_pt, 0.0)
    return z @ w2_pt.T + b2_pt                               # (B, 6)


if __name__ == "__main__":
    key = jax.random.PRNGKey(0)
    kx, kp = jax.random.split(key)

    in_chnl = 4
    x = jax.random.normal(kx, (2, in_chnl, H, W), jnp.float32)   # NCHW input
    params = init_params(kp, in_chnl)

    out = aux_block_forward(x, params)
    out = jax.block_until_ready(out)

    ref = reference_forward(x, params)
    np.testing.assert_allclose(np.asarray(out), np.asarray(ref),
                               rtol=2e-2, atol=2e-2)
    assert out.shape == (2, NUM_CLASSES)
    print("KERNEL_OK")
</pallas_src>

<mosaic_0001>
module attributes {stable_mosaic.version = 11 : i64} {
  func.func @aux_block_kernel(%arg0: i32, %arg1: memref<8x14x14x4xbf16, #tpu.memory_space<vmem>>, %arg2: memref<4x128xbf16, #tpu.memory_space<vmem>>, %arg3: memref<1x128xf32, #tpu.memory_space<vmem>>, %arg4: memref<2048x1024xbf16, #tpu.memory_space<vmem>>, %arg5: memref<1x1024xf32, #tpu.memory_space<vmem>>, %arg6: memref<1024x128xbf16, #tpu.memory_space<vmem>>, %arg7: memref<1x128xf32, #tpu.memory_space<vmem>>, %arg8: memref<8x128xf32, #tpu.memory_space<vmem>>, %arg9: memref<16x8x4xbf16, #tpu.memory_space<vmem>>, %arg10: memref<8x2048xbf16, #tpu.memory_space<vmem>>) attributes {dimension_semantics = [#tpu.dimension_semantics<parallel>], iteration_bounds = array<i64: 1>, scalar_prefetch = 0 : i64, scratch_operands = 2 : i64, tpu.core_type = #tpu.core_type<tc>, window_params = [{transform_indices = @transform_0, window_bounds = array<i64: 8, 14, 14, 4>}, {pipeline_mode = #tpu.pipeline_mode<synchronous>, transform_indices = @transform_1, window_bounds = array<i64: 4, 128>}, {pipeline_mode = #tpu.pipeline_mode<synchronous>, transform_indices = @transform_2, window_bounds = array<i64: 1, 128>}, {pipeline_mode = #tpu.pipeline_mode<synchronous>, transform_indices = @transform_3, window_bounds = array<i64: 2048, 1024>}, {pipeline_mode = #tpu.pipeline_mode<synchronous>, transform_indices = @transform_4, window_bounds = array<i64: 1, 1024>}, {pipeline_mode = #tpu.pipeline_mode<synchronous>, transform_indices = @transform_5, window_bounds = array<i64: 1024, 128>}, {pipeline_mode = #tpu.pipeline_mode<synchronous>, transform_indices = @transform_6, window_bounds = array<i64: 1, 128>}, {transform_indices = @transform_7, window_bounds = array<i64: 8, 128>}]} {
    %c0 = arith.constant 0 : index
    %c0_0 = arith.constant 0 : index
    %c0_1 = arith.constant 0 : index
    %c0_2 = arith.constant 0 : index
    %0 = vector.load %arg1[%c0, %c0_0, %c0_1, %c0_2] : memref<8x14x14x4xbf16, #tpu.memory_space<vmem>>, vector<8x1x14x4xbf16>
    %1 = vector.shape_cast %0 : vector<8x1x14x4xbf16> to vector<8x14x4xbf16>
    %2 = arith.extf %1 : vector<8x14x4xbf16> to vector<8x14x4xf32>
    %c0_3 = arith.constant 0 : index
    %c1 = arith.constant 1 : index
    %c0_4 = arith.constant 0 : index
    %c0_5 = arith.constant 0 : index
    %3 = vector.load %arg1[%c0_3, %c1, %c0_4, %c0_5] : memref<8x14x14x4xbf16, #tpu.memory_space<vmem>>, vector<8x1x14x4xbf16>
    %4 = vector.shape_cast %3 : vector<8x1x14x4xbf16> to vector<8x14x4xbf16>
    %5 = arith.extf %4 : vector<8x14x4xbf16> to vector<8x14x4xf32>
    %6 = arith.addf %2, %5 : vector<8x14x4xf32>
    %c0_6 = arith.constant 0 : index
    %c2 = arith.constant 2 : index
    %c0_7 = arith.constant 0 : index
    %c0_8 = arith.constant 0 : index
    %7 = vector.load %arg1[%c0_6, %c2, %c0_7, %c0_8] : memref<8x14x14x4xbf16, #tpu.memory_space<vmem>>, vector<8x1x14x4xbf16>
    %8 = vector.shape_cast %7 : vector<8x1x14x4xbf16> to vector<8x14x4xbf16>
    %9 = arith.extf %8 : vector<8x14x4xbf16> to vector<8x14x4xf32>
    %10 = arith.addf %6, %9 : vector<8x14x4xf32>
    %c0_9 = arith.constant 0 : index
    %c3 = arith.constant 3 : index
    %c0_10 = arith.constant 0 : index
    %c0_11 = arith.constant 0 : index
    %11 = vector.load %arg1[%c0_9, %c3, %c0_10, %c0_11] : memref<8x14x14x4xbf16, #tpu.memory_space<vmem>>, vector<8x1x14x4xbf16>
    %12 = vector.shape_cast %11 : vector<8x1x14x4xbf16> to vector<8x14x4xbf16>
    %13 = arith.extf %12 : vector<8x14x4xbf16> to vector<8x14x4xf32>
    %14 = arith.addf %10, %13 : vector<8x14x4xf32>
    %c0_12 = arith.constant 0 : index
    %c4 = arith.constant 4 : index
    %c0_13 = arith.constant 0 : index
    %c0_14 = arith.constant 0 : index
    %15 = vector.load %arg1[%c0_12, %c4, %c0_13, %c0_14] : memref<8x14x14x4xbf16, #tpu.memory_space<vmem>>, vector<8x1x14x4xbf16>
    %16 = vector.shape_cast %15 : vector<8x1x14x4xbf16> to vector<8x14x4xbf16>
    %17 = arith.extf %16 : vector<8x14x4xbf16> to vector<8x14x4xf32>
    %18 = arith.addf %14, %17 : vector<8x14x4xf32>
    %19 = vector.extract_strided_slice %18 {offsets = [0, 0, 0], sizes = [8, 1, 4], strides = [1, 1, 1]} : vector<8x14x4xf32> to vector<8x1x4xf32>
    %20 = vector.shape_cast %19 : vector<8x1x4xf32> to vector<8x4xf32>
    %21 = vector.extract_strided_slice %18 {offsets = [0, 1, 0], sizes = [8, 1, 4], strides = [1, 1, 1]} : vector<8x14x4xf32> to vector<8x1x4xf32>
    %22 = vector.shape_cast %21 : vector<8x1x4xf32> to vector<8x4xf32>
    %23 = arith.addf %20, %22 : vector<8x4xf32>
    %24 = vector.extract_strided_slice %18 {offsets = [0, 2, 0], sizes = [8, 1, 4], strides = [1, 1, 1]} : vector<8x14x4xf32> to vector<8x1x4xf32>
    %25 = vector.shape_cast %24 : vector<8x1x4xf32> to vector<8x4xf32>
    %26 = arith.addf %23, %25 : vector<8x4xf32>
    %27 = vector.extract_strided_slice %18 {offsets = [0, 3, 0], sizes = [8, 1, 4], strides = [1, 1, 1]} : vector<8x14x4xf32> to vector<8x1x4xf32>
    %28 = vector.shape_cast %27 : vector<8x1x4xf32> to vector<8x4xf32>
    %29 = arith.addf %26, %28 : vector<8x4xf32>
    %30 = vector.extract_strided_slice %18 {offsets = [0, 4, 0], sizes = [8, 1, 4], strides = [1, 1, 1]} : vector<8x14x4xf32> to vector<8x1x4xf32>
    %31 = vector.shape_cast %30 : vector<8x1x4xf32> to vector<8x4xf32>
    %32 = arith.addf %29, %31 : vector<8x4xf32>
    %cst = arith.constant 4.000000e-02 : f32
    %33 = vector.broadcast %cst : f32 to vector<8x4xf32>
    %34 = arith.mulf %32, %33 : vector<8x4xf32>
    %35 = arith.truncf %34 : vector<8x4xf32> to vector<8x4xbf16>
    %c0_15 = arith.constant 0 : index
    %c0_16 = arith.constant 0 : index
    %c0_17 = arith.constant 0 : index
    %36 = vector.load %arg9[%c0_15, %c0_16, %c0_17] : memref<16x8x4xbf16, #tpu.memory_space<vmem>>, vector<1x8x4xbf16>
    %37 = vector.shape_cast %36 : vector<1x8x4xbf16> to vector<8x4xbf16>
    %38 = vector.shape_cast %35 : vector<8x4xbf16> to vector<1x8x4xbf16>
    tpu.vector_store %arg9[%c0_15, %c0_16, %c0_17], %38 {strides = array<i32>} : memref<16x8x4xbf16, #tpu.memory_space<vmem>>, vector<1x8x4xbf16>,
    %39 = vector.extract_strided_slice %18 {offsets = [0, 3, 0], sizes = [8, 1, 4], strides = [1, 1, 1]} : vector<8x14x4xf32> to vector<8x1x4xf32>
    %40 = vector.shape_cast %39 : vector<8x1x4xf32> to vector<8x4xf32>
    %41 = vector.extract_strided_slice %18 {offsets = [0, 4, 0], sizes = [8, 1, 4], strides = [1, 1, 1]} : vector<8x14x4xf32> to vector<8x1x4xf32>
    %42 = vector.shape_cast %41 : vector<8x1x4xf32> to vector<8x4xf32>
    %43 = arith.addf %40, %42 : vector<8x4xf32>
    %44 = vector.extract_strided_slice %18 {offsets = [0, 5, 0], sizes = [8, 1, 4], strides = [1, 1, 1]} : vector<8x14x4xf32> to vector<8x1x4xf32>
    %45 = vector.shape_cast %44 : vector<8x1x4xf32> to vector<8x4xf32>
    %46 = arith.addf %43, %45 : vector<8x4xf32>
    %47 = vector.extract_strided_slice %18 {offsets = [0, 6, 0], sizes = [8, 1, 4], strides = [1, 1, 1]} : vector<8x14x4xf32> to vector<8x1x4xf32>
    %48 = vector.shape_cast %47 : vector<8x1x4xf32> to vector<8x4xf32>
    %49 = arith.addf %46, %48 : vector<8x4xf32>
    %50 = vector.extract_strided_slice %18 {offsets = [0, 7, 0], sizes = [8, 1, 4], strides = [1, 1, 1]} : vector<8x14x4xf32> to vector<8x1x4xf32>
    %51 = vector.shape_cast %50 : vector<8x1x4xf32> to vector<8x4xf32>
    %52 = arith.addf %49, %51 : vector<8x4xf32>
    %cst_18 = arith.constant 4.000000e-02 : f32
    %53 = vector.broadcast %cst_18 : f32 to vector<8x4xf32>
    %54 = arith.mulf %52, %53 : vector<8x4xf32>
    %55 = arith.truncf %54 : vector<8x4xf32> to vector<8x4xbf16>
    %c1_19 = arith.constant 1 : index
    %c0_20 = arith.constant 0 : index
    %c0_21 = arith.constant 0 : index
    %56 = vector.load %arg9[%c1_19, %c0_20, %c0_21] : memref<16x8x4xbf16, #tpu.memory_space<vmem>>, vector<1x8x4xbf16>
    %57 = vector.shape_cast %56 : vector<1x8x4xbf16> to vector<8x4xbf16>
    %58 = vector.shape_cast %55 : vector<8x4xbf16> to vector<1x8x4xbf16>
    tpu.vector_store %arg9[%c1_19, %c0_20, %c0_21], %58 {strides = array<i32>} : memref<16x8x4xbf16, #tpu.memory_space<vmem>>, vector<1x8x4xbf16>,
    %59 = vector.extract_strided_slice %18 {offsets = [0, 6, 0], sizes = [8, 1, 4], strides = [1, 1, 1]} : vector<8x14x4xf32> to vector<8x1x4xf32>
    %60 = vector.shape_cast %59 : vector<8x1x4xf32> to vector<8x4xf32>
    %61 = vector.extract_strided_slice %18 {offsets = [0, 7, 0], sizes = [8, 1, 4], strides = [1, 1, 1]} : vector<8x14x4xf32> to vector<8x1x4xf32>
    %62 = vector.shape_cast %61 : vector<8x1x4xf32> to vector<8x4xf32>
    %63 = arith.addf %60, %62 : vector<8x4xf32>
    %64 = vector.extract_strided_slice %18 {offsets = [0, 8, 0], sizes = [8, 1, 4], strides = [1, 1, 1]} : vector<8x14x4xf32> to vector<8x1x4xf32>
    %65 = vector.shape_cast %64 : vector<8x1x4xf32> to vector<8x4xf32>
    %66 = arith.addf %63, %65 : vector<8x4xf32>
    %67 = vector.extract_strided_slice %18 {offsets = [0, 9, 0], sizes = [8, 1, 4], strides = [1, 1, 1]} : vector<8x14x4xf32> to vector<8x1x4xf32>
    %68 = vector.shape_cast %67 : vector<8x1x4xf32> to vector<8x4xf32>
    %69 = arith.addf %66, %68 : vector<8x4xf32>
    %70 = vector.extract_strided_slice %18 {offsets = [0, 10, 0], sizes = [8, 1, 4], strides = [1, 1, 1]} : vector<8x14x4xf32> to vector<8x1x4xf32>
    %71 = vector.shape_cast %70 : vector<8x1x4xf32> to vector<8x4xf32>
    %72 = arith.addf %69, %71 : vector<8x4xf32>
    %cst_22 = arith.constant 4.000000e-02 : f32
    %73 = vector.broadcast %cst_22 : f32 to vector<8x4xf32>
    %74 = arith.mulf %72, %73 : vector<8x4xf32>
    %75 = arith.truncf %74 : vector<8x4xf32> to vector<8x4xbf16>
    %c2_23 = arith.constant 2 : index
    %c0_24 = arith.constant 0 : index
    %c0_25 = arith.constant 0 : index
    %76 = vector.load %arg9[%c2_23, %c0_24, %c0_25] : memref<16x8x4xbf16, #tpu.memory_space<vmem>>, vector<1x8x4xbf16>
    %77 = vector.shape_cast %76 : vector<1x8x4xbf16> to vector<8x4xbf16>
    %78 = vector.shape_cast %75 : vector<8x4xbf16> to vector<1x8x4xbf16>
    tpu.vector_store %arg9[%c2_23, %c0_24, %c0_25], %78 {strides = array<i32>} : memref<16x8x4xbf16, #tpu.memory_space<vmem>>, vector<1x8x4xbf16>,
    %79 = vector.extract_strided_slice %18 {offsets = [0, 9, 0], sizes = [8, 1, 4], strides = [1, 1, 1]} : vector<8x14x4xf32> to vector<8x1x4xf32>
    %80 = vector.shape_cast %79 : vector<8x1x4xf32> to vector<8x4xf32>
    %81 = vector.extract_strided_slice %18 {offsets = [0, 10, 0], sizes = [8, 1, 4], strides = [1, 1, 1]} : vector<8x14x4xf32> to vector<8x1x4xf32>
    %82 = vector.shape_cast %81 : vector<8x1x4xf32> to vector<8x4xf32>
    %83 = arith.addf %80, %82 : vector<8x4xf32>
    %84 = vector.extract_strided_slice %18 {offsets = [0, 11, 0], sizes = [8, 1, 4], strides = [1, 1, 1]} : vector<8x14x4xf32> to vector<8x1x4xf32>
    %85 = vector.shape_cast %84 : vector<8x1x4xf32> to vector<8x4xf32>
    %86 = arith.addf %83, %85 : vector<8x4xf32>
    %87 = vector.extract_strided_slice %18 {offsets = [0, 12, 0], sizes = [8, 1, 4], strides = [1, 1, 1]} : vector<8x14x4xf32> to vector<8x1x4xf32>
    %88 = vector.shape_cast %87 : vector<8x1x4xf32> to vector<8x4xf32>
    %89 = arith.addf %86, %88 : vector<8x4xf32>
    %90 = vector.extract_strided_slice %18 {offsets = [0, 13, 0], sizes = [8, 1, 4], strides = [1, 1, 1]} : vector<8x14x4xf32> to vector<8x1x4xf32>
    %91 = vector.shape_cast %90 : vector<8x1x4xf32> to vector<8x4xf32>
    %92 = arith.addf %89, %91 : vector<8x4xf32>
    %cst_26 = arith.constant 4.000000e-02 : f32
    %93 = vector.broadcast %cst_26 : f32 to vector<8x4xf32>
    %94 = arith.mulf %92, %93 : vector<8x4xf32>
    %95 = arith.truncf %94 : vector<8x4xf32> to vector<8x4xbf16>
    %c3_27 = arith.constant 3 : index
    %c0_28 = arith.constant 0 : index
    %c0_29 = arith.constant 0 : index
    %96 = vector.load %arg9[%c3_27, %c0_28, %c0_29] : memref<16x8x4xbf16, #tpu.memory_space<vmem>>, vector<1x8x4xbf16>
    %97 = vector.shape_cast %96 : vector<1x8x4xbf16> to vector<8x4xbf16>
    %98 = vector.shape_cast %95 : vector<8x4xbf16> to vector<1x8x4xbf16>
    tpu.vector_store %arg9[%c3_27, %c0_28, %c0_29], %98 {strides = array<i32>} : memref<16x8x4xbf16, #tpu.memory_space<vmem>>, vector<1x8x4xbf16>,
    %c0_30 = arith.constant 0 : index
    %c3_31 = arith.constant 3 : index
    %c0_32 = arith.constant 0 : index
    %c0_33 = arith.constant 0 : index
    %99 = vector.load %arg1[%c0_30, %c3_31, %c0_32, %c0_33] : memref<8x14x14x4xbf16, #tpu.memory_space<vmem>>, vector<8x1x14x4xbf16>
    %100 = vector.shape_cast %99 : vector<8x1x14x4xbf16> to vector<8x14x4xbf16>
    %101 = arith.extf %100 : vector<8x14x4xbf16> to vector<8x14x4xf32>
    %c0_34 = arith.constant 0 : index
    %c4_35 = arith.constant 4 : index
    %c0_36 = arith.constant 0 : index
    %c0_37 = arith.constant 0 : index
    %102 = vector.load %arg1[%c0_34, %c4_35, %c0_36, %c0_37] : memref<8x14x14x4xbf16, #tpu.memory_space<vmem>>, vector<8x1x14x4xbf16>
    %103 = vector.shape_cast %102 : vector<8x1x14x4xbf16> to vector<8x14x4xbf16>
    %104 = arith.extf %103 : vector<8x14x4xbf16> to vector<8x14x4xf32>
    %105 = arith.addf %101, %104 : vector<8x14x4xf32>
    %c0_38 = arith.constant 0 : index
    %c5 = arith.constant 5 : index
    %c0_39 = arith.constant 0 : index
    %c0_40 = arith.constant 0 : index
    %106 = vector.load %arg1[%c0_38, %c5, %c0_39, %c0_40] : memref<8x14x14x4xbf16, #tpu.memory_space<vmem>>, vector<8x1x14x4xbf16>
    %107 = vector.shape_cast %106 : vector<8x1x14x4xbf16> to vector<8x14x4xbf16>
    %108 = arith.extf %107 : vector<8x14x4xbf16> to vector<8x14x4xf32>
    %109 = arith.addf %105, %108 : vector<8x14x4xf32>
    %c0_41 = arith.constant 0 : index
    %c6 = arith.constant 6 : index
    %c0_42 = arith.constant 0 : index
    %c0_43 = arith.constant 0 : index
    %110 = vector.load %arg1[%c0_41, %c6, %c0_42, %c0_43] : memref<8x14x14x4xbf16, #tpu.memory_space<vmem>>, vector<8x1x14x4xbf16>
    %111 = vector.shape_cast %110 : vector<8x1x14x4xbf16> to vector<8x14x4xbf16>
    %112 = arith.extf %111 : vector<8x14x4xbf16> to vector<8x14x4xf32>
    %113 = arith.addf %109, %112 : vector<8x14x4xf32>
    %c0_44 = arith.constant 0 : index
    %c7 = arith.constant 7 : index
    %c0_45 = arith.constant 0 : index
    %c0_46 = arith.constant 0 : index
    %114 = vector.load %arg1[%c0_44, %c7, %c0_45, %c0_46] : memref<8x14x14x4xbf16, #tpu.memory_space<vmem>>, vector<8x1x14x4xbf16>
    %115 = vector.shape_cast %114 : vector<8x1x14x4xbf16> to vector<8x14x4xbf16>
    %116 = arith.extf %115 : vector<8x14x4xbf16> to vector<8x14x4xf32>
    %117 = arith.addf %113, %116 : vector<8x14x4xf32>
    %118 = vector.extract_strided_slice %117 {offsets = [0, 0, 0], sizes = [8, 1, 4], strides = [1, 1, 1]} : vector<8x14x4xf32> to vector<8x1x4xf32>
    %119 = vector.shape_cast %118 : vector<8x1x4xf32> to vector<8x4xf32>
    %120 = vector.extract_strided_slice %117 {offsets = [0, 1, 0], sizes = [8, 1, 4], strides = [1, 1, 1]} : vector<8x14x4xf32> to vector<8x1x4xf32>
    %121 = vector.shape_cast %120 : vector<8x1x4xf32> to vector<8x4xf32>
    %122 = arith.addf %119, %121 : vector<8x4xf32>
    %123 = vector.extract_strided_slice %117 {offsets = [0, 2, 0], sizes = [8, 1, 4], strides = [1, 1, 1]} : vector<8x14x4xf32> to vector<8x1x4xf32>
    %124 = vector.shape_cast %123 : vector<8x1x4xf32> to vector<8x4xf32>
    %125 = arith.addf %122, %124 : vector<8x4xf32>
    %126 = vector.extract_strided_slice %117 {offsets = [0, 3, 0], sizes = [8, 1, 4], strides = [1, 1, 1]} : vector<8x14x4xf32> to vector<8x1x4xf32>
    %127 = vector.shape_cast %126 : vector<8x1x4xf32> to vector<8x4xf32>
    %128 = arith.addf %125, %127 : vector<8x4xf32>
    %129 = vector.extract_strided_slice %117 {offsets = [0, 4, 0], sizes = [8, 1, 4], strides = [1, 1, 1]} : vector<8x14x4xf32> to vector<8x1x4xf32>
    %130 = vector.shape_cast %129 : vector<8x1x4xf32> to vector<8x4xf32>
    %131 = arith.addf %128, %130 : vector<8x4xf32>
    %cst_47 = arith.constant 4.000000e-02 : f32
    %132 = vector.broadcast %cst_47 : f32 to vector<8x4xf32>
    %133 = arith.mulf %131, %132 : vector<8x4xf32>
    %134 = arith.truncf %133 : vector<8x4xf32> to vector<8x4xbf16>
    %c4_48 = arith.constant 4 : index
    %c0_49 = arith.constant 0 : index
    %c0_50 = arith.constant 0 : index
    %135 = vector.load %arg9[%c4_48, %c0_49, %c0_50] : memref<16x8x4xbf16, #tpu.memory_space<vmem>>, vector<1x8x4xbf16>
    %136 = vector.shape_cast %135 : vector<1x8x4xbf16> to vector<8x4xbf16>
    %137 = vector.shape_cast %134 : vector<8x4xbf16> to vector<1x8x4xbf16>
    tpu.vector_store %arg9[%c4_48, %c0_49, %c0_50], %137 {strides = array<i32>} : memref<16x8x4xbf16, #tpu.memory_space<vmem>>, vector<1x8x4xbf16>,
    %138 = vector.extract_strided_slice %117 {offsets = [0, 3, 0], sizes = [8, 1, 4], strides = [1, 1, 1]} : vector<8x14x4xf32> to vector<8x1x4xf32>
    %139 = vector.shape_cast %138 : vector<8x1x4xf32> to vector<8x4xf32>
    %140 = vector.extract_strided_slice %117 {offsets = [0, 4, 0], sizes = [8, 1, 4], strides = [1, 1, 1]} : vector<8x14x4xf32> to vector<8x1x4xf32>
    %141 = vector.shape_cast %140 : vector<8x1x4xf32> to vector<8x4xf32>
    %142 = arith.addf %139, %141 : vector<8x4xf32>
    %143 = vector.extract_strided_slice %117 {offsets = [0, 5, 0], sizes = [8, 1, 4], strides = [1, 1, 1]} : vector<8x14x4xf32> to vector<8x1x4xf32>
    %144 = vector.shape_cast %143 : vector<8x1x4xf32> to vector<8x4xf32>
    %145 = arith.addf %142, %144 : vector<8x4xf32>
    %146 = vector.extract_strided_slice %117 {offsets = [0, 6, 0], sizes = [8, 1, 4], strides = [1, 1, 1]} : vector<8x14x4xf32> to vector<8x1x4xf32>
    %147 = vector.shape_cast %146 : vector<8x1x4xf32> to vector<8x4xf32>
    %148 = arith.addf %145, %147 : vector<8x4xf32>
    %149 = vector.extract_strided_slice %117 {offsets = [0, 7, 0], sizes = [8, 1, 4], strides = [1, 1, 1]} : vector<8x14x4xf32> to vector<8x1x4xf32>
    %150 = vector.shape_cast %149 : vector<8x1x4xf32> to vector<8x4xf32>
    %151 = arith.addf %148, %150 : vector<8x4xf32>
    %cst_51 = arith.constant 4.000000e-02 : f32
    %152 = vector.broadcast %cst_51 : f32 to vector<8x4xf32>
    %153 = arith.mulf %151, %152 : vector<8x4xf32>
    %154 = arith.truncf %153 : vector<8x4xf32> to vector<8x4xbf16>
    %c5_52 = arith.constant 5 : index
    %c0_53 = arith.constant 0 : index
    %c0_54 = arith.constant 0 : index
    %155 = vector.load %arg9[%c5_52, %c0_53, %c0_54] : memref<16x8x4xbf16, #tpu.memory_space<vmem>>, vector<1x8x4xbf16>
    %156 = vector.shape_cast %155 : vector<1x8x4xbf16> to vector<8x4xbf16>
    %157 = vector.shape_cast %154 : vector<8x4xbf16> to vector<1x8x4xbf16>
    tpu.vector_store %arg9[%c5_52, %c0_53, %c0_54], %157 {strides = array<i32>} : memref<16x8x4xbf16, #tpu.memory_space<vmem>>, vector<1x8x4xbf16>,
    %158 = vector.extract_strided_slice %117 {offsets = [0, 6, 0], sizes = [8, 1, 4], strides = [1, 1, 1]} : vector<8x14x4xf32> to vector<8x1x4xf32>
    %159 = vector.shape_cast %158 : vector<8x1x4xf32> to vector<8x4xf32>
    %160 = vector.extract_strided_slice %117 {offsets = [0, 7, 0], sizes = [8, 1, 4], strides = [1, 1, 1]} : vector<8x14x4xf32> to vector<8x1x4xf32>
    %161 = vector.shape_cast %160 : vector<8x1x4xf32> to vector<8x4xf32>
    %162 = arith.addf %159, %161 : vector<8x4xf32>
    %163 = vector.extract_strided_slice %117 {offsets = [0, 8, 0], sizes = [8, 1, 4], strides = [1, 1, 1]} : vector<8x14x4xf32> to vector<8x1x4xf32>
    %164 = vector.shape_cast %163 : vector<8x1x4xf32> to vector<8x4xf32>
    %165 = arith.addf %162, %164 : vector<8x4xf32>
    %166 = vector.extract_strided_slice %117 {offsets = [0, 9, 0], sizes = [8, 1, 4], strides = [1, 1, 1]} : vector<8x14x4xf32> to vector<8x1x4xf32>
    %167 = vector.shape_cast %166 : vector<8x1x4xf32> to vector<8x4xf32>
    %168 = arith.addf %165, %167 : vector<8x4xf32>
    %169 = vector.extract_strided_slice %117 {offsets = [0, 10, 0], sizes = [8, 1, 4], strides = [1, 1, 1]} : vector<8x14x4xf32> to vector<8x1x4xf32>
    %170 = vector.shape_cast %169 : vector<8x1x4xf32> to vector<8x4xf32>
    %171 = arith.addf %168, %170 : vector<8x4xf32>
    %cst_55 = arith.constant 4.000000e-02 : f32
    %172 = vector.broadcast %cst_55 : f32 to vector<8x4xf32>
    %173 = arith.mulf %171, %172 : vector<8x4xf32>
    %174 = arith.truncf %173 : vector<8x4xf32> to vector<8x4xbf16>
    %c6_56 = arith.constant 6 : index
    %c0_57 = arith.constant 0 : index
    %c0_58 = arith.constant 0 : index
    %175 = vector.load %arg9[%c6_56, %c0_57, %c0_58] : memref<16x8x4xbf16, #tpu.memory_space<vmem>>, vector<1x8x4xbf16>
    %176 = vector.shape_cast %175 : vector<1x8x4xbf16> to vector<8x4xbf16>
    %177 = vector.shape_cast %174 : vector<8x4xbf16> to vector<1x8x4xbf16>
    tpu.vector_store %arg9[%c6_56, %c0_57, %c0_58], %177 {strides = array<i32>} : memref<16x8x4xbf16, #tpu.memory_space<vmem>>, vector<1x8x4xbf16>,
    %178 = vector.extract_strided_slice %117 {offsets = [0, 9, 0], sizes = [8, 1, 4], strides = [1, 1, 1]} : vector<8x14x4xf32> to vector<8x1x4xf32>
    %179 = vector.shape_cast %178 : vector<8x1x4xf32> to vector<8x4xf32>
    %180 = vector.extract_strided_slice %117 {offsets = [0, 10, 0], sizes = [8, 1, 4], strides = [1, 1, 1]} : vector<8x14x4xf32> to vector<8x1x4xf32>
    %181 = vector.shape_cast %180 : vector<8x1x4xf32> to vector<8x4xf32>
    %182 = arith.addf %179, %181 : vector<8x4xf32>
    %183 = vector.extract_strided_slice %117 {offsets = [0, 11, 0], sizes = [8, 1, 4], strides = [1, 1, 1]} : vector<8x14x4xf32> to vector<8x1x4xf32>
    %184 = vector.shape_cast %183 : vector<8x1x4xf32> to vector<8x4xf32>
    %185 = arith.addf %182, %184 : vector<8x4xf32>
    %186 = vector.extract_strided_slice %117 {offsets = [0, 12, 0], sizes = [8, 1, 4], strides = [1, 1, 1]} : vector<8x14x4xf32> to vector<8x1x4xf32>
    %187 = vector.shape_cast %186 : vector<8x1x4xf32> to vector<8x4xf32>
    %188 = arith.addf %185, %187 : vector<8x4xf32>
    %189 = vector.extract_strided_slice %117 {offsets = [0, 13, 0], sizes = [8, 1, 4], strides = [1, 1, 1]} : vector<8x14x4xf32> to vector<8x1x4xf32>
    %190 = vector.shape_cast %189 : vector<8x1x4xf32> to vector<8x4xf32>
    %191 = arith.addf %188, %190 : vector<8x4xf32>
    %cst_59 = arith.constant 4.000000e-02 : f32
    %192 = vector.broadcast %cst_59 : f32 to vector<8x4xf32>
    %193 = arith.mulf %191, %192 : vector<8x4xf32>
    %194 = arith.truncf %193 : vector<8x4xf32> to vector<8x4xbf16>
    %c7_60 = arith.constant 7 : index
    %c0_61 = arith.constant 0 : index
    %c0_62 = arith.constant 0 : index
    %195 = vector.load %arg9[%c7_60, %c0_61, %c0_62] : memref<16x8x4xbf16, #tpu.memory_space<vmem>>, vector<1x8x4xbf16>
    %196 = vector.shape_cast %195 : vector<1x8x4xbf16> to vector<8x4xbf16>
    %197 = vector.shape_cast %194 : vector<8x4xbf16> to vector<1x8x4xbf16>
    tpu.vector_store %arg9[%c7_60, %c0_61, %c0_62], %197 {strides = array<i32>} : memref<16x8x4xbf16, #tpu.memory_space<vmem>>, vector<1x8x4xbf16>,
    %c0_63 = arith.constant 0 : index
    %c6_64 = arith.constant 6 : index
    %c0_65 = arith.constant 0 : index
    %c0_66 = arith.constant 0 : index
    %198 = vector.load %arg1[%c0_63, %c6_64, %c0_65, %c0_66] : memref<8x14x14x4xbf16, #tpu.memory_space<vmem>>, vector<8x1x14x4xbf16>
    %199 = vector.shape_cast %198 : vector<8x1x14x4xbf16> to vector<8x14x4xbf16>
    %200 = arith.extf %199 : vector<8x14x4xbf16> to vector<8x14x4xf32>
    %c0_67 = arith.constant 0 : index
    %c7_68 = arith.constant 7 : index
    %c0_69 = arith.constant 0 : index
    %c0_70 = arith.constant 0 : index
    %201 = vector.load %arg1[%c0_67, %c7_68, %c0_69, %c0_70] : memref<8x14x14x4xbf16, #tpu.memory_space<vmem>>, vector<8x1x14x4xbf16>
    %202 = vector.shape_cast %201 : vector<8x1x14x4xbf16> to vector<8x14x4xbf16>
    %203 = arith.extf %202 : vector<8x14x4xbf16> to vector<8x14x4xf32>
    %204 = arith.addf %200, %203 : vector<8x14x4xf32>
    %c0_71 = arith.constant 0 : index
    %c8 = arith.constant 8 : index
    %c0_72 = arith.constant 0 : index
    %c0_73 = arith.constant 0 : index
    %205 = vector.load %arg1[%c0_71, %c8, %c0_72, %c0_73] : memref<8x14x14x4xbf16, #tpu.memory_space<vmem>>, vector<8x1x14x4xbf16>
    %206 = vector.shape_cast %205 : vector<8x1x14x4xbf16> to vector<8x14x4xbf16>
    %207 = arith.extf %206 : vector<8x14x4xbf16> to vector<8x14x4xf32>
    %208 = arith.addf %204, %207 : vector<8x14x4xf32>
    %c0_74 = arith.constant 0 : index
    %c9 = arith.constant 9 : index
    %c0_75 = arith.constant 0 : index
    %c0_76 = arith.constant 0 : index
    %209 = vector.load %arg1[%c0_74, %c9, %c0_75, %c0_76] : memref<8x14x14x4xbf16, #tpu.memory_space<vmem>>, vector<8x1x14x4xbf16>
    %210 = vector.shape_cast %209 : vector<8x1x14x4xbf16> to vector<8x14x4xbf16>
    %211 = arith.extf %210 : vector<8x14x4xbf16> to vector<8x14x4xf32>
    %212 = arith.addf %208, %211 : vector<8x14x4xf32>
    %c0_77 = arith.constant 0 : index
    %c10 = arith.constant 10 : index
    %c0_78 = arith.constant 0 : index
    %c0_79 = arith.constant 0 : index
    %213 = vector.load %arg1[%c0_77, %c10, %c0_78, %c0_79] : memref<8x14x14x4xbf16, #tpu.memory_space<vmem>>, vector<8x1x14x4xbf16>
    %214 = vector.shape_cast %213 : vector<8x1x14x4xbf16> to vector<8x14x4xbf16>
    %215 = arith.extf %214 : vector<8x14x4xbf16> to vector<8x14x4xf32>
    %216 = arith.addf %212, %215 : vector<8x14x4xf32>
    %217 = vector.extract_strided_slice %216 {offsets = [0, 0, 0], sizes = [8, 1, 4], strides = [1, 1, 1]} : vector<8x14x4xf32> to vector<8x1x4xf32>
    %218 = vector.shape_cast %217 : vector<8x1x4xf32> to vector<8x4xf32>
    %219 = vector.extract_strided_slice %216 {offsets = [0, 1, 0], sizes = [8, 1, 4], strides = [1, 1, 1]} : vector<8x14x4xf32> to vector<8x1x4xf32>
    %220 = vector.shape_cast %219 : vector<8x1x4xf32> to vector<8x4xf32>
    %221 = arith.addf %218, %220 : vector<8x4xf32>
    %222 = vector.extract_strided_slice %216 {offsets = [0, 2, 0], sizes = [8, 1, 4], strides = [1, 1, 1]} : vector<8x14x4xf32> to vector<8x1x4xf32>
    %223 = vector.shape_cast %222 : vector<8x1x4xf32> to vector<8x4xf32>
    %224 = arith.addf %221, %223 : vector<8x4xf32>
    %225 = vector.extract_strided_slice %216 {offsets = [0, 3, 0], sizes = [8, 1, 4], strides = [1, 1, 1]} : vector<8x14x4xf32> to vector<8x1x4xf32>
    %226 = vector.shape_cast %225 : vector<8x1x4xf32> to vector<8x4xf32>
    %227 = arith.addf %224, %226 : vector<8x4xf32>
    %228 = vector.extract_strided_slice %216 {offsets = [0, 4, 0], sizes = [8, 1, 4], strides = [1, 1, 1]} : vector<8x14x4xf32> to vector<8x1x4xf32>
    %229 = vector.shape_cast %228 : vector<8x1x4xf32> to vector<8x4xf32>
    %230 = arith.addf %227, %229 : vector<8x4xf32>
    %cst_80 = arith.constant 4.000000e-02 : f32
    %231 = vector.broadcast %cst_80 : f32 to vector<8x4xf32>
    %232 = arith.mulf %230, %231 : vector<8x4xf32>
    %233 = arith.truncf %232 : vector<8x4xf32> to vector<8x4xbf16>
    %c8_81 = arith.constant 8 : index
    %c0_82 = arith.constant 0 : index
    %c0_83 = arith.constant 0 : index
    %234 = vector.load %arg9[%c8_81, %c0_82, %c0_83] : memref<16x8x4xbf16, #tpu.memory_space<vmem>>, vector<1x8x4xbf16>
    %235 = vector.shape_cast %234 : vector<1x8x4xbf16> to vector<8x4xbf16>
    %236 = vector.shape_cast %233 : vector<8x4xbf16> to vector<1x8x4xbf16>
    tpu.vector_store %arg9[%c8_81, %c0_82, %c0_83], %236 {strides = array<i32>} : memref<16x8x4xbf16, #tpu.memory_space<vmem>>, vector<1x8x4xbf16>,
    %237 = vector.extract_strided_slice %216 {offsets = [0, 3, 0], sizes = [8, 1, 4], strides = [1, 1, 1]} : vector<8x14x4xf32> to vector<8x1x4xf32>
    %238 = vector.shape_cast %237 : vector<8x1x4xf32> to vector<8x4xf32>
    %239 = vector.extract_strided_slice %216 {offsets = [0, 4, 0], sizes = [8, 1, 4], strides = [1, 1, 1]} : vector<8x14x4xf32> to vector<8x1x4xf32>
    %240 = vector.shape_cast %239 : vector<8x1x4xf32> to vector<8x4xf32>
    %241 = arith.addf %238, %240 : vector<8x4xf32>
    %242 = vector.extract_strided_slice %216 {offsets = [0, 5, 0], sizes = [8, 1, 4], strides = [1, 1, 1]} : vector<8x14x4xf32> to vector<8x1x4xf32>
    %243 = vector.shape_cast %242 : vector<8x1x4xf32> to vector<8x4xf32>
    %244 = arith.addf %241, %243 : vector<8x4xf32>
    %245 = vector.extract_strided_slice %216 {offsets = [0, 6, 0], sizes = [8, 1, 4], strides = [1, 1, 1]} : vector<8x14x4xf32> to vector<8x1x4xf32>
    %246 = vector.shape_cast %245 : vector<8x1x4xf32> to vector<8x4xf32>
    %247 = arith.addf %244, %246 : vector<8x4xf32>
    %248 = vector.extract_strided_slice %216 {offsets = [0, 7, 0], sizes = [8, 1, 4], strides = [1, 1, 1]} : vector<8x14x4xf32> to vector<8x1x4xf32>
    %249 = vector.shape_cast %248 : vector<8x1x4xf32> to vector<8x4xf32>
    %250 = arith.addf %247, %249 : vector<8x4xf32>
    %cst_84 = arith.constant 4.000000e-02 : f32
    %251 = vector.broadcast %cst_84 : f32 to vector<8x4xf32>
    %252 = arith.mulf %250, %251 : vector<8x4xf32>
    %253 = arith.truncf %252 : vector<8x4xf32> to vector<8x4xbf16>
    %c9_85 = arith.constant 9 : index
    %c0_86 = arith.constant 0 : index
    %c0_87 = arith.constant 0 : index
    %254 = vector.load %arg9[%c9_85, %c0_86, %c0_87] : memref<16x8x4xbf16, #tpu.memory_space<vmem>>, vector<1x8x4xbf16>
    %255 = vector.shape_cast %254 : vector<1x8x4xbf16> to vector<8x4xbf16>
    %256 = vector.shape_cast %253 : vector<8x4xbf16> to vector<1x8x4xbf16>
    tpu.vector_store %arg9[%c9_85, %c0_86, %c0_87], %256 {strides = array<i32>} : memref<16x8x4xbf16, #tpu.memory_space<vmem>>, vector<1x8x4xbf16>,
    %257 = vector.extract_strided_slice %216 {offsets = [0, 6, 0], sizes = [8, 1, 4], strides = [1, 1, 1]} : vector<8x14x4xf32> to vector<8x1x4xf32>
    %258 = vector.shape_cast %257 : vector<8x1x4xf32> to vector<8x4xf32>
    %259 = vector.extract_strided_slice %216 {offsets = [0, 7, 0], sizes = [8, 1, 4], strides = [1, 1, 1]} : vector<8x14x4xf32> to vector<8x1x4xf32>
    %260 = vector.shape_cast %259 : vector<8x1x4xf32> to vector<8x4xf32>
    %261 = arith.addf %258, %260 : vector<8x4xf32>
    %262 = vector.extract_strided_slice %216 {offsets = [0, 8, 0], sizes = [8, 1, 4], strides = [1, 1, 1]} : vector<8x14x4xf32> to vector<8x1x4xf32>
    %263 = vector.shape_cast %262 : vector<8x1x4xf32> to vector<8x4xf32>
    %264 = arith.addf %261, %263 : vector<8x4xf32>
    %265 = vector.extract_strided_slice %216 {offsets = [0, 9, 0], sizes = [8, 1, 4], strides = [1, 1, 1]} : vector<8x14x4xf32> to vector<8x1x4xf32>
    %266 = vector.shape_cast %265 : vector<8x1x4xf32> to vector<8x4xf32>
    %267 = arith.addf %264, %266 : vector<8x4xf32>
    %268 = vector.extract_strided_slice %216 {offsets = [0, 10, 0], sizes = [8, 1, 4], strides = [1, 1, 1]} : vector<8x14x4xf32> to vector<8x1x4xf32>
    %269 = vector.shape_cast %268 : vector<8x1x4xf32> to vector<8x4xf32>
    %270 = arith.addf %267, %269 : vector<8x4xf32>
    %cst_88 = arith.constant 4.000000e-02 : f32
    %271 = vector.broadcast %cst_88 : f32 to vector<8x4xf32>
    %272 = arith.mulf %270, %271 : vector<8x4xf32>
    %273 = arith.truncf %272 : vector<8x4xf32> to vector<8x4xbf16>
    %c10_89 = arith.constant 10 : index
    %c0_90 = arith.constant 0 : index
    %c0_91 = arith.constant 0 : index
    %274 = vector.load %arg9[%c10_89, %c0_90, %c0_91] : memref<16x8x4xbf16, #tpu.memory_space<vmem>>, vector<1x8x4xbf16>
    %275 = vector.shape_cast %274 : vector<1x8x4xbf16> to vector<8x4xbf16>
    %276 = vector.shape_cast %273 : vector<8x4xbf16> to vector<1x8x4xbf16>
    tpu.vector_store %arg9[%c10_89, %c0_90, %c0_91], %276 {strides = array<i32>} : memref<16x8x4xbf16, #tpu.memory_space<vmem>>, vector<1x8x4xbf16>,
    %277 = vector.extract_strided_slice %216 {offsets = [0, 9, 0], sizes = [8, 1, 4], strides = [1, 1, 1]} : vector<8x14x4xf32> to vector<8x1x4xf32>
    %278 = vector.shape_cast %277 : vector<8x1x4xf32> to vector<8x4xf32>
    %279 = vector.extract_strided_slice %216 {offsets = [0, 10, 0], sizes = [8, 1, 4], strides = [1, 1, 1]} : vector<8x14x4xf32> to vector<8x1x4xf32>
    %280 = vector.shape_cast %279 : vector<8x1x4xf32> to vector<8x4xf32>
    %281 = arith.addf %278, %280 : vector<8x4xf32>
    %282 = vector.extract_strided_slice %216 {offsets = [0, 11, 0], sizes = [8, 1, 4], strides = [1, 1, 1]} : vector<8x14x4xf32> to vector<8x1x4xf32>
    %283 = vector.shape_cast %282 : vector<8x1x4xf32> to vector<8x4xf32>
    %284 = arith.addf %281, %283 : vector<8x4xf32>
    %285 = vector.extract_strided_slice %216 {offsets = [0, 12, 0], sizes = [8, 1, 4], strides = [1, 1, 1]} : vector<8x14x4xf32> to vector<8x1x4xf32>
    %286 = vector.shape_cast %285 : vector<8x1x4xf32> to vector<8x4xf32>
    %287 = arith.addf %284, %286 : vector<8x4xf32>
    %288 = vector.extract_strided_slice %216 {offsets = [0, 13, 0], sizes = [8, 1, 4], strides = [1, 1, 1]} : vector<8x14x4xf32> to vector<8x1x4xf32>
    %289 = vector.shape_cast %288 : vector<8x1x4xf32> to vector<8x4xf32>
    %290 = arith.addf %287, %289 : vector<8x4xf32>
    %cst_92 = arith.constant 4.000000e-02 : f32
    %291 = vector.broadcast %cst_92 : f32 to vector<8x4xf32>
    %292 = arith.mulf %290, %291 : vector<8x4xf32>
    %293 = arith.truncf %292 : vector<8x4xf32> to vector<8x4xbf16>
    %c11 = arith.constant 11 : index
    %c0_93 = arith.constant 0 : index
    %c0_94 = arith.constant 0 : index
    %294 = vector.load %arg9[%c11, %c0_93, %c0_94] : memref<16x8x4xbf16, #tpu.memory_space<vmem>>, vector<1x8x4xbf16>
    %295 = vector.shape_cast %294 : vector<1x8x4xbf16> to vector<8x4xbf16>
    %296 = vector.shape_cast %293 : vector<8x4xbf16> to vector<1x8x4xbf16>
    tpu.vector_store %arg9[%c11, %c0_93, %c0_94], %296 {strides = array<i32>} : memref<16x8x4xbf16, #tpu.memory_space<vmem>>, vector<1x8x4xbf16>,
    %c0_95 = arith.constant 0 : index
    %c9_96 = arith.constant 9 : index
    %c0_97 = arith.constant 0 : index
    %c0_98 = arith.constant 0 : index
    %297 = vector.load %arg1[%c0_95, %c9_96, %c0_97, %c0_98] : memref<8x14x14x4xbf16, #tpu.memory_space<vmem>>, vector<8x1x14x4xbf16>
    %298 = vector.shape_cast %297 : vector<8x1x14x4xbf16> to vector<8x14x4xbf16>
    %299 = arith.extf %298 : vector<8x14x4xbf16> to vector<8x14x4xf32>
    %c0_99 = arith.constant 0 : index
    %c10_100 = arith.constant 10 : index
    %c0_101 = arith.constant 0 : index
    %c0_102 = arith.constant 0 : index
    %300 = vector.load %arg1[%c0_99, %c10_100, %c0_101, %c0_102] : memref<8x14x14x4xbf16, #tpu.memory_space<vmem>>, vector<8x1x14x4xbf16>
    %301 = vector.shape_cast %300 : vector<8x1x14x4xbf16> to vector<8x14x4xbf16>
    %302 = arith.extf %301 : vector<8x14x4xbf16> to vector<8x14x4xf32>
    %303 = arith.addf %299, %302 : vector<8x14x4xf32>
    %c0_103 = arith.constant 0 : index
    %c11_104 = arith.constant 11 : index
    %c0_105 = arith.constant 0 : index
    %c0_106 = arith.constant 0 : index
    %304 = vector.load %arg1[%c0_103, %c11_104, %c0_105, %c0_106] : memref<8x14x14x4xbf16, #tpu.memory_space<vmem>>, vector<8x1x14x4xbf16>
    %305 = vector.shape_cast %304 : vector<8x1x14x4xbf16> to vector<8x14x4xbf16>
    %306 = arith.extf %305 : vector<8x14x4xbf16> to vector<8x14x4xf32>
    %307 = arith.addf %303, %306 : vector<8x14x4xf32>
    %c0_107 = arith.constant 0 : index
    %c12 = arith.constant 12 : index
    %c0_108 = arith.constant 0 : index
    %c0_109 = arith.constant 0 : index
    %308 = vector.load %arg1[%c0_107, %c12, %c0_108, %c0_109] : memref<8x14x14x4xbf16, #tpu.memory_space<vmem>>, vector<8x1x14x4xbf16>
    %309 = vector.shape_cast %308 : vector<8x1x14x4xbf16> to vector<8x14x4xbf16>
    %310 = arith.extf %309 : vector<8x14x4xbf16> to vector<8x14x4xf32>
    %311 = arith.addf %307, %310 : vector<8x14x4xf32>
    %c0_110 = arith.constant 0 : index
    %c13 = arith.constant 13 : index
    %c0_111 = arith.constant 0 : index
    %c0_112 = arith.constant 0 : index
    %312 = vector.load %arg1[%c0_110, %c13, %c0_111, %c0_112] : memref<8x14x14x4xbf16, #tpu.memory_space<vmem>>, vector<8x1x14x4xbf16>
    %313 = vector.shape_cast %312 : vector<8x1x14x4xbf16> to vector<8x14x4xbf16>
    %314 = arith.extf %313 : vector<8x14x4xbf16> to vector<8x14x4xf32>
    %315 = arith.addf %311, %314 : vector<8x14x4xf32>
    %316 = vector.extract_strided_slice %315 {offsets = [0, 0, 0], sizes = [8, 1, 4], strides = [1, 1, 1]} : vector<8x14x4xf32> to vector<8x1x4xf32>
    %317 = vector.shape_cast %316 : vector<8x1x4xf32> to vector<8x4xf32>
    %318 = vector.extract_strided_slice %315 {offsets = [0, 1, 0], sizes = [8, 1, 4], strides = [1, 1, 1]} : vector<8x14x4xf32> to vector<8x1x4xf32>
    %319 = vector.shape_cast %318 : vector<8x1x4xf32> to vector<8x4xf32>
    %320 = arith.addf %317, %319 : vector<8x4xf32>
    %321 = vector.extract_strided_slice %315 {offsets = [0, 2, 0], sizes = [8, 1, 4], strides = [1, 1, 1]} : vector<8x14x4xf32> to vector<8x1x4xf32>
    %322 = vector.shape_cast %321 : vector<8x1x4xf32> to vector<8x4xf32>
    %323 = arith.addf %320, %322 : vector<8x4xf32>
    %324 = vector.extract_strided_slice %315 {offsets = [0, 3, 0], sizes = [8, 1, 4], strides = [1, 1, 1]} : vector<8x14x4xf32> to vector<8x1x4xf32>
    %325 = vector.shape_cast %324 : vector<8x1x4xf32> to vector<8x4xf32>
    %326 = arith.addf %323, %325 : vector<8x4xf32>
    %327 = vector.extract_strided_slice %315 {offsets = [0, 4, 0], sizes = [8, 1, 4], strides = [1, 1, 1]} : vector<8x14x4xf32> to vector<8x1x4xf32>
    %328 = vector.shape_cast %327 : vector<8x1x4xf32> to vector<8x4xf32>
    %329 = arith.addf %326, %328 : vector<8x4xf32>
    %cst_113 = arith.constant 4.000000e-02 : f32
    %330 = vector.broadcast %cst_113 : f32 to vector<8x4xf32>
    %331 = arith.mulf %329, %330 : vector<8x4xf32>
    %332 = arith.truncf %331 : vector<8x4xf32> to vector<8x4xbf16>
    %c12_114 = arith.constant 12 : index
    %c0_115 = arith.constant 0 : index
    %c0_116 = arith.constant 0 : index
    %333 = vector.load %arg9[%c12_114, %c0_115, %c0_116] : memref<16x8x4xbf16, #tpu.memory_space<vmem>>, vector<1x8x4xbf16>
    %334 = vector.shape_cast %333 : vector<1x8x4xbf16> to vector<8x4xbf16>
    %335 = vector.shape_cast %332 : vector<8x4xbf16> to vector<1x8x4xbf16>
    tpu.vector_store %arg9[%c12_114, %c0_115, %c0_116], %335 {strides = array<i32>} : memref<16x8x4xbf16, #tpu.memory_space<vmem>>, vector<1x8x4xbf16>,
    %336 = vector.extract_strided_slice %315 {offsets = [0, 3, 0], sizes = [8, 1, 4], strides = [1, 1, 1]} : vector<8x14x4xf32> to vector<8x1x4xf32>
    %337 = vector.shape_cast %336 : vector<8x1x4xf32> to vector<8x4xf32>
    %338 = vector.extract_strided_slice %315 {offsets = [0, 4, 0], sizes = [8, 1, 4], strides = [1, 1, 1]} : vector<8x14x4xf32> to vector<8x1x4xf32>
    %339 = vector.shape_cast %338 : vector<8x1x4xf32> to vector<8x4xf32>
    %340 = arith.addf %337, %339 : vector<8x4xf32>
    %341 = vector.extract_strided_slice %315 {offsets = [0, 5, 0], sizes = [8, 1, 4], strides = [1, 1, 1]} : vector<8x14x4xf32> to vector<8x1x4xf32>
    %342 = vector.shape_cast %341 : vector<8x1x4xf32> to vector<8x4xf32>
    %343 = arith.addf %340, %342 : vector<8x4xf32>
    %344 = vector.extract_strided_slice %315 {offsets = [0, 6, 0], sizes = [8, 1, 4], strides = [1, 1, 1]} : vector<8x14x4xf32> to vector<8x1x4xf32>
    %345 = vector.shape_cast %344 : vector<8x1x4xf32> to vector<8x4xf32>
    %346 = arith.addf %343, %345 : vector<8x4xf32>
    %347 = vector.extract_strided_slice %315 {offsets = [0, 7, 0], sizes = [8, 1, 4], strides = [1, 1, 1]} : vector<8x14x4xf32> to vector<8x1x4xf32>
    %348 = vector.shape_cast %347 : vector<8x1x4xf32> to vector<8x4xf32>
    %349 = arith.addf %346, %348 : vector<8x4xf32>
    %cst_117 = arith.constant 4.000000e-02 : f32
    %350 = vector.broadcast %cst_117 : f32 to vector<8x4xf32>
    %351 = arith.mulf %349, %350 : vector<8x4xf32>
    %352 = arith.truncf %351 : vector<8x4xf32> to vector<8x4xbf16>
    %c13_118 = arith.constant 13 : index
    %c0_119 = arith.constant 0 : index
    %c0_120 = arith.constant 0 : index
    %353 = vector.load %arg9[%c13_118, %c0_119, %c0_120] : memref<16x8x4xbf16, #tpu.memory_space<vmem>>, vector<1x8x4xbf16>
    %354 = vector.shape_cast %353 : vector<1x8x4xbf16> to vector<8x4xbf16>
    %355 = vector.shape_cast %352 : vector<8x4xbf16> to vector<1x8x4xbf16>
    tpu.vector_store %arg9[%c13_118, %c0_119, %c0_120], %355 {strides = array<i32>} : memref<16x8x4xbf16, #tpu.memory_space<vmem>>, vector<1x8x4xbf16>,
    %356 = vector.extract_strided_slice %315 {offsets = [0, 6, 0], sizes = [8, 1, 4], strides = [1, 1, 1]} : vector<8x14x4xf32> to vector<8x1x4xf32>
    %357 = vector.shape_cast %356 : vector<8x1x4xf32> to vector<8x4xf32>
    %358 = vector.extract_strided_slice %315 {offsets = [0, 7, 0], sizes = [8, 1, 4], strides = [1, 1, 1]} : vector<8x14x4xf32> to vector<8x1x4xf32>
    %359 = vector.shape_cast %358 : vector<8x1x4xf32> to vector<8x4xf32>
    %360 = arith.addf %357, %359 : vector<8x4xf32>
    %361 = vector.extract_strided_slice %315 {offsets = [0, 8, 0], sizes = [8, 1, 4], strides = [1, 1, 1]} : vector<8x14x4xf32> to vector<8x1x4xf32>
    %362 = vector.shape_cast %361 : vector<8x1x4xf32> to vector<8x4xf32>
    %363 = arith.addf %360, %362 : vector<8x4xf32>
    %364 = vector.extract_strided_slice %315 {offsets = [0, 9, 0], sizes = [8, 1, 4], strides = [1, 1, 1]} : vector<8x14x4xf32> to vector<8x1x4xf32>
    %365 = vector.shape_cast %364 : vector<8x1x4xf32> to vector<8x4xf32>
    %366 = arith.addf %363, %365 : vector<8x4xf32>
    %367 = vector.extract_strided_slice %315 {offsets = [0, 10, 0], sizes = [8, 1, 4], strides = [1, 1, 1]} : vector<8x14x4xf32> to vector<8x1x4xf32>
    %368 = vector.shape_cast %367 : vector<8x1x4xf32> to vector<8x4xf32>
    %369 = arith.addf %366, %368 : vector<8x4xf32>
    %cst_121 = arith.constant 4.000000e-02 : f32
    %370 = vector.broadcast %cst_121 : f32 to vector<8x4xf32>
    %371 = arith.mulf %369, %370 : vector<8x4xf32>
    %372 = arith.truncf %371 : vector<8x4xf32> to vector<8x4xbf16>
    %c14 = arith.constant 14 : index
    %c0_122 = arith.constant 0 : index
    %c0_123 = arith.constant 0 : index
    %373 = vector.load %arg9[%c14, %c0_122, %c0_123] : memref<16x8x4xbf16, #tpu.memory_space<vmem>>, vector<1x8x4xbf16>
    %374 = vector.shape_cast %373 : vector<1x8x4xbf16> to vector<8x4xbf16>
    %375 = vector.shape_cast %372 : vector<8x4xbf16> to vector<1x8x4xbf16>
    tpu.vector_store %arg9[%c14, %c0_122, %c0_123], %375 {strides = array<i32>} : memref<16x8x4xbf16, #tpu.memory_space<vmem>>, vector<1x8x4xbf16>,
    %376 = vector.extract_strided_slice %315 {offsets = [0, 9, 0], sizes = [8, 1, 4], strides = [1, 1, 1]} : vector<8x14x4xf32> to vector<8x1x4xf32>
    %377 = vector.shape_cast %376 : vector<8x1x4xf32> to vector<8x4xf32>
    %378 = vector.extract_strided_slice %315 {offsets = [0, 10, 0], sizes = [8, 1, 4], strides = [1, 1, 1]} : vector<8x14x4xf32> to vector<8x1x4xf32>
    %379 = vector.shape_cast %378 : vector<8x1x4xf32> to vector<8x4xf32>
    %380 = arith.addf %377, %379 : vector<8x4xf32>
    %381 = vector.extract_strided_slice %315 {offsets = [0, 11, 0], sizes = [8, 1, 4], strides = [1, 1, 1]} : vector<8x14x4xf32> to vector<8x1x4xf32>
    %382 = vector.shape_cast %381 : vector<8x1x4xf32> to vector<8x4xf32>
    %383 = arith.addf %380, %382 : vector<8x4xf32>
    %384 = vector.extract_strided_slice %315 {offsets = [0, 12, 0], sizes = [8, 1, 4], strides = [1, 1, 1]} : vector<8x14x4xf32> to vector<8x1x4xf32>
    %385 = vector.shape_cast %384 : vector<8x1x4xf32> to vector<8x4xf32>
    %386 = arith.addf %383, %385 : vector<8x4xf32>
    %387 = vector.extract_strided_slice %315 {offsets = [0, 13, 0], sizes = [8, 1, 4], strides = [1, 1, 1]} : vector<8x14x4xf32> to vector<8x1x4xf32>
    %388 = vector.shape_cast %387 : vector<8x1x4xf32> to vector<8x4xf32>
    %389 = arith.addf %386, %388 : vector<8x4xf32>
    %cst_124 = arith.constant 4.000000e-02 : f32
    %390 = vector.broadcast %cst_124 : f32 to vector<8x4xf32>
    %391 = arith.mulf %389, %390 : vector<8x4xf32>
    %392 = arith.truncf %391 : vector<8x4xf32> to vector<8x4xbf16>
    %c15 = arith.constant 15 : index
    %c0_125 = arith.constant 0 : index
    %c0_126 = arith.constant 0 : index
    %393 = vector.load %arg9[%c15, %c0_125, %c0_126] : memref<16x8x4xbf16, #tpu.memory_space<vmem>>, vector<1x8x4xbf16>
    %394 = vector.shape_cast %393 : vector<1x8x4xbf16> to vector<8x4xbf16>
    %395 = vector.shape_cast %392 : vector<8x4xbf16> to vector<1x8x4xbf16>
    tpu.vector_store %arg9[%c15, %c0_125, %c0_126], %395 {strides = array<i32>} : memref<16x8x4xbf16, #tpu.memory_space<vmem>>, vector<1x8x4xbf16>,
    %c0_127 = arith.constant 0 : index
    %c0_128 = arith.constant 0 : index
    %c0_129 = arith.constant 0 : index
    %396 = vector.load %arg9[%c0_127, %c0_128, %c0_129] : memref<16x8x4xbf16, #tpu.memory_space<vmem>>, vector<16x8x4xbf16>
    %397 = vector.shape_cast %396 : vector<16x8x4xbf16> to vector<128x4xbf16>
    %c0_130 = arith.constant 0 : index
    %c0_131 = arith.constant 0 : index
    %398 = vector.load %arg2[%c0_130, %c0_131] : memref<4x128xbf16, #tpu.memory_space<vmem>>, vector<4x128xbf16>
    %cst_132 = arith.constant dense<0.000000e+00> : vector<128x128xf32>
    %399 = tpu.matmul %397, %398, %cst_132 {dimension_numbers = #tpu.dot_dimension_numbers<[1], [0], [0], [1], [0, 0, 1, 1], [], []>} : vector<128x4xbf16>, vector<4x128xbf16>, vector<128x128xf32> -> vector<128x128xf32>
    %c0_133 = arith.constant 0 : index
    %c0_134 = arith.constant 0 : index
    %400 = vector.load %arg3[%c0_133, %c0_134] : memref<1x128xf32, #tpu.memory_space<vmem>>, vector<1x128xf32>
    %401 = vector.broadcast %400 : vector<1x128xf32> to vector<128x128xf32>
    %402 = arith.addf %399, %401 : vector<128x128xf32>
    %cst_135 = arith.constant 0.000000e+00 : f32
    %403 = vector.broadcast %cst_135 : f32 to vector<128x128xf32>
    %404 = arith.maximumf %402, %403 : vector<128x128xf32>
    %405 = arith.truncf %404 : vector<128x128xf32> to vector<128x128xbf16>
    %406 = vector.shape_cast %405 : vector<128x128xbf16> to vector<16x8x128xbf16>
    %407 = vector.extract_strided_slice %406 {offsets = [0, 0, 0], sizes = [1, 8, 128], strides = [1, 1, 1]} : vector<16x8x128xbf16> to vector<1x8x128xbf16>
    %408 = vector.shape_cast %407 : vector<1x8x128xbf16> to vector<8x128xbf16>
    %c0_136 = arith.constant 0 : index
    %c0_137 = arith.constant 0 : index
    %409 = vector.load %arg10[%c0_136, %c0_137] : memref<8x2048xbf16, #tpu.memory_space<vmem>>, vector<8x128xbf16>
    tpu.vector_store %arg10[%c0_136, %c0_137], %408 {strides = array<i32>} : memref<8x2048xbf16, #tpu.memory_space<vmem>>, vector<8x128xbf16>,
    %410 = vector.extract_strided_slice %406 {offsets = [1, 0, 0], sizes = [1, 8, 128], strides = [1, 1, 1]} : vector<16x8x128xbf16> to vector<1x8x128xbf16>
    %411 = vector.shape_cast %410 : vector<1x8x128xbf16> to vector<8x128xbf16>
    %c0_138 = arith.constant 0 : index
    %c128 = arith.constant 128 : index
    %412 = vector.load %arg10[%c0_138, %c128] : memref<8x2048xbf16, #tpu.memory_space<vmem>>, vector<8x128xbf16>
    tpu.vector_store %arg10[%c0_138, %c128], %411 {strides = array<i32>} : memref<8x2048xbf16, #tpu.memory_space<vmem>>, vector<8x128xbf16>,
    %413 = vector.extract_strided_slice %406 {offsets = [2, 0, 0], sizes = [1, 8, 128], strides = [1, 1, 1]} : vector<16x8x128xbf16> to vector<1x8x128xbf16>
    %414 = vector.shape_cast %413 : vector<1x8x128xbf16> to vector<8x128xbf16>
    %c0_139 = arith.constant 0 : index
    %c256 = arith.constant 256 : index
    %415 = vector.load %arg10[%c0_139, %c256] : memref<8x2048xbf16, #tpu.memory_space<vmem>>, vector<8x128xbf16>
    tpu.vector_store %arg10[%c0_139, %c256], %414 {strides = array<i32>} : memref<8x2048xbf16, #tpu.memory_space<vmem>>, vector<8x128xbf16>,
    %416 = vector.extract_strided_slice %406 {offsets = [3, 0, 0], sizes = [1, 8, 128], strides = [1, 1, 1]} : vector<16x8x128xbf16> to vector<1x8x128xbf16>
    %417 = vector.shape_cast %416 : vector<1x8x128xbf16> to vector<8x128xbf16>
    %c0_140 = arith.constant 0 : index
    %c384 = arith.constant 384 : index
    %418 = vector.load %arg10[%c0_140, %c384] : memref<8x2048xbf16, #tpu.memory_space<vmem>>, vector<8x128xbf16>
    tpu.vector_store %arg10[%c0_140, %c384], %417 {strides = array<i32>} : memref<8x2048xbf16, #tpu.memory_space<vmem>>, vector<8x128xbf16>,
    %419 = vector.extract_strided_slice %406 {offsets = [4, 0, 0], sizes = [1, 8, 128], strides = [1, 1, 1]} : vector<16x8x128xbf16> to vector<1x8x128xbf16>
    %420 = vector.shape_cast %419 : vector<1x8x128xbf16> to vector<8x128xbf16>
    %c0_141 = arith.constant 0 : index
    %c512 = arith.constant 512 : index
    %421 = vector.load %arg10[%c0_141, %c512] : memref<8x2048xbf16, #tpu.memory_space<vmem>>, vector<8x128xbf16>
    tpu.vector_store %arg10[%c0_141, %c512], %420 {strides = array<i32>} : memref<8x2048xbf16, #tpu.memory_space<vmem>>, vector<8x128xbf16>,
    %422 = vector.extract_strided_slice %406 {offsets = [5, 0, 0], sizes = [1, 8, 128], strides = [1, 1, 1]} : vector<16x8x128xbf16> to vector<1x8x128xbf16>
    %423 = vector.shape_cast %422 : vector<1x8x128xbf16> to vector<8x128xbf16>
    %c0_142 = arith.constant 0 : index
    %c640 = arith.constant 640 : index
    %424 = vector.load %arg10[%c0_142, %c640] : memref<8x2048xbf16, #tpu.memory_space<vmem>>, vector<8x128xbf16>
    tpu.vector_store %arg10[%c0_142, %c640], %423 {strides = array<i32>} : memref<8x2048xbf16, #tpu.memory_space<vmem>>, vector<8x128xbf16>,
    %425 = vector.extract_strided_slice %406 {offsets = [6, 0, 0], sizes = [1, 8, 128], strides = [1, 1, 1]} : vector<16x8x128xbf16> to vector<1x8x128xbf16>
    %426 = vector.shape_cast %425 : vector<1x8x128xbf16> to vector<8x128xbf16>
    %c0_143 = arith.constant 0 : index
    %c768 = arith.constant 768 : index
    %427 = vector.load %arg10[%c0_143, %c768] : memref<8x2048xbf16, #tpu.memory_space<vmem>>, vector<8x128xbf16>
    tpu.vector_store %arg10[%c0_143, %c768], %426 {strides = array<i32>} : memref<8x2048xbf16, #tpu.memory_space<vmem>>, vector<8x128xbf16>,
    %428 = vector.extract_strided_slice %406 {offsets = [7, 0, 0], sizes = [1, 8, 128], strides = [1, 1, 1]} : vector<16x8x128xbf16> to vector<1x8x128xbf16>
    %429 = vector.shape_cast %428 : vector<1x8x128xbf16> to vector<8x128xbf16>
    %c0_144 = arith.constant 0 : index
    %c896 = arith.constant 896 : index
    %430 = vector.load %arg10[%c0_144, %c896] : memref<8x2048xbf16, #tpu.memory_space<vmem>>, vector<8x128xbf16>
    tpu.vector_store %arg10[%c0_144, %c896], %429 {strides = array<i32>} : memref<8x2048xbf16, #tpu.memory_space<vmem>>, vector<8x128xbf16>,
    %431 = vector.extract_strided_slice %406 {offsets = [8, 0, 0], sizes = [1, 8, 128], strides = [1, 1, 1]} : vector<16x8x128xbf16> to vector<1x8x128xbf16>
    %432 = vector.shape_cast %431 : vector<1x8x128xbf16> to vector<8x128xbf16>
    %c0_145 = arith.constant 0 : index
    %c1024 = arith.constant 1024 : index
    %433 = vector.load %arg10[%c0_145, %c1024] : memref<8x2048xbf16, #tpu.memory_space<vmem>>, vector<8x128xbf16>
    tpu.vector_store %arg10[%c0_145, %c1024], %432 {strides = array<i32>} : memref<8x2048xbf16, #tpu.memory_space<vmem>>, vector<8x128xbf16>,
    %434 = vector.extract_strided_slice %406 {offsets = [9, 0, 0], sizes = [1, 8, 128], strides = [1, 1, 1]} : vector<16x8x128xbf16> to vector<1x8x128xbf16>
    %435 = vector.shape_cast %434 : vector<1x8x128xbf16> to vector<8x128xbf16>
    %c0_146 = arith.constant 0 : index
    %c1152 = arith.constant 1152 : index
    %436 = vector.load %arg10[%c0_146, %c1152] : memref<8x2048xbf16, #tpu.memory_space<vmem>>, vector<8x128xbf16>
    tpu.vector_store %arg10[%c0_146, %c1152], %435 {strides = array<i32>} : memref<8x2048xbf16, #tpu.memory_space<vmem>>, vector<8x128xbf16>,
    %437 = vector.extract_strided_slice %406 {offsets = [10, 0, 0], sizes = [1, 8, 128], strides = [1, 1, 1]} : vector<16x8x128xbf16> to vector<1x8x128xbf16>
    %438 = vector.shape_cast %437 : vector<1x8x128xbf16> to vector<8x128xbf16>
    %c0_147 = arith.constant 0 : index
    %c1280 = arith.constant 1280 : index
    %439 = vector.load %arg10[%c0_147, %c1280] : memref<8x2048xbf16, #tpu.memory_space<vmem>>, vector<8x128xbf16>
    tpu.vector_store %arg10[%c0_147, %c1280], %438 {strides = array<i32>} : memref<8x2048xbf16, #tpu.memory_space<vmem>>, vector<8x128xbf16>,
    %440 = vector.extract_strided_slice %406 {offsets = [11, 0, 0], sizes = [1, 8, 128], strides = [1, 1, 1]} : vector<16x8x128xbf16> to vector<1x8x128xbf16>
    %441 = vector.shape_cast %440 : vector<1x8x128xbf16> to vector<8x128xbf16>
    %c0_148 = arith.constant 0 : index
    %c1408 = arith.constant 1408 : index
    %442 = vector.load %arg10[%c0_148, %c1408] : memref<8x2048xbf16, #tpu.memory_space<vmem>>, vector<8x128xbf16>
    tpu.vector_store %arg10[%c0_148, %c1408], %441 {strides = array<i32>} : memref<8x2048xbf16, #tpu.memory_space<vmem>>, vector<8x128xbf16>,
    %443 = vector.extract_strided_slice %406 {offsets = [12, 0, 0], sizes = [1, 8, 128], strides = [1, 1, 1]} : vector<16x8x128xbf16> to vector<1x8x128xbf16>
    %444 = vector.shape_cast %443 : vector<1x8x128xbf16> to vector<8x128xbf16>
    %c0_149 = arith.constant 0 : index
    %c1536 = arith.constant 1536 : index
    %445 = vector.load %arg10[%c0_149, %c1536] : memref<8x2048xbf16, #tpu.memory_space<vmem>>, vector<8x128xbf16>
    tpu.vector_store %arg10[%c0_149, %c1536], %444 {strides = array<i32>} : memref<8x2048xbf16, #tpu.memory_space<vmem>>, vector<8x128xbf16>,
    %446 = vector.extract_strided_slice %406 {offsets = [13, 0, 0], sizes = [1, 8, 128], strides = [1, 1, 1]} : vector<16x8x128xbf16> to vector<1x8x128xbf16>
    %447 = vector.shape_cast %446 : vector<1x8x128xbf16> to vector<8x128xbf16>
    %c0_150 = arith.constant 0 : index
    %c1664 = arith.constant 1664 : index
    %448 = vector.load %arg10[%c0_150, %c1664] : memref<8x2048xbf16, #tpu.memory_space<vmem>>, vector<8x128xbf16>
    tpu.vector_store %arg10[%c0_150, %c1664], %447 {strides = array<i32>} : memref<8x2048xbf16, #tpu.memory_space<vmem>>, vector<8x128xbf16>,
    %449 = vector.extract_strided_slice %406 {offsets = [14, 0, 0], sizes = [1, 8, 128], strides = [1, 1, 1]} : vector<16x8x128xbf16> to vector<1x8x128xbf16>
    %450 = vector.shape_cast %449 : vector<1x8x128xbf16> to vector<8x128xbf16>
    %c0_151 = arith.constant 0 : index
    %c1792 = arith.constant 1792 : index
    %451 = vector.load %arg10[%c0_151, %c1792] : memref<8x2048xbf16, #tpu.memory_space<vmem>>, vector<8x128xbf16>
    tpu.vector_store %arg10[%c0_151, %c1792], %450 {strides = array<i32>} : memref<8x2048xbf16, #tpu.memory_space<vmem>>, vector<8x128xbf16>,
    %452 = vector.extract_strided_slice %406 {offsets = [15, 0, 0], sizes = [1, 8, 128], strides = [1, 1, 1]} : vector<16x8x128xbf16> to vector<1x8x128xbf16>
    %453 = vector.shape_cast %452 : vector<1x8x128xbf16> to vector<8x128xbf16>
    %c0_152 = arith.constant 0 : index
    %c1920 = arith.constant 1920 : index
    %454 = vector.load %arg10[%c0_152, %c1920] : memref<8x2048xbf16, #tpu.memory_space<vmem>>, vector<8x128xbf16>
    tpu.vector_store %arg10[%c0_152, %c1920], %453 {strides = array<i32>} : memref<8x2048xbf16, #tpu.memory_space<vmem>>, vector<8x128xbf16>,
    %c0_153 = arith.constant 0 : index
    %c0_154 = arith.constant 0 : index
    %455 = vector.load %arg10[%c0_153, %c0_154] : memref<8x2048xbf16, #tpu.memory_space<vmem>>, vector<8x2048xbf16>
    %c0_155 = arith.constant 0 : index
    %c0_156 = arith.constant 0 : index
    %456 = vector.load %arg4[%c0_155, %c0_156] : memref<2048x1024xbf16, #tpu.memory_space<vmem>>, vector<2048x1024xbf16>
    %cst_157 = arith.constant dense<0.000000e+00> : vector<8x1024xf32>
    %457 = tpu.matmul %455, %456, %cst_157 {dimension_numbers = #tpu.dot_dimension_numbers<[1], [0], [0], [1], [0, 0, 1, 1], [], []>} : vector<8x2048xbf16>, vector<2048x1024xbf16>, vector<8x1024xf32> -> vector<8x1024xf32>
    %c0_158 = arith.constant 0 : index
    %c0_159 = arith.constant 0 : index
    %458 = vector.load %arg5[%c0_158, %c0_159] : memref<1x1024xf32, #tpu.memory_space<vmem>>, vector<1x1024xf32>
    %459 = vector.broadcast %458 : vector<1x1024xf32> to vector<8x1024xf32>
    %460 = arith.addf %457, %459 : vector<8x1024xf32>
    %cst_160 = arith.constant 0.000000e+00 : f32
    %461 = vector.broadcast %cst_160 : f32 to vector<8x1024xf32>
    %462 = arith.maximumf %460, %461 : vector<8x1024xf32>
    %463 = arith.truncf %462 : vector<8x1024xf32> to vector<8x1024xbf16>
    %c0_161 = arith.constant 0 : index
    %c0_162 = arith.constant 0 : index
    %464 = vector.load %arg6[%c0_161, %c0_162] : memref<1024x128xbf16, #tpu.memory_space<vmem>>, vector<1024x128xbf16>
    %cst_163 = arith.constant dense<0.000000e+00> : vector<8x128xf32>
    %465 = tpu.matmul %463, %464, %cst_163 {dimension_numbers = #tpu.dot_dimension_numbers<[1], [0], [0], [1], [0, 0, 1, 1], [], []>} : vector<8x1024xbf16>, vector<1024x128xbf16>, vector<8x128xf32> -> vector<8x128xf32>
    %c0_164 = arith.constant 0 : index
    %c0_165 = arith.constant 0 : index
    %466 = vector.load %arg7[%c0_164, %c0_165] : memref<1x128xf32, #tpu.memory_space<vmem>>, vector<1x128xf32>
    %467 = vector.broadcast %466 : vector<1x128xf32> to vector<8x128xf32>
    %468 = arith.addf %465, %467 : vector<8x128xf32>
    %c0_166 = arith.constant 0 : index
    %c0_167 = arith.constant 0 : index
    %469 = vector.load %arg8[%c0_166, %c0_167] : memref<8x128xf32, #tpu.memory_space<vmem>>, vector<8x128xf32>
    tpu.vector_store %arg8[%c0_166, %c0_167], %468 {strides = array<i32>} : memref<8x128xf32, #tpu.memory_space<vmem>>, vector<8x128xf32>,
    return
  }
  func.func @transform_0(%arg0: i32) -> (i32, i32, i32, i32) {
    %c0_i32 = arith.constant 0 : i32
    %c0_i32_0 = arith.constant 0 : i32
    %c0_i32_1 = arith.constant 0 : i32
    %c0_i32_2 = arith.constant 0 : i32
    return %arg0, %c0_i32, %c0_i32_0, %c0_i32_1 : i32, i32, i32, i32
  }
  func.func @transform_1(%arg0: i32) -> (i32, i32) {
    %c0_i32 = arith.constant 0 : i32
    %c0_i32_0 = arith.constant 0 : i32
    %c0_i32_1 = arith.constant 0 : i32
    return %c0_i32, %c0_i32_0 : i32, i32
  }
  func.func @transform_2(%arg0: i32) -> (i32, i32) {
    %c0_i32 = arith.constant 0 : i32
    %c0_i32_0 = arith.constant 0 : i32
    %c0_i32_1 = arith.constant 0 : i32
    return %c0_i32, %c0_i32_0 : i32, i32
  }
  func.func @transform_3(%arg0: i32) -> (i32, i32) {
    %c0_i32 = arith.constant 0 : i32
    %c0_i32_0 = arith.constant 0 : i32
    %c0_i32_1 = arith.constant 0 : i32
    return %c0_i32, %c0_i32_0 : i32, i32
  }
  func.func @transform_4(%arg0: i32) -> (i32, i32) {
    %c0_i32 = arith.constant 0 : i32
    %c0_i32_0 = arith.constant 0 : i32
    %c0_i32_1 = arith.constant 0 : i32
    return %c0_i32, %c0_i32_0 : i32, i32
  }
  func.func @transform_5(%arg0: i32) -> (i32, i32) {
    %c0_i32 = arith.constant 0 : i32
    %c0_i32_0 = arith.constant 0 : i32
    %c0_i32_1 = arith.constant 0 : i32
    return %c0_i32, %c0_i32_0 : i32, i32
  }
  func.func @transform_6(%arg0: i32) -> (i32, i32) {
    %c0_i32 = arith.constant 0 : i32
    %c0_i32_0 = arith.constant 0 : i32
    %c0_i32_1 = arith.constant 0 : i32
    return %c0_i32, %c0_i32_0 : i32, i32
  }
  func.func @transform_7(%arg0: i32) -> (i32, i32) {
    %c0_i32 = arith.constant 0 : i32
    %c0_i32_0 = arith.constant 0 : i32
    return %arg0, %c0_i32 : i32, i32
  }
}

</mosaic_0001>

<bundles_post_ra>
// kernel: tpu_custom_call.1
= control target key start
LH: loop header
LB: loop body
LE: loop exit
PB: predicated region body
PF: predicated region fallthrough
CT: control target
= control target key end

     0   :  { %12 = vsyncpa [#allocation5], 0  ;;  %s15876_s0 = inlined_call_operand.vmem [shape: bf16[8,14,14,4], index: 0, kind: input, shape index: {}]   ;;  %s15877_s1 = inlined_call_operand.hbm [shape: bf16[4,128], index: 1, kind: input, shape index: {}]   ;;  %s15878_s2 = inlined_call_operand.hbm [shape: f32[1,128], index: 2, kind: input, shape index: {}]   ;;  %s15879_s3 = inlined_call_operand.hbm [shape: bf16[2048,1024], index: 3, kind: input, shape index: {}]   ;;  %s15880_s4 = inlined_call_operand.hbm [shape: f32[1,1024], index: 4, kind: input, shape index: {}]   ;;  %s15881_s5 = inlined_call_operand.hbm [shape: bf16[1024,128], index: 5, kind: input, shape index: {}]   ;;  %s15882_s6 = inlined_call_operand.hbm [shape: f32[1,128], index: 6, kind: input, shape index: {}]   ;;  %s15883_s7 = inlined_call_operand.hbm [shape: f32[8,128], index: 7, kind: output, shape index: {}]  }
   0x1   :  { %13 = vsyncpa [#allocation8], 0 }
   0x2   :  { %14 = vsyncpa [#allocation11], 0 }
   0x3   :  { %15 = vsyncpa [#allocation14], 0 }
   0x4   :  { %16 = vsyncpa [#allocation6], 0  ;;  %s13438_s24 = smov [#allocation7]   ;;  %s13439_s26 = smov [#allocation10]  }
   0x5   :  { %s35_s25 = sshll.u32 %s13438_s24, 4  ;;  %s57_s27 = sshll.u32 %s13439_s26, 4  ;;  %s36_s25 = int_to_ptr.vmem [resolvable:$true] %s35_s25  ;;  %s58_s27 = int_to_ptr.vmem [resolvable:$true] %s57_s27 }
   0x6   :  { %s13296_s28 = scalar_lea.vmem %s36_s25, 16  ;;  %s13300_s29 = scalar_lea.vmem %s36_s25, 32 }
   0x7   :  { %p13297_p0 = scmp.ne.s32.totalorder %s36_s25, %s13296_s28  ;;  %p13301_p1 = scmp.lt.s32.totalorder %s36_s25, %s36_s25 }
   0x8   :  { %p13302_p2 = scmp.lt.s32.totalorder %s13300_s29, %s13296_s28 }
   0xa   :  { %p13303_p3 = por %p13302_p2, %p13301_p1 }
   0xc   :  { %p13304_p4 = pnand %p13303_p3, %p13297_p0 }
   0xe   :  { %13307 = shalt.err (!%p13304_p4)
}
   0xf   :  { %38 = dma.hbm_to_vmem [thread:$0]  %s15878_s2, 16, %s36_s25, [#allocation8]  }
  0x10   :  { %s13316_s9 = scalar_lea.vmem %s58_s27, 128  ;;  %p13321_p6 = scmp.lt.s32.totalorder %s58_s27, %s58_s27 }
  0x11   :  { %p13317_p5 = scmp.ne.s32.totalorder %s58_s27, %s13316_s9  ;;  %p13322_p7 = scmp.lt.s32.totalorder %s13316_s9, %s13316_s9 }
  0x13   :  { %p13323_p8 = por %p13322_p7, %p13321_p6 }
  0x15   :  { %p13324_p9 = pnand %p13323_p8, %p13317_p5 }
  0x17   :  { %13327 = shalt.err (!%p13324_p9)
}
  0x18   :  { %60 = dma.hbm_to_vmem [thread:$0]  %s15880_s4, 128, %s58_s27, [#allocation11]  }
  0x19   :  { %s13440_s12 = smov [#allocation4]   ;;  %s13441_s14 = smov [#allocation9]  }
  0x1a   :  { %s25_s13 = sshll.u32 %s13440_s12, 4  ;;  %s44_s15 = sshll.u32 %s13441_s14, 4  ;;  %s26_s13 = int_to_ptr.vmem [resolvable:$true] %s25_s13  ;;  %s45_s15 = int_to_ptr.vmem [resolvable:$true] %s44_s15 }
  0x1b   :  { %s13336_s16 = scalar_lea.vmem %s26_s13, 32  ;;  %p13341_p11 = scmp.lt.s32.totalorder %s26_s13, %s26_s13 }
  0x1c   :  { %p13337_p10 = scmp.ne.s32.totalorder %s26_s13, %s13336_s16  ;;  %p13342_p12 = scmp.lt.s32.totalorder %s13336_s16, %s13336_s16 }
  0x1e   :  { %p13343_p13 = por %p13342_p12, %p13341_p11 }
  0x20   :  { %p13344_p0 = pnand %p13343_p13, %p13337_p10 }
  0x22   :  { %13347 = shalt.err (!%p13344_p0)
}
  0x23   :  { %28 = dma.hbm_to_vmem [thread:$0]  %s15877_s1, 32, %s26_s13, [#allocation5]  }
  0x24   :  { %s13356_s18 = scalar_lea.vmem %s45_s15, 131072  ;;  %p13361_p2 = scmp.lt.s32.totalorder %s45_s15, %s45_s15 }
  0x25   :  { %p13357_p1 = scmp.ne.s32.totalorder %s45_s15, %s13356_s18  ;;  %p13362_p3 = scmp.lt.s32.totalorder %s13356_s18, %s13356_s18 }
  0x27   :  { %p13363_p4 = por %p13362_p3, %p13361_p2 }
  0x29   :  { %p13364_p5 = pnand %p13363_p4, %p13357_p1 }
  0x2b   :  { %13367 = shalt.err (!%p13364_p5)
}
  0x2c   :  { %s13442_s4 = smov 512   ;;  %s13443_s19 = smov 32  }
  0x2d   :  { %50 = dma.hbm_to_vmem [thread:$0]  %s15879_s3, 131072, %s45_s15, [#allocation8], %s13442_s4, %s13442_s4, %s13443_s19  }
  0x2e   :  { %s13444_s22 = smov [#allocation12]  }
  0x2f   :  { %s66_s23 = sshll.u32 %s13444_s22, 4  ;;  %s67_s23 = int_to_ptr.vmem [resolvable:$true] %s66_s23 }
  0x30   :  { %s13376_s24 = scalar_lea.vmem %s67_s23, 8192  ;;  %p13381_p7 = scmp.lt.s32.totalorder %s67_s23, %s67_s23 }
  0x31   :  { %p13377_p6 = scmp.ne.s32.totalorder %s67_s23, %s13376_s24  ;;  %p13382_p8 = scmp.lt.s32.totalorder %s13376_s24, %s13376_s24 }
  0x33   :  { %p13383_p9 = por %p13382_p8, %p13381_p7 }
  0x35   :  { %p13384_p10 = pnand %p13383_p9, %p13377_p6 }
  0x37   :  { %13387 = shalt.err (!%p13384_p10)
}
  0x38   :  { %s13445_s1 = smov 64   ;;  %s13446_s25 = smov 4  }
  0x39   :  { %72 = dma.hbm_to_vmem [thread:$0]  %s15881_s5, 8192, %s67_s23, [#allocation11], %s13445_s1, %s13445_s1, %s13446_s25  }
  0x3a   :  { %s13447_s28 = smov [#allocation13]  }
  0x3b   :  { %s79_s29 = sshll.u32 %s13447_s28, 4  ;;  %s80_s29 = int_to_ptr.vmem [resolvable:$true] %s79_s29 }
  0x3c   :  { %s13396_s3 = scalar_lea.vmem %s80_s29, 16  ;;  %s13400_s30 = scalar_lea.vmem %s80_s29, 32 }
  0x3d   :  { %p13397_p11 = scmp.ne.s32.totalorder %s80_s29, %s13396_s3  ;;  %p13401_p12 = scmp.lt.s32.totalorder %s80_s29, %s80_s29 }
  0x3e   :  { %p13402_p13 = scmp.lt.s32.totalorder %s13400_s30, %s13396_s3 }
  0x40   :  { %p13403_p0 = por %p13402_p13, %p13401_p12 }
  0x42   :  { %p13404_p1 = pnand %p13403_p0, %p13397_p11 }
  0x44   :  { %13407 = shalt.err (!%p13404_p1)
}
  0x45   :  { %82 = dma.hbm_to_vmem [thread:$0]  %s15882_s6, 16, %s80_s29, [#allocation14]  }
  0x46   :  { %13428 = dma.done.wait [#allocation5], 32  }
  0x47   :  { %13429 = vsyncadd [#allocation5], 4294967264 }
  0x48   :  { %13430 = dma.done.wait [#allocation8], 131088  }
  0x49   :  { %13431 = vsyncadd [#allocation8], 4294836208 }
  0x4a   :  { %13432 = dma.done.wait [#allocation11], 8320  }
  0x4b   :  { %13433 = vsyncadd [#allocation11], 4294958976 }
  0x4c   :  { %13434 = dma.done.wait [#allocation14], 16  }
  0x4d   :  { %13435 = vsyncadd [#allocation14], 4294967280  ;;  %vm2899_vm0 = vcmask 1041408   ;;  %v2826_v0 = vld [vmem:[#allocation4] sm:$0x3]  ;;  %vm483_vm1 = vcmask 1041409  }
  0x4e   :  { %v102_v1 = vld [vmem:[%s15876_s0] ss:$112 sps:$4 sm:$0xff]   ;;  %v103_v2 = vld [vmem:[%s15876_s0 + $0x4] sm:$0x7]  ;;  %13200 = vmatprep.subr.msk.bf16.mxu0 %vm2899_vm0, %v2826_v0  ;;  %v2901_v3 = vsel %vm2899_vm0, %v2826_v0, 0  ;;  %vm486_vm2 = vcmask 1042434  }
  0x4f   :  { %v105_v4 = vld [vmem:[%s15876_s0 + $0x74] sm:$0x7]  ;;  %v106_v5 = vld [vmem:[%s15876_s0 + $0xe0] ss:$112 sps:$4 sm:$0xff]   ;;  %v118_v6 = vunpack.c.l.bf16 %v102_v1  ;;  %v119_v7 = vunpack.c.l.bf16 %v103_v2  ;;  %13183 = vmatpush3.bf16.msra.mxu0 %v2901_v3  ;;  %v107_v8 = vld [vmem:[%s15876_s0 + $0xe4] sm:$0x7]  ;;  %v120_v11 = vunpack.c.h.bf16 %v102_v1 }
  0x50   :  { %v109_v9 = vld [vmem:[%s15876_s0 + $0x154] sm:$0x7]  ;;  %v110_v10 = vld [vmem:[%s15876_s0 + $0x1c0] ss:$112 sps:$4 sm:$0xff]   ;;  %v121_v12 = vunpack.c.l.bf16 %v105_v4  ;;  %v122_v13 = vunpack.c.l.bf16 %v106_v5  ;;  %v124_v14 = vunpack.c.h.bf16 %v106_v5  ;;  %v111_v15 = vld [vmem:[%s15876_s0 + $0x1c4] sm:$0x7]  ;;  %v123_v18 = vunpack.c.l.bf16 %v107_v8 }
  0x51   :  { %v113_v16 = vld [vmem:[%s15876_s0 + $0x234] sm:$0x7]  ;;  %v114_v17 = vld [vmem:[%s15876_s0 + $0x2a0] ss:$112 sps:$4 sm:$0xff]   ;;  %v125_v19 = vunpack.c.l.bf16 %v109_v9  ;;  %v126_v20 = vunpack.c.l.bf16 %v110_v10  ;;  %v128_v21 = vunpack.c.h.bf16 %v110_v10  ;;  %v127_v23 = vunpack.c.l.bf16 %v111_v15  ;;  %v11372_v27 = vld [vmem:[%s15876_s0 + $0x8] ss:$112 sps:$4 sm:$0xff]  }
  0x52   :  { %v117_v22 = vld [vmem:[%s15876_s0 + $0x314] sm:$0x7]  ;;  %v129_v24 = vunpack.c.l.bf16 %v113_v16  ;;  %v130_v25 = vunpack.c.l.bf16 %v114_v17  ;;  %v132_v26 = vunpack.c.h.bf16 %v114_v17  ;;  %v11373_v28 = vld [vmem:[%s15876_s0 + $0xc] sm:$0x7]  ;;  %v11375_v30 = vld [vmem:[%s15876_s0 + $0x7c] sm:$0x7]  ;;  %v151_v33 = vunpack.c.l.bf16 %v11372_v27 }
  0x53   :  { %v133_v29 = vunpack.c.l.bf16 %v117_v22  ;;  %v11376_v31 = vld [vmem:[%s15876_s0 + $0xe8] ss:$112 sps:$4 sm:$0xff]   ;;  %v11377_v32 = vld [vmem:[%s15876_s0 + $0xec] sm:$0x7]  ;;  %v152_v34 = vunpack.c.l.bf16 %v11373_v28  ;;  %v153_v35 = vunpack.c.h.bf16 %v11372_v27  ;;  %v11379_v36 = vld [vmem:[%s15876_s0 + $0x15c] sm:$0x7]  ;;  %v154_v39 = vunpack.c.l.bf16 %v11375_v30 }
  0x54   :  { %v11380_v37 = vld [vmem:[%s15876_s0 + $0x1c8] ss:$112 sps:$4 sm:$0xff]   ;;  %v11381_v38 = vld [vmem:[%s15876_s0 + $0x1cc] sm:$0x7]  ;;  %v155_v40 = vunpack.c.l.bf16 %v11376_v31  ;;  %v156_v41 = vunpack.c.l.bf16 %v11377_v32  ;;  %v157_v42 = vunpack.c.h.bf16 %v11376_v31  ;;  %v11383_v43 = vld [vmem:[%s15876_s0 + $0x23c] sm:$0x7]  ;;  %v158_v46 = vunpack.c.l.bf16 %v11379_v36 }
  0x55   :  { %v11384_v44 = vld [vmem:[%s15876_s0 + $0x2a8] ss:$112 sps:$4 sm:$0xff]   ;;  %v11387_v45 = vld [vmem:[%s15876_s0 + $0x31c] sm:$0x7]  ;;  %v159_v47 = vunpack.c.l.bf16 %v11380_v37  ;;  %v160_v48 = vunpack.c.l.bf16 %v11381_v38  ;;  %v161_v49 = vunpack.c.h.bf16 %v11380_v37  ;;  %v162_v50 = vunpack.c.l.bf16 %v11383_v43  ;;  %v11388_v58 = vld [vmem:[%s15876_s0 + $0x10] ss:$112 sps:$4 sm:$0xff]  }
  0x56   :  { %v163_v51 = vunpack.c.l.bf16 %v11384_v44  ;;  %v165_v52 = vunpack.c.h.bf16 %v11384_v44  ;;  %v166_v53 = vunpack.c.l.bf16 %v11387_v45  ;;  %v167_v54 = vadd.f32 %v151_v33, %v118_v6  ;;  %v11389_v63 = vld [vmem:[%s15876_s0 + $0x14] sm:$0x7]  ;;  %v11391_v0 = vld [vmem:[%s15876_s0 + $0x84] sm:$0x7]  ;;  %v11392_v1 = vld [vmem:[%s15876_s0 + $0xf0] ss:$112 sps:$4 sm:$0xff]  }
  0x57   :  { %v168_v55 = vadd.f32 %v152_v34, %v119_v7  ;;  %v169_v56 = vadd.f32 %v153_v35, %v120_v11  ;;  %v170_v57 = vadd.f32 %v154_v39, %v121_v12  ;;  %v171_v59 = vadd.f32 %v155_v40, %v122_v13  ;;  %v11393_v6 = vld [vmem:[%s15876_s0 + $0xf4] sm:$0x7]  ;;  %v11395_v7 = vld [vmem:[%s15876_s0 + $0x164] sm:$0x7]  ;;  %v11396_v8 = vld [vmem:[%s15876_s0 + $0x1d0] ss:$112 sps:$4 sm:$0xff]  }
  0x58   :  { %v172_v60 = vadd.f32 %v156_v41, %v123_v18  ;;  %v173_v61 = vadd.f32 %v157_v42, %v124_v14  ;;  %v174_v62 = vadd.f32 %v158_v46, %v125_v19  ;;  %v175_v2 = vadd.f32 %v159_v47, %v126_v20  ;;  %v11397_v12 = vld [vmem:[%s15876_s0 + $0x1d4] sm:$0x7]  ;;  %v11399_v13 = vld [vmem:[%s15876_s0 + $0x244] sm:$0x7]  ;;  %v11400_v14 = vld [vmem:[%s15876_s0 + $0x2b0] ss:$112 sps:$4 sm:$0xff]  }
  0x59   :  { %v176_v3 = vadd.f32 %v160_v48, %v127_v23  ;;  %v177_v4 = vadd.f32 %v161_v49, %v128_v21  ;;  %v178_v5 = vadd.f32 %v162_v50, %v129_v24  ;;  %v179_v9 = vadd.f32 %v163_v51, %v130_v25  ;;  %v11403_v16 = vld [vmem:[%s15876_s0 + $0x324] sm:$0x7]  ;;  %v11404_v37 = vld [vmem:[%s15876_s0 + $0x18] ss:$112 sps:$4 sm:$0xff]   ;;  %v11405_v38 = vld [vmem:[%s15876_s0 + $0x1c] sm:$0x7] }
  0x5a   :  { %v181_v10 = vadd.f32 %v165_v52, %v132_v26  ;;  %v182_v11 = vadd.f32 %v166_v53, %v133_v29  ;;  %v200_v15 = vunpack.c.l.bf16 %v11388_v58  ;;  %v201_v17 = vunpack.c.l.bf16 %v11389_v63  ;;  %v11407_v43 = vld [vmem:[%s15876_s0 + $0x8c] sm:$0x7]  ;;  %v11408_v44 = vld [vmem:[%s15876_s0 + $0xf8] ss:$112 sps:$4 sm:$0xff]   ;;  %v11409_v45 = vld [vmem:[%s15876_s0 + $0xfc] sm:$0x7] }
  0x5b   :  { %v202_v18 = vunpack.c.h.bf16 %v11388_v58  ;;  %v203_v19 = vunpack.c.l.bf16 %v11391_v0  ;;  %v204_v20 = vunpack.c.l.bf16 %v11392_v1  ;;  %v205_v21 = vunpack.c.l.bf16 %v11393_v6  ;;  %v11411_v50 = vld [vmem:[%s15876_s0 + $0x16c] sm:$0x7]  ;;  %v11412_v51 = vld [vmem:[%s15876_s0 + $0x1d8] ss:$112 sps:$4 sm:$0xff]   ;;  %v11413_v52 = vld [vmem:[%s15876_s0 + $0x1dc] sm:$0x7] }
  0x5c   :  { %v206_v22 = vunpack.c.h.bf16 %v11392_v1  ;;  %v207_v23 = vunpack.c.l.bf16 %v11395_v7  ;;  %v208_v24 = vunpack.c.l.bf16 %v11396_v8  ;;  %v209_v25 = vunpack.c.l.bf16 %v11397_v12  ;;  %v11420_v12 = vld [vmem:[%s15876_s0 + $0x20] ss:$112 sps:$4 sm:$0xff]  }
  0x5d   :  { %v210_v26 = vunpack.c.h.bf16 %v11396_v8  ;;  %v211_v27 = vunpack.c.l.bf16 %v11399_v13  ;;  %v212_v28 = vunpack.c.l.bf16 %v11400_v14  ;;  %v214_v29 = vunpack.c.h.bf16 %v11400_v14 }
  0x5e   :  { %v215_v30 = vunpack.c.l.bf16 %v11403_v16  ;;  %v216_v31 = vadd.f32 %v200_v15, %v167_v54  ;;  %v217_v32 = vadd.f32 %v201_v17, %v168_v55  ;;  %v218_v33 = vadd.f32 %v202_v18, %v169_v56  ;;  %v11415_v54 = vld [vmem:[%s15876_s0 + $0x24c] sm:$0x7]  ;;  %v11416_v55 = vld [vmem:[%s15876_s0 + $0x2b8] ss:$112 sps:$4 sm:$0xff]   ;;  %v11421_v17 = vld [vmem:[%s15876_s0 + $0x24] sm:$0x7] }
  0x5f   :  { %v219_v34 = vadd.f32 %v203_v19, %v170_v57  ;;  %v220_v35 = vadd.f32 %v204_v20, %v171_v59  ;;  %v221_v36 = vadd.f32 %v205_v21, %v172_v60  ;;  %v222_v39 = vadd.f32 %v206_v22, %v173_v61  ;;  %v11419_v56 = vld [vmem:[%s15876_s0 + $0x32c] sm:$0x7]  ;;  %v11423_v18 = vld [vmem:[%s15876_s0 + $0x94] sm:$0x7]  ;;  %v11424_v19 = vld [vmem:[%s15876_s0 + $0x100] ss:$112 sps:$4 sm:$0xff]  }
  0x60   :  { %v223_v40 = vadd.f32 %v207_v23, %v174_v62  ;;  %v224_v41 = vadd.f32 %v208_v24, %v175_v2  ;;  %v225_v42 = vadd.f32 %v209_v25, %v176_v3  ;;  %v226_v46 = vadd.f32 %v210_v26, %v177_v4  ;;  %v11425_v24 = vld [vmem:[%s15876_s0 + $0x104] sm:$0x7]  ;;  %v11427_v25 = vld [vmem:[%s15876_s0 + $0x174] sm:$0x7]  ;;  %v11428_v26 = vld [vmem:[%s15876_s0 + $0x1e0] ss:$112 sps:$4 sm:$0xff]  }
  0x61   :  { %v227_v47 = vadd.f32 %v211_v27, %v178_v5  ;;  %v228_v48 = vadd.f32 %v212_v28, %v179_v9  ;;  %v230_v49 = vadd.f32 %v214_v29, %v181_v10  ;;  %v231_v53 = vadd.f32 %v215_v30, %v182_v11  ;;  %v11429_v30 = vld [vmem:[%s15876_s0 + $0x1e4] sm:$0x7] }
  0x62   :  { %v249_v57 = vunpack.c.l.bf16 %v11404_v37  ;;  %v250_v58 = vunpack.c.l.bf16 %v11405_v38  ;;  %v251_v59 = vunpack.c.h.bf16 %v11404_v37  ;;  %v252_v60 = vunpack.c.l.bf16 %v11407_v43 }
  0x63   :  { %v253_v61 = vunpack.c.l.bf16 %v11408_v44  ;;  %v254_v62 = vunpack.c.l.bf16 %v11409_v45  ;;  %v255_v63 = vunpack.c.h.bf16 %v11408_v44  ;;  %v256_v0 = vunpack.c.l.bf16 %v11411_v50 }
  0x64   :  { %v257_v1 = vunpack.c.l.bf16 %v11412_v51  ;;  %v258_v2 = vunpack.c.l.bf16 %v11413_v52  ;;  %v259_v3 = vunpack.c.h.bf16 %v11412_v51  ;;  %v260_v4 = vunpack.c.l.bf16 %v11415_v54 }
  0x65   :  { %v261_v5 = vunpack.c.l.bf16 %v11416_v55  ;;  %v263_v6 = vunpack.c.h.bf16 %v11416_v55  ;;  %v264_v7 = vunpack.c.l.bf16 %v11419_v56  ;;  %v265_v8 = vadd.f32 %v249_v57, %v216_v31  ;;  %v11431_v31 = vld [vmem:[%s15876_s0 + $0x254] sm:$0x7] }
  0x66   :  { %v266_v9 = vadd.f32 %v250_v58, %v217_v32  ;;  %v267_v10 = vadd.f32 %v251_v59, %v218_v33  ;;  %v268_v11 = vadd.f32 %v252_v60, %v219_v34  ;;  %v269_v13 = vadd.f32 %v253_v61, %v220_v35  ;;  %v11432_v32 = vld [vmem:[%s15876_s0 + $0x2c0] ss:$112 sps:$4 sm:$0xff]   ;;  %v11435_v34 = vld [vmem:[%s15876_s0 + $0x334] sm:$0x7] }
  0x67   :  { %v270_v14 = vadd.f32 %v254_v62, %v221_v36  ;;  %v271_v15 = vadd.f32 %v255_v63, %v222_v39  ;;  %v272_v16 = vadd.f32 %v256_v0, %v223_v40  ;;  %v273_v20 = vadd.f32 %v257_v1, %v224_v41 }
  0x68   :  { %v274_v21 = vadd.f32 %v258_v2, %v225_v42  ;;  %v275_v22 = vadd.f32 %v259_v3, %v226_v46  ;;  %v276_v23 = vadd.f32 %v260_v4, %v227_v47  ;;  %v277_v27 = vadd.f32 %v261_v5, %v228_v48 }
  0x69   :  { %v279_v28 = vadd.f32 %v263_v6, %v230_v49  ;;  %v280_v29 = vadd.f32 %v264_v7, %v231_v53  ;;  %v298_v33 = vunpack.c.l.bf16 %v11420_v12  ;;  %v299_v35 = vunpack.c.l.bf16 %v11421_v17 }
  0x6a   :  { %v300_v36 = vunpack.c.h.bf16 %v11420_v12  ;;  %v301_v37 = vunpack.c.l.bf16 %v11423_v18  ;;  %v302_v38 = vunpack.c.l.bf16 %v11424_v19  ;;  %v303_v39 = vunpack.c.l.bf16 %v11425_v24 }
  0x6b   :  { %v304_v40 = vunpack.c.h.bf16 %v11424_v19  ;;  %v305_v41 = vunpack.c.l.bf16 %v11427_v25  ;;  %v306_v42 = vunpack.c.l.bf16 %v11428_v26  ;;  %v307_v43 = vunpack.c.l.bf16 %v11429_v30 }
  0x6c   :  { %v308_v44 = vunpack.c.h.bf16 %v11428_v26  ;;  %v309_v45 = vunpack.c.l.bf16 %v11431_v31  ;;  %v310_v46 = vunpack.c.l.bf16 %v11432_v32  ;;  %v312_v47 = vunpack.c.h.bf16 %v11432_v32 }
  0x6d   :  { %v313_v48 = vunpack.c.l.bf16 %v11435_v34  ;;  %v13672_v49 = vadd.f32 %v298_v33, %v265_v8  ;;  %v13674_v50 = vadd.f32 %v299_v35, %v266_v9  ;;  %v13676_v51 = vadd.f32 %v300_v36, %v267_v10 }
  0x6e   :  { %v13678_v52 = vadd.f32 %v301_v37, %v268_v11  ;;  %v13680_v53 = vadd.f32 %v302_v38, %v269_v13  ;;  %v13682_v54 = vadd.f32 %v303_v39, %v270_v14  ;;  %v13684_v55 = vadd.f32 %v304_v40, %v271_v15 }
  0x6f   :  { %v13686_v56 = vadd.f32 %v305_v41, %v272_v16  ;;  %v13688_v57 = vadd.f32 %v306_v42, %v273_v20  ;;  %v13690_v58 = vadd.f32 %v307_v43, %v274_v21  ;;  %v13692_v59 = vadd.f32 %v308_v44, %v275_v22 }
  0x70   :  { %v13694_v60 = vadd.f32 %v309_v45, %v276_v23  ;;  %v13696_v61 = vadd.f32 %v310_v46, %v277_v27  ;;  %v13698_v62 = vadd.f32 %v312_v47, %v279_v28  ;;  %v13700_v63 = vadd.f32 %v313_v48, %v280_v29 }
  0x71   :  { %v338_v0 = vrot.slane %v13672_v49, 1  ;;  %v339_v1 = vrot.slane %v13676_v51, 1  ;;  %v340_v2 = vrot.slane %v13680_v53, 1  ;;  %v341_v3 = vrot.slane %v13684_v55, 1 }
  0x72   :  { %v342_v4 = vrot.slane %v13688_v57, 1  ;;  %v343_v5 = vrot.slane %v13692_v59, 1  ;;  %v344_v6 = vrot.slane %v13696_v61, 1  ;;  %v345_v7 = vrot.slane %v13698_v62, 1 }
  0x73   :  { %v13711_v8 = vadd.f32 %v338_v0, %v13672_v49  ;;  %v13714_v9 = vadd.f32 %v339_v1, %v13676_v51  ;;  %v13717_v10 = vadd.f32 %v340_v2, %v13680_v53  ;;  %v13720_v11 = vadd.f32 %v341_v3, %v13684_v55  ;;  %v13764_v2 = vld [vmem:[%s15876_s0 + $0x2a4] sm:$0x7] }
  0x74   :  { %v13723_v12 = vadd.f32 %v342_v4, %v13688_v57  ;;  %v13726_v13 = vadd.f32 %v343_v5, %v13692_v59  ;;  %v13729_v14 = vadd.f32 %v344_v6, %v13696_v61  ;;  %v13732_v15 = vadd.f32 %v345_v7, %v13698_v62 }
  0x75   :  { %v362_v16 = vrot.slane %v13672_v49, 2  ;;  %v363_v17 = vrot.slane %v13676_v51, 2  ;;  %v364_v18 = vrot.slane %v13680_v53, 2  ;;  %v365_v19 = vrot.slane %v13684_v55, 2 }
  0x76   :  { %v366_v20 = vrot.slane %v13688_v57, 2  ;;  %v367_v21 = vrot.slane %v13692_v59, 2  ;;  %v368_v22 = vrot.slane %v13696_v61, 2  ;;  %v369_v23 = vrot.slane %v13698_v62, 2 }
  0x77   :  { %v378_v24 = vadd.f32 %v362_v16, %v13711_v8  ;;  %v379_v25 = vadd.f32 %v363_v17, %v13714_v9  ;;  %v380_v26 = vadd.f32 %v364_v18, %v13717_v10  ;;  %v381_v27 = vadd.f32 %v365_v19, %v13720_v11 }
  0x78   :  { %v382_v28 = vadd.f32 %v366_v20, %v13723_v12  ;;  %v383_v29 = vadd.f32 %v367_v21, %v13726_v13  ;;  %v384_v30 = vadd.f32 %v368_v22, %v13729_v14  ;;  %v385_v31 = vadd.f32 %v369_v23, %v13732_v15 }
  0x79   :  { %v386_v32 = vrot.slane %v13672_v49, 3  ;;  %v387_v33 = vrot.slane %v13676_v51, 3  ;;  %v388_v34 = vrot.slane %v13680_v53, 3  ;;  %v389_v35 = vrot.slane %v13684_v55, 3 }
  0x7a   :  { %v390_v36 = vrot.slane %v13688_v57, 3  ;;  %v391_v37 = vrot.slane %v13692_v59, 3  ;;  %v392_v38 = vrot.slane %v13696_v61, 3  ;;  %v393_v39 = vrot.slane %v13698_v62, 3 }
  0x7b   :  { %v402_v40 = vadd.f32 %v386_v32, %v378_v24  ;;  %v403_v41 = vadd.f32 %v387_v33, %v379_v25  ;;  %v404_v42 = vadd.f32 %v388_v34, %v380_v26  ;;  %v405_v43 = vadd.f32 %v389_v35, %v381_v27 }
  0x7c   :  { %v406_v44 = vadd.f32 %v390_v36, %v382_v28  ;;  %v407_v45 = vadd.f32 %v391_v37, %v383_v29  ;;  %v408_v46 = vadd.f32 %v392_v38, %v384_v30  ;;  %v409_v47 = vadd.f32 %v393_v39, %v385_v31 }
  0x7d   :  { %v410_v48 = vrot.slane %v13672_v49, 4  ;;  %v411_v0 = vrot.slane %v13676_v51, 4  ;;  %v412_v1 = vrot.slane %v13680_v53, 4  ;;  %v413_v3 = vrot.slane %v13684_v55, 4 }
  0x7e   :  { %v414_v4 = vrot.slane %v13688_v57, 4  ;;  %v415_v5 = vrot.slane %v13692_v59, 4  ;;  %v416_v6 = vrot.slane %v13696_v61, 4  ;;  %v417_v49 = vrot.slane %v13698_v62, 4 }
  0x7f   :  { %v426_v7 = vadd.f32 %v410_v48, %v402_v40  ;;  %v427_v51 = vadd.f32 %v411_v0, %v403_v41  ;;  %v428_v16 = vadd.f32 %v412_v1, %v404_v42  ;;  %v429_v53 = vadd.f32 %v413_v3, %v405_v43 }
  0x80   :  { %v430_v17 = vadd.f32 %v414_v4, %v406_v44  ;;  %v431_v18 = vadd.f32 %v415_v5, %v407_v45  ;;  %v432_v19 = vadd.f32 %v416_v6, %v408_v46  ;;  %vm489_vm3 = vcmask 1043459  }
  0x81   :  { %v433_v20 = vadd.f32 %v417_v49, %v409_v47  ;;  %v434_v55 = vmul.f32 0.04, %v426_v7  ;;  %v435_v21 = vmul.f32 0.04, %v427_v51  ;;  %v436_v57 = vmul.f32 0.04, %v428_v16 }
  0x82   :  { %vm492_vm4 = vcmask 1044484   ;;  %v437_v59 = vmul.f32 0.04, %v429_v53  ;;  %v438_v22 = vmul.f32 0.04, %v430_v17  ;;  %vm495_vm5 = vcmask 1045509  }
  0x83   :  { %v439_v61 = vmul.f32 0.04, %v431_v18  ;;  %v131_v62 = vunpack.c.l.bf16 %v13764_v2  ;;  %v440_v23 = vmul.f32 0.04, %v432_v19  ;;  %v441_v24 = vmul.f32 0.04, %v433_v20 }
  0x84   :  { %v12910_v25 = vpack.c.bf16 %v434_v55, %v434_v55  ;;  %v12911_v26 = vpack.c.bf16 %v435_v21, %v435_v21  ;;  %vm498_vm6 = vcmask 1046534   ;;  %v12912_v27 = vpack.c.bf16 %v436_v57, %v436_v57 }
  0x85   :  { %v12913_v28 = vpack.c.bf16 %v437_v59, %v437_v59  ;;  %v12914_v29 = vpack.c.bf16 %v438_v22, %v438_v22  ;;  %v12915_v30 = vpack.c.bf16 %v439_v61, %v439_v61  ;;  %vm501_vm7 = vcmask 1047559   ;;  %v11385_v59 = vld [vmem:[%s15876_s0 + $0x2ac] sm:$0x7]  ;;  %v11401_v22 = vld [vmem:[%s15876_s0 + $0x2b4] sm:$0x7] }
  0x86   :  { %v12916_v31 = vpack.c.bf16 %v440_v23, %v440_v23  ;;  %v12917_v32 = vpack.c.bf16 %v441_v24, %v441_v24  ;;  %v474_v33 = vunpack.c.l.b16 %v12910_v25  ;;  %v475_v34 = vunpack.c.l.b16 %v12911_v26  ;;  %v11417_v26 = vld [vmem:[%s15876_s0 + $0x2bc] sm:$0x7] }
  0x87   :  { %v476_v35 = vunpack.c.l.b16 %v12912_v27  ;;  %v477_v36 = vunpack.c.l.b16 %v12913_v28  ;;  %v478_v37 = vunpack.c.l.b16 %v12914_v29  ;;  %v479_v38 = vunpack.c.l.b16 %v12915_v30  ;;  %v11433_v27 = vld [vmem:[%s15876_s0 + $0x2c4] sm:$0x7] }
  0x88   :  { %v480_v39 = vunpack.c.l.b16 %v12916_v31  ;;  %v481_v40 = vunpack.c.l.b16 %v12917_v32  ;;  %v482_v41 = vrot.slane %v475_v34, 7  ;;  %vm505_vm8 = vcmask 27648  }
  0x89   :  { %v507_v42 = vrot.slane %v474_v33, 3  ;;  %v485_v43 = vrot.slane %v476_v35, 6  ;;  %v488_v44 = vrot.slane %v477_v36, 5  ;;  %v491_v45 = vrot.slane %v478_v37, 4 }
  0x8a   :  { %v494_v46 = vrot.slane %v479_v38, 3  ;;  %v484_v47 = vsel %vm483_vm1, %v482_v41, %v474_v33  ;;  %v497_v48 = vrot.slane %v480_v39, 2  ;;  %v500_v0 = vrot.slane %v481_v40, 1 }
  0x8b   :  { %v508_v1 = vrot.slane %v475_v34, 2  ;;  %v487_v3 = vsel %vm486_vm2, %v485_v43, %v484_v47  ;;  %v510_v4 = vrot.slane %v476_v35, 1  ;;  %v513_v5 = vrot.slane %v478_v37, 7 }
  0x8c   :  { %v515_v6 = vrot.slane %v479_v38, 6  ;;  %v490_v49 = vsel %vm489_vm3, %v488_v44, %v487_v3  ;;  %v517_v51 = vrot.slane %v480_v39, 5  ;;  %v519_v16 = vrot.slane %v481_v40, 4 }
  0x8d   :  { %v509_v7 = vsel %vm483_vm1, %v508_v1, %v507_v42  ;;  %v493_v53 = vsel %vm492_vm4, %v491_v45, %v490_v49  ;;  %v533_v18 = vrot.slane %v13674_v50, 2  ;;  %v534_v19 = vrot.slane %v13678_v52, 2 }
  0x8e   :  { %v511_v17 = vsel %vm486_vm2, %v510_v4, %v509_v7  ;;  %v496_v20 = vsel %vm495_vm5, %v494_v46, %v493_v53  ;;  %v535_v21 = vrot.slane %v13682_v54, 2  ;;  %v536_v57 = vrot.slane %v13686_v56, 2 }
  0x8f   :  { %v512_v55 = vsel %vm489_vm3, %v477_v36, %v511_v17  ;;  %v499_v61 = vsel %vm498_vm6, %v497_v48, %v496_v20  ;;  %v537_v24 = vrot.slane %v13690_v58, 2  ;;  %v538_v25 = vrot.slane %v13694_v60, 2 }
  0x90   :  { %v514_v23 = vsel %vm492_vm4, %v513_v5, %v512_v55  ;;  %v502_v28 = vsel %vm501_vm7, %v500_v0, %v499_v61  ;;  %v540_v30 = vrot.slane %v13700_v63, 2  ;;  %v549_v31 = vadd.f32 %v533_v18, %v13711_v8 }
  0x91   :  { %v516_v29 = vsel %vm495_vm5, %v515_v6, %v514_v23  ;;  %v503_v32 = vpack.c.b16 %v502_v28, %v502_v28  ;;  %v550_v34 = vadd.f32 %v534_v19, %v13714_v9  ;;  %v551_v35 = vadd.f32 %v535_v21, %v13717_v10 }
  0x92   :  { %v518_v33 = vsel %vm498_vm6, %v517_v51, %v516_v29  ;;  %v552_v37 = vadd.f32 %v536_v57, %v13720_v11  ;;  %v553_v8 = vadd.f32 %v537_v24, %v13723_v12  ;;  %v554_v38 = vadd.f32 %v538_v25, %v13726_v13 }
  0x93   :  { %v520_v36 = vsel %vm501_vm7, %v519_v16, %v518_v33  ;;  %506 = vst.msk [vmem:[#allocation2] sm:$0xf] %vm505_vm8, %v503_v32  ;;  %v556_v10 = vadd.f32 %v540_v30, %v13732_v15  ;;  %vm2874_vm9 = vcmask 31744   ;;  %v164_v39 = vunpack.c.l.bf16 %v11385_v59 }
  0x94   :  { %v521_v9 = vpack.c.b16 %v520_v36, %v520_v36  ;;  %v213_v40 = vunpack.c.l.bf16 %v11401_v22  ;;  %v262_v41 = vunpack.c.l.bf16 %v11417_v26  ;;  %v311_v11 = vunpack.c.l.bf16 %v11433_v27 }
  0x95   :  { %v557_v42 = vrot.slane %v13674_v50, 3  ;;  %v558_v12 = vrot.slane %v13678_v52, 3  ;;  %v180_v13 = vadd.f32 %v164_v39, %v131_v62  ;;  %v559_v43 = vrot.slane %v13682_v54, 3 }
  0x96   :  { %524 = vst.msk [vmem:[#allocation2 + $0x4] sm:$0xf] %vm505_vm8, %v521_v9  ;;  %v560_v44 = vrot.slane %v13686_v56, 3  ;;  %v561_v15 = vrot.slane %v13690_v58, 3  ;;  %v562_v45 = vrot.slane %v13694_v60, 3  ;;  %v564_v46 = vrot.slane %v13700_v63, 3 }
  0x97   :  { %v573_v47 = vadd.f32 %v557_v42, %v549_v31  ;;  %v574_v48 = vadd.f32 %v558_v12, %v550_v34  ;;  %v229_v0 = vadd.f32 %v213_v40, %v180_v13  ;;  %v575_v2 = vadd.f32 %v559_v43, %v551_v35 }
  0x98   :  { %v576_v62 = vadd.f32 %v560_v44, %v552_v37  ;;  %v577_v1 = vadd.f32 %v561_v15, %v553_v8  ;;  %v578_v3 = vadd.f32 %v562_v45, %v554_v38  ;;  %v580_v4 = vadd.f32 %v564_v46, %v556_v10 }
  0x99   :  { %v581_v5 = vrot.slane %v13674_v50, 4  ;;  %v582_v6 = vrot.slane %v13678_v52, 4  ;;  %v278_v49 = vadd.f32 %v262_v41, %v229_v0  ;;  %v583_v7 = vrot.slane %v13682_v54, 4 }
  0x9a   :  { %v584_v51 = vrot.slane %v13686_v56, 4  ;;  %v585_v16 = vrot.slane %v13690_v58, 4  ;;  %v586_v53 = vrot.slane %v13694_v60, 4  ;;  %v588_v17 = vrot.slane %v13700_v63, 4 }
  0x9b   :  { %v597_v20 = vadd.f32 %v581_v5, %v573_v47  ;;  %v598_v55 = vadd.f32 %v582_v6, %v574_v48  ;;  %v13862_v59 = vadd.f32 %v311_v11, %v278_v49  ;;  %v599_v22 = vadd.f32 %v583_v7, %v575_v2 }
  0x9c   :  { %v600_v61 = vadd.f32 %v584_v51, %v576_v62  ;;  %v601_v23 = vadd.f32 %v585_v16, %v577_v1  ;;  %v602_v27 = vadd.f32 %v586_v53, %v578_v3  ;;  %v604_v28 = vadd.f32 %v588_v17, %v580_v4 }
  0x9d   :  { %v13212_v26 = vld [vmem:[#allocation2] sm:$0xff]   ;;  %v605_v29 = vmul.f32 0.04, %v597_v20  ;;  %v671_v31 = vrot.slane %v13674_v50, 1  ;;  %v539_v32 = vrot.slane %v13862_v59, 2  ;;  %v563_v33 = vrot.slane %v13862_v59, 3 }
  0x9e   :  { %v587_v34 = vrot.slane %v13862_v59, 4  ;;  %v606_v35 = vmul.f32 0.04, %v598_v55  ;;  %13184 = vmatprep.mubr.msk.bf16.mxu0 %vm2874_vm9, %v13212_v26  ;;  %v607_v36 = vmul.f32 0.04, %v599_v22 }
  0x9f   :  { %v608_v37 = vmul.f32 0.04, %v600_v61  ;;  %v609_v8 = vmul.f32 0.04, %v601_v23  ;;  %v12918_v38 = vpack.c.bf16 %v605_v29, %v605_v29  ;;  %v555_v9 = vadd.f32 %v539_v32, %v13729_v14 }
  0xa0   :  { %v610_v10 = vmul.f32 0.04, %v602_v27  ;;  %v612_v39 = vmul.f32 0.04, %v604_v28  ;;  %v12919_v40 = vpack.c.bf16 %v606_v35, %v606_v35  ;;  %v12920_v41 = vpack.c.bf16 %v607_v36, %v607_v36 }
  0xa1   :  { %v12921_v11 = vpack.c.bf16 %v608_v37, %v608_v37  ;;  %v12922_v13 = vpack.c.bf16 %v609_v8, %v609_v8  ;;  %v645_v47 = vunpack.c.l.b16 %v12918_v38  ;;  %v579_v48 = vadd.f32 %v563_v33, %v555_v9 }
  0xa2   :  { %v12923_v0 = vpack.c.bf16 %v610_v10, %v610_v10  ;;  %v12925_v2 = vpack.c.bf16 %v612_v39, %v612_v39  ;;  %v646_v62 = vunpack.c.l.b16 %v12919_v40  ;;  %v647_v1 = vunpack.c.l.b16 %v12920_v41 }
  0xa3   :  { %v648_v3 = vunpack.c.l.b16 %v12921_v11  ;;  %v649_v4 = vunpack.c.l.b16 %v12922_v13  ;;  %v653_v49 = vrot.slane %v645_v47, 6  ;;  %v603_v14 = vadd.f32 %v587_v34, %v579_v48 }
  0xa4   :  { %v650_v20 = vunpack.c.l.b16 %v12923_v0  ;;  %v652_v55 = vunpack.c.l.b16 %v12925_v2  ;;  %v654_v22 = vrot.slane %v646_v62, 5  ;;  %v656_v61 = vrot.slane %v647_v1, 4 }
  0xa5   :  { %v658_v23 = vrot.slane %v648_v3, 3  ;;  %v660_v26 = vrot.slane %v649_v4, 2  ;;  %v672_v27 = vrot.slane %v13678_v52, 1  ;;  %v611_v28 = vmul.f32 0.04, %v603_v14 }
  0xa6   :  { %v655_v29 = vsel %vm483_vm1, %v654_v22, %v653_v49  ;;  %v662_v35 = vrot.slane %v650_v20, 1  ;;  %v665_v36 = vrot.slane %v652_v55, 7  ;;  %v673_v8 = vrot.slane %v13682_v54, 1 }
  0xa7   :  { %v657_v37 = vsel %vm486_vm2, %v656_v61, %v655_v29  ;;  %v674_v38 = vrot.slane %v13686_v56, 1  ;;  %v675_v9 = vrot.slane %v13690_v58, 1  ;;  %v12924_v10 = vpack.c.bf16 %v611_v28, %v611_v28 }
  0xa8   :  { %v659_v39 = vsel %vm489_vm3, %v658_v23, %v657_v37  ;;  %v676_v40 = vrot.slane %v13694_v60, 1  ;;  %v677_v41 = vrot.slane %v13862_v59, 1  ;;  %v678_v13 = vrot.slane %v13700_v63, 1 }
  0xa9   :  { %v661_v11 = vsel %vm492_vm4, %v660_v26, %v659_v39  ;;  %v687_v47 = vadd.f32 %v671_v31, %v13674_v50  ;;  %v688_v48 = vadd.f32 %v672_v27, %v13678_v52  ;;  %v651_v0 = vunpack.c.l.b16 %v12924_v10 }
  0xaa   :  { %v663_v2 = vsel %vm495_vm5, %v662_v35, %v661_v11  ;;  %v689_v62 = vadd.f32 %v673_v8, %v13682_v54  ;;  %v690_v1 = vadd.f32 %v674_v38, %v13686_v56  ;;  %v691_v3 = vadd.f32 %v675_v9, %v13690_v58 }
  0xab   :  { %v692_v4 = vadd.f32 %v676_v40, %v13694_v60  ;;  %v693_v49 = vadd.f32 %v677_v41, %v13862_v59  ;;  %v694_v14 = vadd.f32 %v678_v13, %v13700_v63  ;;  %v664_v20 = vsel %vm498_vm6, %v651_v0, %v663_v2  ;;  %v11464_v13 = vld [vmem:[%s15876_s0 + $0xf8] ss:$112 sps:$4 sm:$0xff]  }
  0xac   :  { %v695_v31 = vadd.f32 %v687_v47, %v533_v18  ;;  %v696_v55 = vadd.f32 %v688_v48, %v534_v19  ;;  %v697_v22 = vadd.f32 %v689_v62, %v535_v21  ;;  %v666_v61 = vsel %vm501_vm7, %v665_v36, %v664_v20  ;;  %v11468_v2 = vld [vmem:[%s15876_s0 + $0x1d8] ss:$112 sps:$4 sm:$0xff]   ;;  %v11476_v20 = vld [vmem:[%s15876_s0 + $0x20] ss:$112 sps:$4 sm:$0xff]  }
  0xad   :  { %v698_v23 = vadd.f32 %v690_v1, %v536_v57  ;;  %v699_v26 = vadd.f32 %v691_v3, %v537_v24  ;;  %v700_v27 = vadd.f32 %v692_v4, %v538_v25  ;;  %v667_v28 = vpack.c.b16 %v666_v61, %v666_v61  ;;  %v13929_v57 = vld [vmem:[%s15876_s0 + $0x18] ss:$112 sps:$4 sm:$0xff]  }
  0xae   :  { %v701_v18 = vadd.f32 %v693_v49, %v539_v32  ;;  %v702_v19 = vadd.f32 %v694_v14, %v540_v30  ;;  %v703_v21 = vadd.f32 %v695_v31, %v557_v42  ;;  %v704_v24 = vadd.f32 %v696_v55, %v558_v12  ;;  %v11472_v62 = vld [vmem:[%s15876_s0 + $0x2b8] ss:$112 sps:$4 sm:$0xff]  }
  0xaf   :  { %v705_v25 = vadd.f32 %v697_v22, %v559_v43  ;;  %v706_v32 = vadd.f32 %v698_v23, %v560_v44  ;;  %v707_v30 = vadd.f32 %v699_v26, %v561_v15  ;;  %670 = vst.msk [vmem:[#allocation2 + $0x8] sm:$0xf] %vm505_vm8, %v667_v28  ;;  %v708_v42 = vadd.f32 %v700_v27, %v562_v45  ;;  %v11480_v23 = vld [vmem:[%s15876_s0 + $0x100] ss:$112 sps:$4 sm:$0xff]  }
  0xb0   :  { %v709_v29 = vadd.f32 %v701_v18, %v563_v33  ;;  %v710_v12 = vadd.f32 %v702_v19, %v564_v46  ;;  %v711_v43 = vadd.f32 %v703_v21, %v581_v5  ;;  %v712_v44 = vadd.f32 %v704_v24, %v582_v6  ;;  %v11484_v26 = vld [vmem:[%s15876_s0 + $0x1e0] ss:$112 sps:$4 sm:$0xff]  }
  0xb1   :  { %v713_v15 = vadd.f32 %v705_v25, %v583_v7  ;;  %v714_v35 = vadd.f32 %v706_v32, %v584_v51  ;;  %v715_v45 = vadd.f32 %v707_v30, %v585_v16  ;;  %v716_v33 = vadd.f32 %v708_v42, %v586_v53  ;;  %v11488_v21 = vld [vmem:[%s15876_s0 + $0x2c0] ss:$112 sps:$4 sm:$0xff]  }
  0xb2   :  { %v717_v46 = vadd.f32 %v709_v29, %v587_v34  ;;  %v718_v50 = vadd.f32 %v710_v12, %v588_v17  ;;  %v719_v52 = vmul.f32 0.04, %v711_v43  ;;  %v720_v5 = vmul.f32 0.04, %v712_v44 }
  0xb3   :  { %v721_v6 = vmul.f32 0.04, %v713_v15  ;;  %v722_v54 = vmul.f32 0.04, %v714_v35  ;;  %v801_v7 = vunpack.c.l.bf16 %v13929_v57  ;;  %v723_v56 = vmul.f32 0.04, %v715_v45 }
  0xb4   :  { %v724_v51 = vmul.f32 0.04, %v716_v33  ;;  %v725_v36 = vmul.f32 0.04, %v717_v46  ;;  %v12926_v58 = vpack.c.bf16 %v719_v52, %v719_v52  ;;  %v726_v16 = vmul.f32 0.04, %v718_v50 }
  0xb5   :  { %v12927_v37 = vpack.c.bf16 %v720_v5, %v720_v5  ;;  %v12928_v60 = vpack.c.bf16 %v721_v6, %v721_v6  ;;  %v12929_v53 = vpack.c.bf16 %v722_v54, %v722_v54  ;;  %v12930_v8 = vpack.c.bf16 %v723_v56, %v723_v56  ;;  %v11492_v45 = vld [vmem:[%s15876_s0 + $0x28] ss:$112 sps:$4 sm:$0xff]  }
  0xb6   :  { %v12931_v59 = vpack.c.bf16 %v724_v51, %v724_v51  ;;  %v12932_v34 = vpack.c.bf16 %v725_v36, %v725_v36  ;;  %v759_v38 = vunpack.c.l.b16 %v12926_v58  ;;  %v12933_v63 = vpack.c.bf16 %v726_v16, %v726_v16  ;;  %v11496_v33 = vld [vmem:[%s15876_s0 + $0x108] ss:$112 sps:$4 sm:$0xff]   ;;  %v11508_v16 = vld [vmem:[%s15876_s0 + $0x30] ss:$112 sps:$4 sm:$0xff]  }
  0xb7   :  { %v760_v17 = vunpack.c.l.b16 %v12927_v37  ;;  %v761_v9 = vunpack.c.l.b16 %v12928_v60  ;;  %v762_v10 = vunpack.c.l.b16 %v12929_v53  ;;  %v763_v39 = vunpack.c.l.b16 %v12930_v8  ;;  %v11500_v46 = vld [vmem:[%s15876_s0 + $0x1e8] ss:$112 sps:$4 sm:$0xff]  }
  0xb8   :  { %v764_v40 = vunpack.c.l.b16 %v12931_v59  ;;  %v765_v41 = vunpack.c.l.b16 %v12932_v34  ;;  %v767_v11 = vrot.slane %v759_v38, 1  ;;  %v766_v47 = vunpack.c.l.b16 %v12933_v63  ;;  %v11504_v54 = vld [vmem:[%s15876_s0 + $0x2c8] ss:$112 sps:$4 sm:$0xff]   ;;  %v11516_v59 = vld [vmem:[%s15876_s0 + $0x1f0] ss:$112 sps:$4 sm:$0xff]  }
  0xb9   :  { %v769_v48 = vrot.slane %v761_v9, 7  ;;  %v771_v0 = vrot.slane %v762_v10, 6  ;;  %v803_v1 = vunpack.c.h.bf16 %v13929_v57  ;;  %v773_v4 = vrot.slane %v763_v39, 5  ;;  %v11520_v9 = vld [vmem:[%s15876_s0 + $0x2d0] ss:$112 sps:$4 sm:$0xff]  }
  0xba   :  { %v768_v3 = vsel %vm483_vm1, %v760_v17, %v767_v11  ;;  %v775_v49 = vrot.slane %v764_v40, 4  ;;  %v777_v14 = vrot.slane %v765_v41, 3  ;;  %v779_v55 = vrot.slane %v766_v47, 2 }
  0xbb   :  { %v770_v31 = vsel %vm486_vm2, %v769_v48, %v768_v3  ;;  %v805_v22 = vunpack.c.l.bf16 %v11464_v13  ;;  %v807_v61 = vunpack.c.h.bf16 %v11464_v13  ;;  %v809_v28 = vunpack.c.l.bf16 %v11468_v2 }
  0xbc   :  { %v772_v27 = vsel %vm489_vm3, %v771_v0, %v770_v31  ;;  %v811_v18 = vunpack.c.h.bf16 %v11468_v2  ;;  %v813_v19 = vunpack.c.l.bf16 %v11472_v62  ;;  %v815_v24 = vunpack.c.h.bf16 %v11472_v62 }
  0xbd   :  { %v774_v57 = vsel %vm492_vm4, %v773_v4, %v772_v27  ;;  %v833_v25 = vunpack.c.l.bf16 %v11476_v20  ;;  %v835_v32 = vunpack.c.h.bf16 %v11476_v20  ;;  %v837_v42 = vunpack.c.l.bf16 %v11480_v23  ;;  %v11524_v20 = vld [vmem:[%s15876_s0 + $0x38] ss:$112 sps:$4 sm:$0xff]  }
  0xbe   :  { %v776_v30 = vsel %vm495_vm5, %v775_v49, %v774_v57  ;;  %v839_v29 = vunpack.c.h.bf16 %v11480_v23  ;;  %v841_v12 = vunpack.c.l.bf16 %v11484_v26  ;;  %v843_v44 = vunpack.c.h.bf16 %v11484_v26  ;;  %v11528_v23 = vld [vmem:[%s15876_s0 + $0x118] ss:$112 sps:$4 sm:$0xff]  }
  0xbf   :  { %v778_v43 = vsel %vm498_vm6, %v777_v14, %v776_v30  ;;  %v845_v15 = vunpack.c.l.bf16 %v11488_v21  ;;  %v847_v35 = vunpack.c.h.bf16 %v11488_v21  ;;  %v849_v52 = vadd.f32 %v833_v25, %v801_v7  ;;  %v11512_v7 = vld [vmem:[%s15876_s0 + $0x110] ss:$112 sps:$4 sm:$0xff]   ;;  %v11532_v26 = vld [vmem:[%s15876_s0 + $0x1f8] ss:$112 sps:$4 sm:$0xff]  }
  0xc0   :  { %v780_v50 = vsel %vm501_vm7, %v779_v55, %v778_v43  ;;  %v851_v5 = vadd.f32 %v835_v32, %v803_v1  ;;  %v853_v6 = vadd.f32 %v837_v42, %v805_v22  ;;  %v855_v51 = vadd.f32 %v839_v29, %v807_v61  ;;  %v11536_v21 = vld [vmem:[%s15876_s0 + $0x2d8] ss:$112 sps:$4 sm:$0xff]  }
  0xc1   :  { %v781_v56 = vpack.c.b16 %v780_v50, %v780_v50  ;;  %v857_v36 = vadd.f32 %v841_v12, %v809_v28  ;;  %v859_v58 = vadd.f32 %v843_v44, %v811_v18  ;;  %v861_v37 = vadd.f32 %v845_v15, %v813_v19 }
  0xc2   :  { %v863_v60 = vadd.f32 %v847_v35, %v815_v24  ;;  %v882_v53 = vunpack.c.l.bf16 %v11492_v45  ;;  %v884_v8 = vunpack.c.h.bf16 %v11492_v45  ;;  %v886_v34 = vunpack.c.l.bf16 %v11496_v33 }
  0xc3   :  { %784 = vst.msk [vmem:[#allocation2 + $0xc] sm:$0xf] %vm505_vm8, %v781_v56  ;;  %v888_v38 = vunpack.c.h.bf16 %v11496_v33  ;;  %v890_v63 = vunpack.c.l.bf16 %v11500_v46  ;;  %v892_v17 = vunpack.c.h.bf16 %v11500_v46  ;;  %v894_v10 = vunpack.c.l.bf16 %v11504_v54 }
  0xc4   :  { %v896_v39 = vunpack.c.h.bf16 %v11504_v54  ;;  %v898_v40 = vadd.f32 %v882_v53, %v849_v52  ;;  %v900_v41 = vadd.f32 %v884_v8, %v851_v5  ;;  %v902_v11 = vadd.f32 %v886_v34, %v853_v6 }
  0xc5   :  { %v904_v13 = vadd.f32 %v888_v38, %v855_v51  ;;  %v906_v47 = vadd.f32 %v890_v63, %v857_v36  ;;  %v908_v48 = vadd.f32 %v892_v17, %v859_v58  ;;  %v910_v0 = vadd.f32 %v894_v10, %v861_v37 }
  0xc6   :  { %v912_v2 = vadd.f32 %v896_v39, %v863_v60  ;;  %v931_v62 = vunpack.c.l.bf16 %v11508_v16  ;;  %v933_v1 = vunpack.c.h.bf16 %v11508_v16  ;;  %v935_v3 = vunpack.c.l.bf16 %v11512_v7 }
  0xc7   :  { %v937_v4 = vunpack.c.h.bf16 %v11512_v7  ;;  %v939_v49 = vunpack.c.l.bf16 %v11516_v59  ;;  %v941_v14 = vunpack.c.h.bf16 %v11516_v59  ;;  %v943_v31 = vunpack.c.l.bf16 %v11520_v9 }
  0xc8   :  { %v945_v55 = vunpack.c.h.bf16 %v11520_v9  ;;  %v947_v22 = vadd.f32 %v931_v62, %v898_v40  ;;  %v949_v61 = vadd.f32 %v933_v1, %v900_v41  ;;  %v951_v27 = vadd.f32 %v935_v3, %v902_v11 }
  0xc9   :  { %v953_v28 = vadd.f32 %v937_v4, %v904_v13  ;;  %v955_v18 = vadd.f32 %v939_v49, %v906_v47  ;;  %v957_v19 = vadd.f32 %v941_v14, %v908_v48  ;;  %v959_v24 = vadd.f32 %v943_v31, %v910_v0 }
  0xca   :  { %v13213_v57 = vld [vmem:[#allocation2 + $0x8] sm:$0xff]   ;;  %v961_v25 = vadd.f32 %v945_v55, %v912_v2  ;;  %v980_v32 = vunpack.c.l.bf16 %v11524_v20  ;;  %v982_v30 = vunpack.c.h.bf16 %v11524_v20  ;;  %v984_v42 = vunpack.c.l.bf16 %v11528_v23 }
  0xcb   :  { %v986_v29 = vunpack.c.h.bf16 %v11528_v23  ;;  %v988_v12 = vunpack.c.l.bf16 %v11532_v26  ;;  %v990_v43 = vunpack.c.h.bf16 %v11532_v26  ;;  %13185 = vmatmul.mubr.msk.bf16.vlgmr.msra.gmra.mxu0 %vm2874_vm9, %v13213_v57  ;;  %v992_v44 = vunpack.c.l.bf16 %v11536_v21 }
  0xcc   :  { %v994_v15 = vunpack.c.h.bf16 %v11536_v21  ;;  %v14030_v35 = vadd.f32 %v980_v32, %v947_v22  ;;  %v14032_v45 = vadd.f32 %v982_v30, %v949_v61  ;;  %v14034_v33 = vadd.f32 %v984_v42, %v951_v27 }
  0xcd   :  { %v14036_v46 = vadd.f32 %v986_v29, %v953_v28  ;;  %v14038_v50 = vadd.f32 %v988_v12, %v955_v18  ;;  %v14040_v52 = vadd.f32 %v990_v43, %v957_v19  ;;  %v14042_v5 = vadd.f32 %v992_v44, %v959_v24 }
  0xce   :  { %v14044_v6 = vadd.f32 %v994_v15, %v961_v25  ;;  %v1020_v54 = vrot.slane %v14030_v35, 1  ;;  %v1021_v56 = vrot.slane %v14032_v45, 1  ;;  %v1022_v51 = vrot.slane %v14034_v33, 1 }
  0xcf   :  { %v1023_v36 = vrot.slane %v14036_v46, 1  ;;  %v1024_v58 = vrot.slane %v14038_v50, 1  ;;  %v1025_v16 = vrot.slane %v14040_v52, 1  ;;  %v1026_v37 = vrot.slane %v14042_v5, 1 }
  0xd0   :  { %v1027_v60 = vrot.slane %v14044_v6, 1  ;;  %v14055_v53 = vadd.f32 %v1020_v54, %v14030_v35  ;;  %v14058_v8 = vadd.f32 %v1021_v56, %v14032_v45  ;;  %v14061_v7 = vadd.f32 %v1022_v51, %v14034_v33 }
  0xd1   :  { %v14064_v59 = vadd.f32 %v1023_v36, %v14036_v46  ;;  %v14067_v34 = vadd.f32 %v1024_v58, %v14038_v50  ;;  %v14070_v38 = vadd.f32 %v1025_v16, %v14040_v52  ;;  %v14073_v63 = vadd.f32 %v1026_v37, %v14042_v5 }
  0xd2   :  { %v14076_v17 = vadd.f32 %v1027_v60, %v14044_v6  ;;  %v1044_v9 = vrot.slane %v14030_v35, 2  ;;  %v1045_v10 = vrot.slane %v14032_v45, 2  ;;  %v1046_v39 = vrot.slane %v14034_v33, 2 }
  0xd3   :  { %v1047_v40 = vrot.slane %v14036_v46, 2  ;;  %v1048_v41 = vrot.slane %v14038_v50, 2  ;;  %v1049_v11 = vrot.slane %v14040_v52, 2  ;;  %v1050_v13 = vrot.slane %v14042_v5, 2 }
  0xd4   :  { %v1051_v47 = vrot.slane %v14044_v6, 2  ;;  %v1060_v48 = vadd.f32 %v1044_v9, %v14055_v53  ;;  %v1061_v0 = vadd.f32 %v1045_v10, %v14058_v8  ;;  %v1062_v2 = vadd.f32 %v1046_v39, %v14061_v7 }
  0xd5   :  { %v1063_v62 = vadd.f32 %v1047_v40, %v14064_v59  ;;  %v1064_v1 = vadd.f32 %v1048_v41, %v14067_v34  ;;  %v1065_v3 = vadd.f32 %v1049_v11, %v14070_v38  ;;  %v1066_v4 = vadd.f32 %v1050_v13, %v14073_v63 }
  0xd6   :  { %v1067_v49 = vadd.f32 %v1051_v47, %v14076_v17  ;;  %v1068_v14 = vrot.slane %v14030_v35, 3  ;;  %v1069_v20 = vrot.slane %v14032_v45, 3  ;;  %v1070_v31 = vrot.slane %v14034_v33, 3 }
  0xd7   :  { %v1071_v55 = vrot.slane %v14036_v46, 3  ;;  %v1072_v22 = vrot.slane %v14038_v50, 3  ;;  %v1073_v61 = vrot.slane %v14040_v52, 3  ;;  %v1074_v23 = vrot.slane %v14042_v5, 3 }
  0xd8   :  { %v1075_v26 = vrot.slane %v14044_v6, 3  ;;  %v1084_v27 = vadd.f32 %v1068_v14, %v1060_v48  ;;  %v1085_v28 = vadd.f32 %v1069_v20, %v1061_v0  ;;  %v1086_v18 = vadd.f32 %v1070_v31, %v1062_v2 }
  0xd9   :  { %v1087_v19 = vadd.f32 %v1071_v55, %v1063_v62  ;;  %v1088_v21 = vadd.f32 %v1072_v22, %v1064_v1  ;;  %v1089_v57 = vadd.f32 %v1073_v61, %v1065_v3  ;;  %v1090_v24 = vadd.f32 %v1074_v23, %v1066_v4  ;;  %v14119_v55 = vld [vmem:[%s15876_s0 + $0x8c] sm:$0x7] }
  0xda   :  { %v1091_v25 = vadd.f32 %v1075_v26, %v1067_v49  ;;  %v1092_v32 = vrot.slane %v14030_v35, 4  ;;  %v1093_v30 = vrot.slane %v14032_v45, 4  ;;  %v1094_v42 = vrot.slane %v14034_v33, 4  ;;  %v14113_v35 = vld [vmem:[%s15876_s0 + $0x1c] sm:$0x7] }
  0xdb   :  { %v1095_v29 = vrot.slane %v14036_v46, 4  ;;  %v1096_v12 = vrot.slane %v14038_v50, 4  ;;  %v1097_v43 = vrot.slane %v14040_v52, 4  ;;  %v1098_v44 = vrot.slane %v14042_v5, 4 }
  0xdc   :  { %v1099_v15 = vrot.slane %v14044_v6, 4  ;;  %v1108_v54 = vadd.f32 %v1092_v32, %v1084_v27  ;;  %v1109_v56 = vadd.f32 %v1093_v30, %v1085_v28  ;;  %v1110_v45 = vadd.f32 %v1094_v42, %v1086_v18  ;;  %v14124_v27 = vld [vmem:[%s15876_s0 + $0xfc] sm:$0x7] }
  0xdd   :  { %v1111_v51 = vadd.f32 %v1095_v29, %v1087_v19  ;;  %v1112_v33 = vadd.f32 %v1096_v12, %v1088_v21  ;;  %v1113_v36 = vadd.f32 %v1097_v43, %v1089_v57  ;;  %v1114_v46 = vadd.f32 %v1098_v44, %v1090_v24  ;;  %v11467_v57 = vld [vmem:[%s15876_s0 + $0x16c] sm:$0x7]  ;;  %v11469_v42 = vld [vmem:[%s15876_s0 + $0x1dc] sm:$0x7] }
  0xde   :  { %v1115_v58 = vadd.f32 %v1099_v15, %v1091_v25  ;;  %v1116_v50 = vmul.f32 0.04, %v1108_v54  ;;  %v1117_v16 = vmul.f32 0.04, %v1109_v56  ;;  %v1118_v52 = vmul.f32 0.04, %v1110_v45 }
  0xdf   :  { %v1119_v37 = vmul.f32 0.04, %v1111_v51  ;;  %v1120_v5 = vmul.f32 0.04, %v1112_v33  ;;  %v802_v6 = vunpack.c.l.bf16 %v14113_v35  ;;  %v1121_v60 = vmul.f32 0.04, %v1113_v36 }
  0xe0   :  { %v1122_v9 = vmul.f32 0.04, %v1114_v46  ;;  %v1123_v10 = vmul.f32 0.04, %v1115_v58  ;;  %v12934_v39 = vpack.c.bf16 %v1116_v50, %v1116_v50  ;;  %v12935_v40 = vpack.c.bf16 %v1117_v16, %v1117_v16  ;;  %v11471_v15 = vld [vmem:[%s15876_s0 + $0x24c] sm:$0x7] }
  0xe1   :  { %v12936_v41 = vpack.c.bf16 %v1118_v52, %v1118_v52  ;;  %v12937_v11 = vpack.c.bf16 %v1119_v37, %v1119_v37  ;;  %v12938_v13 = vpack.c.bf16 %v1120_v5, %v1120_v5  ;;  %v12939_v47 = vpack.c.bf16 %v1121_v60, %v1121_v60  ;;  %v11473_v54 = vld [vmem:[%s15876_s0 + $0x2bc] sm:$0x7]  ;;  %v11475_v51 = vld [vmem:[%s15876_s0 + $0x32c] sm:$0x7]  ;;  %v11477_v46 = vld [vmem:[%s15876_s0 + $0x24] sm:$0x7] }
  0xe2   :  { %v12940_v48 = vpack.c.bf16 %v1122_v9, %v1122_v9  ;;  %v12941_v0 = vpack.c.bf16 %v1123_v10, %v1123_v10  ;;  %v1156_v2 = vunpack.c.l.b16 %v12934_v39  ;;  %v1157_v62 = vunpack.c.l.b16 %v12935_v40  ;;  %v11479_v37 = vld [vmem:[%s15876_s0 + $0x94] sm:$0x7]  ;;  %v11481_v5 = vld [vmem:[%s15876_s0 + $0x104] sm:$0x7] }
  0xe3   :  { %v1158_v1 = vunpack.c.l.b16 %v12936_v41  ;;  %v1159_v3 = vunpack.c.l.b16 %v12937_v11  ;;  %v1160_v4 = vunpack.c.l.b16 %v12938_v13  ;;  %v1161_v49 = vunpack.c.l.b16 %v12939_v47  ;;  %v11483_v40 = vld [vmem:[%s15876_s0 + $0x174] sm:$0x7]  ;;  %v11485_v41 = vld [vmem:[%s15876_s0 + $0x1e4] sm:$0x7] }
  0xe4   :  { %v1162_v14 = vunpack.c.l.b16 %v12940_v48  ;;  %v1163_v20 = vunpack.c.l.b16 %v12941_v0  ;;  %v1182_v31 = vrot.slane %v1156_v2, 3  ;;  %v1164_v22 = vrot.slane %v1157_v62, 7  ;;  %v11487_v48 = vld [vmem:[%s15876_s0 + $0x254] sm:$0x7]  ;;  %v11489_v0 = vld [vmem:[%s15876_s0 + $0x2c4] sm:$0x7] }
  0xe5   :  { %v1166_v61 = vrot.slane %v1158_v1, 6  ;;  %v1168_v23 = vrot.slane %v1159_v3, 5  ;;  %v1170_v26 = vrot.slane %v1160_v4, 4  ;;  %v1172_v28 = vrot.slane %v1161_v49, 3 }
  0xe6   :  { %v1174_v18 = vrot.slane %v1162_v14, 2  ;;  %v1176_v19 = vrot.slane %v1163_v20, 1  ;;  %v1183_v21 = vrot.slane %v1157_v62, 2  ;;  %v1165_v24 = vsel %vm483_vm1, %v1164_v22, %v1156_v2  ;;  %v11491_v2 = vld [vmem:[%s15876_s0 + $0x334] sm:$0x7] }
  0xe7   :  { %v1185_v25 = vrot.slane %v1158_v1, 1  ;;  %v1188_v32 = vrot.slane %v1160_v4, 7  ;;  %v1190_v30 = vrot.slane %v1161_v49, 6  ;;  %v1167_v29 = vsel %vm486_vm2, %v1166_v61, %v1165_v24  ;;  %v11493_v22 = vld [vmem:[%s15876_s0 + $0x2c] sm:$0x7] }
  0xe8   :  { %v1184_v12 = vsel %vm483_vm1, %v1183_v21, %v1182_v31  ;;  %v1192_v43 = vrot.slane %v1162_v14, 5  ;;  %v1194_v44 = vrot.slane %v1163_v20, 4  ;;  %v1169_v56 = vsel %vm489_vm3, %v1168_v23, %v1167_v29  ;;  %v11495_v61 = vld [vmem:[%s15876_s0 + $0x9c] sm:$0x7]  ;;  %v11501_v21 = vld [vmem:[%s15876_s0 + $0x1ec] sm:$0x7] }
  0xe9   :  { %v1186_v45 = vsel %vm486_vm2, %v1185_v25, %v1184_v12  ;;  %v804_v33 = vunpack.c.l.bf16 %v14119_v55  ;;  %v806_v36 = vunpack.c.l.bf16 %v14124_v27  ;;  %v1171_v58 = vsel %vm492_vm4, %v1170_v26, %v1169_v56  ;;  %v11507_v29 = vld [vmem:[%s15876_s0 + $0x33c] sm:$0x7] }
  0xea   :  { %v1187_v50 = vsel %vm489_vm3, %v1159_v3, %v1186_v45  ;;  %v808_v16 = vunpack.c.l.bf16 %v11467_v57  ;;  %v810_v52 = vunpack.c.l.bf16 %v11469_v42  ;;  %v1173_v60 = vsel %vm495_vm5, %v1172_v28, %v1171_v58  ;;  %v11505_v42 = vld [vmem:[%s15876_s0 + $0x2cc] sm:$0x7]  ;;  %v11509_v45 = vld [vmem:[%s15876_s0 + $0x34] sm:$0x7] }
  0xeb   :  { %v1189_v9 = vsel %vm492_vm4, %v1188_v32, %v1187_v50  ;;  %v812_v10 = vunpack.c.l.bf16 %v11471_v15  ;;  %v814_v39 = vunpack.c.l.bf16 %v11473_v54  ;;  %v1175_v11 = vsel %vm498_vm6, %v1174_v18, %v1173_v60  ;;  %v11497_v18 = vld [vmem:[%s15876_s0 + $0x10c] sm:$0x7]  ;;  %v11513_v50 = vld [vmem:[%s15876_s0 + $0x114] sm:$0x7] }
  0xec   :  { %v1191_v13 = vsel %vm495_vm5, %v1190_v30, %v1189_v9  ;;  %v816_v47 = vunpack.c.l.bf16 %v11475_v51  ;;  %v834_v62 = vunpack.c.l.bf16 %v11477_v46  ;;  %v1177_v1 = vsel %vm501_vm7, %v1176_v19, %v1175_v11  ;;  %v11499_v19 = vld [vmem:[%s15876_s0 + $0x17c] sm:$0x7]  ;;  %v11511_v51 = vld [vmem:[%s15876_s0 + $0xa4] sm:$0x7] }
  0xed   :  { %v1193_v3 = vsel %vm498_vm6, %v1192_v43, %v1191_v13  ;;  %v836_v4 = vunpack.c.l.bf16 %v11479_v37  ;;  %v838_v49 = vunpack.c.l.bf16 %v11481_v5  ;;  %v1178_v14 = vpack.c.b16 %v1177_v1, %v1177_v1  ;;  %v11503_v30 = vld [vmem:[%s15876_s0 + $0x25c] sm:$0x7] }
  0xee   :  { %v1195_v20 = vsel %vm501_vm7, %v1194_v44, %v1193_v3  ;;  %v840_v31 = vunpack.c.l.bf16 %v11483_v40  ;;  %v842_v55 = vunpack.c.l.bf16 %v11485_v41  ;;  %v844_v26 = vunpack.c.l.bf16 %v11487_v48  ;;  %v11523_v40 = vld [vmem:[%s15876_s0 + $0x344] sm:$0x7]  ;;  %v11525_v48 = vld [vmem:[%s15876_s0 + $0x3c] sm:$0x7] }
  0xef   :  { %v1196_v23 = vpack.c.b16 %v1195_v20, %v1195_v20  ;;  %v846_v27 = vunpack.c.l.bf16 %v11489_v0  ;;  %v848_v28 = vunpack.c.l.bf16 %v11491_v2  ;;  %1181 = vst.msk [vmem:[#allocation2 + $0x10] sm:$0xf] %vm505_vm8, %v1178_v14  ;;  %v850_v57 = vadd.f32 %v834_v62, %v802_v6  ;;  %v11527_v0 = vld [vmem:[%s15876_s0 + $0xac] sm:$0x7]  ;;  %v11533_v14 = vld [vmem:[%s15876_s0 + $0x1fc] sm:$0x7] }
  0xf0   :  { %v852_v24 = vadd.f32 %v836_v4, %v804_v33  ;;  %v854_v25 = vadd.f32 %v838_v49, %v806_v36  ;;  %v856_v32 = vadd.f32 %v840_v31, %v808_v16  ;;  %v858_v12 = vadd.f32 %v842_v55, %v810_v52  ;;  %v11515_v16 = vld [vmem:[%s15876_s0 + $0x184] sm:$0x7]  ;;  %v11517_v52 = vld [vmem:[%s15876_s0 + $0x1f4] sm:$0x7]  ;;  %v11529_v4 = vld [vmem:[%s15876_s0 + $0x11c] sm:$0x7] }
  0xf1   :  { %1199 = vst.msk [vmem:[#allocation2 + $0x14] sm:$0xf] %vm505_vm8, %v1196_v23  ;;  %v860_v35 = vadd.f32 %v844_v26, %v812_v10  ;;  %v862_v6 = vadd.f32 %v846_v27, %v814_v39  ;;  %v864_v43 = vadd.f32 %v848_v28, %v816_v47  ;;  %v883_v44 = vunpack.c.l.bf16 %v11493_v22  ;;  %v11519_v10 = vld [vmem:[%s15876_s0 + $0x264] sm:$0x7]  ;;  %v11521_v39 = vld [vmem:[%s15876_s0 + $0x2d4] sm:$0x7] }
  0xf2   :  { %v885_v15 = vunpack.c.l.bf16 %v11495_v61  ;;  %v887_v54 = vunpack.c.l.bf16 %v11497_v18  ;;  %v889_v56 = vunpack.c.l.bf16 %v11499_v19  ;;  %v891_v33 = vunpack.c.l.bf16 %v11501_v21  ;;  %v11531_v49 = vld [vmem:[%s15876_s0 + $0x18c] sm:$0x7]  ;;  %v11537_v23 = vld [vmem:[%s15876_s0 + $0x2dc] sm:$0x7] }
  0xf3   :  { %v893_v36 = vunpack.c.l.bf16 %v11503_v30  ;;  %v895_v46 = vunpack.c.l.bf16 %v11505_v42  ;;  %v897_v58 = vunpack.c.l.bf16 %v11507_v29  ;;  %v899_v37 = vadd.f32 %v883_v44, %v850_v57  ;;  %v11535_v61 = vld [vmem:[%s15876_s0 + $0x26c] sm:$0x7] }
  0xf4   :  { %v901_v5 = vadd.f32 %v885_v15, %v852_v24  ;;  %v903_v60 = vadd.f32 %v887_v54, %v854_v25  ;;  %v905_v9 = vadd.f32 %v889_v56, %v856_v32  ;;  %v907_v41 = vadd.f32 %v891_v33, %v858_v12  ;;  %v11539_v21 = vld [vmem:[%s15876_s0 + $0x34c] sm:$0x7] }
  0xf5   :  { %v909_v11 = vadd.f32 %v893_v36, %v860_v35  ;;  %v911_v13 = vadd.f32 %v895_v46, %v862_v6  ;;  %v913_v47 = vadd.f32 %v897_v58, %v864_v43  ;;  %v932_v2 = vunpack.c.l.bf16 %v11509_v45 }
  0xf6   :  { %v934_v62 = vunpack.c.l.bf16 %v11511_v51  ;;  %v936_v1 = vunpack.c.l.bf16 %v11513_v50  ;;  %v938_v3 = vunpack.c.l.bf16 %v11515_v16  ;;  %v940_v20 = vunpack.c.l.bf16 %v11517_v52 }
  0xf7   :  { %v942_v31 = vunpack.c.l.bf16 %v11519_v10  ;;  %v944_v55 = vunpack.c.l.bf16 %v11521_v39  ;;  %v946_v22 = vunpack.c.l.bf16 %v11523_v40  ;;  %v948_v27 = vadd.f32 %v932_v2, %v899_v37 }
  0xf8   :  { %v13214_v26 = vld [vmem:[#allocation2 + $0x10] sm:$0xff]   ;;  %v950_v28 = vadd.f32 %v934_v62, %v901_v5  ;;  %v952_v18 = vadd.f32 %v936_v1, %v903_v60  ;;  %v954_v19 = vadd.f32 %v938_v3, %v905_v9  ;;  %v956_v57 = vadd.f32 %v940_v20, %v907_v41 }
  0xf9   :  { %v958_v24 = vadd.f32 %v942_v31, %v909_v11  ;;  %v960_v25 = vadd.f32 %v944_v55, %v911_v13  ;;  %v962_v32 = vadd.f32 %v946_v22, %v913_v47  ;;  %13188 = vmatprep.mubr.msk.bf16.mxu0 %vm2874_vm9, %v13214_v26  ;;  %v981_v30 = vunpack.c.l.bf16 %v11525_v48 }
  0xfa   :  { %v983_v42 = vunpack.c.l.bf16 %v11527_v0  ;;  %v985_v29 = vunpack.c.l.bf16 %v11529_v4  ;;  %v987_v12 = vunpack.c.l.bf16 %v11531_v49  ;;  %v989_v35 = vunpack.c.l.bf16 %v11533_v14 }
  0xfb   :  { %v991_v6 = vunpack.c.l.bf16 %v11535_v61  ;;  %v993_v43 = vunpack.c.l.bf16 %v11537_v23  ;;  %v995_v44 = vunpack.c.l.bf16 %v11539_v21  ;;  %v14258_v15 = vadd.f32 %v981_v30, %v948_v27 }
  0xfc   :  { %v14260_v54 = vadd.f32 %v983_v42, %v950_v28  ;;  %v14262_v56 = vadd.f32 %v985_v29, %v952_v18  ;;  %v14264_v45 = vadd.f32 %v987_v12, %v954_v19  ;;  %v14266_v51 = vadd.f32 %v989_v35, %v956_v57  ;;  %v14341_v28 = vld [vmem:[%s15876_s0 + $0x30] ss:$112 sps:$4 sm:$0xff]  }
  0xfd   :  { %v14268_v33 = vadd.f32 %v991_v6, %v958_v24  ;;  %v14270_v36 = vadd.f32 %v993_v43, %v960_v25  ;;  %v14272_v46 = vadd.f32 %v995_v44, %v962_v32  ;;  %v1208_v58 = vrot.slane %v14258_v15, 2 }
  0xfe   :  { %v1209_v50 = vrot.slane %v14260_v54, 2  ;;  %v1210_v16 = vrot.slane %v14262_v56, 2  ;;  %v1211_v52 = vrot.slane %v14264_v45, 2  ;;  %v1212_v37 = vrot.slane %v14266_v51, 2 }
  0xff   :  { %v1213_v5 = vrot.slane %v14268_v33, 2  ;;  %v1214_v60 = vrot.slane %v14270_v36, 2  ;;  %v1215_v9 = vrot.slane %v14272_v46, 2  ;;  %v1224_v10 = vadd.f32 %v1208_v58, %v14055_v53 }
 0x100   :  { %v1225_v39 = vadd.f32 %v1209_v50, %v14058_v8  ;;  %v1226_v40 = vadd.f32 %v1210_v16, %v14061_v7  ;;  %v1227_v41 = vadd.f32 %v1211_v52, %v14064_v59  ;;  %v1228_v11 = vadd.f32 %v1212_v37, %v14067_v34 }
 0x101   :  { %v1229_v53 = vadd.f32 %v1213_v5, %v14070_v38  ;;  %v1230_v8 = vadd.f32 %v1214_v60, %v14073_v63  ;;  %v1231_v7 = vadd.f32 %v1215_v9, %v14076_v17  ;;  %v1232_v13 = vrot.slane %v14258_v15, 3 }
 0x102   :  { %v1233_v59 = vrot.slane %v14260_v54, 3  ;;  %v1234_v47 = vrot.slane %v14262_v56, 3  ;;  %v1235_v34 = vrot.slane %v14264_v45, 3  ;;  %v1236_v48 = vrot.slane %v14266_v51, 3 }
 0x103   :  { %v1237_v38 = vrot.slane %v14268_v33, 3  ;;  %v1238_v0 = vrot.slane %v14270_v36, 3  ;;  %v1239_v63 = vrot.slane %v14272_v46, 3  ;;  %v1248_v2 = vadd.f32 %v1232_v13, %v1224_v10 }
 0x104   :  { %v1249_v17 = vadd.f32 %v1233_v59, %v1225_v39  ;;  %v1250_v62 = vadd.f32 %v1234_v47, %v1226_v40  ;;  %v1251_v1 = vadd.f32 %v1235_v34, %v1227_v41  ;;  %v1252_v3 = vadd.f32 %v1236_v48, %v1228_v11 }
 0x105   :  { %v1253_v4 = vadd.f32 %v1237_v38, %v1229_v53  ;;  %v1254_v49 = vadd.f32 %v1238_v0, %v1230_v8  ;;  %v1255_v14 = vadd.f32 %v1239_v63, %v1231_v7  ;;  %v1256_v20 = vrot.slane %v14258_v15, 4 }
 0x106   :  { %v1257_v31 = vrot.slane %v14260_v54, 4  ;;  %v1258_v55 = vrot.slane %v14262_v56, 4  ;;  %v1259_v22 = vrot.slane %v14264_v45, 4  ;;  %v1260_v61 = vrot.slane %v14266_v51, 4 }
 0x107   :  { %v1261_v23 = vrot.slane %v14268_v33, 4  ;;  %v1262_v26 = vrot.slane %v14270_v36, 4  ;;  %v1263_v27 = vrot.slane %v14272_v46, 4  ;;  %v1272_v18 = vadd.f32 %v1256_v20, %v1248_v2 }
 0x108   :  { %v1273_v19 = vadd.f32 %v1257_v31, %v1249_v17  ;;  %v1274_v21 = vadd.f32 %v1258_v55, %v1250_v62  ;;  %v1275_v57 = vadd.f32 %v1259_v22, %v1251_v1  ;;  %v1276_v24 = vadd.f32 %v1260_v61, %v1252_v3 }
 0x109   :  { %v1277_v25 = vadd.f32 %v1261_v23, %v1253_v4  ;;  %v1278_v32 = vadd.f32 %v1262_v26, %v1254_v49  ;;  %v1279_v30 = vadd.f32 %v1263_v27, %v1255_v14  ;;  %v1280_v42 = vmul.f32 0.04, %v1272_v18 }
 0x10a   :  { %v1281_v29 = vmul.f32 0.04, %v1273_v19  ;;  %v1282_v12 = vmul.f32 0.04, %v1274_v21  ;;  %v1476_v35 = vunpack.c.l.bf16 %v14341_v28  ;;  %v1283_v6 = vmul.f32 0.04, %v1275_v57 }
 0x10b   :  { %v1284_v43 = vmul.f32 0.04, %v1276_v24  ;;  %v1285_v44 = vmul.f32 0.04, %v1277_v25  ;;  %v1478_v10 = vunpack.c.h.bf16 %v14341_v28  ;;  %v1286_v39 = vmul.f32 0.04, %v1278_v32 }
 0x10c   :  { %v1287_v40 = vmul.f32 0.04, %v1279_v30  ;;  %v12942_v41 = vpack.c.bf16 %v1280_v42, %v1280_v42  ;;  %v12943_v11 = vpack.c.bf16 %v1281_v29, %v1281_v29  ;;  %v12944_v53 = vpack.c.bf16 %v1282_v12, %v1282_v12  ;;  %v11608_v28 = vld [vmem:[%s15876_s0 + $0x2e0] ss:$112 sps:$4 sm:$0xff]  }
 0x10d   :  { %v12945_v8 = vpack.c.bf16 %v1283_v6, %v1283_v6  ;;  %v12946_v7 = vpack.c.bf16 %v1284_v43, %v1284_v43  ;;  %v12947_v2 = vpack.c.bf16 %v1285_v44, %v1285_v44  ;;  %v12948_v17 = vpack.c.bf16 %v1286_v39, %v1286_v39 }
 0x10e   :  { %v12949_v62 = vpack.c.bf16 %v1287_v40, %v1287_v40  ;;  %v1320_v1 = vunpack.c.l.b16 %v12942_v41  ;;  %v1321_v3 = vunpack.c.l.b16 %v12943_v11  ;;  %v1322_v4 = vunpack.c.l.b16 %v12944_v53 }
 0x10f   :  { %v1323_v49 = vunpack.c.l.b16 %v12945_v8  ;;  %v1324_v14 = vunpack.c.l.b16 %v12946_v7  ;;  %v1325_v18 = vunpack.c.l.b16 %v12947_v2  ;;  %v1326_v19 = vunpack.c.l.b16 %v12948_v17 }
 0x110   :  { %v1327_v21 = vunpack.c.l.b16 %v12949_v62  ;;  %v1328_v57 = vrot.slane %v1320_v1, 6  ;;  %v1329_v24 = vrot.slane %v1321_v3, 5  ;;  %v1331_v25 = vrot.slane %v1322_v4, 4 }
 0x111   :  { %v1333_v32 = vrot.slane %v1323_v49, 3  ;;  %v1335_v30 = vrot.slane %v1324_v14, 2  ;;  %v1337_v42 = vrot.slane %v1325_v18, 1  ;;  %v1346_v6 = vrot.slane %v14258_v15, 1 }
 0x112   :  { %v1330_v29 = vsel %vm483_vm1, %v1329_v24, %v1328_v57  ;;  %v1340_v12 = vrot.slane %v1327_v21, 7  ;;  %v1347_v43 = vrot.slane %v14260_v54, 1  ;;  %v1348_v39 = vrot.slane %v14262_v56, 1 }
 0x113   :  { %v1332_v44 = vsel %vm486_vm2, %v1331_v25, %v1330_v29  ;;  %v1349_v40 = vrot.slane %v14264_v45, 1  ;;  %v1350_v41 = vrot.slane %v14266_v51, 1  ;;  %v1351_v53 = vrot.slane %v14268_v33, 1 }
 0x114   :  { %v1334_v11 = vsel %vm489_vm3, %v1333_v32, %v1332_v44  ;;  %v1352_v8 = vrot.slane %v14270_v36, 1  ;;  %v1353_v7 = vrot.slane %v14272_v46, 1  ;;  %v1362_v17 = vadd.f32 %v1346_v6, %v14258_v15 }
 0x115   :  { %v1336_v2 = vsel %vm492_vm4, %v1335_v30, %v1334_v11  ;;  %v1363_v62 = vadd.f32 %v1347_v43, %v14260_v54  ;;  %v1364_v1 = vadd.f32 %v1348_v39, %v14262_v56  ;;  %v1365_v4 = vadd.f32 %v1349_v40, %v14264_v45 }
 0x116   :  { %v1338_v3 = vsel %vm495_vm5, %v1337_v42, %v1336_v2  ;;  %v1366_v49 = vadd.f32 %v1350_v41, %v14266_v51  ;;  %v1367_v14 = vadd.f32 %v1351_v53, %v14268_v33  ;;  %v1368_v21 = vadd.f32 %v1352_v8, %v14270_v36  ;;  %v11572_v2 = vld [vmem:[%s15876_s0 + $0x1f0] ss:$112 sps:$4 sm:$0xff]  }
 0x117   :  { %v1339_v18 = vsel %vm498_vm6, %v1326_v19, %v1338_v3  ;;  %v1369_v57 = vadd.f32 %v1353_v7, %v14272_v46  ;;  %v1370_v24 = vadd.f32 %v1362_v17, %v1208_v58  ;;  %v1371_v32 = vadd.f32 %v1363_v62, %v1209_v50  ;;  %v11576_v3 = vld [vmem:[%s15876_s0 + $0x2d0] ss:$112 sps:$4 sm:$0xff]  }
 0x118   :  { %v1341_v25 = vsel %vm501_vm7, %v1340_v12, %v1339_v18  ;;  %v1372_v30 = vadd.f32 %v1364_v1, %v1210_v16  ;;  %v1373_v42 = vadd.f32 %v1365_v4, %v1211_v52  ;;  %v1374_v19 = vadd.f32 %v1366_v49, %v1212_v37  ;;  %v11580_v49 = vld [vmem:[%s15876_s0 + $0x38] ss:$112 sps:$4 sm:$0xff]  }
 0x119   :  { %v1342_v29 = vpack.c.b16 %v1341_v25, %v1341_v25  ;;  %v1375_v6 = vadd.f32 %v1367_v14, %v1213_v5  ;;  %v1376_v58 = vadd.f32 %v1368_v21, %v1214_v60  ;;  %v1377_v12 = vadd.f32 %v1369_v57, %v1215_v9 }
 0x11a   :  { %v1378_v50 = vadd.f32 %v1370_v24, %v1232_v13  ;;  %v1379_v16 = vadd.f32 %v1371_v32, %v1233_v59  ;;  %v1380_v52 = vadd.f32 %v1372_v30, %v1234_v47  ;;  %v1381_v37 = vadd.f32 %v1373_v42, %v1235_v34  ;;  %v11584_v24 = vld [vmem:[%s15876_s0 + $0x118] ss:$112 sps:$4 sm:$0xff]  }
 0x11b   :  { %1345 = vst.msk [vmem:[#allocation2 + $0x18] sm:$0xf] %vm505_vm8, %v1342_v29  ;;  %v1382_v5 = vadd.f32 %v1374_v19, %v1236_v48  ;;  %v1383_v60 = vadd.f32 %v1375_v6, %v1237_v38  ;;  %v1384_v9 = vadd.f32 %v1376_v58, %v1238_v0  ;;  %v1385_v13 = vadd.f32 %v1377_v12, %v1239_v63  ;;  %v14426_v48 = vld [vmem:[%s15876_s0 + $0x110] ss:$112 sps:$4 sm:$0xff]   ;;  %v11588_v29 = vld [vmem:[%s15876_s0 + $0x1f8] ss:$112 sps:$4 sm:$0xff]  }
 0x11c   :  { %v1386_v59 = vadd.f32 %v1378_v50, %v1256_v20  ;;  %v1387_v47 = vadd.f32 %v1379_v16, %v1257_v31  ;;  %v1388_v34 = vadd.f32 %v1380_v52, %v1258_v55  ;;  %v1389_v38 = vadd.f32 %v1381_v37, %v1259_v22  ;;  %v11592_v50 = vld [vmem:[%s15876_s0 + $0x2d8] ss:$112 sps:$4 sm:$0xff]  }
 0x11d   :  { %v1390_v0 = vadd.f32 %v1382_v5, %v1260_v61  ;;  %v1391_v15 = vadd.f32 %v1383_v60, %v1261_v23  ;;  %v1392_v54 = vadd.f32 %v1384_v9, %v1262_v26  ;;  %v1393_v56 = vadd.f32 %v1385_v13, %v1263_v27 }
 0x11e   :  { %v1394_v63 = vmul.f32 0.04, %v1386_v59  ;;  %v1395_v20 = vmul.f32 0.04, %v1387_v47  ;;  %v1396_v31 = vmul.f32 0.04, %v1388_v34  ;;  %v1480_v45 = vunpack.c.l.bf16 %v14426_v48 }
 0x11f   :  { %v1397_v55 = vmul.f32 0.04, %v1389_v38  ;;  %v1398_v43 = vmul.f32 0.04, %v1390_v0  ;;  %v1399_v44 = vmul.f32 0.04, %v1391_v15  ;;  %v1482_v4 = vunpack.c.h.bf16 %v14426_v48 }
 0x120   :  { %v1400_v22 = vmul.f32 0.04, %v1392_v54  ;;  %v1401_v51 = vmul.f32 0.04, %v1393_v56  ;;  %v12950_v61 = vpack.c.bf16 %v1394_v63, %v1394_v63  ;;  %v12951_v39 = vpack.c.bf16 %v1395_v20, %v1395_v20  ;;  %v11596_v0 = vld [vmem:[%s15876_s0 + $0x40] ss:$112 sps:$4 sm:$0xff]  }
 0x121   :  { %v12952_v33 = vpack.c.bf16 %v1396_v31, %v1396_v31  ;;  %v12953_v23 = vpack.c.bf16 %v1397_v55, %v1397_v55  ;;  %v12954_v40 = vpack.c.bf16 %v1398_v43, %v1398_v43  ;;  %v12955_v36 = vpack.c.bf16 %v1399_v44, %v1399_v44  ;;  %v11600_v20 = vld [vmem:[%s15876_s0 + $0x120] ss:$112 sps:$4 sm:$0xff]  }
 0x122   :  { %v12956_v26 = vpack.c.bf16 %v1400_v22, %v1400_v22  ;;  %v12957_v41 = vpack.c.bf16 %v1401_v51, %v1401_v51  ;;  %v1434_v46 = vunpack.c.l.b16 %v12950_v61  ;;  %v1435_v27 = vunpack.c.l.b16 %v12951_v39  ;;  %v11604_v31 = vld [vmem:[%s15876_s0 + $0x200] ss:$112 sps:$4 sm:$0xff]  }
 0x123   :  { %v1436_v11 = vunpack.c.l.b16 %v12952_v33  ;;  %v1437_v53 = vunpack.c.l.b16 %v12953_v23  ;;  %v1438_v8 = vunpack.c.l.b16 %v12954_v40  ;;  %v1439_v7 = vunpack.c.l.b16 %v12955_v36  ;;  %v11612_v40 = vld [vmem:[%s15876_s0 + $0x48] ss:$112 sps:$4 sm:$0xff]  }
 0x124   :  { %v1440_v17 = vunpack.c.l.b16 %v12956_v26  ;;  %v1441_v62 = vunpack.c.l.b16 %v12957_v41  ;;  %v1442_v1 = vrot.slane %v1434_v46, 1  ;;  %v1484_v42 = vunpack.c.l.bf16 %v11572_v2 }
 0x125   :  { %v1444_v14 = vrot.slane %v1436_v11, 7  ;;  %v1446_v18 = vrot.slane %v1437_v53, 6  ;;  %v1448_v21 = vrot.slane %v1438_v8, 5  ;;  %v1450_v57 = vrot.slane %v1439_v7, 4  ;;  %v11620_v11 = vld [vmem:[%s15876_s0 + $0x208] ss:$112 sps:$4 sm:$0xff]  }
 0x126   :  { %v1443_v25 = vsel %vm483_vm1, %v1435_v27, %v1442_v1  ;;  %v1452_v32 = vrot.slane %v1440_v17, 3  ;;  %v1454_v30 = vrot.slane %v1441_v62, 2  ;;  %v1486_v6 = vunpack.c.h.bf16 %v11572_v2  ;;  %v11616_v27 = vld [vmem:[%s15876_s0 + $0x128] ss:$112 sps:$4 sm:$0xff]  }
 0x127   :  { %v1445_v19 = vsel %vm486_vm2, %v1444_v14, %v1443_v25  ;;  %v1488_v58 = vunpack.c.l.bf16 %v11576_v3  ;;  %v1490_v12 = vunpack.c.h.bf16 %v11576_v3  ;;  %v1508_v52 = vunpack.c.l.bf16 %v11580_v49  ;;  %v11624_v17 = vld [vmem:[%s15876_s0 + $0x2e8] ss:$112 sps:$4 sm:$0xff]  }
 0x128   :  { %v1447_v16 = vsel %vm489_vm3, %v1446_v18, %v1445_v19  ;;  %v1510_v37 = vunpack.c.h.bf16 %v11580_v49  ;;  %v1512_v5 = vunpack.c.l.bf16 %v11584_v24  ;;  %v1514_v9 = vunpack.c.h.bf16 %v11584_v24 }
 0x129   :  { %v1449_v60 = vsel %vm492_vm4, %v1448_v21, %v1447_v16  ;;  %v1516_v13 = vunpack.c.l.bf16 %v11588_v29  ;;  %v1518_v59 = vunpack.c.h.bf16 %v11588_v29  ;;  %v1520_v34 = vunpack.c.l.bf16 %v11592_v50  ;;  %v11636_v29 = vld [vmem:[%s15876_s0 + $0x210] ss:$112 sps:$4 sm:$0xff]  }
 0x12a   :  { %v1451_v47 = vsel %vm495_vm5, %v1450_v57, %v1449_v60  ;;  %v1522_v48 = vunpack.c.h.bf16 %v11592_v50  ;;  %v1524_v38 = vadd.f32 %v1508_v52, %v1476_v35  ;;  %v1526_v54 = vadd.f32 %v1510_v37, %v1478_v10  ;;  %v11628_v57 = vld [vmem:[%s15876_s0 + $0x50] ss:$112 sps:$4 sm:$0xff]  }
 0x12b   :  { %v1453_v15 = vsel %vm498_vm6, %v1452_v32, %v1451_v47  ;;  %v1528_v56 = vadd.f32 %v1512_v5, %v1480_v45  ;;  %v1530_v63 = vadd.f32 %v1514_v9, %v1482_v4  ;;  %v1532_v55 = vadd.f32 %v1516_v13, %v1484_v42  ;;  %v11632_v42 = vld [vmem:[%s15876_s0 + $0x130] ss:$112 sps:$4 sm:$0xff]  }
 0x12c   :  { %v1455_v35 = vsel %vm501_vm7, %v1454_v30, %v1453_v15  ;;  %v1534_v43 = vadd.f32 %v1518_v59, %v1486_v6  ;;  %v1536_v44 = vadd.f32 %v1520_v34, %v1488_v58  ;;  %v1538_v45 = vadd.f32 %v1522_v48, %v1490_v12  ;;  %v11640_v50 = vld [vmem:[%s15876_s0 + $0x2f0] ss:$112 sps:$4 sm:$0xff]  }
 0x12d   :  { %v1456_v10 = vpack.c.b16 %v1455_v35, %v1455_v35  ;;  %v1557_v22 = vunpack.c.l.bf16 %v11596_v0  ;;  %v1559_v51 = vunpack.c.h.bf16 %v11596_v0  ;;  %v1561_v61 = vunpack.c.l.bf16 %v11600_v20 }
 0x12e   :  { %v1563_v39 = vunpack.c.h.bf16 %v11600_v20  ;;  %v1565_v33 = vunpack.c.l.bf16 %v11604_v31  ;;  %v1567_v23 = vunpack.c.h.bf16 %v11604_v31  ;;  %v1569_v36 = vunpack.c.l.bf16 %v11608_v28 }
 0x12f   :  { %1459 = vst.msk [vmem:[#allocation2 + $0x1c] sm:$0xf] %vm505_vm8, %v1456_v10  ;;  %v1571_v26 = vunpack.c.h.bf16 %v11608_v28  ;;  %v1573_v41 = vadd.f32 %v1557_v22, %v1524_v38  ;;  %v1575_v46 = vadd.f32 %v1559_v51, %v1526_v54  ;;  %v1577_v53 = vadd.f32 %v1561_v61, %v1528_v56 }
 0x130   :  { %v1579_v8 = vadd.f32 %v1563_v39, %v1530_v63  ;;  %v1581_v7 = vadd.f32 %v1565_v33, %v1532_v55  ;;  %v1583_v2 = vadd.f32 %v1567_v23, %v1534_v43  ;;  %v1585_v62 = vadd.f32 %v1569_v36, %v1536_v44 }
 0x131   :  { %v1587_v1 = vadd.f32 %v1571_v26, %v1538_v45  ;;  %v1606_v3 = vunpack.c.l.bf16 %v11612_v40  ;;  %v1608_v4 = vunpack.c.h.bf16 %v11612_v40  ;;  %v1610_v49 = vunpack.c.l.bf16 %v11616_v27 }
 0x132   :  { %v1612_v14 = vunpack.c.h.bf16 %v11616_v27  ;;  %v1614_v18 = vunpack.c.l.bf16 %v11620_v11  ;;  %v1616_v21 = vunpack.c.h.bf16 %v11620_v11  ;;  %v1618_v24 = vunpack.c.l.bf16 %v11624_v17 }
 0x133   :  { %v1620_v25 = vunpack.c.h.bf16 %v11624_v17  ;;  %v1622_v32 = vadd.f32 %v1606_v3, %v1573_v41  ;;  %v1624_v30 = vadd.f32 %v1608_v4, %v1575_v46  ;;  %v1626_v19 = vadd.f32 %v1610_v49, %v1577_v53 }
 0x134   :  { %v1628_v6 = vadd.f32 %v1612_v14, %v1579_v8  ;;  %v1630_v58 = vadd.f32 %v1614_v18, %v1581_v7  ;;  %v1632_v12 = vadd.f32 %v1616_v21, %v1583_v2  ;;  %v1634_v16 = vadd.f32 %v1618_v24, %v1585_v62 }
 0x135   :  { %v1636_v52 = vadd.f32 %v1620_v25, %v1587_v1  ;;  %v1655_v37 = vunpack.c.l.bf16 %v11628_v57  ;;  %v1657_v5 = vunpack.c.h.bf16 %v11628_v57  ;;  %v1659_v9 = vunpack.c.l.bf16 %v11632_v42 }
 0x136   :  { %v13215_v60 = vld [vmem:[#allocation2 + $0x18] sm:$0xff]   ;;  %v1661_v13 = vunpack.c.h.bf16 %v11632_v42  ;;  %v1663_v59 = vunpack.c.l.bf16 %v11636_v29  ;;  %v1665_v47 = vunpack.c.h.bf16 %v11636_v29  ;;  %v1667_v34 = vunpack.c.l.bf16 %v11640_v50 }
 0x137   :  { %v1669_v48 = vunpack.c.h.bf16 %v11640_v50  ;;  %v14506_v38 = vadd.f32 %v1655_v37, %v1622_v32  ;;  %v14508_v0 = vadd.f32 %v1657_v5, %v1624_v30  ;;  %13189 = vmatmul.mubr.msk.bf16.gmra.mxu0 %vm2874_vm9, %v13215_v60  ;;  %v14511_v15 = vadd.f32 %v1659_v9, %v1626_v19 }
 0x138   :  { %v14513_v54 = vadd.f32 %v1661_v13, %v1628_v6  ;;  %v14515_v56 = vadd.f32 %v1663_v59, %v1630_v58  ;;  %v14517_v63 = vadd.f32 %v1665_v47, %v1632_v12  ;;  %v14519_v20 = vadd.f32 %v1667_v34, %v1634_v16 }
 0x139   :  { %v14521_v31 = vadd.f32 %v1669_v48, %v1636_v52  ;;  %v1695_v35 = vrot.slane %v14506_v38, 1  ;;  %v1696_v55 = vrot.slane %v14508_v0, 1  ;;  %v1697_v43 = vrot.slane %v14511_v15, 1 }
 0x13a   :  { %v1698_v44 = vrot.slane %v14513_v54, 1  ;;  %v1699_v28 = vrot.slane %v14515_v56, 1  ;;  %v1700_v10 = vrot.slane %v14517_v63, 1  ;;  %v1701_v45 = vrot.slane %v14519_v20, 1 }
 0x13b   :  { %v1702_v22 = vrot.slane %v14521_v31, 1  ;;  %v14532_v51 = vadd.f32 %v1695_v35, %v14506_v38  ;;  %v14535_v61 = vadd.f32 %v1696_v55, %v14508_v0  ;;  %v14538_v39 = vadd.f32 %v1697_v43, %v14511_v15 }
 0x13c   :  { %v14541_v33 = vadd.f32 %v1698_v44, %v14513_v54  ;;  %v14544_v23 = vadd.f32 %v1699_v28, %v14515_v56  ;;  %v14547_v40 = vadd.f32 %v1700_v10, %v14517_v63  ;;  %v14550_v36 = vadd.f32 %v1701_v45, %v14519_v20 }
 0x13d   :  { %v14553_v26 = vadd.f32 %v1702_v22, %v14521_v31  ;;  %v1719_v41 = vrot.slane %v14506_v38, 2  ;;  %v1720_v46 = vrot.slane %v14508_v0, 2  ;;  %v1721_v27 = vrot.slane %v14511_v15, 2 }
 0x13e   :  { %v1722_v11 = vrot.slane %v14513_v54, 2  ;;  %v1723_v53 = vrot.slane %v14515_v56, 2  ;;  %v1724_v8 = vrot.slane %v14517_v63, 2  ;;  %v1725_v7 = vrot.slane %v14519_v20, 2 }
 0x13f   :  { %v1726_v2 = vrot.slane %v14521_v31, 2  ;;  %v1735_v17 = vadd.f32 %v1719_v41, %v14532_v51  ;;  %v1736_v62 = vadd.f32 %v1720_v46, %v14535_v61  ;;  %v1737_v1 = vadd.f32 %v1721_v27, %v14538_v39 }
 0x140   :  { %v1738_v3 = vadd.f32 %v1722_v11, %v14541_v33  ;;  %v1739_v4 = vadd.f32 %v1723_v53, %v14544_v23  ;;  %v1740_v49 = vadd.f32 %v1724_v8, %v14547_v40  ;;  %v1741_v14 = vadd.f32 %v1725_v7, %v14550_v36 }
 0x141   :  { %v1742_v18 = vadd.f32 %v1726_v2, %v14553_v26  ;;  %v1743_v21 = vrot.slane %v14506_v38, 3  ;;  %v1744_v57 = vrot.slane %v14508_v0, 3  ;;  %v1745_v24 = vrot.slane %v14511_v15, 3 }
 0x142   :  { %v1746_v25 = vrot.slane %v14513_v54, 3  ;;  %v1747_v32 = vrot.slane %v14515_v56, 3  ;;  %v1748_v30 = vrot.slane %v14517_v63, 3  ;;  %v1749_v42 = vrot.slane %v14519_v20, 3 }
 0x143   :  { %v1750_v29 = vrot.slane %v14521_v31, 3  ;;  %v1759_v19 = vadd.f32 %v1743_v21, %v1735_v17  ;;  %v1760_v6 = vadd.f32 %v1744_v57, %v1736_v62  ;;  %v1761_v58 = vadd.f32 %v1745_v24, %v1737_v1 }
 0x144   :  { %v1762_v12 = vadd.f32 %v1746_v25, %v1738_v3  ;;  %v1763_v50 = vadd.f32 %v1747_v32, %v1739_v4  ;;  %v1764_v16 = vadd.f32 %v1748_v30, %v1740_v49  ;;  %v1765_v52 = vadd.f32 %v1749_v42, %v1741_v14  ;;  %v14596_v25 = vld [vmem:[%s15876_s0 + $0x114] sm:$0x7] }
 0x145   :  { %v1766_v37 = vadd.f32 %v1750_v29, %v1742_v18  ;;  %v1767_v5 = vrot.slane %v14506_v38, 4  ;;  %v1768_v60 = vrot.slane %v14508_v0, 4  ;;  %v1769_v9 = vrot.slane %v14511_v15, 4  ;;  %v14590_v38 = vld [vmem:[%s15876_s0 + $0x34] sm:$0x7] }
 0x146   :  { %v1770_v13 = vrot.slane %v14513_v54, 4  ;;  %v1771_v59 = vrot.slane %v14515_v56, 4  ;;  %v1772_v47 = vrot.slane %v14517_v63, 4  ;;  %v1773_v34 = vrot.slane %v14519_v20, 4 }
 0x147   :  { %v1774_v48 = vrot.slane %v14521_v31, 4  ;;  %v1783_v35 = vadd.f32 %v1767_v5, %v1759_v19  ;;  %v1784_v55 = vadd.f32 %v1768_v60, %v1760_v6  ;;  %v1785_v0 = vadd.f32 %v1769_v9, %v1761_v58  ;;  %v11567_v19 = vld [vmem:[%s15876_s0 + $0xa4] sm:$0x7]  ;;  %v11573_v9 = vld [vmem:[%s15876_s0 + $0x1f4] sm:$0x7] }
 0x148   :  { %v1786_v43 = vadd.f32 %v1770_v13, %v1762_v12  ;;  %v1787_v15 = vadd.f32 %v1771_v59, %v1763_v50  ;;  %v1788_v44 = vadd.f32 %v1772_v47, %v1764_v16  ;;  %v1789_v54 = vadd.f32 %v1773_v34, %v1765_v52  ;;  %v11571_v16 = vld [vmem:[%s15876_s0 + $0x184] sm:$0x7] }
 0x149   :  { %v1790_v28 = vadd.f32 %v1774_v48, %v1766_v37  ;;  %v1791_v56 = vmul.f32 0.04, %v1783_v35  ;;  %v1792_v10 = vmul.f32 0.04, %v1784_v55  ;;  %v1793_v63 = vmul.f32 0.04, %v1785_v0 }
 0x14a   :  { %v1794_v45 = vmul.f32 0.04, %v1786_v43  ;;  %v1795_v20 = vmul.f32 0.04, %v1787_v15  ;;  %v1477_v31 = vunpack.c.l.bf16 %v14590_v38  ;;  %v1796_v22 = vmul.f32 0.04, %v1788_v44 }
 0x14b   :  { %v1797_v41 = vmul.f32 0.04, %v1789_v54  ;;  %v1798_v46 = vmul.f32 0.04, %v1790_v28  ;;  %v12958_v27 = vpack.c.bf16 %v1791_v56, %v1791_v56  ;;  %v12959_v11 = vpack.c.bf16 %v1792_v10, %v1792_v10  ;;  %v11575_v48 = vld [vmem:[%s15876_s0 + $0x264] sm:$0x7] }
 0x14c   :  { %v12960_v53 = vpack.c.bf16 %v1793_v63, %v1793_v63  ;;  %v12961_v8 = vpack.c.bf16 %v1794_v45, %v1794_v45  ;;  %v12962_v7 = vpack.c.bf16 %v1795_v20, %v1795_v20  ;;  %v12963_v2 = vpack.c.bf16 %v1796_v22, %v1796_v22  ;;  %v11577_v35 = vld [vmem:[%s15876_s0 + $0x2d4] sm:$0x7]  ;;  %v11579_v43 = vld [vmem:[%s15876_s0 + $0x344] sm:$0x7]  ;;  %v11581_v54 = vld [vmem:[%s15876_s0 + $0x3c] sm:$0x7] }
 0x14d   :  { %v12964_v17 = vpack.c.bf16 %v1797_v41, %v1797_v41  ;;  %v12965_v62 = vpack.c.bf16 %v1798_v46, %v1798_v46  ;;  %v1831_v1 = vunpack.c.l.b16 %v12958_v27  ;;  %v1832_v3 = vunpack.c.l.b16 %v12959_v11  ;;  %v11583_v45 = vld [vmem:[%s15876_s0 + $0xac] sm:$0x7]  ;;  %v11585_v20 = vld [vmem:[%s15876_s0 + $0x11c] sm:$0x7] }
 0x14e   :  { %v1833_v4 = vunpack.c.l.b16 %v12960_v53  ;;  %v1834_v49 = vunpack.c.l.b16 %v12961_v8  ;;  %v1835_v14 = vunpack.c.l.b16 %v12962_v7  ;;  %v1836_v18 = vunpack.c.l.b16 %v12963_v2  ;;  %v11587_v11 = vld [vmem:[%s15876_s0 + $0x18c] sm:$0x7]  ;;  %v11589_v53 = vld [vmem:[%s15876_s0 + $0x1fc] sm:$0x7] }
 0x14f   :  { %v1837_v21 = vunpack.c.l.b16 %v12964_v17  ;;  %v1838_v57 = vunpack.c.l.b16 %v12965_v62  ;;  %v1857_v24 = vrot.slane %v1831_v1, 3  ;;  %v1839_v32 = vrot.slane %v1832_v3, 7  ;;  %v11591_v17 = vld [vmem:[%s15876_s0 + $0x26c] sm:$0x7]  ;;  %v11593_v62 = vld [vmem:[%s15876_s0 + $0x2dc] sm:$0x7] }
 0x150   :  { %v1841_v30 = vrot.slane %v1833_v4, 6  ;;  %v1843_v42 = vrot.slane %v1834_v49, 5  ;;  %v1845_v29 = vrot.slane %v1835_v14, 4  ;;  %v1847_v6 = vrot.slane %v1836_v18, 3 }
 0x151   :  { %v1849_v58 = vrot.slane %v1837_v21, 2  ;;  %v1851_v12 = vrot.slane %v1838_v57, 1  ;;  %v1858_v50 = vrot.slane %v1832_v3, 2  ;;  %v1840_v52 = vsel %vm483_vm1, %v1839_v32, %v1831_v1  ;;  %v11595_v1 = vld [vmem:[%s15876_s0 + $0x34c] sm:$0x7] }
 0x152   :  { %v1860_v37 = vrot.slane %v1833_v4, 1  ;;  %v1863_v5 = vrot.slane %v1835_v14, 7  ;;  %v1865_v60 = vrot.slane %v1836_v18, 6  ;;  %v1842_v13 = vsel %vm486_vm2, %v1841_v30, %v1840_v52  ;;  %v11597_v32 = vld [vmem:[%s15876_s0 + $0x44] sm:$0x7] }
 0x153   :  { %v1859_v59 = vsel %vm483_vm1, %v1858_v50, %v1857_v24  ;;  %v1867_v47 = vrot.slane %v1837_v21, 5  ;;  %v1869_v34 = vrot.slane %v1838_v57, 4  ;;  %v1844_v55 = vsel %vm489_vm3, %v1843_v42, %v1842_v13  ;;  %v11601_v30 = vld [vmem:[%s15876_s0 + $0x124] sm:$0x7]  ;;  %v11611_v13 = vld [vmem:[%s15876_s0 + $0x354] sm:$0x7] }
 0x154   :  { %v1861_v0 = vsel %vm486_vm2, %v1860_v37, %v1859_v59  ;;  %v1479_v15 = vunpack.c.l.bf16 %v11567_v19  ;;  %v1481_v44 = vunpack.c.l.bf16 %v14596_v25  ;;  %v1846_v28 = vsel %vm492_vm4, %v1845_v29, %v1844_v55  ;;  %v11605_v50 = vld [vmem:[%s15876_s0 + $0x204] sm:$0x7] }
 0x155   :  { %v1862_v56 = vsel %vm489_vm3, %v1834_v49, %v1861_v0  ;;  %v1483_v10 = vunpack.c.l.bf16 %v11571_v16  ;;  %v1485_v63 = vunpack.c.l.bf16 %v11573_v9  ;;  %v1848_v22 = vsel %vm495_vm5, %v1847_v6, %v1846_v28  ;;  %v11609_v9 = vld [vmem:[%s15876_s0 + $0x2e4] sm:$0x7]  ;;  %v11613_v0 = vld [vmem:[%s15876_s0 + $0x4c] sm:$0x7] }
 0x156   :  { %v1864_v41 = vsel %vm492_vm4, %v1863_v5, %v1862_v56  ;;  %v1487_v46 = vunpack.c.l.bf16 %v11575_v48  ;;  %v1489_v27 = vunpack.c.l.bf16 %v11577_v35  ;;  %v1850_v8 = vsel %vm498_vm6, %v1849_v58, %v1848_v22  ;;  %v11599_v58 = vld [vmem:[%s15876_s0 + $0xb4] sm:$0x7]  ;;  %v11617_v56 = vld [vmem:[%s15876_s0 + $0x12c] sm:$0x7] }
 0x157   :  { %v1866_v7 = vsel %vm495_vm5, %v1865_v60, %v1864_v41  ;;  %v1491_v2 = vunpack.c.l.bf16 %v11579_v43  ;;  %v1509_v3 = vunpack.c.l.bf16 %v11581_v54  ;;  %v1852_v4 = vsel %vm501_vm7, %v1851_v12, %v1850_v8  ;;  %v11603_v12 = vld [vmem:[%s15876_s0 + $0x194] sm:$0x7]  ;;  %v11615_v43 = vld [vmem:[%s15876_s0 + $0xbc] sm:$0x7] }
 0x158   :  { %v1868_v49 = vsel %vm498_vm6, %v1867_v47, %v1866_v7  ;;  %v1511_v14 = vunpack.c.l.bf16 %v11583_v45  ;;  %v1513_v18 = vunpack.c.l.bf16 %v11585_v20  ;;  %v1853_v21 = vpack.c.b16 %v1852_v4, %v1852_v4  ;;  %v11607_v60 = vld [vmem:[%s15876_s0 + $0x274] sm:$0x7] }
 0x159   :  { %v1870_v57 = vsel %vm501_vm7, %v1869_v34, %v1868_v49  ;;  %v1515_v24 = vunpack.c.l.bf16 %v11587_v11  ;;  %v1517_v25 = vunpack.c.l.bf16 %v11589_v53  ;;  %v1519_v29 = vunpack.c.l.bf16 %v11591_v17  ;;  %v11627_v11 = vld [vmem:[%s15876_s0 + $0x35c] sm:$0x7]  ;;  %v11629_v17 = vld [vmem:[%s15876_s0 + $0x54] sm:$0x7] }
 0x15a   :  { %v1871_v42 = vpack.c.b16 %v1870_v57, %v1870_v57  ;;  %v1521_v19 = vunpack.c.l.bf16 %v11593_v62  ;;  %v1523_v6 = vunpack.c.l.bf16 %v11595_v1  ;;  %1856 = vst.msk [vmem:[#allocation2 + $0x20] sm:$0xf] %vm505_vm8, %v1853_v21  ;;  %v1525_v16 = vadd.f32 %v1509_v3, %v1477_v31  ;;  %v11631_v62 = vld [vmem:[%s15876_s0 + $0xc4] sm:$0x7]  ;;  %v11637_v21 = vld [vmem:[%s15876_s0 + $0x214] sm:$0x7] }
 0x15b   :  { %v1527_v52 = vadd.f32 %v1511_v14, %v1479_v15  ;;  %v1529_v37 = vadd.f32 %v1513_v18, %v1481_v44  ;;  %v1531_v5 = vadd.f32 %v1515_v24, %v1483_v10  ;;  %v1533_v59 = vadd.f32 %v1517_v25, %v1485_v63  ;;  %v11619_v10 = vld [vmem:[%s15876_s0 + $0x19c] sm:$0x7]  ;;  %v11621_v63 = vld [vmem:[%s15876_s0 + $0x20c] sm:$0x7]  ;;  %v11633_v14 = vld [vmem:[%s15876_s0 + $0x134] sm:$0x7] }
 0x15c   :  { %1874 = vst.msk [vmem:[#allocation2 + $0x24] sm:$0xf] %vm505_vm8, %v1871_v42  ;;  %v1535_v38 = vadd.f32 %v1519_v29, %v1487_v46  ;;  %v1537_v31 = vadd.f32 %v1521_v19, %v1489_v27  ;;  %v1539_v47 = vadd.f32 %v1523_v6, %v1491_v2  ;;  %v1558_v34 = vunpack.c.l.bf16 %v11597_v32  ;;  %v11623_v46 = vld [vmem:[%s15876_s0 + $0x27c] sm:$0x7]  ;;  %v11625_v27 = vld [vmem:[%s15876_s0 + $0x2ec] sm:$0x7] }
 0x15d   :  { %v1560_v48 = vunpack.c.l.bf16 %v11599_v58  ;;  %v1562_v35 = vunpack.c.l.bf16 %v11601_v30  ;;  %v1564_v55 = vunpack.c.l.bf16 %v11603_v12  ;;  %v1566_v15 = vunpack.c.l.bf16 %v11605_v50  ;;  %v11635_v18 = vld [vmem:[%s15876_s0 + $0x1a4] sm:$0x7]  ;;  %v11641_v42 = vld [vmem:[%s15876_s0 + $0x2f4] sm:$0x7] }
 0x15e   :  { %v1568_v44 = vunpack.c.l.bf16 %v11607_v60  ;;  %v1570_v54 = vunpack.c.l.bf16 %v11609_v9  ;;  %v1572_v28 = vunpack.c.l.bf16 %v11611_v13  ;;  %v1574_v45 = vadd.f32 %v1558_v34, %v1525_v16  ;;  %v11639_v30 = vld [vmem:[%s15876_s0 + $0x284] sm:$0x7] }
 0x15f   :  { %v1576_v20 = vadd.f32 %v1560_v48, %v1527_v52  ;;  %v1578_v22 = vadd.f32 %v1562_v35, %v1529_v37  ;;  %v1580_v41 = vadd.f32 %v1564_v55, %v1531_v5  ;;  %v1582_v53 = vadd.f32 %v1566_v15, %v1533_v59  ;;  %v11643_v50 = vld [vmem:[%s15876_s0 + $0x364] sm:$0x7] }
 0x160   :  { %v1584_v8 = vadd.f32 %v1568_v44, %v1535_v38  ;;  %v1586_v7 = vadd.f32 %v1570_v54, %v1537_v31  ;;  %v1588_v2 = vadd.f32 %v1572_v28, %v1539_v47  ;;  %v1607_v1 = vunpack.c.l.bf16 %v11613_v0 }
 0x161   :  { %v1609_v3 = vunpack.c.l.bf16 %v11615_v43  ;;  %v1611_v4 = vunpack.c.l.bf16 %v11617_v56  ;;  %v1613_v49 = vunpack.c.l.bf16 %v11619_v10  ;;  %v1615_v57 = vunpack.c.l.bf16 %v11621_v63 }
 0x162   :  { %v1617_v24 = vunpack.c.l.bf16 %v11623_v46  ;;  %v1619_v25 = vunpack.c.l.bf16 %v11625_v27  ;;  %v1621_v32 = vunpack.c.l.bf16 %v11627_v11  ;;  %v1623_v19 = vadd.f32 %v1607_v1, %v1574_v45 }
 0x163   :  { %v13216_v29 = vld [vmem:[#allocation2 + $0x20] sm:$0xff]   ;;  %v1625_v6 = vadd.f32 %v1609_v3, %v1576_v20  ;;  %v1627_v58 = vadd.f32 %v1611_v4, %v1578_v22  ;;  %v1629_v12 = vadd.f32 %v1613_v49, %v1580_v41  ;;  %v1631_v16 = vadd.f32 %v1615_v57, %v1582_v53 }
 0x164   :  { %v1633_v52 = vadd.f32 %v1617_v24, %v1584_v8  ;;  %v1635_v37 = vadd.f32 %v1619_v25, %v1586_v7  ;;  %v1637_v5 = vadd.f32 %v1621_v32, %v1588_v2  ;;  %13192 = vmatprep.mubr.msk.bf16.mxu0 %vm2874_vm9, %v13216_v29  ;;  %v1656_v60 = vunpack.c.l.bf16 %v11629_v17 }
 0x165   :  { %v1658_v9 = vunpack.c.l.bf16 %v11631_v62  ;;  %v1660_v13 = vunpack.c.l.bf16 %v11633_v14  ;;  %v1662_v59 = vunpack.c.l.bf16 %v11635_v18  ;;  %v1664_v38 = vunpack.c.l.bf16 %v11637_v21 }
 0x166   :  { %v1666_v31 = vunpack.c.l.bf16 %v11639_v30  ;;  %v1668_v47 = vunpack.c.l.bf16 %v11641_v42  ;;  %v1670_v34 = vunpack.c.l.bf16 %v11643_v50  ;;  %v14732_v48 = vadd.f32 %v1656_v60, %v1623_v19 }
 0x167   :  { %v14734_v35 = vadd.f32 %v1658_v9, %v1625_v6  ;;  %v14736_v55 = vadd.f32 %v1660_v13, %v1627_v58  ;;  %v14738_v0 = vadd.f32 %v1662_v59, %v1629_v12  ;;  %v14740_v43 = vadd.f32 %v1664_v38, %v1631_v16  ;;  %v3288_v6 = vld [vmem:[#allocation9 + $0x5c0] sm:$0xff] }
 0x168   :  { %v14742_v15 = vadd.f32 %v1666_v31, %v1633_v52  ;;  %v14744_v44 = vadd.f32 %v1668_v47, %v1635_v37  ;;  %v14746_v54 = vadd.f32 %v1670_v34, %v1637_v5  ;;  %v1883_v28 = vrot.slane %v14732_v48, 2  ;;  %v3292_v58 = vld [vmem:[#allocation9 + $0x5e0] sm:$0xff] }
 0x169   :  { %v1884_v56 = vrot.slane %v14734_v35, 2  ;;  %v1885_v10 = vrot.slane %v14736_v55, 2  ;;  %v1886_v63 = vrot.slane %v14738_v0, 2  ;;  %v1887_v45 = vrot.slane %v14740_v43, 2 }
 0x16a   :  { %v1888_v20 = vrot.slane %v14742_v15, 2  ;;  %v1889_v22 = vrot.slane %v14744_v44, 2  ;;  %v1890_v41 = vrot.slane %v14746_v54, 2  ;;  %v1899_v46 = vadd.f32 %v1883_v28, %v14532_v51 }
 0x16b   :  { %v1900_v27 = vadd.f32 %v1884_v56, %v14535_v61  ;;  %v1901_v11 = vadd.f32 %v1885_v10, %v14538_v39  ;;  %v1902_v53 = vadd.f32 %v1886_v63, %v14541_v33  ;;  %v1903_v8 = vadd.f32 %v1887_v45, %v14544_v23 }
 0x16c   :  { %v1904_v51 = vadd.f32 %v1888_v20, %v14547_v40  ;;  %v1905_v61 = vadd.f32 %v1889_v22, %v14550_v36  ;;  %v1906_v39 = vadd.f32 %v1890_v41, %v14553_v26  ;;  %v1907_v7 = vrot.slane %v14732_v48, 3 }
 0x16d   :  { %v1908_v33 = vrot.slane %v14734_v35, 3  ;;  %v1909_v2 = vrot.slane %v14736_v55, 3  ;;  %v1910_v23 = vrot.slane %v14738_v0, 3  ;;  %v1911_v17 = vrot.slane %v14740_v43, 3 }
 0x16e   :  { %v1912_v40 = vrot.slane %v14742_v15, 3  ;;  %v1913_v62 = vrot.slane %v14744_v44, 3  ;;  %v1914_v36 = vrot.slane %v14746_v54, 3  ;;  %v1923_v1 = vadd.f32 %v1907_v7, %v1899_v46 }
 0x16f   :  { %v1924_v26 = vadd.f32 %v1908_v33, %v1900_v27  ;;  %v1925_v3 = vadd.f32 %v1909_v2, %v1901_v11  ;;  %v1926_v4 = vadd.f32 %v1910_v23, %v1902_v53  ;;  %v1927_v49 = vadd.f32 %v1911_v17, %v1903_v8 }
 0x170   :  { %v1928_v14 = vadd.f32 %v1912_v40, %v1904_v51  ;;  %v1929_v18 = vadd.f32 %v1913_v62, %v1905_v61  ;;  %v1930_v21 = vadd.f32 %v1914_v36, %v1906_v39  ;;  %v1931_v57 = vrot.slane %v14732_v48, 4 }
 0x171   :  { %v1932_v24 = vrot.slane %v14734_v35, 4  ;;  %v1933_v25 = vrot.slane %v14736_v55, 4  ;;  %v1934_v32 = vrot.slane %v14738_v0, 4  ;;  %v1935_v30 = vrot.slane %v14740_v43, 4 }
 0x172   :  { %v1936_v42 = vrot.slane %v14742_v15, 4  ;;  %v1937_v29 = vrot.slane %v14744_v44, 4  ;;  %v1938_v19 = vrot.slane %v14746_v54, 4  ;;  %v1947_v12 = vadd.f32 %v1931_v57, %v1923_v1 }
 0x173   :  { %v1948_v50 = vadd.f32 %v1932_v24, %v1924_v26  ;;  %v1949_v16 = vadd.f32 %v1933_v25, %v1925_v3  ;;  %v1950_v52 = vadd.f32 %v1934_v32, %v1926_v4  ;;  %v1951_v37 = vadd.f32 %v1935_v30, %v1927_v49 }
 0x174   :  { %v1952_v5 = vadd.f32 %v1936_v42, %v1928_v14  ;;  %v1953_v60 = vadd.f32 %v1937_v29, %v1929_v18  ;;  %v1954_v9 = vadd.f32 %v1938_v19, %v1930_v21  ;;  %v1955_v13 = vmul.f32 0.04, %v1947_v12 }
 0x175   :  { %v1956_v59 = vmul.f32 0.04, %v1948_v50  ;;  %v1957_v38 = vmul.f32 0.04, %v1949_v16  ;;  %v12005_v31 = vcombine.low %v3288_v6, %v3292_v58  ;;  %v1958_v47 = vmul.f32 0.04, %v1950_v52 }
 0x176   :  { %v1959_v34 = vmul.f32 0.04, %v1951_v37  ;;  %v1960_v46 = vmul.f32 0.04, %v1952_v5  ;;  %v12006_v27 = vcombine.high %v3288_v6, %v3292_v58  ;;  %v1961_v11 = vmul.f32 0.04, %v1953_v60 }
 0x177   :  { %v1962_v53 = vmul.f32 0.04, %v1954_v9  ;;  %v12966_v8 = vpack.c.bf16 %v1955_v13, %v1955_v13  ;;  %v12967_v51 = vpack.c.bf16 %v1956_v59, %v1956_v59  ;;  %v12968_v61 = vpack.c.bf16 %v1957_v38, %v1957_v38 }
 0x178   :  { %v12969_v39 = vpack.c.bf16 %v1958_v47, %v1958_v47  ;;  %v12970_v1 = vpack.c.bf16 %v1959_v34, %v1959_v34  ;;  %v12971_v26 = vpack.c.bf16 %v1960_v46, %v1960_v46  ;;  %9387 = vmatprep.subr.bf16.mxu0 %v12006_v27  ;;  %v12972_v3 = vpack.c.bf16 %v1961_v11, %v1961_v11 }
 0x179   :  { %v12973_v4 = vpack.c.bf16 %v1962_v53, %v1962_v53  ;;  %v1995_v49 = vunpack.c.l.b16 %v12966_v8  ;;  %v1996_v14 = vunpack.c.l.b16 %v12967_v51  ;;  %9388 = vmatpush1.bf16.msra.mxu0 %v12005_v31  ;;  %v1997_v18 = vunpack.c.l.b16 %v12968_v61 }
 0x17a   :  { %v1998_v21 = vunpack.c.l.b16 %v12969_v39  ;;  %v1999_v12 = vunpack.c.l.b16 %v12970_v1  ;;  %v2000_v50 = vunpack.c.l.b16 %v12971_v26  ;;  %v2001_v16 = vunpack.c.l.b16 %v12972_v3 }
 0x17b   :  { %v2002_v6 = vunpack.c.l.b16 %v12973_v4  ;;  %v2003_v58 = vrot.slane %v1995_v49, 6  ;;  %v2004_v52 = vrot.slane %v1996_v14, 5  ;;  %v2006_v37 = vrot.slane %v1997_v18, 4 }
 0x17c   :  { %v2008_v5 = vrot.slane %v1998_v21, 3  ;;  %v2010_v60 = vrot.slane %v1999_v12, 2  ;;  %v2012_v9 = vrot.slane %v2000_v50, 1  ;;  %v2021_v38 = vrot.slane %v14732_v48, 1 }
 0x17d   :  { %v2005_v13 = vsel %vm483_vm1, %v2004_v52, %v2003_v58  ;;  %v2015_v59 = vrot.slane %v2002_v6, 7  ;;  %v2022_v47 = vrot.slane %v14734_v35, 1  ;;  %v2023_v34 = vrot.slane %v14736_v55, 1 }
 0x17e   :  { %v2007_v31 = vsel %vm486_vm2, %v2006_v37, %v2005_v13  ;;  %v2024_v46 = vrot.slane %v14738_v0, 1  ;;  %v2025_v27 = vrot.slane %v14740_v43, 1  ;;  %v2026_v53 = vrot.slane %v14742_v15, 1  ;;  %v3160_v13 = vld [vmem:[#allocation9 + $0x1c0] sm:$0xff] }
 0x17f   :  { %v2009_v11 = vsel %vm489_vm3, %v2008_v5, %v2007_v31  ;;  %v2027_v8 = vrot.slane %v14744_v44, 1  ;;  %v2028_v51 = vrot.slane %v14746_v54, 1  ;;  %v2037_v39 = vadd.f32 %v2021_v38, %v14732_v48 }
 0x180   :  { %v2011_v61 = vsel %vm492_vm4, %v2010_v60, %v2009_v11  ;;  %v2038_v1 = vadd.f32 %v2022_v47, %v14734_v35  ;;  %v2039_v26 = vadd.f32 %v2023_v34, %v14736_v55  ;;  %v2040_v4 = vadd.f32 %v2024_v46, %v14738_v0  ;;  %v3152_v11 = vld [vmem:[#allocation9 + $0x180] sm:$0xff] }
 0x181   :  { %v2013_v3 = vsel %vm495_vm5, %v2012_v9, %v2011_v61  ;;  %v2041_v49 = vadd.f32 %v2025_v27, %v14740_v43  ;;  %v2042_v14 = vadd.f32 %v2026_v53, %v14742_v15  ;;  %v2043_v21 = vadd.f32 %v2027_v8, %v14744_v44  ;;  %v3280_v44 = vld [vmem:[#allocation9 + $0x580] sm:$0xff] }
 0x182   :  { %v2014_v18 = vsel %vm498_vm6, %v2001_v16, %v2013_v3  ;;  %v2044_v12 = vadd.f32 %v2028_v51, %v14746_v54  ;;  %v2045_v50 = vadd.f32 %v2037_v39, %v1883_v28  ;;  %v2046_v58 = vadd.f32 %v2038_v1, %v1884_v56  ;;  %v3284_v27 = vld [vmem:[#allocation9 + $0x5a0] sm:$0xff] }
 0x183   :  { %v2016_v6 = vsel %vm501_vm7, %v2015_v59, %v2014_v18  ;;  %v2047_v52 = vadd.f32 %v2039_v26, %v1885_v10  ;;  %v2048_v37 = vadd.f32 %v2040_v4, %v1886_v63  ;;  %v2049_v16 = vadd.f32 %v2041_v49, %v1887_v45  ;;  %v3156_v39 = vld [vmem:[#allocation9 + $0x1a0] sm:$0xff] }
 0x184   :  { %v2017_v5 = vpack.c.b16 %v2016_v6, %v2016_v6  ;;  %v2050_v60 = vadd.f32 %v2042_v14, %v1888_v20  ;;  %v2051_v28 = vadd.f32 %v2043_v21, %v1889_v22  ;;  %v2052_v9 = vadd.f32 %v2044_v12, %v1890_v41  ;;  %v14900_v1 = vld [vmem:[#allocation9 + $0x540] sm:$0xff] }
 0x185   :  { %v2053_v56 = vadd.f32 %v2045_v50, %v1907_v7  ;;  %v2054_v10 = vadd.f32 %v2046_v58, %v1908_v33  ;;  %v2055_v63 = vadd.f32 %v2047_v52, %v1909_v2  ;;  %v2056_v45 = vadd.f32 %v2048_v37, %v1910_v23  ;;  %v14902_v26 = vld [vmem:[#allocation9 + $0x560] sm:$0xff] }
 0x186   :  { %2020 = vst.msk [vmem:[#allocation2 + $0x28] sm:$0xf] %vm505_vm8, %v2017_v5  ;;  %v2057_v20 = vadd.f32 %v2049_v16, %v1911_v17  ;;  %v2058_v22 = vadd.f32 %v2050_v60, %v1912_v40  ;;  %v2059_v41 = vadd.f32 %v2051_v28, %v1913_v62  ;;  %v2060_v7 = vadd.f32 %v2052_v9, %v1914_v36  ;;  %v3164_v17 = vld [vmem:[#allocation9 + $0x1e0] sm:$0xff] }
 0x187   :  { %v2061_v33 = vadd.f32 %v2053_v56, %v1931_v57  ;;  %v2062_v2 = vadd.f32 %v2054_v10, %v1932_v24  ;;  %v2063_v23 = vadd.f32 %v2055_v63, %v1933_v25  ;;  %v2064_v40 = vadd.f32 %v2056_v45, %v1934_v32  ;;  %v14906_v18 = vld [vmem:[#allocation9 + $0x140] sm:$0xff] }
 0x188   :  { %v2065_v62 = vadd.f32 %v2057_v20, %v1935_v30  ;;  %v2066_v36 = vadd.f32 %v2058_v22, %v1936_v42  ;;  %v2067_v48 = vadd.f32 %v2059_v41, %v1937_v29  ;;  %v2068_v35 = vadd.f32 %v2060_v7, %v1938_v19  ;;  %v14908_v21 = vld [vmem:[#allocation9 + $0x160] sm:$0xff] }
 0x189   :  { %v2069_v57 = vmul.f32 0.04, %v2061_v33  ;;  %v2070_v55 = vmul.f32 0.04, %v2062_v2  ;;  %v2071_v24 = vmul.f32 0.04, %v2063_v23  ;;  %v11878_v0 = vcombine.high %v3160_v13, %v3164_v17 }
 0x18a   :  { %v2072_v25 = vmul.f32 0.04, %v2064_v40  ;;  %v2073_v59 = vmul.f32 0.04, %v2065_v62  ;;  %v2074_v38 = vmul.f32 0.04, %v2066_v36  ;;  %v11877_v14 = vcombine.low %v3160_v13, %v3164_v17 }
 0x18b   :  { %v2075_v32 = vmul.f32 0.04, %v2067_v48  ;;  %v2076_v47 = vmul.f32 0.04, %v2068_v35  ;;  %v12974_v43 = vpack.c.bf16 %v2069_v57, %v2069_v57  ;;  %v12975_v30 = vpack.c.bf16 %v2070_v55, %v2070_v55  ;;  %9346 = vmatprep.subr.bf16.mxu1 %v11878_v0  ;;  %v14910_v12 = vld [vmem:[#allocation9 + $0x500] sm:$0xff] }
 0x18c   :  { %v12976_v31 = vpack.c.bf16 %v2071_v24, %v2071_v24  ;;  %v12977_v15 = vpack.c.bf16 %v2072_v25, %v2072_v25  ;;  %v12978_v42 = vpack.c.bf16 %v2073_v59, %v2073_v59  ;;  %v12979_v34 = vpack.c.bf16 %v2074_v38, %v2074_v38  ;;  %v14912_v37 = vld [vmem:[#allocation9 + $0x520] sm:$0xff]  ;;  %9347 = vmatpush1.bf16.msra.mxu1 %v11877_v14 }
 0x18d   :  { %v12980_v29 = vpack.c.bf16 %v2075_v32, %v2075_v32  ;;  %v12981_v54 = vpack.c.bf16 %v2076_v47, %v2076_v47  ;;  %v2109_v19 = vunpack.c.l.b16 %v12974_v43  ;;  %v2110_v46 = vunpack.c.l.b16 %v12975_v30  ;;  %v14914_v5 = vld [vmem:[#allocation9 + $0x100] sm:$0xff] }
 0x18e   :  { %v2111_v53 = vunpack.c.l.b16 %v12976_v31  ;;  %v2112_v8 = vunpack.c.l.b16 %v12977_v15  ;;  %v2113_v51 = vunpack.c.l.b16 %v12978_v42  ;;  %v2114_v61 = vunpack.c.l.b16 %v12979_v34  ;;  %v14918_v56 = vld [vmem:[#allocation9 + $0x120] sm:$0xff] }
 0x18f   :  { %v2115_v3 = vunpack.c.l.b16 %v12980_v29  ;;  %v14904_v4 = vunpack.c.l.b16 %v12981_v54  ;;  %v2117_v49 = vrot.slane %v2109_v19, 1  ;;  %v11997_v9 = vcombine.low %v3280_v44, %v3284_v27  ;;  %v14920_v10 = vld [vmem:[#allocation9 + $0x4c0] sm:$0xff] }
 0x190   :  { %v2119_v50 = vrot.slane %v2111_v53, 7  ;;  %v2121_v6 = vrot.slane %v2112_v8, 6  ;;  %v2123_v58 = vrot.slane %v2113_v51, 5  ;;  %v2125_v52 = vrot.slane %v2114_v61, 4  ;;  %v14925_v63 = vld [vmem:[%s15876_s0 + $0x48] ss:$112 sps:$4 sm:$0xff]  }
 0x191   :  { %v2118_v16 = vsel %vm483_vm1, %v2110_v46, %v2117_v49  ;;  %v2127_v60 = vrot.slane %v2115_v3, 3  ;;  %v2129_v28 = vrot.slane %v14904_v4, 2  ;;  %v11998_v20 = vcombine.high %v3280_v44, %v3284_v27  ;;  %v14928_v7 = vld [vmem:[#allocation9 + $0x4e0] sm:$0xff] }
 0x192   :  { %v2120_v45 = vsel %vm486_vm2, %v2119_v50, %v2118_v16  ;;  %v11870_v22 = vcombine.high %v3152_v11, %v3156_v39  ;;  %v11869_v41 = vcombine.low %v3152_v11, %v3156_v39  ;;  %v14930_v33 = vld [vmem:[#allocation9 + $0xc0] sm:$0xff]  ;;  %v11989_v13 = vcombine.low %v14900_v1, %v14902_v26 }
 0x193   :  { %v14932_v2 = vld [vmem:[#allocation9 + $0xe0] sm:$0xff]  ;;  %v2122_v23 = vsel %vm489_vm3, %v2121_v6, %v2120_v45  ;;  %v11990_v17 = vcombine.high %v14900_v1, %v14902_v26  ;;  %v11862_v40 = vcombine.high %v14906_v18, %v14908_v21  ;;  %9389 = vmatprep.subr.bf16.mxu0 %v11998_v20  ;;  %v11861_v57 = vcombine.low %v14906_v18, %v14908_v21 }
 0x194   :  { %v14941_v62 = vld [vmem:[#allocation9 + $0x480] sm:$0xff]  ;;  %v2124_v35 = vsel %vm492_vm4, %v2123_v58, %v2122_v23  ;;  %9348 = vmatprep.subr.bf16.mxu1 %v11870_v22  ;;  %v11981_v55 = vcombine.low %v14910_v12, %v14912_v37  ;;  %v2151_v38 = vunpack.c.l.bf16 %v14925_v63  ;;  %9390 = vmatpush1.bf16.msra.mxu0 %v11997_v9  ;;  %v11982_v32 = vcombine.high %v14910_v12, %v14912_v37  ;;  %v11688_v12 = vld [vmem:[%s15876_s0 + $0x130] ss:$112 sps:$4 sm:$0xff]  }
 0x195   :  { %v14943_v36 = vld [vmem:[#allocation9 + $0x4a0] sm:$0xff]  ;;  %v2126_v0 = vsel %vm495_vm5, %v2125_v52, %v2124_v35  ;;  %9349 = vmatpush1.bf16.msra.mxu1 %v11869_v41  ;;  %v11854_v47 = vcombine.high %v14914_v5, %v14918_v56  ;;  %v2153_v15 = vunpack.c.h.bf16 %v14925_v63  ;;  %9391 = vmatprep.subr.bf16.mxu0 %v11990_v17  ;;  %v11853_v34 = vcombine.low %v14914_v5, %v14918_v56 }
 0x196   :  { %v14948_v48 = vld [vmem:[%s15876_s0 + $0x128] ss:$112 sps:$4 sm:$0xff]   ;;  %v2128_v42 = vsel %vm498_vm6, %v2127_v60, %v2126_v0  ;;  %9350 = vmatprep.subr.bf16.mxu1 %v11862_v40  ;;  %v11973_v44 = vcombine.low %v14920_v10, %v14928_v7  ;;  %v11974_v11 = vcombine.high %v14920_v10, %v14928_v7  ;;  %v11846_v53 = vcombine.high %v14930_v33, %v14932_v2  ;;  %v11684_v0 = vld [vmem:[%s15876_s0 + $0x50] ss:$112 sps:$4 sm:$0xff]  }
 0x197   :  { %v14955_v24 = vld [vmem:[#allocation9 + $0x80] sm:$0xff]  ;;  %v2155_v46 = vunpack.c.l.bf16 %v14948_v48  ;;  %v2130_v27 = vsel %vm501_vm7, %v2129_v28, %v2128_v42  ;;  %v11845_v8 = vcombine.low %v14930_v33, %v14932_v2  ;;  %v11965_v26 = vcombine.low %v14941_v62, %v14943_v36 }
 0x198   :  { %v14957_v25 = vld [vmem:[#allocation9 + $0xa0] sm:$0xff]  ;;  %v2131_v1 = vpack.c.b16 %v2130_v27, %v2130_v27  ;;  %v11966_v3 = vcombine.high %v14941_v62, %v14943_v36  ;;  %9392 = vmatpush1.bf16.msra.mxu0 %v11989_v13  ;;  %v2157_v16 = vunpack.c.h.bf16 %v14948_v48  ;;  %v2183_v17 = vunpack.c.l.bf16 %v11684_v0 }
 0x199   :  { %v14959_v59 = vld [vmem:[#allocation9 + $0x440] sm:$0xff]  ;;  %v11838_v4 = vcombine.high %v14955_v24, %v14957_v25  ;;  %9351 = vmatpush1.bf16.msra.mxu1 %v11861_v57  ;;  %v11837_v21 = vcombine.low %v14955_v24, %v14957_v25  ;;  %9393 = vmatprep.subr.bf16.mxu0 %v11982_v32  ;;  %v11696_v32 = vld [vmem:[%s15876_s0 + $0x2f0] ss:$112 sps:$4 sm:$0xff]   ;;  %v2185_v13 = vunpack.c.h.bf16 %v11684_v0  ;;  %v2187_v9 = vunpack.c.l.bf16 %v11688_v12 }
 0x19a   :  { %v14967_v43 = vld [vmem:[#allocation9 + $0x460] sm:$0xff]  ;;  %2134 = vst.msk [vmem:[#allocation2 + $0x2c] sm:$0xf] %vm505_vm8, %v2131_v1  ;;  %9352 = vmatprep.subr.bf16.mxu1 %v11854_v47  ;;  %v11692_v47 = vld [vmem:[%s15876_s0 + $0x210] ss:$112 sps:$4 sm:$0xff]   ;;  %v2189_v23 = vunpack.c.h.bf16 %v11688_v12  ;;  %v2199_v10 = vadd.f32 %v2183_v17, %v2151_v38 }
 0x19b   :  { %v14969_v30 = vld [vmem:[#allocation9 + $0x40] sm:$0xff]  ;;  %v11957_v50 = vcombine.low %v14959_v59, %v14967_v43  ;;  %v11958_v6 = vcombine.high %v14959_v59, %v14967_v43  ;;  %v2193_v37 = vunpack.c.h.bf16 %v11692_v47  ;;  %v2201_v7 = vadd.f32 %v2185_v13, %v2153_v15  ;;  %v11724_v25 = vld [vmem:[%s15876_s0 + $0x220] ss:$112 sps:$4 sm:$0xff]  }
 0x19c   :  { %v14971_v31 = vld [vmem:[#allocation9 + $0x60] sm:$0xff]  ;;  %9394 = vmatpush1.bf16.msra.mxu0 %v11981_v55  ;;  %v2203_v33 = vadd.f32 %v2187_v9, %v2155_v46  ;;  %v2205_v38 = vadd.f32 %v2189_v23, %v2157_v16  ;;  %v11716_v46 = vld [vmem:[%s15876_s0 + $0x60] ss:$112 sps:$4 sm:$0xff]  }
 0x19d   :  { %v14979_v29 = vld [vmem:[#allocation9 + $0x400] sm:$0xff]  ;;  %v11830_v60 = vcombine.high %v14969_v30, %v14971_v31  ;;  %9353 = vmatpush1.bf16.msra.mxu1 %v11853_v34  ;;  %9395 = vmatprep.subr.bf16.mxu0 %v11974_v11  ;;  %v2197_v11 = vunpack.c.h.bf16 %v11696_v32  ;;  %v11720_v23 = vld [vmem:[%s15876_s0 + $0x140] ss:$112 sps:$4 sm:$0xff]  }
 0x19e   :  { %v14981_v54 = vld [vmem:[#allocation9 + $0x420] sm:$0xff]  ;;  %9354 = vmatprep.subr.bf16.mxu1 %v11846_v53  ;;  %v2191_v53 = vunpack.c.l.bf16 %v11692_v47  ;;  %v2285_v12 = vunpack.c.l.bf16 %v11720_v23 }
 0x19f   :  { %v14983_v19 = vld [vmem:[#allocation9] sm:$0xff] }
 0x1a0   :  { %v14993_v51 = vld [vmem:[#allocation9 + $0x20] sm:$0xff]  ;;  %9396 = vmatpush1.bf16.msra.mxu0 %v11973_v44 }
 0x1a1   :  { %v14995_v61 = vld [vmem:[#allocation9 + $0x7c0] sm:$0xff]  ;;  %9355 = vmatpush1.bf16.msra.mxu1 %v11845_v8  ;;  %9397 = vmatprep.subr.bf16.mxu0 %v11966_v3  ;;  %v15886_v59 = vcombine.high %v14983_v19, %v14993_v51 }
 0x1a2   :  { %v15000_v39 = vld [vmem:[%s15876_s0 + $0x208] ss:$112 sps:$4 sm:$0xff]   ;;  %9356 = vmatprep.subr.bf16.mxu1 %v11838_v4 }
 0x1a3   :  { %v15008_v49 = vld [vmem:[#allocation9 + $0x7e0] sm:$0xff]  ;;  %v2159_v22 = vunpack.c.l.bf16 %v15000_v39  ;;  %v2161_v42 = vunpack.c.h.bf16 %v15000_v39 }
 0x1a4   :  { %v15010_v14 = vld [vmem:[#allocation9 + $0x3c0] sm:$0xff]  ;;  %9398 = vmatpush1.bf16.msra.mxu0 %v11965_v26  ;;  %v11728_v26 = vld [vmem:[%s15876_s0 + $0x300] ss:$112 sps:$4 sm:$0xff]  }
 0x1a5   :  { %v15012_v18 = vld [vmem:[#allocation9 + $0x3e0] sm:$0xff]  ;;  %v2207_v3 = vadd.f32 %v2191_v53, %v2159_v22  ;;  %v2209_v63 = vadd.f32 %v2193_v37, %v2161_v42  ;;  %9357 = vmatpush1.bf16.msra.mxu1 %v11837_v21  ;;  %9399 = vmatprep.subr.bf16.mxu0 %v11958_v6  ;;  %v2281_v21 = vunpack.c.l.bf16 %v11716_v46  ;;  %v2283_v42 = vunpack.c.h.bf16 %v11716_v46 }
 0x1a6   :  { %v15020_v58 = vld [vmem:[#allocation9 + $0x780] sm:$0xff]  ;;  %9358 = vmatprep.subr.bf16.mxu1 %v11830_v60  ;;  %v2287_v37 = vunpack.c.h.bf16 %v11720_v23  ;;  %v2295_v53 = vunpack.c.h.bf16 %v11728_v26  ;;  %v15890_v23 = vcombine.high %v15010_v14, %v15012_v18 }
 0x1a7   :  { %v15022_v52 = vld [vmem:[#allocation9 + $0x7a0] sm:$0xff] }
 0x1a8   :  { %v15024_v5 = vld [vmem:[#allocation9 + $0x380] sm:$0xff]  ;;  %9400 = vmatpush1.bf16.msra.mxu0 %v11957_v50 }
 0x1a9   :  { %v15034_v56 = vld [vmem:[#allocation9 + $0x3a0] sm:$0xff] }
 0x1aa   :  { %v15036_v45 = vld [vmem:[#allocation9 + $0x740] sm:$0xff] }
 0x1ab   :  { %v15038_v20 = vld [vmem:[#allocation9 + $0x760] sm:$0xff] }
 0x1ac   :  { %v15049_v40 = vld [vmem:[#allocation9 + $0x340] sm:$0xff] }
 0x1ad   :  { %v15051_v35 = vld [vmem:[#allocation9 + $0x360] sm:$0xff] }
 0x1ae   :  { %v11680_v57 = vld [vmem:[%s15876_s0 + $0x2e8] ss:$112 sps:$4 sm:$0xff]  }
 0x1af   :  { %v15064_v27 = vld [vmem:[#allocation9 + $0x700] sm:$0xff]  ;;  %v2163_v39 = vunpack.c.l.bf16 %v11680_v57  ;;  %v2165_v55 = vunpack.c.h.bf16 %v11680_v57  ;;  %v2195_v57 = vunpack.c.l.bf16 %v11696_v32 }
 0x1b0   :  { %v15066_v1 = vld [vmem:[#allocation9 + $0x720] sm:$0xff] }
 0x1b1   :  { %v11700_v34 = vld [vmem:[%s15876_s0 + $0x58] ss:$112 sps:$4 sm:$0xff]   ;;  %v2211_v15 = vadd.f32 %v2195_v57, %v2163_v39  ;;  %v2213_v4 = vadd.f32 %v2197_v11, %v2165_v55  ;;  %v15884_v55 = vcombine.low %v14969_v30, %v14971_v31  ;;  %v2291_v39 = vunpack.c.h.bf16 %v11724_v25 }
 0x1b2   :  { %v13217_v41 = vld [vmem:[#allocation2 + $0x28] sm:$0xff]   ;;  %v2232_v8 = vunpack.c.l.bf16 %v11700_v34  ;;  %v2234_v9 = vunpack.c.h.bf16 %v11700_v34  ;;  %v2289_v34 = vunpack.c.l.bf16 %v11724_v25  ;;  %v2293_v11 = vunpack.c.l.bf16 %v11728_v26 }
 0x1b3   :  { %v11704_v28 = vld [vmem:[%s15876_s0 + $0x138] ss:$112 sps:$4 sm:$0xff]   ;;  %13193 = vmatmul.mubr.msk.bf16.gmra.mxu0 %vm2874_vm9, %v13217_v41  ;;  %9359 = vmatpush1.bf16.msra.mxu1 %v15884_v55 }
 0x1b4   :  { %v11708_v2 = vld [vmem:[%s15876_s0 + $0x218] ss:$112 sps:$4 sm:$0xff]   ;;  %v2236_v13 = vunpack.c.l.bf16 %v11704_v28  ;;  %v2238_v17 = vunpack.c.h.bf16 %v11704_v28  ;;  %v2248_v62 = vadd.f32 %v2232_v8, %v2199_v10  ;;  %v2250_v36 = vadd.f32 %v2234_v9, %v2201_v7  ;;  %9360 = vmatprep.subr.bf16.mxu1 %v15886_v59 }
 0x1b5   :  { %v11712_v44 = vld [vmem:[%s15876_s0 + $0x2f8] ss:$112 sps:$4 sm:$0xff]   ;;  %v2240_v48 = vunpack.c.l.bf16 %v11708_v2  ;;  %v2242_v16 = vunpack.c.h.bf16 %v11708_v2  ;;  %v15885_v10 = vcombine.high %v14979_v29, %v14981_v54  ;;  %v15887_v9 = vcombine.low %v14979_v29, %v14981_v54 }
 0x1b6   :  { %v2244_v22 = vunpack.c.l.bf16 %v11712_v44  ;;  %v2246_v41 = vunpack.c.h.bf16 %v11712_v44  ;;  %v2252_v24 = vadd.f32 %v2236_v13, %v2203_v33  ;;  %v2254_v28 = vadd.f32 %v2238_v17, %v2205_v38  ;;  %v11732_v60 = vld [vmem:[%s15876_s0 + $0x68] ss:$112 sps:$4 sm:$0xff]  }
 0x1b7   :  { %v2256_v0 = vadd.f32 %v2240_v48, %v2207_v3  ;;  %v2258_v32 = vadd.f32 %v2242_v16, %v2209_v63  ;;  %v11736_v57 = vld [vmem:[%s15876_s0 + $0x148] ss:$112 sps:$4 sm:$0xff]   ;;  %9401 = vmatprep.subr.bf16.mxu0 %v15885_v10  ;;  %v2297_v43 = vadd.f32 %v2281_v21, %v2248_v62  ;;  %v2299_v50 = vadd.f32 %v2283_v42, %v2250_v36  ;;  %v15186_v3 = vld [vmem:[%s15876_s0 + $0x4c] sm:$0x7] }
 0x1b8   :  { %v2260_v6 = vadd.f32 %v2244_v22, %v2211_v15  ;;  %v2262_v47 = vadd.f32 %v2246_v41, %v2213_v4  ;;  %v2301_v30 = vadd.f32 %v2285_v12, %v2252_v24  ;;  %v11740_v31 = vld [vmem:[%s15876_s0 + $0x228] ss:$112 sps:$4 sm:$0xff]   ;;  %v2330_v33 = vunpack.c.l.bf16 %v11732_v60  ;;  %9402 = vmatpush1.bf16.msra.mxu0 %v15887_v9 }
 0x1b9   :  { %v11744_v7 = vld [vmem:[%s15876_s0 + $0x308] ss:$112 sps:$4 sm:$0xff]   ;;  %v2303_v2 = vadd.f32 %v2287_v37, %v2254_v28  ;;  %v2305_v44 = vadd.f32 %v2289_v34, %v2256_v0  ;;  %v2307_v8 = vadd.f32 %v2291_v39, %v2258_v32  ;;  %v2332_v15 = vunpack.c.h.bf16 %v11732_v60 }
 0x1ba   :  { %v2309_v38 = vadd.f32 %v2293_v11, %v2260_v6  ;;  %v2311_v63 = vadd.f32 %v2295_v53, %v2262_v47  ;;  %v2334_v46 = vunpack.c.l.bf16 %v11736_v57  ;;  %v2336_v4 = vunpack.c.h.bf16 %v11736_v57 }
 0x1bb   :  { %v15888_v13 = vcombine.low %v14983_v19, %v14993_v51  ;;  %v2338_v17 = vunpack.c.l.bf16 %v11740_v31  ;;  %v2340_v48 = vunpack.c.h.bf16 %v11740_v31  ;;  %v2342_v16 = vunpack.c.l.bf16 %v11744_v7 }
 0x1bc   :  { %v2344_v22 = vunpack.c.h.bf16 %v11744_v7  ;;  %v15889_v41 = vcombine.high %v14995_v61, %v15008_v49  ;;  %v15200_v62 = vadd.f32 %v2330_v33, %v2297_v43  ;;  %v15202_v29 = vadd.f32 %v2332_v15, %v2299_v50 }
 0x1bd   :  { %9361 = vmatpush1.bf16.msra.mxu1 %v15888_v13  ;;  %v15204_v54 = vadd.f32 %v2334_v46, %v2301_v30  ;;  %v2152_v19 = vunpack.c.l.bf16 %v15186_v3  ;;  %v15207_v51 = vadd.f32 %v2336_v4, %v2303_v2  ;;  %v15209_v36 = vadd.f32 %v2338_v17, %v2305_v44  ;;  %v11711_v3 = vld [vmem:[%s15876_s0 + $0x28c] sm:$0x7] }
 0x1be   :  { %9403 = vmatprep.subr.bf16.mxu0 %v15889_v41  ;;  %9362 = vmatprep.subr.bf16.mxu1 %v15890_v23  ;;  %v15211_v24 = vadd.f32 %v2340_v48, %v2307_v8  ;;  %v15213_v25 = vadd.f32 %v2342_v16, %v2309_v38  ;;  %v15215_v26 = vadd.f32 %v2344_v22, %v2311_v63  ;;  %v2370_v21 = vrot.slane %v15200_v62, 1 }
 0x1bf   :  { %v2371_v28 = vrot.slane %v15202_v29, 1  ;;  %v2372_v0 = vrot.slane %v15204_v54, 1  ;;  %v15891_v32 = vcombine.low %v14995_v61, %v15008_v49  ;;  %v15892_v6 = vcombine.low %v15010_v14, %v15012_v18 }
 0x1c0   :  { %v2373_v60 = vrot.slane %v15207_v51, 1  ;;  %v2374_v47 = vrot.slane %v15209_v36, 1  ;;  %v2375_v42 = vrot.slane %v15211_v24, 1  ;;  %v2376_v12 = vrot.slane %v15213_v25, 1 }
 0x1c1   :  { %9404 = vmatpush2.bf16.msra.mxu0 %v15891_v32  ;;  %9363 = vmatpush2.bf16.msra.mxu1 %v15892_v6  ;;  %v15893_v37 = vcombine.high %v15020_v58, %v15022_v52  ;;  %v15894_v61 = vcombine.high %v15024_v5, %v15034_v56  ;;  %v2377_v49 = vrot.slane %v15215_v26, 1  ;;  %v15238_v14 = vadd.f32 %v2370_v21, %v15200_v62 }
 0x1c2   :  { %v15241_v18 = vadd.f32 %v2371_v28, %v15202_v29  ;;  %v15244_v55 = vadd.f32 %v2372_v0, %v15204_v54  ;;  %v15247_v34 = vadd.f32 %v2373_v60, %v15207_v51  ;;  %v15250_v39 = vadd.f32 %v2374_v47, %v15209_v36 }
 0x1c3   :  { %9405 = vmatprep.subr.bf16.mxu0 %v15893_v37  ;;  %9364 = vmatprep.subr.bf16.mxu1 %v15894_v61  ;;  %v15253_v11 = vadd.f32 %v2375_v42, %v15211_v24  ;;  %v15256_v53 = vadd.f32 %v2376_v12, %v15213_v25  ;;  %v15259_v57 = vadd.f32 %v2377_v49, %v15215_v26  ;;  %v2394_v10 = vrot.slane %v15200_v62, 2 }
 0x1c4   :  { %v2395_v59 = vrot.slane %v15202_v29, 2  ;;  %v2396_v43 = vrot.slane %v15204_v54, 2  ;;  %v15895_v50 = vcombine.low %v15020_v58, %v15022_v52  ;;  %v15896_v30 = vcombine.low %v15024_v5, %v15034_v56 }
 0x1c5   :  { %v2397_v31 = vrot.slane %v15207_v51, 2  ;;  %v2398_v7 = vrot.slane %v15209_v36, 2  ;;  %v2399_v33 = vrot.slane %v15211_v24, 2  ;;  %v2400_v2 = vrot.slane %v15213_v25, 2 }
 0x1c6   :  { %9406 = vmatpush2.bf16.msra.mxu0 %v15895_v50  ;;  %9365 = vmatpush2.bf16.msra.mxu1 %v15896_v30  ;;  %v15897_v44 = vcombine.high %v15036_v45, %v15038_v20  ;;  %v15898_v58 = vcombine.high %v15049_v40, %v15051_v35  ;;  %v2401_v52 = vrot.slane %v15215_v26, 2  ;;  %v2410_v5 = vadd.f32 %v2394_v10, %v15238_v14 }
 0x1c7   :  { %v2411_v56 = vadd.f32 %v2395_v59, %v15241_v18  ;;  %v2412_v8 = vadd.f32 %v2396_v43, %v15244_v55  ;;  %v2413_v38 = vadd.f32 %v2397_v31, %v15247_v34  ;;  %v2414_v63 = vadd.f32 %v2398_v7, %v15250_v39 }
 0x1c8   :  { %9407 = vmatprep.subr.bf16.mxu0 %v15897_v44  ;;  %9366 = vmatprep.subr.bf16.mxu1 %v15898_v58  ;;  %v2415_v15 = vadd.f32 %v2399_v33, %v15253_v11  ;;  %v2416_v46 = vadd.f32 %v2400_v2, %v15256_v53  ;;  %v2417_v4 = vadd.f32 %v2401_v52, %v15259_v57  ;;  %v2418_v9 = vrot.slane %v15200_v62, 3 }
 0x1c9   :  { %v2419_v13 = vrot.slane %v15202_v29, 3  ;;  %v2420_v17 = vrot.slane %v15204_v54, 3  ;;  %v15899_v48 = vcombine.low %v15036_v45, %v15038_v20  ;;  %v15900_v16 = vcombine.low %v15049_v40, %v15051_v35 }
 0x1ca   :  { %v2421_v22 = vrot.slane %v15207_v51, 3  ;;  %v2422_v41 = vrot.slane %v15209_v36, 3  ;;  %v2423_v23 = vrot.slane %v15211_v24, 3  ;;  %v2424_v21 = vrot.slane %v15213_v25, 3 }
 0x1cb   :  { %9408 = vmatpush2.bf16.msra.mxu0 %v15899_v48  ;;  %9367 = vmatpush2.bf16.msra.mxu1 %v15900_v16  ;;  %v15901_v28 = vcombine.high %v15064_v27, %v15066_v1  ;;  %v2425_v0 = vrot.slane %v15215_v26, 3  ;;  %v2434_v45 = vadd.f32 %v2418_v9, %v2410_v5  ;;  %v2435_v20 = vadd.f32 %v2419_v13, %v2411_v56 }
 0x1cc   :  { %v2436_v32 = vadd.f32 %v2420_v17, %v2412_v8  ;;  %v2437_v6 = vadd.f32 %v2421_v22, %v2413_v38  ;;  %v2438_v40 = vadd.f32 %v2422_v41, %v2414_v63  ;;  %v2439_v35 = vadd.f32 %v2423_v23, %v2415_v15 }
 0x1cd   :  { %9409 = vmatprep.subr.bf16.mxu0 %v15901_v28  ;;  %v2440_v60 = vadd.f32 %v2424_v21, %v2416_v46  ;;  %v2441_v47 = vadd.f32 %v2425_v0, %v2417_v4  ;;  %v2442_v42 = vrot.slane %v15200_v62, 4  ;;  %v2443_v12 = vrot.slane %v15202_v29, 4  ;;  %v15317_v29 = vld [vmem:[#allocation9 + $0x300] sm:$0xff] }
 0x1ce   :  { %v2444_v37 = vrot.slane %v15204_v54, 4  ;;  %v15902_v61 = vcombine.low %v15064_v27, %v15066_v1  ;;  %v2445_v49 = vrot.slane %v15207_v51, 4  ;;  %v2446_v10 = vrot.slane %v15209_v36, 4  ;;  %v15319_v54 = vld [vmem:[#allocation9 + $0x320] sm:$0xff] }
 0x1cf   :  { %v2447_v59 = vrot.slane %v15211_v24, 4  ;;  %v2448_v43 = vrot.slane %v15213_v25, 4  ;;  %v2449_v50 = vrot.slane %v15215_v26, 4  ;;  %v2458_v30 = vadd.f32 %v2442_v42, %v2434_v45  ;;  %v15326_v45 = vld [vmem:[%s15876_s0 + $0xbc] sm:$0x7] }
 0x1d0   :  { %9410 = vmatpush2.bf16.msra.mxu0 %v15902_v61  ;;  %v2459_v62 = vadd.f32 %v2443_v12, %v2435_v20  ;;  %v2460_v31 = vadd.f32 %v2444_v37, %v2436_v32  ;;  %v2461_v7 = vadd.f32 %v2445_v49, %v2437_v6  ;;  %v2462_v27 = vadd.f32 %v2446_v10, %v2438_v40  ;;  %v11675_v37 = vld [vmem:[%s15876_s0 + $0x19c] sm:$0x7] }
 0x1d1   :  { %v2463_v1 = vadd.f32 %v2447_v59, %v2439_v35  ;;  %v2464_v33 = vadd.f32 %v2448_v43, %v2440_v60  ;;  %v2465_v51 = vadd.f32 %v2449_v50, %v2441_v47  ;;  %v2466_v2 = vmul.f32 0.04, %v2458_v30  ;;  %v11673_v35 = vld [vmem:[%s15876_s0 + $0x12c] sm:$0x7] }
 0x1d2   :  { %v2467_v36 = vmul.f32 0.04, %v2459_v62  ;;  %v2468_v44 = vmul.f32 0.04, %v2460_v31  ;;  %v2469_v24 = vmul.f32 0.04, %v2461_v7  ;;  %v11918_v26 = vcombine.high %v15317_v29, %v15319_v54 }
 0x1d3   :  { %v2470_v58 = vmul.f32 0.04, %v2462_v27  ;;  %v2471_v25 = vmul.f32 0.04, %v2463_v1  ;;  %v2472_v52 = vmul.f32 0.04, %v2464_v33  ;;  %v12982_v56 = vpack.c.bf16 %v2466_v2, %v2466_v2 }
 0x1d4   :  { %v2473_v5 = vmul.f32 0.04, %v2465_v51  ;;  %v12983_v8 = vpack.c.bf16 %v2467_v36, %v2467_v36  ;;  %v12984_v38 = vpack.c.bf16 %v2468_v44, %v2468_v44  ;;  %v12985_v63 = vpack.c.bf16 %v2469_v24, %v2469_v24  ;;  %9368 = vmatprep.subr.bf16.mxu1 %v11918_v26  ;;  %v11677_v43 = vld [vmem:[%s15876_s0 + $0x20c] sm:$0x7]  ;;  %v11679_v7 = vld [vmem:[%s15876_s0 + $0x27c] sm:$0x7] }
 0x1d5   :  { %v12986_v15 = vpack.c.bf16 %v2470_v58, %v2470_v58  ;;  %v12987_v46 = vpack.c.bf16 %v2471_v25, %v2471_v25  ;;  %v12988_v4 = vpack.c.bf16 %v2472_v52, %v2472_v52  ;;  %v2506_v13 = vunpack.c.l.b16 %v12982_v56  ;;  %v11681_v27 = vld [vmem:[%s15876_s0 + $0x2ec] sm:$0x7]  ;;  %v11683_v51 = vld [vmem:[%s15876_s0 + $0x35c] sm:$0x7]  ;;  %v11685_v44 = vld [vmem:[%s15876_s0 + $0x54] sm:$0x7] }
 0x1d6   :  { %v12989_v9 = vpack.c.bf16 %v2473_v5, %v2473_v5  ;;  %v2507_v17 = vunpack.c.l.b16 %v12983_v8  ;;  %v2508_v48 = vunpack.c.l.b16 %v12984_v38  ;;  %v2509_v16 = vunpack.c.l.b16 %v12985_v63  ;;  %v11687_v52 = vld [vmem:[%s15876_s0 + $0xc4] sm:$0x7]  ;;  %v11689_v5 = vld [vmem:[%s15876_s0 + $0x134] sm:$0x7] }
 0x1d7   :  { %v2510_v22 = vunpack.c.l.b16 %v12986_v15  ;;  %v2511_v41 = vunpack.c.l.b16 %v12987_v46  ;;  %v2512_v23 = vunpack.c.l.b16 %v12988_v4  ;;  %v2532_v0 = vrot.slane %v2506_v13, 3  ;;  %v11691_v15 = vld [vmem:[%s15876_s0 + $0x1a4] sm:$0x7]  ;;  %v11693_v46 = vld [vmem:[%s15876_s0 + $0x214] sm:$0x7] }
 0x1d8   :  { %v2513_v21 = vunpack.c.l.b16 %v12989_v9  ;;  %v2514_v28 = vrot.slane %v2507_v17, 7  ;;  %v2516_v20 = vrot.slane %v2508_v48, 6  ;;  %v2518_v32 = vrot.slane %v2509_v16, 5  ;;  %v11695_v4 = vld [vmem:[%s15876_s0 + $0x284] sm:$0x7] }
 0x1d9   :  { %v2520_v6 = vrot.slane %v2510_v22, 4  ;;  %v2522_v40 = vrot.slane %v2511_v41, 3  ;;  %v2524_v47 = vrot.slane %v2512_v23, 2  ;;  %v2533_v12 = vrot.slane %v2507_v17, 2 }
 0x1da   :  { %v2515_v60 = vsel %vm483_vm1, %v2514_v28, %v2506_v13  ;;  %v2526_v42 = vrot.slane %v2513_v21, 1  ;;  %v2535_v49 = vrot.slane %v2508_v48, 1  ;;  %v2538_v10 = vrot.slane %v2510_v22, 7  ;;  %v11697_v48 = vld [vmem:[%s15876_s0 + $0x2f4] sm:$0x7] }
 0x1db   :  { %v2517_v61 = vsel %vm486_vm2, %v2516_v20, %v2515_v60  ;;  %v2540_v59 = vrot.slane %v2511_v41, 6  ;;  %v2534_v30 = vsel %vm483_vm1, %v2533_v12, %v2532_v0  ;;  %v2542_v62 = vrot.slane %v2512_v23, 5  ;;  %v11703_v12 = vld [vmem:[%s15876_s0 + $0xcc] sm:$0x7] }
 0x1dc   :  { %v2519_v50 = vsel %vm489_vm3, %v2518_v32, %v2517_v61  ;;  %v2544_v31 = vrot.slane %v2513_v21, 4  ;;  %v2536_v33 = vsel %vm486_vm2, %v2535_v49, %v2534_v30  ;;  %v2154_v2 = vunpack.c.l.bf16 %v15326_v45  ;;  %v11709_v61 = vld [vmem:[%s15876_s0 + $0x21c] sm:$0x7] }
 0x1dd   :  { %v2521_v1 = vsel %vm492_vm4, %v2520_v6, %v2519_v50  ;;  %v2156_v36 = vunpack.c.l.bf16 %v11673_v35  ;;  %v2537_v58 = vsel %vm489_vm3, %v2509_v16, %v2536_v33  ;;  %v2158_v25 = vunpack.c.l.bf16 %v11675_v37  ;;  %v11699_v16 = vld [vmem:[%s15876_s0 + $0x364] sm:$0x7]  ;;  %v11701_v6 = vld [vmem:[%s15876_s0 + $0x5c] sm:$0x7]  ;;  %v11707_v37 = vld [vmem:[%s15876_s0 + $0x1ac] sm:$0x7] }
 0x1de   :  { %v2523_v24 = vsel %vm495_vm5, %v2522_v40, %v2521_v1  ;;  %v2160_v26 = vunpack.c.l.bf16 %v11677_v43  ;;  %v2539_v8 = vsel %vm492_vm4, %v2538_v10, %v2537_v58  ;;  %v2162_v38 = vunpack.c.l.bf16 %v11679_v7  ;;  %v11705_v40 = vld [vmem:[%s15876_s0 + $0x13c] sm:$0x7]  ;;  %v11715_v50 = vld [vmem:[%s15876_s0 + $0x36c] sm:$0x7] }
 0x1df   :  { %v2525_v56 = vsel %vm498_vm6, %v2524_v47, %v2523_v24  ;;  %v2164_v63 = vunpack.c.l.bf16 %v11681_v27  ;;  %v2541_v13 = vsel %vm495_vm5, %v2540_v59, %v2539_v8  ;;  %v2166_v17 = vunpack.c.l.bf16 %v11683_v51 }
 0x1e0   :  { %v2527_v9 = vsel %vm501_vm7, %v2526_v42, %v2525_v56  ;;  %v2184_v22 = vunpack.c.l.bf16 %v11685_v44  ;;  %v2543_v23 = vsel %vm498_vm6, %v2542_v62, %v2541_v13  ;;  %v2186_v21 = vunpack.c.l.bf16 %v11687_v52  ;;  %v11723_v52 = vld [vmem:[%s15876_s0 + $0x1b4] sm:$0x7] }
 0x1e1   :  { %v2528_v41 = vpack.c.b16 %v2527_v9, %v2527_v9  ;;  %v2188_v28 = vunpack.c.l.bf16 %v11689_v5  ;;  %v2545_v0 = vsel %vm501_vm7, %v2544_v31, %v2543_v23  ;;  %v2190_v45 = vunpack.c.l.bf16 %v11691_v15  ;;  %v11725_v5 = vld [vmem:[%s15876_s0 + $0x224] sm:$0x7]  ;;  %v11727_v15 = vld [vmem:[%s15876_s0 + $0x294] sm:$0x7] }
 0x1e2   :  { %v2192_v20 = vunpack.c.l.bf16 %v11693_v46  ;;  %v2194_v32 = vunpack.c.l.bf16 %v11695_v4  ;;  %v2546_v35 = vpack.c.b16 %v2545_v0, %v2545_v0  ;;  %v2196_v60 = vunpack.c.l.bf16 %v11697_v48  ;;  %v11729_v46 = vld [vmem:[%s15876_s0 + $0x304] sm:$0x7]  ;;  %v11731_v4 = vld [vmem:[%s15876_s0 + $0x374] sm:$0x7]  ;;  %v11735_v0 = vld [vmem:[%s15876_s0 + $0xdc] sm:$0x7] }
 0x1e3   :  { %2531 = vst.msk [vmem:[#allocation2 + $0x30] sm:$0xf] %vm505_vm8, %v2528_v41  ;;  %v2198_v47 = vunpack.c.l.bf16 %v11699_v16  ;;  %v2200_v42 = vadd.f32 %v2184_v22, %v2152_v19  ;;  %v2202_v49 = vadd.f32 %v2186_v21, %v2154_v2  ;;  %v2204_v10 = vadd.f32 %v2188_v28, %v2156_v36  ;;  %v11713_v19 = vld [vmem:[%s15876_s0 + $0x2fc] sm:$0x7]  ;;  %v11717_v2 = vld [vmem:[%s15876_s0 + $0x64] sm:$0x7] }
 0x1e4   :  { %v2206_v59 = vadd.f32 %v2190_v45, %v2158_v25  ;;  %v2208_v43 = vadd.f32 %v2192_v20, %v2160_v26  ;;  %2549 = vst.msk [vmem:[#allocation2 + $0x34] sm:$0xf] %vm505_vm8, %v2546_v35  ;;  %v2210_v30 = vadd.f32 %v2194_v32, %v2162_v38  ;;  %v2212_v62 = vadd.f32 %v2196_v60, %v2164_v63  ;;  %v11721_v36 = vld [vmem:[%s15876_s0 + $0x144] sm:$0x7]  ;;  %v11719_v26 = vld [vmem:[%s15876_s0 + $0xd4] sm:$0x7] }
 0x1e5   :  { %v2214_v31 = vadd.f32 %v2198_v47, %v2166_v17  ;;  %v2233_v7 = vunpack.c.l.bf16 %v11701_v6  ;;  %v2235_v27 = vunpack.c.l.bf16 %v11703_v12  ;;  %v2237_v1 = vunpack.c.l.bf16 %v11705_v40  ;;  %v11733_v16 = vld [vmem:[%s15876_s0 + $0x6c] sm:$0x7]  ;;  %v11739_v45 = vld [vmem:[%s15876_s0 + $0x1bc] sm:$0x7] }
 0x1e6   :  { %v2239_v33 = vunpack.c.l.bf16 %v11707_v37  ;;  %v2241_v51 = vunpack.c.l.bf16 %v11709_v61  ;;  %v2243_v44 = vunpack.c.l.bf16 %v11711_v3  ;;  %v2245_v24 = vunpack.c.l.bf16 %v11713_v19  ;;  %v11737_v22 = vld [vmem:[%s15876_s0 + $0x14c] sm:$0x7]  ;;  %v11743_v60 = vld [vmem:[%s15876_s0 + $0x29c] sm:$0x7] }
 0x1e7   :  { %v2247_v58 = vunpack.c.l.bf16 %v11715_v50  ;;  %v2249_v25 = vadd.f32 %v2233_v7, %v2200_v42  ;;  %v2251_v56 = vadd.f32 %v2235_v27, %v2202_v49  ;;  %v2253_v8 = vadd.f32 %v2237_v1, %v2204_v10  ;;  %v11741_v35 = vld [vmem:[%s15876_s0 + $0x22c] sm:$0x7]  ;;  %v11747_v10 = vld [vmem:[%s15876_s0 + $0x37c] sm:$0x7] }
 0x1e8   :  { %v2255_v38 = vadd.f32 %v2239_v33, %v2206_v59  ;;  %v2257_v63 = vadd.f32 %v2241_v51, %v2208_v43  ;;  %v2259_v9 = vadd.f32 %v2243_v44, %v2210_v30  ;;  %v2261_v13 = vadd.f32 %v2245_v24, %v2212_v62  ;;  %v11745_v47 = vld [vmem:[%s15876_s0 + $0x30c] sm:$0x7]  ;;  %s13448_s0 = smov [#allocation15]  }
 0x1e9   :  { %v2263_v17 = vadd.f32 %v2247_v58, %v2214_v31  ;;  %v2282_v48 = vunpack.c.l.bf16 %v11717_v2  ;;  %v2284_v41 = vunpack.c.l.bf16 %v11719_v26  ;;  %v2286_v23 = vunpack.c.l.bf16 %v11721_v36  ;;  %s11360_s22 = sshll.u32 %s13448_s0, 4  ;;  %s11361_s22 = int_to_ptr.vmem [resolvable:$true] %s11360_s22 }
 0x1ea   :  { %v2288_v21 = vunpack.c.l.bf16 %v11723_v52  ;;  %v2290_v28 = vunpack.c.l.bf16 %v11725_v5  ;;  %v2292_v20 = vunpack.c.l.bf16 %v11727_v15  ;;  %v2294_v32 = vunpack.c.l.bf16 %v11729_v46  ;;  %s13408_s23 = scalar_lea.vmem %s11361_s22, 128  ;;  %p13413_p3 = scmp.lt.s32.totalorder %s11361_s22, %s11361_s22 }
 0x1eb   :  { %v2296_v6 = vunpack.c.l.bf16 %v11731_v4  ;;  %v2298_v40 = vadd.f32 %v2282_v48, %v2249_v25  ;;  %v13218_v42 = vld [vmem:[#allocation2 + $0x30] sm:$0xff]   ;;  %v2300_v12 = vadd.f32 %v2284_v41, %v2251_v56  ;;  %v2302_v37 = vadd.f32 %v2286_v23, %v2253_v8  ;;  %p13409_p2 = scmp.ne.s32.totalorder %s11361_s22, %s13408_s23  ;;  %p13414_p4 = scmp.lt.s32.totalorder %s13408_s23, %s13408_s23 }
 0x1ec   :  { %v2304_v61 = vadd.f32 %v2288_v21, %v2255_v38  ;;  %v2306_v49 = vadd.f32 %v2290_v28, %v2257_v63  ;;  %v2308_v59 = vadd.f32 %v2292_v20, %v2259_v9  ;;  %v2310_v43 = vadd.f32 %v2294_v32, %v2261_v13  ;;  %13196 = vmatprep.mubr.msk.bf16.mxu0 %vm2874_vm9, %v13218_v42 }
 0x1ed   :  { %v2312_v3 = vadd.f32 %v2296_v6, %v2263_v17  ;;  %v2331_v19 = vunpack.c.l.bf16 %v11733_v16  ;;  %v2333_v50 = vunpack.c.l.bf16 %v11735_v0  ;;  %v2335_v30 = vunpack.c.l.bf16 %v11737_v22  ;;  %p13415_p5 = por %p13414_p4, %p13413_p3 }
 0x1ee   :  { %v2337_v62 = vunpack.c.l.bf16 %v11739_v45  ;;  %v2339_v31 = vunpack.c.l.bf16 %v11741_v35  ;;  %v2341_v7 = vunpack.c.l.bf16 %v11743_v60  ;;  %v2343_v27 = vunpack.c.l.bf16 %v11745_v47 }
 0x1ef   :  { %v2345_v1 = vunpack.c.l.bf16 %v11747_v10  ;;  %v15462_v33 = vadd.f32 %v2331_v19, %v2298_v40  ;;  %v15464_v51 = vadd.f32 %v2333_v50, %v2300_v12  ;;  %v15466_v2 = vadd.f32 %v2335_v30, %v2302_v37  ;;  %p13416_p6 = pnand %p13415_p5, %p13409_p2 }
 0x1f0   :  { %v15468_v36 = vadd.f32 %v2337_v62, %v2304_v61  ;;  %v15470_v44 = vadd.f32 %v2339_v31, %v2306_v49  ;;  %v15472_v24 = vadd.f32 %v2341_v7, %v2308_v59  ;;  %v15474_v58 = vadd.f32 %v2343_v27, %v2310_v43 }
 0x1f1   :  { %v15476_v25 = vadd.f32 %v2345_v1, %v2312_v3  ;;  %v2558_v26 = vrot.slane %v15462_v33, 2  ;;  %v2559_v52 = vrot.slane %v15464_v51, 2  ;;  %v2560_v5 = vrot.slane %v15466_v2, 2 }
 0x1f2   :  { %v2561_v56 = vrot.slane %v15468_v36, 2  ;;  %v2562_v8 = vrot.slane %v15470_v44, 2  ;;  %v2563_v38 = vrot.slane %v15472_v24, 2  ;;  %v2564_v63 = vrot.slane %v15474_v58, 2 }
 0x1f3   :  { %v2565_v15 = vrot.slane %v15476_v25, 2  ;;  %v2574_v46 = vadd.f32 %v2558_v26, %v15238_v14  ;;  %v2575_v4 = vadd.f32 %v2559_v52, %v15241_v18  ;;  %v2576_v9 = vadd.f32 %v2560_v5, %v15244_v55 }
 0x1f4   :  { %v2577_v13 = vadd.f32 %v2561_v56, %v15247_v34  ;;  %v2578_v17 = vadd.f32 %v2562_v8, %v15250_v39  ;;  %v2579_v14 = vadd.f32 %v2563_v38, %v15253_v11  ;;  %v2580_v18 = vadd.f32 %v2564_v63, %v15256_v53 }
 0x1f5   :  { %v2581_v55 = vadd.f32 %v2565_v15, %v15259_v57  ;;  %v2582_v48 = vrot.slane %v15462_v33, 3  ;;  %v2583_v34 = vrot.slane %v15464_v51, 3  ;;  %v2584_v16 = vrot.slane %v15466_v2, 3 }
 0x1f6   :  { %v2585_v39 = vrot.slane %v15468_v36, 3  ;;  %v2586_v22 = vrot.slane %v15470_v44, 3  ;;  %v2587_v11 = vrot.slane %v15472_v24, 3  ;;  %v2588_v41 = vrot.slane %v15474_v58, 3 }
 0x1f7   :  { %v2589_v53 = vrot.slane %v15476_v25, 3  ;;  %v2598_v23 = vadd.f32 %v2582_v48, %v2574_v46  ;;  %v2599_v57 = vadd.f32 %v2583_v34, %v2575_v4  ;;  %v2600_v21 = vadd.f32 %v2584_v16, %v2576_v9 }
 0x1f8   :  { %v2601_v28 = vadd.f32 %v2585_v39, %v2577_v13  ;;  %v2602_v0 = vadd.f32 %v2586_v22, %v2578_v17  ;;  %v2603_v45 = vadd.f32 %v2587_v11, %v2579_v14  ;;  %v2604_v20 = vadd.f32 %v2588_v41, %v2580_v18 }
 0x1f9   :  { %v2605_v32 = vadd.f32 %v2589_v53, %v2581_v55  ;;  %v2606_v6 = vrot.slane %v15462_v33, 4  ;;  %v2607_v40 = vrot.slane %v15464_v51, 4  ;;  %v2608_v35 = vrot.slane %v15466_v2, 4 }
 0x1fa   :  { %v2609_v60 = vrot.slane %v15468_v36, 4  ;;  %v2610_v47 = vrot.slane %v15470_v44, 4  ;;  %v2611_v42 = vrot.slane %v15472_v24, 4  ;;  %v2612_v12 = vrot.slane %v15474_v58, 4 }
 0x1fb   :  { %v2613_v37 = vrot.slane %v15476_v25, 4  ;;  %v2622_v61 = vadd.f32 %v2606_v6, %v2598_v23  ;;  %v2623_v49 = vadd.f32 %v2607_v40, %v2599_v57  ;;  %v2624_v10 = vadd.f32 %v2608_v35, %v2600_v21 }
 0x1fc   :  { %v2625_v59 = vadd.f32 %v2609_v60, %v2601_v28  ;;  %v2626_v43 = vadd.f32 %v2610_v47, %v2602_v0  ;;  %v2627_v3 = vadd.f32 %v2611_v42, %v2603_v45  ;;  %v2628_v19 = vadd.f32 %v2612_v12, %v2604_v20 }
 0x1fd   :  { %v2629_v50 = vadd.f32 %v2613_v37, %v2605_v32  ;;  %v2630_v30 = vmul.f32 0.04, %v2622_v61  ;;  %v2631_v62 = vmul.f32 0.04, %v2623_v49  ;;  %v2632_v31 = vmul.f32 0.04, %v2624_v10 }
 0x1fe   :  { %v2633_v7 = vmul.f32 0.04, %v2625_v59  ;;  %v11917_v27 = vcombine.low %v15317_v29, %v15319_v54  ;;  %v2634_v1 = vmul.f32 0.04, %v2626_v43  ;;  %v2635_v46 = vmul.f32 0.04, %v2627_v3 }
 0x1ff   :  { %v2636_v4 = vmul.f32 0.04, %v2628_v19  ;;  %v12990_v9 = vpack.c.bf16 %v2630_v30, %v2630_v30  ;;  %v2637_v13 = vmul.f32 0.04, %v2629_v50  ;;  %v12991_v17 = vpack.c.bf16 %v2631_v62, %v2631_v62 }
 0x200   :  { %v12992_v14 = vpack.c.bf16 %v2632_v31, %v2632_v31  ;;  %v12993_v18 = vpack.c.bf16 %v2633_v7, %v2633_v7  ;;  %9369 = vmatpush2.bf16.msra.mxu1 %v11917_v27  ;;  %v12994_v55 = vpack.c.bf16 %v2634_v1, %v2634_v1  ;;  %v12995_v23 = vpack.c.bf16 %v2635_v46, %v2635_v46 }
 0x201   :  { %v12996_v57 = vpack.c.bf16 %v2636_v4, %v2636_v4  ;;  %v2670_v21 = vunpack.c.l.b16 %v12990_v9  ;;  %v12997_v28 = vpack.c.bf16 %v2637_v13, %v2637_v13  ;;  %v2671_v0 = vunpack.c.l.b16 %v12991_v17 }
 0x202   :  { %v2672_v45 = vunpack.c.l.b16 %v12992_v14  ;;  %v2673_v20 = vunpack.c.l.b16 %v12993_v18  ;;  %v2674_v32 = vunpack.c.l.b16 %v12994_v55  ;;  %v2675_v61 = vunpack.c.l.b16 %v12995_v23 }
 0x203   :  { %v2676_v29 = vunpack.c.l.b16 %v12996_v57  ;;  %v2678_v54 = vrot.slane %v2670_v21, 6  ;;  %v2677_v49 = vunpack.c.l.b16 %v12997_v28  ;;  %v2679_v10 = vrot.slane %v2671_v0, 5 }
 0x204   :  { %v2681_v59 = vrot.slane %v2672_v45, 4  ;;  %v2683_v43 = vrot.slane %v2673_v20, 3  ;;  %v2685_v3 = vrot.slane %v2674_v32, 2  ;;  %v2687_v19 = vrot.slane %v2675_v61, 1 }
 0x205   :  { %v2696_v50 = vrot.slane %v15462_v33, 1  ;;  %v2697_v30 = vrot.slane %v15464_v51, 1  ;;  %v2680_v62 = vsel %vm483_vm1, %v2679_v10, %v2678_v54  ;;  %v2690_v31 = vrot.slane %v2677_v49, 7 }
 0x206   :  { %v2698_v7 = vrot.slane %v15466_v2, 1  ;;  %v2699_v27 = vrot.slane %v15468_v36, 1  ;;  %v2682_v1 = vsel %vm486_vm2, %v2681_v59, %v2680_v62  ;;  %v2700_v46 = vrot.slane %v15470_v44, 1 }
 0x207   :  { %v2701_v4 = vrot.slane %v15472_v24, 1  ;;  %v2702_v9 = vrot.slane %v15474_v58, 1  ;;  %v2684_v13 = vsel %vm489_vm3, %v2683_v43, %v2682_v1  ;;  %v2703_v17 = vrot.slane %v15476_v25, 1 }
 0x208   :  { %v2712_v14 = vadd.f32 %v2696_v50, %v15462_v33  ;;  %v2713_v18 = vadd.f32 %v2697_v30, %v15464_v51  ;;  %v2686_v55 = vsel %vm492_vm4, %v2685_v3, %v2684_v13  ;;  %v2714_v23 = vadd.f32 %v2698_v7, %v15466_v2  ;;  %v3324_v50 = vld [vmem:[#allocation9 + $0x6e0] sm:$0xff]  ;;  %v15626_v30 = vpop.f32.mrf.mxu0 }
 0x209   :  { %v2715_v57 = vadd.f32 %v2699_v27, %v15468_v36  ;;  %v2716_v21 = vadd.f32 %v2700_v46, %v15470_v44  ;;  %v2688_v28 = vsel %vm495_vm5, %v2687_v19, %v2686_v55  ;;  %v2717_v0 = vadd.f32 %v2701_v4, %v15472_v24  ;;  %v3192_v55 = vld [vmem:[#allocation9 + $0x2c0] sm:$0xff] }
 0x20a   :  { %v2718_v45 = vadd.f32 %v2702_v9, %v15474_v58  ;;  %v2719_v20 = vadd.f32 %v2703_v17, %v15476_v25  ;;  %v2689_v32 = vsel %vm498_vm6, %v2676_v29, %v2688_v28  ;;  %v2720_v61 = vadd.f32 %v2712_v14, %v2558_v26 }
 0x20b   :  { %v2721_v54 = vadd.f32 %v2713_v18, %v2559_v52  ;;  %v2722_v49 = vadd.f32 %v2714_v23, %v2560_v5  ;;  %v2691_v10 = vsel %vm501_vm7, %v2690_v31, %v2689_v32  ;;  %v2723_v59 = vadd.f32 %v2715_v57, %v2561_v56  ;;  %v3196_v23 = vld [vmem:[#allocation9 + $0x2e0] sm:$0xff] }
 0x20c   :  { %v2724_v43 = vadd.f32 %v2716_v21, %v2562_v8  ;;  %v2725_v29 = vadd.f32 %v2717_v0, %v2563_v38  ;;  %v2692_v3 = vpack.c.b16 %v2691_v10, %v2691_v10  ;;  %v2726_v26 = vadd.f32 %v2718_v45, %v2564_v63  ;;  %v3312_v45 = vld [vmem:[#allocation9 + $0x680] sm:$0xff] }
 0x20d   :  { %v2727_v52 = vadd.f32 %v2719_v20, %v2565_v15  ;;  %v2728_v5 = vadd.f32 %v2720_v61, %v2582_v48  ;;  %v2729_v19 = vadd.f32 %v2721_v54, %v2583_v34  ;;  %v2730_v56 = vadd.f32 %v2722_v49, %v2584_v16  ;;  %v3320_v16 = vld [vmem:[#allocation9 + $0x6c0] sm:$0xff] }
 0x20e   :  { %v2731_v8 = vadd.f32 %v2723_v59, %v2585_v39  ;;  %v2732_v38 = vadd.f32 %v2724_v43, %v2586_v22  ;;  %2695 = vst.msk [vmem:[#allocation2 + $0x38] sm:$0xf] %vm505_vm8, %v2692_v3  ;;  %v2733_v63 = vadd.f32 %v2725_v29, %v2587_v11  ;;  %v2734_v15 = vadd.f32 %v2726_v26, %v2588_v41  ;;  %v3316_v20 = vld [vmem:[#allocation9 + $0x6a0] sm:$0xff] }
 0x20f   :  { %v2735_v48 = vadd.f32 %v2727_v52, %v2589_v53  ;;  %v2736_v34 = vadd.f32 %v2728_v5, %v2606_v6  ;;  %v2737_v39 = vadd.f32 %v2729_v19, %v2607_v40  ;;  %v2738_v22 = vadd.f32 %v2730_v56, %v2608_v35  ;;  %v3184_v10 = vld [vmem:[#allocation9 + $0x280] sm:$0xff] }
 0x210   :  { %v2739_v11 = vadd.f32 %v2731_v8, %v2609_v60  ;;  %v2740_v41 = vadd.f32 %v2732_v38, %v2610_v47  ;;  %v2741_v33 = vadd.f32 %v2733_v63, %v2611_v42  ;;  %v2742_v53 = vadd.f32 %v2734_v15, %v2612_v12  ;;  %v15634_v42 = vpop.f32.mrf.mxu0  ;;  %v3188_v59 = vld [vmem:[#allocation9 + $0x2a0] sm:$0xff] }
 0x211   :  { %v2743_v51 = vadd.f32 %v2735_v48, %v2613_v37  ;;  %v2744_v6 = vmul.f32 0.04, %v2736_v34  ;;  %v2745_v2 = vmul.f32 0.04, %v2737_v39  ;;  %v2746_v40 = vmul.f32 0.04, %v2738_v22 }
 0x212   :  { %v2747_v35 = vmul.f32 0.04, %v2739_v11  ;;  %v12037_v36 = vcombine.low %v3320_v16, %v3324_v50  ;;  %v2748_v60 = vmul.f32 0.04, %v2740_v41  ;;  %v2749_v62 = vmul.f32 0.04, %v2741_v33  ;;  %v13187_v32 = vpop.f32.mrf.mxu0 }
 0x213   :  { %v2750_v44 = vmul.f32 0.04, %v2742_v53  ;;  %v12998_v47 = vpack.c.bf16 %v2744_v6, %v2744_v6  ;;  %v2751_v31 = vmul.f32 0.04, %v2743_v51  ;;  %v12999_v7 = vpack.c.bf16 %v2745_v2, %v2745_v2  ;;  %v3304_v52 = vld [vmem:[#allocation9 + $0x640] sm:$0xff] }
 0x214   :  { %v13000_v27 = vpack.c.bf16 %v2746_v40, %v2746_v40  ;;  %v13001_v24 = vpack.c.bf16 %v2747_v35, %v2747_v35  ;;  %v13002_v58 = vpack.c.bf16 %v2748_v60, %v2748_v60  ;;  %v13003_v12 = vpack.c.bf16 %v2749_v62, %v2749_v62  ;;  %v3308_v5 = vld [vmem:[#allocation9 + $0x660] sm:$0xff]  ;;  %v15642_v41 = vld [vmem:[#allocation7] ss:$0 sm:$0xff] }
 0x215   :  { %v13004_v1 = vpack.c.bf16 %v2750_v44, %v2750_v44  ;;  %v2784_v25 = vunpack.c.l.b16 %v12998_v47  ;;  %v13005_v37 = vpack.c.bf16 %v2751_v31, %v2751_v31  ;;  %v2785_v46 = vunpack.c.l.b16 %v12999_v7  ;;  %v3176_v63 = vld [vmem:[#allocation9 + $0x240] sm:$0xff] }
 0x216   :  { %v2786_v4 = vunpack.c.l.b16 %v13000_v27  ;;  %v2787_v9 = vunpack.c.l.b16 %v13001_v24  ;;  %v2788_v13 = vunpack.c.l.b16 %v13002_v58  ;;  %v2789_v17 = vunpack.c.l.b16 %v13003_v12  ;;  %v3180_v15 = vld [vmem:[#allocation9 + $0x260] sm:$0xff] }
 0x217   :  { %v2790_v14 = vunpack.c.l.b16 %v13004_v1  ;;  %v2792_v18 = vrot.slane %v2784_v25, 1  ;;  %v2791_v57 = vunpack.c.l.b16 %v13005_v37  ;;  %v12038_v0 = vcombine.high %v3320_v16, %v3324_v50  ;;  %v2940_v16 = vpop.f32.mrf.mxu0  ;;  %v3296_v53 = vld [vmem:[#allocation9 + $0x600] sm:$0xff] }
 0x218   :  { %v2794_v21 = vrot.slane %v2786_v4, 7  ;;  %v2796_v28 = vrot.slane %v2787_v9, 6  ;;  %v2798_v54 = vrot.slane %v2788_v13, 5  ;;  %v2800_v49 = vrot.slane %v2789_v17, 4  ;;  %v3300_v51 = vld [vmem:[#allocation9 + $0x620] sm:$0xff] }
 0x219   :  { %v2793_v61 = vsel %vm483_vm1, %v2785_v46, %v2792_v18  ;;  %v2802_v29 = vrot.slane %v2790_v14, 3  ;;  %9411 = vmatprep.subr.bf16.mxu0 %v12038_v0  ;;  %v11910_v3 = vcombine.high %v3192_v55, %v3196_v23  ;;  %v11909_v26 = vcombine.low %v3192_v55, %v3196_v23  ;;  %v3168_v35 = vld [vmem:[#allocation9 + $0x200] sm:$0xff]  ;;  %v15654_v12 = vpop.f32.mrf.mxu0 }
 0x21a   :  { %v2795_v43 = vsel %vm486_vm2, %v2794_v21, %v2793_v61  ;;  %v2804_v56 = vrot.slane %v2791_v57, 2  ;;  %9412 = vmatpush2.bf16.msra.mxu0 %v12037_v36  ;;  %v12029_v8 = vcombine.low %v3312_v45, %v3316_v20  ;;  %v12030_v38 = vcombine.high %v3312_v45, %v3316_v20  ;;  %v3172_v36 = vld [vmem:[#allocation9 + $0x220] sm:$0xff] }
 0x21b   :  { %v2797_v19 = vsel %vm489_vm3, %v2796_v28, %v2795_v43  ;;  %9370 = vmatprep.subr.bf16.mxu1 %v11910_v3  ;;  %v11902_v34 = vcombine.high %v3184_v10, %v3188_v59  ;;  %v11901_v39 = vcombine.low %v3184_v10, %v3188_v59  ;;  %v12022_v22 = vcombine.high %v3304_v52, %v3308_v5  ;;  %v15647_v7 = vld [vmem:[#allocation9 + $0xdc0] sm:$0xff]  ;;  %v15661_v14 = vpop.f32.mrf.mxu0 }
 0x21c   :  { %v2799_v48 = vsel %vm492_vm4, %v2798_v54, %v2797_v19  ;;  %9371 = vmatpush2.bf16.msra.mxu1 %v11909_v26  ;;  %9413 = vmatprep.subr.bf16.mxu0 %v12030_v38  ;;  %v11894_v33 = vcombine.high %v3176_v63, %v3180_v15  ;;  %v12021_v2 = vcombine.low %v3304_v52, %v3308_v5  ;;  %v15649_v27 = vld [vmem:[#allocation9 + $0xde0] sm:$0xff] }
 0x21d   :  { %v2801_v50 = vsel %vm495_vm5, %v2800_v49, %v2799_v48  ;;  %9372 = vmatprep.subr.bf16.mxu1 %v11902_v34  ;;  %v2941_v40 = vadd.f32 %v15642_v41, %v2940_v16  ;;  %v2949_v62 = vadd.f32 %v13187_v32, %v15642_v41  ;;  %v11893_v47 = vcombine.low %v3176_v63, %v3180_v15  ;;  %v3416_v37 = vld [vmem:[#allocation9 + $0x9c0] sm:$0xff]  ;;  %v13191_v20 = vpop.f32.mrf.mxu0 }
 0x21e   :  { %v2803_v11 = vsel %vm498_vm6, %v2802_v29, %v2801_v50  ;;  %9414 = vmatpush2.bf16.msra.mxu0 %v12029_v8  ;;  %v12014_v31 = vcombine.high %v3296_v53, %v3300_v51  ;;  %v2938_v24 = vadd.f32 %v15642_v41, %v15634_v42  ;;  %v11886_v58 = vcombine.high %v3168_v35, %v3172_v36  ;;  %v3420_v46 = vld [vmem:[#allocation9 + $0x9e0] sm:$0xff] }
 0x21f   :  { %v2805_v6 = vsel %vm501_vm7, %v2804_v56, %v2803_v11  ;;  %9415 = vmatprep.subr.bf16.mxu0 %v12022_v22  ;;  %v3001_v44 = vmax.f32 %v2941_v40, 0.0  ;;  %v12013_v25 = vcombine.low %v3296_v53, %v3300_v51  ;;  %v3003_v4 = vmax.f32 %v2949_v62, 0.0  ;;  %v3408_v18 = vld [vmem:[#allocation9 + $0x980] sm:$0xff]  ;;  %v2956_v43 = vpop.f32.mrf.mxu0 }
 0x220   :  { %v2806_v60 = vpack.c.b16 %v2805_v6, %v2805_v6  ;;  %9373 = vmatpush2.bf16.msra.mxu1 %v11901_v39  ;;  %v12262_v9 = vcombine.high %v15647_v7, %v15649_v27  ;;  %v11885_v13 = vcombine.low %v3168_v35, %v3172_v36  ;;  %v3000_v42 = vmax.f32 %v2938_v24, 0.0  ;;  %v3412_v55 = vld [vmem:[#allocation9 + $0x9a0] sm:$0xff] }
 0x221   :  { %9374 = vmatprep.subr.bf16.mxu1 %v11894_v33  ;;  %v15656_v1 = vpack.c.bf16 %v3001_v44, %v3001_v44  ;;  %v12134_v17 = vcombine.high %v3416_v37, %v3420_v46  ;;  %v15663_v23 = vpack.c.bf16 %v3003_v4, %v3003_v4  ;;  %v2946_v21 = vadd.f32 %v15626_v30, %v15642_v41  ;;  %v3400_v32 = vld [vmem:[#allocation9 + $0x940] sm:$0xff] }
 0x222   :  { %2809 = vst.msk [vmem:[#allocation2 + $0x3c] sm:$0xf] %vm505_vm8, %v2806_v60  ;;  %9416 = vmatpush2.bf16.msra.mxu0 %v12021_v2  ;;  %v12133_v28 = vcombine.low %v3416_v37, %v3420_v46  ;;  %v15667_v0 = vpack.c.bf16 %v3000_v42, %v3000_v42  ;;  %v12126_v45 = vcombine.high %v3408_v18, %v3412_v55  ;;  %v3404_v61 = vld [vmem:[#allocation9 + $0x960] sm:$0xff] }
 0x223   :  { %9417 = vmatprep.subr.bf16.mxu0 %v12014_v31  ;;  %9378 = vmatprep.mubr.bf16.mxu1 %v15656_v1  ;;  %v3002_v54 = vmax.f32 %v2946_v21, 0.0  ;;  %v12125_v49 = vcombine.low %v3408_v18, %v3412_v55  ;;  %v3536_v10 = vld [vmem:[#allocation9 + $0xd80] sm:$0xff]  ;;  %v12118_v59 = vcombine.high %v3400_v32, %v3404_v61  ;;  %v12261_v26 = vcombine.low %v15647_v7, %v15649_v27 }
 0x224   :  { %9375 = vmatpush2.bf16.msra.mxu1 %v11893_v47  ;;  %v3540_v30 = vld [vmem:[#allocation9 + $0xda0] sm:$0xff]  ;;  %v2965_v52 = vadd.f32 %v13191_v20, %v15642_v41  ;;  %v12117_v56 = vcombine.low %v3400_v32, %v3404_v61  ;;  %v2957_v8 = vadd.f32 %v15642_v41, %v2956_v43 }
 0x225   :  { %9376 = vmatprep.subr.bf16.mxu1 %v11886_v58  ;;  %v3392_v29 = vld [vmem:[#allocation9 + $0x900] sm:$0xff]  ;;  %v15675_v5 = vpack.c.bf16 %v3002_v54, %v3002_v54  ;;  %v12254_v19 = vcombine.high %v3536_v10, %v3540_v30  ;;  %v12253_v39 = vcombine.low %v3536_v10, %v3540_v30 }
 0x226   :  { %9418 = vmatpush2.bf16.msra.mxu0 %v12013_v25  ;;  %v3396_v3 = vld [vmem:[#allocation9 + $0x920] sm:$0xff]  ;;  %v3007_v48 = vmax.f32 %v2965_v52, 0.0  ;;  %v3005_v50 = vmax.f32 %v2957_v8, 0.0 }
 0x227   :  { %9469 = vmatprep.subr.bf16.mxu0 %v12262_v9  ;;  %v3528_v38 = vld [vmem:[#allocation9 + $0xd40] sm:$0xff]  ;;  %v12110_v15 = vcombine.high %v3392_v29, %v3396_v3  ;;  %v12109_v33 = vcombine.low %v3392_v29, %v3396_v3 }
 0x228   :  { %9377 = vmatpush2.bf16.msra.mxu1 %v11885_v13  ;;  %v3532_v63 = vld [vmem:[#allocation9 + $0xd60] sm:$0xff]  ;;  %v15679_v22 = vpack.c.bf16 %v3007_v48, %v3007_v48  ;;  %v15681_v53 = vpack.c.bf16 %v3005_v50, %v3005_v50 }
 0x229   :  { %v13219_v57 = vld [vmem:[#allocation2 + $0x38] sm:$0xff]   ;;  %9428 = vmatprep.subr.bf16.mxu1 %v12134_v17  ;;  %v3384_v34 = vld [vmem:[#allocation9 + $0x8c0] sm:$0xff]  ;;  %v12246_v11 = vcombine.high %v3528_v38, %v3532_v63  ;;  %v12245_v36 = vcombine.low %v3528_v38, %v3532_v63 }
 0x22a   :  { %13197 = vmatmul.mubr.msk.bf16.gmra.mxu0 %vm2874_vm9, %v13219_v57  ;;  %v3388_v16 = vld [vmem:[#allocation9 + $0x8e0] sm:$0xff] }
 0x22b   :  { %9419 = vmatprep.mubr.bf16.mxu0 %v15663_v23  ;;  %9379 = vmatmul.mubr.bf16.vlgmr.msra.gmra.mxu1 %v15667_v0  ;;  %v3520_v51 = vld [vmem:[#allocation9 + $0xd00] sm:$0xff]  ;;  %v12102_v2 = vcombine.high %v3384_v34, %v3388_v16  ;;  %v12101_v62 = vcombine.low %v3384_v34, %v3388_v16 }
 0x22c   :  { %9429 = vmatpush1.bf16.msra.mxu1 %v12133_v28  ;;  %v3524_v6 = vld [vmem:[#allocation9 + $0xd20] sm:$0xff]  ;;  %9460 = vmatprep.mubr.bf16.mxu1 %v15681_v53 }
 0x22d   :  { %9430 = vmatprep.subr.bf16.mxu1 %v12126_v45  ;;  %v3376_v40 = vld [vmem:[#allocation9 + $0x880] sm:$0xff]  ;;  %v12238_v60 = vcombine.high %v3520_v51, %v3524_v6  ;;  %v12237_v24 = vcombine.low %v3520_v51, %v3524_v6 }
 0x22e   :  { %v3380_v35 = vld [vmem:[#allocation9 + $0x8a0] sm:$0xff] }
 0x22f   :  { %v3512_v44 = vld [vmem:[#allocation9 + $0xcc0] sm:$0xff]  ;;  %v12094_v31 = vcombine.high %v3376_v40, %v3380_v35  ;;  %v12093_v25 = vcombine.low %v3376_v40, %v3380_v35 }
 0x230   :  { %9431 = vmatpush1.bf16.msra.mxu1 %v12125_v49  ;;  %v3516_v47 = vld [vmem:[#allocation9 + $0xce0] sm:$0xff] }
 0x231   :  { %9432 = vmatprep.subr.bf16.mxu1 %v12118_v59  ;;  %v3368_v7 = vld [vmem:[#allocation9 + $0x840] sm:$0xff]  ;;  %v12230_v58 = vcombine.high %v3512_v44, %v3516_v47  ;;  %v12229_v42 = vcombine.low %v3512_v44, %v3516_v47 }
 0x232   :  { %9420 = vmatmul.mubr.bf16.vlgmr.msra.gmra.mxu0 %v15675_v5  ;;  %v3372_v27 = vld [vmem:[#allocation9 + $0x860] sm:$0xff] }
 0x233   :  { %9470 = vmatpush1.bf16.msra.mxu0 %v12261_v26  ;;  %9501 = vmatprep.mubr.bf16.mxu0 %v15679_v22  ;;  %v3504_v37 = vld [vmem:[#allocation9 + $0xc80] sm:$0xff]  ;;  %v12086_v4 = vcombine.high %v3368_v7, %v3372_v27  ;;  %v12085_v18 = vcombine.low %v3368_v7, %v3372_v27 }
 0x234   :  { %9471 = vmatprep.subr.bf16.mxu0 %v12254_v19  ;;  %9433 = vmatpush1.bf16.msra.mxu1 %v12117_v56  ;;  %v3508_v46 = vld [vmem:[#allocation9 + $0xca0] sm:$0xff] }
 0x235   :  { %9434 = vmatprep.subr.bf16.mxu1 %v12110_v15  ;;  %v3360_v9 = vld [vmem:[#allocation9 + $0x800] sm:$0xff]  ;;  %v12222_v17 = vcombine.high %v3504_v37, %v3508_v46  ;;  %v12221_v20 = vcombine.low %v3504_v37, %v3508_v46 }
 0x236   :  { %v3364_v13 = vld [vmem:[#allocation9 + $0x820] sm:$0xff] }
 0x237   :  { %9472 = vmatpush1.bf16.msra.mxu0 %v12253_v39  ;;  %v3496_v55 = vld [vmem:[#allocation9 + $0xc40] sm:$0xff]  ;;  %v12078_v21 = vcombine.high %v3360_v9, %v3364_v13  ;;  %v12077_v61 = vcombine.low %v3360_v9, %v3364_v13 }
 0x238   :  { %9473 = vmatprep.subr.bf16.mxu0 %v12246_v11  ;;  %9435 = vmatpush1.bf16.msra.mxu1 %v12109_v33  ;;  %v3500_v57 = vld [vmem:[#allocation9 + $0xc60] sm:$0xff] }
 0x239   :  { %9436 = vmatprep.subr.bf16.mxu1 %v12102_v2  ;;  %v3480_v28 = vld [vmem:[#allocation9 + $0xbc0] sm:$0xff]  ;;  %v12214_v32 = vcombine.high %v3496_v55, %v3500_v57  ;;  %v12213_v43 = vcombine.low %v3496_v55, %v3500_v57 }
 0x23a   :  { %v3484_v45 = vld [vmem:[#allocation9 + $0xbe0] sm:$0xff] }
 0x23b   :  { %9474 = vmatpush1.bf16.msra.mxu0 %v12245_v36  ;;  %v3488_v54 = vld [vmem:[#allocation9 + $0xc00] sm:$0xff]  ;;  %v12198_v10 = vcombine.high %v3480_v28, %v3484_v45  ;;  %v12197_v3 = vcombine.low %v3480_v28, %v3484_v45 }
 0x23c   :  { %9475 = vmatprep.subr.bf16.mxu0 %v12238_v60  ;;  %9437 = vmatpush1.bf16.msra.mxu1 %v12101_v62  ;;  %v3492_v49 = vld [vmem:[#allocation9 + $0xc20] sm:$0xff] }
 0x23d   :  { %9438 = vmatprep.subr.bf16.mxu1 %v12094_v31  ;;  %v3472_v30 = vld [vmem:[#allocation9 + $0xb80] sm:$0xff]  ;;  %v12206_v29 = vcombine.high %v3488_v54, %v3492_v49  ;;  %v12205_v38 = vcombine.low %v3488_v54, %v3492_v49  ;;  %v2954_v49 = vadd.f32 %v15642_v41, %v15661_v14 }
 0x23e   :  { %v3476_v59 = vld [vmem:[#allocation9 + $0xba0] sm:$0xff] }
 0x23f   :  { %9476 = vmatpush1.bf16.msra.mxu0 %v12237_v24  ;;  %v3608_v26 = vld [vmem:[#allocation9 + $0xfc0] sm:$0xff]  ;;  %v12190_v19 = vcombine.high %v3472_v30, %v3476_v59  ;;  %v12189_v15 = vcombine.low %v3472_v30, %v3476_v59 }
 0x240   :  { %9477 = vmatprep.subr.bf16.mxu0 %v12230_v58  ;;  %9439 = vmatpush1.bf16.msra.mxu1 %v12093_v25  ;;  %v3612_v52 = vld [vmem:[#allocation9 + $0xfe0] sm:$0xff] }
 0x241   :  { %9440 = vmatprep.subr.bf16.mxu1 %v12086_v4  ;;  %v3464_v56 = vld [vmem:[#allocation9 + $0xb40] sm:$0xff]  ;;  %v12326_v63 = vcombine.high %v3608_v26, %v3612_v52  ;;  %v12325_v11 = vcombine.low %v3608_v26, %v3612_v52 }
 0x242   :  { %v3468_v8 = vld [vmem:[#allocation9 + $0xb60] sm:$0xff] }
 0x243   :  { %9478 = vmatpush1.bf16.msra.mxu0 %v12229_v42  ;;  %v3600_v48 = vld [vmem:[#allocation9 + $0xf80] sm:$0xff]  ;;  %v12182_v16 = vcombine.high %v3464_v56, %v3468_v8  ;;  %v12181_v51 = vcombine.low %v3464_v56, %v3468_v8 }
 0x244   :  { %9479 = vmatprep.subr.bf16.mxu0 %v12222_v17  ;;  %9441 = vmatpush1.bf16.msra.mxu1 %v12085_v18  ;;  %v3604_v34 = vld [vmem:[#allocation9 + $0xfa0] sm:$0xff] }
 0x245   :  { %9442 = vmatprep.subr.bf16.mxu1 %v12078_v21  ;;  %v3456_v50 = vld [vmem:[#allocation9 + $0xb00] sm:$0xff]  ;;  %v12318_v33 = vcombine.high %v3600_v48, %v3604_v34  ;;  %v12317_v60 = vcombine.low %v3600_v48, %v3604_v34  ;;  %v2962_v48 = vadd.f32 %v15654_v12, %v15642_v41 }
 0x246   :  { %v3460_v39 = vld [vmem:[#allocation9 + $0xb20] sm:$0xff] }
 0x247   :  { %9480 = vmatpush1.bf16.msra.mxu0 %v12221_v20  ;;  %v3592_v6 = vld [vmem:[#allocation9 + $0xf40] sm:$0xff]  ;;  %v12174_v40 = vcombine.high %v3456_v50, %v3460_v39  ;;  %v12173_v44 = vcombine.low %v3456_v50, %v3460_v39 }
 0x248   :  { %9481 = vmatprep.subr.bf16.mxu0 %v12214_v32  ;;  %9443 = vmatpush1.bf16.msra.mxu1 %v12077_v61  ;;  %v3596_v2 = vld [vmem:[#allocation9 + $0xf60] sm:$0xff] }
 0x249   :  { %9444 = vmatprep.subr.bf16.mxu1 %v12198_v10  ;;  %v3448_v35 = vld [vmem:[#allocation9 + $0xac0] sm:$0xff]  ;;  %v12310_v62 = vcombine.high %v3592_v6, %v3596_v2  ;;  %v12309_v58 = vcombine.low %v3592_v6, %v3596_v2 }
 0x24a   :  { %v3452_v36 = vld [vmem:[#allocation9 + $0xae0] sm:$0xff] }
 0x24b   :  { %9482 = vmatpush1.bf16.msra.mxu0 %v12213_v43  ;;  %v3584_v47 = vld [vmem:[#allocation9 + $0xf00] sm:$0xff]  ;;  %v12166_v7 = vcombine.high %v3448_v35, %v3452_v36  ;;  %v12165_v37 = vcombine.low %v3448_v35, %v3452_v36 }
 0x24c   :  { %9483 = vmatprep.subr.bf16.mxu0 %v12206_v29  ;;  %9445 = vmatpush2.bf16.msra.mxu1 %v12197_v3  ;;  %v3588_v31 = vld [vmem:[#allocation9 + $0xf20] sm:$0xff] }
 0x24d   :  { %9446 = vmatprep.subr.bf16.mxu1 %v12190_v19  ;;  %v3440_v27 = vld [vmem:[#allocation9 + $0xa80] sm:$0xff]  ;;  %v12302_v25 = vcombine.high %v3584_v47, %v3588_v31  ;;  %v12301_v17 = vcombine.low %v3584_v47, %v3588_v31  ;;  %v3004_v19 = vmax.f32 %v2954_v49, 0.0 }
 0x24e   :  { %v3444_v24 = vld [vmem:[#allocation9 + $0xaa0] sm:$0xff] }
 0x24f   :  { %9484 = vmatpush1.bf16.msra.mxu0 %v12205_v38  ;;  %v3576_v46 = vld [vmem:[#allocation9 + $0xec0] sm:$0xff]  ;;  %v12158_v9 = vcombine.high %v3440_v27, %v3444_v24  ;;  %v12157_v55 = vcombine.low %v3440_v27, %v3444_v24  ;;  %v15689_v50 = vpack.c.bf16 %v3004_v19, %v3004_v19 }
 0x250   :  { %9485 = vmatprep.subr.bf16.mxu0 %v12326_v63  ;;  %9447 = vmatpush2.bf16.msra.mxu1 %v12189_v15  ;;  %v3580_v4 = vld [vmem:[#allocation9 + $0xee0] sm:$0xff] }
 0x251   :  { %9448 = vmatprep.subr.bf16.mxu1 %v12182_v16  ;;  %v3432_v13 = vld [vmem:[#allocation9 + $0xa40] sm:$0xff]  ;;  %v12294_v18 = vcombine.high %v3576_v46, %v3580_v4  ;;  %v12293_v32 = vcombine.low %v3576_v46, %v3580_v4 }
 0x252   :  { %v3436_v42 = vld [vmem:[#allocation9 + $0xa60] sm:$0xff] }
 0x253   :  { %9486 = vmatpush2.bf16.msra.mxu0 %v12325_v11  ;;  %v3568_v57 = vld [vmem:[#allocation9 + $0xe80] sm:$0xff]  ;;  %v12150_v28 = vcombine.high %v3432_v13, %v3436_v42  ;;  %v12149_v54 = vcombine.low %v3432_v13, %v3436_v42 }
 0x254   :  { %9487 = vmatprep.subr.bf16.mxu0 %v12318_v33  ;;  %9449 = vmatpush2.bf16.msra.mxu1 %v12181_v51  ;;  %v3572_v21 = vld [vmem:[#allocation9 + $0xea0] sm:$0xff] }
 0x255   :  { %9450 = vmatprep.subr.bf16.mxu1 %v12174_v40  ;;  %v3424_v45 = vld [vmem:[#allocation9 + $0xa00] sm:$0xff]  ;;  %v12286_v61 = vcombine.high %v3568_v57, %v3572_v21  ;;  %v12285_v3 = vcombine.low %v3568_v57, %v3572_v21  ;;  %v3006_v40 = vmax.f32 %v2962_v48, 0.0 }
 0x256   :  { %v3428_v20 = vld [vmem:[#allocation9 + $0xa20] sm:$0xff] }
 0x257   :  { %9488 = vmatpush2.bf16.msra.mxu0 %v12317_v60  ;;  %v3560_v10 = vld [vmem:[#allocation9 + $0xe40] sm:$0xff]  ;;  %v12142_v59 = vcombine.high %v3424_v45, %v3428_v20  ;;  %v12141_v52 = vcombine.low %v3424_v45, %v3428_v20 }
 0x258   :  { %9489 = vmatprep.subr.bf16.mxu0 %v12310_v62  ;;  %9451 = vmatpush2.bf16.msra.mxu1 %v12173_v44  ;;  %v3564_v30 = vld [vmem:[#allocation9 + $0xe60] sm:$0xff] }
 0x259   :  { %9452 = vmatprep.subr.bf16.mxu1 %v12166_v7  ;;  %v3672_v43 = vld [vmem:[#allocation9 + $0x11c0] sm:$0xff]  ;;  %v12278_v26 = vcombine.high %v3560_v10, %v3564_v30  ;;  %v12277_v14 = vcombine.low %v3560_v10, %v3564_v30  ;;  %v15692_v7 = vpack.c.bf16 %v3006_v40, %v3006_v40 }
 0x25a   :  { %v3676_v29 = vld [vmem:[#allocation9 + $0x11e0] sm:$0xff] }
 0x25b   :  { %9490 = vmatpush2.bf16.msra.mxu0 %v12309_v58  ;;  %v3552_v56 = vld [vmem:[#allocation9 + $0xe00] sm:$0xff]  ;;  %v12390_v38 = vcombine.high %v3672_v43, %v3676_v29  ;;  %v12389_v16 = vcombine.low %v3672_v43, %v3676_v29 }
 0x25c   :  { %9491 = vmatprep.subr.bf16.mxu0 %v12302_v25  ;;  %9453 = vmatpush2.bf16.msra.mxu1 %v12165_v37  ;;  %v3556_v8 = vld [vmem:[#allocation9 + $0xe20] sm:$0xff] }
 0x25d   :  { %9454 = vmatprep.subr.bf16.mxu1 %v12158_v9  ;;  %v3664_v63 = vld [vmem:[#allocation9 + $0x1180] sm:$0xff]  ;;  %v12270_v34 = vcombine.high %v3552_v56, %v3556_v8  ;;  %v12269_v2 = vcombine.low %v3552_v56, %v3556_v8 }
 0x25e   :  { %v3668_v15 = vld [vmem:[#allocation9 + $0x11a0] sm:$0xff] }
 0x25f   :  { %9492 = vmatpush2.bf16.msra.mxu0 %v12301_v17  ;;  %v3800_v39 = vld [vmem:[#allocation9 + $0x15c0] sm:$0xff]  ;;  %v12382_v33 = vcombine.high %v3664_v63, %v3668_v15  ;;  %v12381_v12 = vcombine.low %v3664_v63, %v3668_v15 }
 0x260   :  { %9493 = vmatprep.subr.bf16.mxu0 %v12294_v18  ;;  %9455 = vmatpush2.bf16.msra.mxu1 %v12157_v55  ;;  %v3804_v11 = vld [vmem:[#allocation9 + $0x15e0] sm:$0xff] }
 0x261   :  { %9456 = vmatprep.subr.bf16.mxu1 %v12150_v28  ;;  %v3656_v51 = vld [vmem:[#allocation9 + $0x1140] sm:$0xff]  ;;  %v12518_v35 = vcombine.high %v3800_v39, %v3804_v11  ;;  %v12517_v31 = vcombine.low %v3800_v39, %v3804_v11 }
 0x262   :  { %v3660_v6 = vld [vmem:[#allocation9 + $0x1160] sm:$0xff] }
 0x263   :  { %9494 = vmatpush2.bf16.msra.mxu0 %v12293_v32  ;;  %v3792_v36 = vld [vmem:[#allocation9 + $0x1580] sm:$0xff]  ;;  %v12374_v62 = vcombine.high %v3656_v51, %v3660_v6  ;;  %v12373_v24 = vcombine.low %v3656_v51, %v3660_v6 }
 0x264   :  { %9495 = vmatprep.subr.bf16.mxu0 %v12286_v61  ;;  %9457 = vmatpush2.bf16.msra.mxu1 %v12149_v54  ;;  %v3796_v60 = vld [vmem:[#allocation9 + $0x15a0] sm:$0xff] }
 0x265   :  { %9458 = vmatprep.subr.bf16.mxu1 %v12142_v59  ;;  %v3648_v44 = vld [vmem:[#allocation9 + $0x1100] sm:$0xff]  ;;  %v12510_v27 = vcombine.high %v3792_v36, %v3796_v60  ;;  %v12509_v9 = vcombine.low %v3792_v36, %v3796_v60 }
 0x266   :  { %v3652_v47 = vld [vmem:[#allocation9 + $0x1120] sm:$0xff] }
 0x267   :  { %9496 = vmatpush2.bf16.msra.mxu0 %v12285_v3  ;;  %v3784_v58 = vld [vmem:[#allocation9 + $0x1540] sm:$0xff]  ;;  %v12366_v37 = vcombine.high %v3648_v44, %v3652_v47  ;;  %v12365_v42 = vcombine.low %v3648_v44, %v3652_v47 }
 0x268   :  { %9497 = vmatprep.subr.bf16.mxu0 %v12278_v26  ;;  %9459 = vmatpush2.bf16.msra.mxu1 %v12141_v52  ;;  %v3788_v25 = vld [vmem:[#allocation9 + $0x1560] sm:$0xff] }
 0x269   :  { %9510 = vmatprep.subr.bf16.mxu1 %v12390_v38  ;;  %v3640_v46 = vld [vmem:[#allocation9 + $0x10c0] sm:$0xff]  ;;  %v12502_v13 = vcombine.high %v3784_v58, %v3788_v25  ;;  %v12501_v20 = vcombine.low %v3784_v58, %v3788_v25 }
 0x26a   :  { %v3644_v4 = vld [vmem:[#allocation9 + $0x10e0] sm:$0xff] }
 0x26b   :  { %9498 = vmatpush2.bf16.msra.mxu0 %v12277_v14  ;;  %9461 = vmatmul.mubr.bf16.vlgmr.msra.gmra.mxu1 %v15689_v50  ;;  %v3776_v18 = vld [vmem:[#allocation9 + $0x1500] sm:$0xff]  ;;  %v12358_v57 = vcombine.high %v3640_v46, %v3644_v4  ;;  %v12357_v61 = vcombine.low %v3640_v46, %v3644_v4 }
 0x26c   :  { %9499 = vmatprep.subr.bf16.mxu0 %v12270_v34  ;;  %9511 = vmatpush1.bf16.msra.mxu1 %v12389_v16  ;;  %v3780_v55 = vld [vmem:[#allocation9 + $0x1520] sm:$0xff] }
 0x26d   :  { %9512 = vmatprep.subr.bf16.mxu1 %v12382_v33  ;;  %v3632_v21 = vld [vmem:[#allocation9 + $0x1080] sm:$0xff]  ;;  %v12494_v32 = vcombine.high %v3776_v18, %v3780_v55  ;;  %v12493_v26 = vcombine.low %v3776_v18, %v3780_v55 }
 0x26e   :  { %v3636_v28 = vld [vmem:[#allocation9 + $0x10a0] sm:$0xff] }
 0x26f   :  { %9500 = vmatpush2.bf16.msra.mxu0 %v12269_v2  ;;  %v3768_v49 = vld [vmem:[#allocation9 + $0x14c0] sm:$0xff]  ;;  %v12350_v30 = vcombine.high %v3632_v21, %v3636_v28  ;;  %v12349_v8 = vcombine.low %v3632_v21, %v3636_v28 }
 0x270   :  { %9551 = vmatprep.subr.bf16.mxu0 %v12518_v35  ;;  %9513 = vmatpush1.bf16.msra.mxu1 %v12381_v12  ;;  %v3772_v10 = vld [vmem:[#allocation9 + $0x14e0] sm:$0xff] }
 0x271   :  { %9514 = vmatprep.subr.bf16.mxu1 %v12374_v62  ;;  %v3624_v43 = vld [vmem:[#allocation9 + $0x1040] sm:$0xff]  ;;  %v12486_v56 = vcombine.high %v3768_v49, %v3772_v10  ;;  %v12485_v39 = vcombine.low %v3768_v49, %v3772_v10 }
 0x272   :  { %9502 = vmatmul.mubr.bf16.vlgmr.msra.gmra.mxu0 %v15692_v7  ;;  %v3628_v29 = vld [vmem:[#allocation9 + $0x1060] sm:$0xff] }
 0x273   :  { %9552 = vmatpush1.bf16.msra.mxu0 %v12517_v31  ;;  %v15695_v17 = vpop.f32.mrf.mxu0  ;;  %v3760_v38 = vld [vmem:[#allocation9 + $0x1480] sm:$0xff]  ;;  %v12342_v15 = vcombine.high %v3624_v43, %v3628_v29  ;;  %v12341_v51 = vcombine.low %v3624_v43, %v3628_v29 }
 0x274   :  { %9553 = vmatprep.subr.bf16.mxu0 %v12510_v27  ;;  %9515 = vmatpush1.bf16.msra.mxu1 %v12373_v24  ;;  %v3764_v63 = vld [vmem:[#allocation9 + $0x14a0] sm:$0xff] }
 0x275   :  { %9516 = vmatprep.subr.bf16.mxu1 %v12366_v37  ;;  %v15697_v45 = vpop.f32.mrf.mxu0  ;;  %v3616_v34 = vld [vmem:[#allocation9 + $0x1000] sm:$0xff]  ;;  %v12478_v33 = vcombine.high %v3760_v38, %v3764_v63  ;;  %v12477_v36 = vcombine.low %v3760_v38, %v3764_v63 }
 0x276   :  { %v3620_v16 = vld [vmem:[#allocation9 + $0x1020] sm:$0xff] }
 0x277   :  { %9554 = vmatpush1.bf16.msra.mxu0 %v12509_v9  ;;  %v13195_v54 = vpop.f32.mrf.mxu0  ;;  %v3752_v6 = vld [vmem:[#allocation9 + $0x1440] sm:$0xff]  ;;  %v12334_v40 = vcombine.high %v3616_v34, %v3620_v16  ;;  %v12333_v62 = vcombine.low %v3616_v34, %v3620_v16 }
 0x278   :  { %9555 = vmatprep.subr.bf16.mxu0 %v12502_v13  ;;  %9517 = vmatpush1.bf16.msra.mxu1 %v12365_v42  ;;  %v2981_v59 = vadd.f32 %v13195_v54, %v15642_v41  ;;  %v3756_v2 = vld [vmem:[#allocation9 + $0x1460] sm:$0xff] }
 0x279   :  { %9518 = vmatprep.subr.bf16.mxu1 %v12358_v57  ;;  %v2972_v3 = vpop.f32.mrf.mxu0  ;;  %v3736_v35 = vld [vmem:[#allocation9 + $0x13c0] sm:$0xff]  ;;  %v12470_v60 = vcombine.high %v3752_v6, %v3756_v2  ;;  %v12469_v58 = vcombine.low %v3752_v6, %v3756_v2 }
 0x27a   :  { %v3011_v52 = vmax.f32 %v2981_v59, 0.0  ;;  %v2973_v19 = vadd.f32 %v15642_v41, %v2972_v3  ;;  %v3740_v12 = vld [vmem:[#allocation9 + $0x13e0] sm:$0xff] }
 0x27b   :  { %9556 = vmatpush1.bf16.msra.mxu0 %v12501_v20  ;;  %v3744_v44 = vld [vmem:[#allocation9 + $0x1400] sm:$0xff]  ;;  %v12454_v31 = vcombine.high %v3736_v35, %v3740_v12  ;;  %v12453_v37 = vcombine.low %v3736_v35, %v3740_v12 }
 0x27c   :  { %9557 = vmatprep.subr.bf16.mxu0 %v12494_v32  ;;  %9519 = vmatpush1.bf16.msra.mxu1 %v12357_v61  ;;  %v15701_v14 = vpack.c.bf16 %v3011_v52, %v3011_v52  ;;  %v3009_v48 = vmax.f32 %v2973_v19, 0.0  ;;  %v3748_v47 = vld [vmem:[#allocation9 + $0x1420] sm:$0xff] }
 0x27d   :  { %9520 = vmatprep.subr.bf16.mxu1 %v12350_v30  ;;  %v3728_v27 = vld [vmem:[#allocation9 + $0x1380] sm:$0xff]  ;;  %v12462_v25 = vcombine.high %v3744_v44, %v3748_v47  ;;  %v12461_v18 = vcombine.low %v3744_v44, %v3748_v47 }
 0x27e   :  { %v15703_v11 = vpack.c.bf16 %v3009_v48, %v3009_v48  ;;  %9583 = vmatprep.mubr.bf16.mxu0 %v15701_v14  ;;  %v3732_v24 = vld [vmem:[#allocation9 + $0x13a0] sm:$0xff] }
 0x27f   :  { %9558 = vmatpush1.bf16.msra.mxu0 %v12493_v26  ;;  %v3864_v46 = vld [vmem:[#allocation9 + $0x17c0] sm:$0xff]  ;;  %v12446_v9 = vcombine.high %v3728_v27, %v3732_v24  ;;  %v12445_v57 = vcombine.low %v3728_v27, %v3732_v24 }
 0x280   :  { %9559 = vmatprep.subr.bf16.mxu0 %v12486_v56  ;;  %9521 = vmatpush1.bf16.msra.mxu1 %v12349_v8  ;;  %v3868_v4 = vld [vmem:[#allocation9 + $0x17e0] sm:$0xff] }
 0x281   :  { %9522 = vmatprep.subr.bf16.mxu1 %v12342_v15  ;;  %9542 = vmatprep.mubr.bf16.mxu1 %v15703_v11  ;;  %v3720_v13 = vld [vmem:[#allocation9 + $0x1340] sm:$0xff]  ;;  %v12582_v55 = vcombine.high %v3864_v46, %v3868_v4  ;;  %v12581_v54 = vcombine.low %v3864_v46, %v3868_v4 }
 0x282   :  { %v3724_v42 = vld [vmem:[#allocation9 + $0x1360] sm:$0xff] }
 0x283   :  { %9560 = vmatpush1.bf16.msra.mxu0 %v12485_v39  ;;  %v3856_v21 = vld [vmem:[#allocation9 + $0x1780] sm:$0xff]  ;;  %v12438_v20 = vcombine.high %v3720_v13, %v3724_v42  ;;  %v12437_v10 = vcombine.low %v3720_v13, %v3724_v42 }
 0x284   :  { %9561 = vmatprep.subr.bf16.mxu0 %v12478_v33  ;;  %9523 = vmatpush1.bf16.msra.mxu1 %v12341_v51  ;;  %v3860_v28 = vld [vmem:[#allocation9 + $0x17a0] sm:$0xff] }
 0x285   :  { %9524 = vmatprep.subr.bf16.mxu1 %v12334_v40  ;;  %v3712_v32 = vld [vmem:[#allocation9 + $0x1300] sm:$0xff]  ;;  %v12574_v49 = vcombine.high %v3856_v21, %v3860_v28  ;;  %v12573_v26 = vcombine.low %v3856_v21, %v3860_v28 }
 0x286   :  { %v3716_v61 = vld [vmem:[#allocation9 + $0x1320] sm:$0xff] }
 0x287   :  { %9562 = vmatpush1.bf16.msra.mxu0 %v12477_v36  ;;  %v3848_v30 = vld [vmem:[#allocation9 + $0x1740] sm:$0xff]  ;;  %v12430_v43 = vcombine.high %v3712_v32, %v3716_v61  ;;  %v12429_v19 = vcombine.low %v3712_v32, %v3716_v61  ;;  %v2978_v61 = vadd.f32 %v15695_v17, %v15642_v41 }
 0x288   :  { %9563 = vmatprep.subr.bf16.mxu0 %v12470_v60  ;;  %9525 = vmatpush1.bf16.msra.mxu1 %v12333_v62  ;;  %v3852_v59 = vld [vmem:[#allocation9 + $0x1760] sm:$0xff] }
 0x289   :  { %9526 = vmatprep.subr.bf16.mxu1 %v12454_v31  ;;  %v3704_v29 = vld [vmem:[#allocation9 + $0x12c0] sm:$0xff]  ;;  %v12566_v52 = vcombine.high %v3848_v30, %v3852_v59  ;;  %v12565_v48 = vcombine.low %v3848_v30, %v3852_v59 }
 0x28a   :  { %v3708_v3 = vld [vmem:[#allocation9 + $0x12e0] sm:$0xff] }
 0x28b   :  { %9564 = vmatpush1.bf16.msra.mxu0 %v12469_v58  ;;  %v3840_v56 = vld [vmem:[#allocation9 + $0x1700] sm:$0xff]  ;;  %v12422_v38 = vcombine.high %v3704_v29, %v3708_v3  ;;  %v12421_v16 = vcombine.low %v3704_v29, %v3708_v3  ;;  %v2970_v58 = vadd.f32 %v15642_v41, %v15697_v45 }
 0x28c   :  { %9565 = vmatprep.subr.bf16.mxu0 %v12462_v25  ;;  %9527 = vmatpush2.bf16.msra.mxu1 %v12453_v37  ;;  %v3844_v8 = vld [vmem:[#allocation9 + $0x1720] sm:$0xff] }
 0x28d   :  { %9528 = vmatprep.subr.bf16.mxu1 %v12446_v9  ;;  %v3696_v63 = vld [vmem:[#allocation9 + $0x1280] sm:$0xff]  ;;  %v12558_v34 = vcombine.high %v3840_v56, %v3844_v8  ;;  %v12557_v40 = vcombine.low %v3840_v56, %v3844_v8 }
 0x28e   :  { %v3700_v15 = vld [vmem:[#allocation9 + $0x12a0] sm:$0xff] }
 0x28f   :  { %9566 = vmatpush1.bf16.msra.mxu0 %v12461_v18  ;;  %v3832_v39 = vld [vmem:[#allocation9 + $0x16c0] sm:$0xff]  ;;  %v12414_v51 = vcombine.high %v3696_v63, %v3700_v15  ;;  %v12413_v12 = vcombine.low %v3696_v63, %v3700_v15 }
 0x290   :  { %9567 = vmatprep.subr.bf16.mxu0 %v12582_v55  ;;  %9529 = vmatpush2.bf16.msra.mxu1 %v12445_v57  ;;  %v3836_v33 = vld [vmem:[#allocation9 + $0x16e0] sm:$0xff]  ;;  %v3008_v55 = vmax.f32 %v2970_v58, 0.0 }
 0x291   :  { %9530 = vmatprep.subr.bf16.mxu1 %v12438_v20  ;;  %v3688_v6 = vld [vmem:[#allocation9 + $0x1240] sm:$0xff]  ;;  %v12550_v35 = vcombine.high %v3832_v39, %v3836_v33  ;;  %v12549_v31 = vcombine.low %v3832_v39, %v3836_v33 }
 0x292   :  { %v3692_v2 = vld [vmem:[#allocation9 + $0x1260] sm:$0xff] }
 0x293   :  { %9568 = vmatpush2.bf16.msra.mxu0 %v12581_v54  ;;  %v3824_v36 = vld [vmem:[#allocation9 + $0x1680] sm:$0xff]  ;;  %v12406_v62 = vcombine.high %v3688_v6, %v3692_v2  ;;  %v12405_v24 = vcombine.low %v3688_v6, %v3692_v2 }
 0x294   :  { %9569 = vmatprep.subr.bf16.mxu0 %v12574_v49  ;;  %9531 = vmatpush2.bf16.msra.mxu1 %v12437_v10  ;;  %v3828_v60 = vld [vmem:[#allocation9 + $0x16a0] sm:$0xff]  ;;  %v15711_v10 = vpack.c.bf16 %v3008_v55, %v3008_v55 }
 0x295   :  { %9532 = vmatprep.subr.bf16.mxu1 %v12430_v43  ;;  %v3680_v44 = vld [vmem:[#allocation9 + $0x1200] sm:$0xff]  ;;  %v12542_v27 = vcombine.high %v3824_v36, %v3828_v60  ;;  %v12541_v13 = vcombine.low %v3824_v36, %v3828_v60 }
 0x296   :  { %v3684_v47 = vld [vmem:[#allocation9 + $0x1220] sm:$0xff] }
 0x297   :  { %9570 = vmatpush2.bf16.msra.mxu0 %v12573_v26  ;;  %v3816_v25 = vld [vmem:[#allocation9 + $0x1640] sm:$0xff]  ;;  %v12398_v46 = vcombine.high %v3680_v44, %v3684_v47  ;;  %v12397_v18 = vcombine.low %v3680_v44, %v3684_v47 }
 0x298   :  { %9571 = vmatprep.subr.bf16.mxu0 %v12566_v52  ;;  %9533 = vmatpush2.bf16.msra.mxu1 %v12429_v19  ;;  %v3820_v37 = vld [vmem:[#allocation9 + $0x1660] sm:$0xff]  ;;  %v3010_v52 = vmax.f32 %v2978_v61, 0.0 }
 0x299   :  { %9534 = vmatprep.subr.bf16.mxu1 %v12422_v38  ;;  %v3928_v4 = vld [vmem:[#allocation9 + $0x19c0] sm:$0xff]  ;;  %v12534_v42 = vcombine.high %v3816_v25, %v3820_v37  ;;  %v12533_v45 = vcombine.low %v3816_v25, %v3820_v37 }
 0x29a   :  { %v3932_v9 = vld [vmem:[#allocation9 + $0x19e0] sm:$0xff] }
 0x29b   :  { %9572 = vmatpush2.bf16.msra.mxu0 %v12565_v48  ;;  %v3808_v57 = vld [vmem:[#allocation9 + $0x1600] sm:$0xff]  ;;  %v12646_v28 = vcombine.high %v3928_v4, %v3932_v9  ;;  %v12645_v49 = vcombine.low %v3928_v4, %v3932_v9  ;;  %v15714_v48 = vpack.c.bf16 %v3010_v52, %v3010_v52 }
 0x29c   :  { %9573 = vmatprep.subr.bf16.mxu0 %v12558_v34  ;;  %9535 = vmatpush2.bf16.msra.mxu1 %v12421_v16  ;;  %v3812_v21 = vld [vmem:[#allocation9 + $0x1620] sm:$0xff] }
 0x29d   :  { %9536 = vmatprep.subr.bf16.mxu1 %v12414_v51  ;;  %v3920_v20 = vld [vmem:[#allocation9 + $0x1980] sm:$0xff]  ;;  %v12526_v54 = vcombine.high %v3808_v57, %v3812_v21  ;;  %v12525_v26 = vcombine.low %v3808_v57, %v3812_v21 }
 0x29e   :  { %v3924_v32 = vld [vmem:[#allocation9 + $0x19a0] sm:$0xff] }
 0x29f   :  { %9574 = vmatpush2.bf16.msra.mxu0 %v12557_v40  ;;  %v4056_v30 = vld [vmem:[#allocation9 + $0x1dc0] sm:$0xff]  ;;  %v12638_v43 = vcombine.high %v3920_v20, %v3924_v32  ;;  %v12637_v41 = vcombine.low %v3920_v20, %v3924_v32 }
 0x2a0   :  { %9575 = vmatprep.subr.bf16.mxu0 %v12550_v35  ;;  %9537 = vmatpush2.bf16.msra.mxu1 %v12413_v12  ;;  %v4060_v59 = vld [vmem:[#allocation9 + $0x1de0] sm:$0xff] }
 0x2a1   :  { %9538 = vmatprep.subr.bf16.mxu1 %v12406_v62  ;;  %v3912_v29 = vld [vmem:[#allocation9 + $0x1940] sm:$0xff]  ;;  %v12774_v19 = vcombine.high %v4056_v30, %v4060_v59  ;;  %v12773_v15 = vcombine.low %v4056_v30, %v4060_v59 }
 0x2a2   :  { %v3916_v3 = vld [vmem:[#allocation9 + $0x1960] sm:$0xff] }
 0x2a3   :  { %9576 = vmatpush2.bf16.msra.mxu0 %v12549_v31  ;;  %v4048_v17 = vld [vmem:[#allocation9 + $0x1d80] sm:$0xff]  ;;  %v12630_v8 = vcombine.high %v3912_v29, %v3916_v3  ;;  %v12629_v16 = vcombine.low %v3912_v29, %v3916_v3 }
 0x2a4   :  { %9577 = vmatprep.subr.bf16.mxu0 %v12542_v27  ;;  %9539 = vmatpush2.bf16.msra.mxu1 %v12405_v24  ;;  %v4052_v56 = vld [vmem:[#allocation9 + $0x1da0] sm:$0xff] }
 0x2a5   :  { %9540 = vmatprep.subr.bf16.mxu1 %v12398_v46  ;;  %v3904_v38 = vld [vmem:[#allocation9 + $0x1900] sm:$0xff]  ;;  %v12766_v34 = vcombine.high %v4048_v17, %v4052_v56  ;;  %v12765_v40 = vcombine.low %v4048_v17, %v4052_v56 }
 0x2a6   :  { %v3908_v63 = vld [vmem:[#allocation9 + $0x1920] sm:$0xff] }
 0x2a7   :  { %9578 = vmatpush2.bf16.msra.mxu0 %v12541_v13  ;;  %v4040_v39 = vld [vmem:[#allocation9 + $0x1d40] sm:$0xff]  ;;  %v12622_v51 = vcombine.high %v3904_v38, %v3908_v63  ;;  %v12621_v12 = vcombine.low %v3904_v38, %v3908_v63 }
 0x2a8   :  { %9579 = vmatprep.subr.bf16.mxu0 %v12534_v42  ;;  %9541 = vmatpush2.bf16.msra.mxu1 %v12397_v18  ;;  %v4044_v33 = vld [vmem:[#allocation9 + $0x1d60] sm:$0xff] }
 0x2a9   :  { %9592 = vmatprep.subr.bf16.mxu1 %v12646_v28  ;;  %v3896_v6 = vld [vmem:[#allocation9 + $0x18c0] sm:$0xff]  ;;  %v12758_v35 = vcombine.high %v4040_v39, %v4044_v33  ;;  %v12757_v31 = vcombine.low %v4040_v39, %v4044_v33 }
 0x2aa   :  { %v3900_v2 = vld [vmem:[#allocation9 + $0x18e0] sm:$0xff] }
 0x2ab   :  { %9580 = vmatpush2.bf16.msra.mxu0 %v12533_v45  ;;  %9543 = vmatmul.mubr.bf16.vlgmr.msra.gmra.mxu1 %v15711_v10  ;;  %v4032_v36 = vld [vmem:[#allocation9 + $0x1d00] sm:$0xff]  ;;  %v12614_v62 = vcombine.high %v3896_v6, %v3900_v2  ;;  %v12613_v24 = vcombine.low %v3896_v6, %v3900_v2 }
 0x2ac   :  { %9581 = vmatprep.subr.bf16.mxu0 %v12526_v54  ;;  %9593 = vmatpush1.bf16.msra.mxu1 %v12645_v49  ;;  %v4036_v60 = vld [vmem:[#allocation9 + $0x1d20] sm:$0xff] }
 0x2ad   :  { %9594 = vmatprep.subr.bf16.mxu1 %v12638_v43  ;;  %v3888_v44 = vld [vmem:[#allocation9 + $0x1880] sm:$0xff]  ;;  %v12750_v27 = vcombine.high %v4032_v36, %v4036_v60  ;;  %v12749_v9 = vcombine.low %v4032_v36, %v4036_v60 }
 0x2ae   :  { %v3892_v47 = vld [vmem:[#allocation9 + $0x18a0] sm:$0xff] }
 0x2af   :  { %9582 = vmatpush2.bf16.msra.mxu0 %v12525_v26  ;;  %v4024_v58 = vld [vmem:[#allocation9 + $0x1cc0] sm:$0xff]  ;;  %v12606_v37 = vcombine.high %v3888_v44, %v3892_v47  ;;  %v12605_v42 = vcombine.low %v3888_v44, %v3892_v47 }
 0x2b0   :  { %9633 = vmatprep.subr.bf16.mxu0 %v12774_v19  ;;  %9595 = vmatpush1.bf16.msra.mxu1 %v12637_v41  ;;  %v4028_v25 = vld [vmem:[#allocation9 + $0x1ce0] sm:$0xff] }
 0x2b1   :  { %9596 = vmatprep.subr.bf16.mxu1 %v12630_v8  ;;  %v3880_v46 = vld [vmem:[#allocation9 + $0x1840] sm:$0xff]  ;;  %v12742_v13 = vcombine.high %v4024_v58, %v4028_v25  ;;  %v12741_v20 = vcombine.low %v4024_v58, %v4028_v25 }
 0x2b2   :  { %9584 = vmatmul.mubr.bf16.vlgmr.msra.gmra.mxu0 %v15714_v48  ;;  %v3884_v4 = vld [vmem:[#allocation9 + $0x1860] sm:$0xff] }
 0x2b3   :  { %9634 = vmatpush1.bf16.msra.mxu0 %v12773_v15  ;;  %v4016_v18 = vld [vmem:[#allocation9 + $0x1c80] sm:$0xff]  ;;  %v12598_v57 = vcombine.high %v3880_v46, %v3884_v4  ;;  %v12597_v45 = vcombine.low %v3880_v46, %v3884_v4 }
 0x2b4   :  { %9635 = vmatprep.subr.bf16.mxu0 %v12766_v34  ;;  %9597 = vmatpush1.bf16.msra.mxu1 %v12629_v16  ;;  %v4020_v55 = vld [vmem:[#allocation9 + $0x1ca0] sm:$0xff] }
 0x2b5   :  { %9598 = vmatprep.subr.bf16.mxu1 %v12622_v51  ;;  %v3872_v21 = vld [vmem:[#allocation9 + $0x1800] sm:$0xff]  ;;  %v12734_v32 = vcombine.high %v4016_v18, %v4020_v55  ;;  %v12733_v43 = vcombine.low %v4016_v18, %v4020_v55 }
 0x2b6   :  { %v3876_v28 = vld [vmem:[#allocation9 + $0x1820] sm:$0xff] }
 0x2b7   :  { %9636 = vmatpush1.bf16.msra.mxu0 %v12765_v40  ;;  %v4008_v61 = vld [vmem:[#allocation9 + $0x1c40] sm:$0xff]  ;;  %v12590_v49 = vcombine.high %v3872_v21, %v3876_v28  ;;  %v12589_v3 = vcombine.low %v3872_v21, %v3876_v28 }
 0x2b8   :  { %9637 = vmatprep.subr.bf16.mxu0 %v12758_v35  ;;  %9599 = vmatpush1.bf16.msra.mxu1 %v12621_v12  ;;  %v4012_v54 = vld [vmem:[#allocation9 + $0x1c60] sm:$0xff] }
 0x2b9   :  { %9600 = vmatprep.subr.bf16.mxu1 %v12614_v62  ;;  %v3992_v30 = vld [vmem:[#allocation9 + $0x1bc0] sm:$0xff]  ;;  %v12726_v29 = vcombine.high %v4008_v61, %v4012_v54  ;;  %v12725_v56 = vcombine.low %v4008_v61, %v4012_v54 }
 0x2ba   :  { %v3996_v59 = vld [vmem:[#allocation9 + $0x1be0] sm:$0xff] }
 0x2bb   :  { %9638 = vmatpush1.bf16.msra.mxu0 %v12757_v31  ;;  %v4000_v26 = vld [vmem:[#allocation9 + $0x1c00] sm:$0xff]  ;;  %v12710_v19 = vcombine.high %v3992_v30, %v3996_v59  ;;  %v12709_v38 = vcombine.low %v3992_v30, %v3996_v59 }
 0x2bc   :  { %9639 = vmatprep.subr.bf16.mxu0 %v12750_v27  ;;  %9601 = vmatpush1.bf16.msra.mxu1 %v12613_v24  ;;  %v4004_v52 = vld [vmem:[#allocation9 + $0x1c20] sm:$0xff] }
 0x2bd   :  { %9602 = vmatprep.subr.bf16.mxu1 %v12606_v37  ;;  %v3984_v41 = vld [vmem:[#allocation9 + $0x1b80] sm:$0xff]  ;;  %v12718_v8 = vcombine.high %v4000_v26, %v4004_v52  ;;  %v12717_v33 = vcombine.low %v4000_v26, %v4004_v52 }
 0x2be   :  { %v3988_v17 = vld [vmem:[#allocation9 + $0x1ba0] sm:$0xff] }
 0x2bf   :  { %9640 = vmatpush1.bf16.msra.mxu0 %v12749_v9  ;;  %v4120_v63 = vld [vmem:[#allocation9 + $0x1fc0] sm:$0xff]  ;;  %v12702_v34 = vcombine.high %v3984_v41, %v3988_v17  ;;  %v12701_v6 = vcombine.low %v3984_v41, %v3988_v17 }
 0x2c0   :  { %9641 = vmatprep.subr.bf16.mxu0 %v12742_v13  ;;  %9603 = vmatpush1.bf16.msra.mxu1 %v12605_v42  ;;  %v4124_v15 = vld [vmem:[#allocation9 + $0x1fe0] sm:$0xff] }
 0x2c1   :  { %9604 = vmatprep.subr.bf16.mxu1 %v12598_v57  ;;  %v3976_v16 = vld [vmem:[#allocation9 + $0x1b40] sm:$0xff]  ;;  %v12838_v51 = vcombine.high %v4120_v63, %v4124_v15  ;;  %v12837_v60 = vcombine.low %v4120_v63, %v4124_v15  ;;  %v15717_v63 = vld [vmem:[#allocation9 + $0x1c8] sm:$0xff] }
 0x2c2   :  { %v3980_v39 = vld [vmem:[#allocation9 + $0x1b60] sm:$0xff]  ;;  %v15719_v15 = vld [vmem:[#allocation9 + $0x1e8] sm:$0xff] }
 0x2c3   :  { %9642 = vmatpush1.bf16.msra.mxu0 %v12741_v20  ;;  %v4112_v2 = vld [vmem:[#allocation9 + $0x1f80] sm:$0xff]  ;;  %v12694_v35 = vcombine.high %v3976_v16, %v3980_v39  ;;  %v12693_v44 = vcombine.low %v3976_v16, %v3980_v39 }
 0x2c4   :  { %9643 = vmatprep.subr.bf16.mxu0 %v12734_v32  ;;  %9605 = vmatpush1.bf16.msra.mxu1 %v12597_v45  ;;  %v4116_v40 = vld [vmem:[#allocation9 + $0x1fa0] sm:$0xff] }
 0x2c5   :  { %9606 = vmatprep.subr.bf16.mxu1 %v12590_v49  ;;  %v3968_v12 = vld [vmem:[#allocation9 + $0x1b00] sm:$0xff]  ;;  %v12830_v62 = vcombine.high %v4112_v2, %v4116_v40  ;;  %v12829_v25 = vcombine.low %v4112_v2, %v4116_v40  ;;  %v11880_v2 = vcombine.high %v15717_v63, %v15719_v15 }
 0x2c6   :  { %v3972_v36 = vld [vmem:[#allocation9 + $0x1b20] sm:$0xff] }
 0x2c7   :  { %9644 = vmatpush1.bf16.msra.mxu0 %v12733_v43  ;;  %v4104_v47 = vld [vmem:[#allocation9 + $0x1f40] sm:$0xff]  ;;  %v12686_v27 = vcombine.high %v3968_v12, %v3972_v36  ;;  %v12685_v46 = vcombine.low %v3968_v12, %v3972_v36 }
 0x2c8   :  { %9645 = vmatprep.subr.bf16.mxu0 %v12726_v29  ;;  %9607 = vmatpush1.bf16.msra.mxu1 %v12589_v3  ;;  %v4108_v31 = vld [vmem:[#allocation9 + $0x1f60] sm:$0xff] }
 0x2c9   :  { %9608 = vmatprep.subr.bf16.mxu1 %v12710_v19  ;;  %v3960_v24 = vld [vmem:[#allocation9 + $0x1ac0] sm:$0xff]  ;;  %v12822_v37 = vcombine.high %v4104_v47, %v4108_v31  ;;  %v12821_v55 = vcombine.low %v4104_v47, %v4108_v31  ;;  %v4130_v19 = vlaneseq }
 0x2ca   :  { %v3964_v58 = vld [vmem:[#allocation9 + $0x1ae0] sm:$0xff] }
 0x2cb   :  { %9646 = vmatpush1.bf16.msra.mxu0 %v12725_v56  ;;  %v4096_v4 = vld [vmem:[#allocation9 + $0x1f00] sm:$0xff]  ;;  %v12678_v13 = vcombine.high %v3960_v24, %v3964_v58  ;;  %v12677_v21 = vcombine.low %v3960_v24, %v3964_v58  ;;  %v15721_v16 = vshrl.u32 %v4130_v19, 7  ;;  %v13284_v58 = vld [vmem:[#allocation7] ss:$0 sm:$0xff] }
 0x2cc   :  { %9647 = vmatprep.subr.bf16.mxu0 %v12718_v8  ;;  %9609 = vmatpush2.bf16.msra.mxu1 %v12709_v38  ;;  %v4100_v9 = vld [vmem:[#allocation9 + $0x1f20] sm:$0xff] }
 0x2cd   :  { %9610 = vmatprep.subr.bf16.mxu1 %v12702_v34  ;;  %v3952_v42 = vld [vmem:[#allocation9 + $0x1a80] sm:$0xff]  ;;  %v12814_v57 = vcombine.high %v4096_v4, %v4100_v9  ;;  %v12813_v54 = vcombine.low %v4096_v4, %v4100_v9 }
 0x2ce   :  { %v3956_v18 = vld [vmem:[#allocation9 + $0x1aa0] sm:$0xff] }
 0x2cf   :  { %9648 = vmatpush1.bf16.msra.mxu0 %v12717_v33  ;;  %v4088_v28 = vld [vmem:[#allocation9 + $0x1ec0] sm:$0xff]  ;;  %v12670_v32 = vcombine.high %v3952_v42, %v3956_v18  ;;  %v12669_v30 = vcombine.low %v3952_v42, %v3956_v18 }
 0x2d0   :  { %9649 = vmatprep.subr.bf16.mxu0 %v12838_v51  ;;  %9611 = vmatpush2.bf16.msra.mxu1 %v12701_v6  ;;  %v4092_v20 = vld [vmem:[#allocation9 + $0x1ee0] sm:$0xff] }
 0x2d1   :  { %9612 = vmatprep.subr.bf16.mxu1 %v12694_v35  ;;  %v3944_v45 = vld [vmem:[#allocation9 + $0x1a40] sm:$0xff]  ;;  %v12806_v49 = vcombine.high %v4088_v28, %v4092_v20  ;;  %v12805_v52 = vcombine.low %v4088_v28, %v4092_v20  ;;  %v4132_v35 = vsub.s32 0, %v15721_v16 }
 0x2d2   :  { %v3948_v61 = vld [vmem:[#allocation9 + $0x1a60] sm:$0xff] }
 0x2d3   :  { %9650 = vmatpush2.bf16.msra.mxu0 %v12837_v60  ;;  %v4080_v59 = vld [vmem:[#allocation9 + $0x1e80] sm:$0xff]  ;;  %v12662_v29 = vcombine.high %v3944_v45, %v3948_v61  ;;  %v12661_v17 = vcombine.low %v3944_v45, %v3948_v61  ;;  %v3289_v60 = vld [vmem:[#allocation9 + $0x5c8] sm:$0xff] }
 0x2d4   :  { %9651 = vmatprep.subr.bf16.mxu0 %v12830_v62  ;;  %9613 = vmatpush2.bf16.msra.mxu1 %v12693_v44  ;;  %v4084_v43 = vld [vmem:[#allocation9 + $0x1ea0] sm:$0xff]  ;;  %v3293_v62 = vld [vmem:[#allocation9 + $0x5e8] sm:$0xff]  ;;  %v4136_v44 = vsub.s32 1, %v15721_v16 }
 0x2d5   :  { %9614 = vmatprep.subr.bf16.mxu1 %v12686_v27  ;;  %v3936_v3 = vld [vmem:[#allocation9 + $0x1a00] sm:$0xff]  ;;  %v12798_v41 = vcombine.high %v4080_v59, %v4084_v43  ;;  %v12797_v34 = vcombine.low %v4080_v59, %v4084_v43 }
 0x2d6   :  { %v3940_v26 = vld [vmem:[#allocation9 + $0x1a20] sm:$0xff] }
 0x2d7   :  { %9652 = vmatpush2.bf16.msra.mxu0 %v12829_v25  ;;  %v4072_v56 = vld [vmem:[#allocation9 + $0x1e40] sm:$0xff]  ;;  %v12654_v38 = vcombine.high %v3936_v3, %v3940_v26  ;;  %v12653_v33 = vcombine.low %v3936_v3, %v3940_v26  ;;  %v3285_v3 = vld [vmem:[#allocation9 + $0x5a8] sm:$0xff] }
 0x2d8   :  { %9653 = vmatprep.subr.bf16.mxu0 %v12822_v37  ;;  %9615 = vmatpush2.bf16.msra.mxu1 %v12685_v46  ;;  %v4076_v8 = vld [vmem:[#allocation9 + $0x1e60] sm:$0xff]  ;;  %v12008_v46 = vcombine.high %v3289_v60, %v3293_v62  ;;  %v3153_v26 = vld [vmem:[#allocation9 + $0x188] sm:$0xff] }
 0x2d9   :  { %9616 = vmatprep.subr.bf16.mxu1 %v12678_v13  ;;  %v12790_v39 = vcombine.high %v4072_v56, %v4076_v8  ;;  %v4064_v51 = vld [vmem:[#allocation9 + $0x1e00] sm:$0xff]  ;;  %v12789_v40 = vcombine.low %v4072_v56, %v4076_v8  ;;  %v11879_v8 = vcombine.low %v15717_v63, %v15719_v15 }
 0x2da   :  { %v4068_v6 = vld [vmem:[#allocation9 + $0x1e20] sm:$0xff] }
 0x2db   :  { %9654 = vmatpush2.bf16.msra.mxu0 %v12821_v55  ;;  %v12782_v12 = vcombine.high %v4064_v51, %v4068_v6  ;;  %v4128_v36 = vld [vmem:[#allocation10] sm:$0xff]  ;;  %v12781_v31 = vcombine.low %v4064_v51, %v4068_v6 }
 0x2dc   :  { %9655 = vmatprep.subr.bf16.mxu0 %v12814_v57  ;;  %9617 = vmatpush2.bf16.msra.mxu1 %v12677_v21  ;;  %v4133_v27 = vrot.slane %v4128_v36, %v4132_v35  ;;  %v4137_v4 = vrot.slane %v4128_v36, %v4136_v44  ;;  %v3145_v35 = vld [vmem:[#allocation9 + $0x148] sm:$0xff] }
 0x2dd   :  { %9618 = vmatprep.subr.bf16.mxu1 %v12670_v32 }
 0x2df   :  { %9656 = vmatpush2.bf16.msra.mxu0 %v12813_v54 }
 0x2e0   :  { %9657 = vmatprep.subr.bf16.mxu0 %v12806_v49  ;;  %9619 = vmatpush2.bf16.msra.mxu1 %v12669_v30  ;;  %v3281_v30 = vld [vmem:[#allocation9 + $0x588] sm:$0xff] }
 0x2e1   :  { %9620 = vmatprep.subr.bf16.mxu1 %v12662_v29  ;;  %v12007_v29 = vcombine.low %v3289_v60, %v3293_v62  ;;  %v12000_v51 = vcombine.high %v3281_v30, %v3285_v3  ;;  %v3265_v60 = vld [vmem:[#allocation9 + $0x508] sm:$0xff] }
 0x2e2   :  { %v3269_v62 = vld [vmem:[#allocation9 + $0x528] sm:$0xff] }
 0x2e3   :  { %9658 = vmatpush2.bf16.msra.mxu0 %v12805_v52  ;;  %v3157_v52 = vld [vmem:[#allocation9 + $0x1a8] sm:$0xff] }
 0x2e4   :  { %9659 = vmatprep.subr.bf16.mxu0 %v12798_v41  ;;  %9621 = vmatpush2.bf16.msra.mxu1 %v12661_v17  ;;  %v11871_v36 = vcombine.low %v3153_v26, %v3157_v52 }
 0x2e5   :  { %9622 = vmatprep.subr.bf16.mxu1 %v12654_v38  ;;  %v3273_v38 = vld [vmem:[#allocation9 + $0x548] sm:$0xff] }
 0x2e7   :  { %9660 = vmatpush2.bf16.msra.mxu0 %v12797_v34  ;;  %v3277_v34 = vld [vmem:[#allocation9 + $0x568] sm:$0xff] }
 0x2e8   :  { %9661 = vmatprep.subr.bf16.mxu0 %v12790_v39  ;;  %9623 = vmatpush2.bf16.msra.mxu1 %v12653_v33  ;;  %v11992_v15 = vcombine.high %v3273_v38, %v3277_v34 }
 0x2e9   :  { %9674 = vmatprep.subr.bf16.mxu1 %v11880_v2  ;;  %v11872_v2 = vcombine.high %v3153_v26, %v3157_v52 }
 0x2ea   :  { %v13198_v47 = vpop.f32.mrf.mxu0 }
 0x2eb   :  { %9662 = vmatpush2.bf16.msra.mxu0 %v12789_v40  ;;  %v9380_v24 = vpop.f32.mrf.mxu1  ;;  %v2994_v25 = vadd.f32 %v13284_v58, %v13198_v47  ;;  %v11999_v40 = vcombine.low %v3281_v30, %v3285_v3  ;;  %v11991_v47 = vcombine.low %v3273_v38, %v3277_v34  ;;  %v3117_v3 = vld [vmem:[#allocation9 + $0x68] sm:$0xff] }
 0x2ec   :  { %v2985_v37 = vpop.f32.mrf.mxu0  ;;  %9663 = vmatprep.subr.bf16.mxu0 %v12782_v12  ;;  %v9381_v55 = vadd.f32 %v9380_v24, %v4133_v27  ;;  %v3149_v12 = vld [vmem:[#allocation9 + $0x168] sm:$0xff]  ;;  %v11984_v24 = vcombine.high %v3265_v60, %v3269_v62 }
 0x2ed   :  { %v9382_v9 = vpop.f32.mrf.mxu1  ;;  %v2986_v13 = vadd.f32 %v13284_v58, %v2985_v37  ;;  %v3014_v21 = vmax.f32 %v2994_v25, 0.0  ;;  %v11864_v44 = vcombine.high %v3145_v35, %v3149_v12  ;;  %v3141_v27 = vld [vmem:[#allocation9 + $0x128] sm:$0xff] }
 0x2ee   :  { %v13199_v42 = vpop.f32.mrf.mxu0  ;;  %v9383_v45 = vadd.f32 %v9382_v9, %v4137_v4  ;;  %v3257_v25 = vld [vmem:[#allocation9 + $0x4c8] sm:$0xff]  ;;  %v11983_v4 = vcombine.low %v3265_v60, %v3269_v62 }
 0x2ef   :  { %v2997_v18 = vadd.f32 %v13284_v58, %v13199_v42  ;;  %9664 = vmatpush2.bf16.msra.mxu0 %v12781_v31  ;;  %v9384_v57 = vpop.f32.mrf.mxu1  ;;  %v3012_v54 = vmax.f32 %v2986_v13, 0.0  ;;  %v15731_v41 = vpack.c.bf16 %v3014_v21, %v3014_v21  ;;  %v3137_v31 = vld [vmem:[#allocation9 + $0x108] sm:$0xff] }
 0x2f0   :  { %v2988_v28 = vpop.f32.mrf.mxu0  ;;  %9715 = vmatprep.subr.bf16.mxu0 %v12008_v46  ;;  %v3261_v37 = vld [vmem:[#allocation9 + $0x4e8] sm:$0xff]  ;;  %v11856_v46 = vcombine.high %v3137_v31, %v3141_v27 }
 0x2f1   :  { %v3015_v20 = vmax.f32 %v2997_v18, 0.0  ;;  %v2989_v32 = vadd.f32 %v13284_v58, %v2988_v28  ;;  %v9385_v61 = vpop.f32.mrf.mxu1  ;;  %v15740_v33 = vpack.c.bf16 %v3012_v54, %v3012_v54  ;;  %v11863_v58 = vcombine.low %v3145_v35, %v3149_v12  ;;  %v3129_v9 = vld [vmem:[#allocation9 + $0xc8] sm:$0xff] }
 0x2f2   :  { %v9421_v49 = vpop.f32.mrf.mxu0  ;;  %v3133_v13 = vld [vmem:[#allocation9 + $0xe8] sm:$0xff]  ;;  %v11976_v42 = vcombine.high %v3257_v25, %v3261_v37  ;;  %v11855_v18 = vcombine.low %v3137_v31, %v3141_v27  ;;  %v11975_v28 = vcombine.low %v3257_v25, %v3261_v37 }
 0x2f3   :  { %v15727_v59 = vpack.c.bf16 %v3015_v20, %v3015_v20  ;;  %v3013_v43 = vmax.f32 %v2989_v32, 0.0  ;;  %v15729_v19 = vadd.f32 %v9421_v49, %v9381_v55  ;;  %v3249_v55 = vld [vmem:[#allocation9 + $0x488] sm:$0xff]  ;;  %v11848_v21 = vcombine.high %v3129_v9, %v3133_v13 }
 0x2f4   :  { %v9423_v17 = vpop.f32.mrf.mxu0  ;;  %v3253_v57 = vld [vmem:[#allocation9 + $0x4a8] sm:$0xff]  ;;  %v11847_v61 = vcombine.low %v3129_v9, %v3133_v13 }
 0x2f5   :  { %v15733_v56 = vpack.c.bf16 %v3013_v43, %v3013_v43  ;;  %9665 = vmatprep.mubr.bf16.mxu0 %v15727_v59  ;;  %v15738_v39 = vadd.f32 %v9423_v17, %v9383_v45  ;;  %v3121_v20 = vld [vmem:[#allocation9 + $0x88] sm:$0xff]  ;;  %v11968_v45 = vcombine.high %v3249_v55, %v3253_v57  ;;  %v11967_v43 = vcombine.low %v3249_v55, %v3253_v57 }
 0x2f6   :  { %9666 = vmatmul.mubr.bf16.vlgmr.msra.gmra.mxu0 %v15731_v41  ;;  %v9425_v6 = vpop.f32.mrf.mxu0  ;;  %v3125_v32 = vld [vmem:[#allocation9 + $0xa8] sm:$0xff] }
 0x2f7   :  { %9624 = vmatprep.mubr.bf16.mxu1 %v15733_v56  ;;  %9716 = vmatpush1.bf16.msra.mxu0 %v12007_v29  ;;  %v3241_v54 = vld [vmem:[#allocation9 + $0x448] sm:$0xff]  ;;  %v11840_v30 = vcombine.high %v3121_v20, %v3125_v32  ;;  %v11839_v52 = vcombine.low %v3121_v20, %v3125_v32 }
 0x2f8   :  { %9747 = vmatprep.mubr.bf16.mxu0 %v15663_v23  ;;  %9625 = vmatmul.mubr.bf16.vlgmr.msra.gmra.mxu1 %v15740_v33  ;;  %v9426_v63 = vpop.f32.mrf.mxu0  ;;  %v3245_v49 = vld [vmem:[#allocation9 + $0x468] sm:$0xff] }
 0x2f9   :  { %9675 = vmatpush1.bf16.msra.mxu1 %v11879_v8  ;;  %9706 = vmatprep.mubr.bf16.mxu1 %v15656_v1  ;;  %v3113_v29 = vld [vmem:[#allocation9 + $0x48] sm:$0xff]  ;;  %v11960_v26 = vcombine.high %v3241_v54, %v3245_v49  ;;  %v11959_v34 = vcombine.low %v3241_v54, %v3245_v49 }
 0x2fa   :  { %9717 = vmatprep.subr.bf16.mxu0 %v12000_v51  ;;  %9676 = vmatprep.subr.bf16.mxu1 %v11872_v2  ;;  %v3233_v17 = vld [vmem:[#allocation9 + $0x408] sm:$0xff]  ;;  %v11832_v38 = vcombine.high %v3113_v29, %v3117_v3 }
 0x2fb   :  { %9718 = vmatpush1.bf16.msra.mxu0 %v11999_v40  ;;  %v3237_v8 = vld [vmem:[#allocation9 + $0x428] sm:$0xff]  ;;  %v11831_v40 = vcombine.low %v3113_v29, %v3117_v3 }
 0x2fc   :  { %9719 = vmatprep.subr.bf16.mxu0 %v11992_v15  ;;  %v3105_v51 = vld [vmem:[#allocation9 + $0x8] sm:$0xff]  ;;  %v11952_v2 = vcombine.high %v3233_v17, %v3237_v8  ;;  %v11951_v15 = vcombine.low %v3233_v17, %v3237_v8 }
 0x2fd   :  { %9677 = vmatpush1.bf16.msra.mxu1 %v11871_v36  ;;  %v3109_v6 = vld [vmem:[#allocation9 + $0x28] sm:$0xff] }
 0x2fe   :  { %9678 = vmatprep.subr.bf16.mxu1 %v11864_v44  ;;  %v3353_v35 = vld [vmem:[#allocation9 + $0x7c8] sm:$0xff]  ;;  %v11824_v63 = vcombine.high %v3105_v51, %v3109_v6  ;;  %v11823_v44 = vcombine.low %v3105_v51, %v3109_v6 }
 0x2ff   :  { %9720 = vmatpush1.bf16.msra.mxu0 %v11991_v47  ;;  %v3357_v12 = vld [vmem:[#allocation9 + $0x7e8] sm:$0xff] }
 0x300   :  { %9721 = vmatprep.subr.bf16.mxu0 %v11984_v24  ;;  %v3225_v36 = vld [vmem:[#allocation9 + $0x3c8] sm:$0xff]  ;;  %v12072_v62 = vcombine.high %v3353_v35, %v3357_v12  ;;  %v12071_v24 = vcombine.low %v3353_v35, %v3357_v12 }
 0x301   :  { %9679 = vmatpush1.bf16.msra.mxu1 %v11863_v58  ;;  %v3229_v60 = vld [vmem:[#allocation9 + $0x3e8] sm:$0xff] }
 0x302   :  { %9680 = vmatprep.subr.bf16.mxu1 %v11856_v46  ;;  %v3345_v47 = vld [vmem:[#allocation9 + $0x788] sm:$0xff]  ;;  %v11944_v27 = vcombine.high %v3225_v36, %v3229_v60  ;;  %v11943_v46 = vcombine.low %v3225_v36, %v3229_v60 }
 0x303   :  { %9722 = vmatpush1.bf16.msra.mxu0 %v11983_v4  ;;  %v3349_v31 = vld [vmem:[#allocation9 + $0x7a8] sm:$0xff] }
 0x304   :  { %9723 = vmatprep.subr.bf16.mxu0 %v11976_v42  ;;  %v3217_v58 = vld [vmem:[#allocation9 + $0x388] sm:$0xff]  ;;  %v12064_v37 = vcombine.high %v3345_v47, %v3349_v31  ;;  %v12063_v42 = vcombine.low %v3345_v47, %v3349_v31 }
 0x305   :  { %9681 = vmatpush1.bf16.msra.mxu1 %v11855_v18  ;;  %v3221_v25 = vld [vmem:[#allocation9 + $0x3a8] sm:$0xff] }
 0x306   :  { %9682 = vmatprep.subr.bf16.mxu1 %v11848_v21  ;;  %v3337_v4 = vld [vmem:[#allocation9 + $0x748] sm:$0xff]  ;;  %v11936_v13 = vcombine.high %v3217_v58, %v3221_v25  ;;  %v11935_v21 = vcombine.low %v3217_v58, %v3221_v25 }
 0x307   :  { %9724 = vmatpush1.bf16.msra.mxu0 %v11975_v28  ;;  %v3341_v9 = vld [vmem:[#allocation9 + $0x768] sm:$0xff] }
 0x308   :  { %9725 = vmatprep.subr.bf16.mxu0 %v11968_v45  ;;  %v3209_v18 = vld [vmem:[#allocation9 + $0x348] sm:$0xff]  ;;  %v12056_v57 = vcombine.high %v3337_v4, %v3341_v9  ;;  %v12055_v45 = vcombine.low %v3337_v4, %v3341_v9 }
 0x309   :  { %9683 = vmatpush1.bf16.msra.mxu1 %v11847_v61  ;;  %v3213_v55 = vld [vmem:[#allocation9 + $0x368] sm:$0xff] }
 0x30a   :  { %9684 = vmatprep.subr.bf16.mxu1 %v11840_v30  ;;  %v3329_v28 = vld [vmem:[#allocation9 + $0x708] sm:$0xff]  ;;  %v11928_v32 = vcombine.high %v3209_v18, %v3213_v55  ;;  %v11927_v30 = vcombine.low %v3209_v18, %v3213_v55 }
 0x30b   :  { %9726 = vmatpush1.bf16.msra.mxu0 %v11967_v43  ;;  %v3333_v20 = vld [vmem:[#allocation9 + $0x728] sm:$0xff] }
 0x30c   :  { %9727 = vmatprep.subr.bf16.mxu0 %v11960_v26  ;;  %v3201_v61 = vld [vmem:[#allocation9 + $0x308] sm:$0xff]  ;;  %v12048_v49 = vcombine.high %v3329_v28, %v3333_v20  ;;  %v12047_v26 = vcombine.low %v3329_v28, %v3333_v20 }
 0x30d   :  { %9685 = vmatpush1.bf16.msra.mxu1 %v11839_v52  ;;  %v3205_v54 = vld [vmem:[#allocation9 + $0x328] sm:$0xff] }
 0x30e   :  { %9686 = vmatprep.subr.bf16.mxu1 %v11832_v38  ;;  %v3321_v43 = vld [vmem:[#allocation9 + $0x6c8] sm:$0xff]  ;;  %v11920_v3 = vcombine.high %v3201_v61, %v3205_v54  ;;  %v11919_v38 = vcombine.low %v3201_v61, %v3205_v54 }
 0x30f   :  { %9728 = vmatpush1.bf16.msra.mxu0 %v11959_v34  ;;  %v3325_v29 = vld [vmem:[#allocation9 + $0x6e8] sm:$0xff] }
 0x310   :  { %9729 = vmatprep.subr.bf16.mxu0 %v11952_v2  ;;  %v3193_v52 = vld [vmem:[#allocation9 + $0x2c8] sm:$0xff]  ;;  %v12040_v8 = vcombine.high %v3321_v43, %v3325_v29  ;;  %v12039_v2 = vcombine.low %v3321_v43, %v3325_v29 }
 0x311   :  { %9687 = vmatpush1.bf16.msra.mxu1 %v11831_v40  ;;  %v3197_v17 = vld [vmem:[#allocation9 + $0x2e8] sm:$0xff] }
 0x312   :  { %9688 = vmatprep.subr.bf16.mxu1 %v11824_v63  ;;  %v3313_v34 = vld [vmem:[#allocation9 + $0x688] sm:$0xff]  ;;  %v11912_v6 = vcombine.high %v3193_v52, %v3197_v17  ;;  %v11911_v63 = vcombine.low %v3193_v52, %v3197_v17 }
 0x313   :  { %9730 = vmatpush1.bf16.msra.mxu0 %v11951_v15  ;;  %v3317_v51 = vld [vmem:[#allocation9 + $0x6a8] sm:$0xff] }
 0x314   :  { %9731 = vmatprep.subr.bf16.mxu0 %v12072_v62  ;;  %v3185_v40 = vld [vmem:[#allocation9 + $0x288] sm:$0xff]  ;;  %v12032_v12 = vcombine.high %v3313_v34, %v3317_v51  ;;  %v12031_v62 = vcombine.low %v3313_v34, %v3317_v51 }
 0x315   :  { %9689 = vmatpush1.bf16.msra.mxu1 %v11823_v44  ;;  %v3189_v35 = vld [vmem:[#allocation9 + $0x2a8] sm:$0xff] }
 0x316   :  { %9690 = vmatprep.subr.bf16.mxu1 %v11944_v27  ;;  %v3305_v15 = vld [vmem:[#allocation9 + $0x648] sm:$0xff]  ;;  %v11904_v60 = vcombine.high %v3185_v40, %v3189_v35  ;;  %v11903_v27 = vcombine.low %v3185_v40, %v3189_v35 }
 0x317   :  { %9732 = vmatpush2.bf16.msra.mxu0 %v12071_v24  ;;  %v3309_v36 = vld [vmem:[#allocation9 + $0x668] sm:$0xff] }
 0x318   :  { %9733 = vmatprep.subr.bf16.mxu0 %v12064_v37  ;;  %v3177_v44 = vld [vmem:[#allocation9 + $0x248] sm:$0xff]  ;;  %v12024_v31 = vcombine.high %v3305_v15, %v3309_v36  ;;  %v12023_v37 = vcombine.low %v3305_v15, %v3309_v36 }
 0x319   :  { %9691 = vmatpush2.bf16.msra.mxu1 %v11943_v46  ;;  %v3181_v47 = vld [vmem:[#allocation9 + $0x268] sm:$0xff] }
 0x31a   :  { %9692 = vmatprep.subr.bf16.mxu1 %v11936_v13  ;;  %v3297_v24 = vld [vmem:[#allocation9 + $0x608] sm:$0xff]  ;;  %v11896_v25 = vcombine.high %v3177_v44, %v3181_v47  ;;  %v11895_v18 = vcombine.low %v3177_v44, %v3181_v47 }
 0x31b   :  { %9734 = vmatpush2.bf16.msra.mxu0 %v12063_v42  ;;  %v3301_v58 = vld [vmem:[#allocation9 + $0x628] sm:$0xff] }
 0x31c   :  { %9735 = vmatprep.subr.bf16.mxu0 %v12056_v57  ;;  %v3169_v46 = vld [vmem:[#allocation9 + $0x208] sm:$0xff]  ;;  %v12016_v13 = vcombine.high %v3297_v24, %v3301_v58 }
 0x31d   :  { %9693 = vmatpush2.bf16.msra.mxu1 %v11935_v21  ;;  %v3173_v4 = vld [vmem:[#allocation9 + $0x228] sm:$0xff] }
 0x31e   :  { %9694 = vmatprep.subr.bf16.mxu1 %v11928_v32  ;;  %v3545_v55 = vld [vmem:[#allocation9 + $0xdc8] sm:$0xff]  ;;  %v11888_v28 = vcombine.high %v3169_v46, %v3173_v4  ;;  %v12015_v32 = vcombine.low %v3297_v24, %v3301_v58 }
 0x31f   :  { %9736 = vmatpush2.bf16.msra.mxu0 %v12055_v45  ;;  %v3549_v57 = vld [vmem:[#allocation9 + $0xde8] sm:$0xff] }
 0x320   :  { %9737 = vmatprep.subr.bf16.mxu0 %v12048_v49  ;;  %v3417_v45 = vld [vmem:[#allocation9 + $0x9c8] sm:$0xff]  ;;  %v12264_v49 = vcombine.high %v3545_v55, %v3549_v57  ;;  %v12263_v52 = vcombine.low %v3545_v55, %v3549_v57 }
 0x321   :  { %9695 = vmatpush2.bf16.msra.mxu1 %v11927_v30  ;;  %v3421_v61 = vld [vmem:[#allocation9 + $0x9e8] sm:$0xff]  ;;  %v11887_v30 = vcombine.low %v3169_v46, %v3173_v4 }
 0x322   :  { %9696 = vmatprep.subr.bf16.mxu1 %v11920_v3  ;;  %v3537_v43 = vld [vmem:[#allocation9 + $0xd88] sm:$0xff]  ;;  %v12135_v51 = vcombine.low %v3417_v45, %v3421_v61 }
 0x323   :  { %9738 = vmatpush2.bf16.msra.mxu0 %v12047_v26  ;;  %v12136_v26 = vcombine.high %v3417_v45, %v3421_v61  ;;  %v3409_v17 = vld [vmem:[#allocation9 + $0x988] sm:$0xff] }
 0x324   :  { %9739 = vmatprep.subr.bf16.mxu0 %v12040_v8  ;;  %v3413_v8 = vld [vmem:[#allocation9 + $0x9a8] sm:$0xff] }
 0x325   :  { %9697 = vmatpush2.bf16.msra.mxu1 %v11919_v38  ;;  %v3401_v15 = vld [vmem:[#allocation9 + $0x948] sm:$0xff]  ;;  %v12127_v44 = vcombine.low %v3409_v17, %v3413_v8 }
 0x326   :  { %9698 = vmatprep.subr.bf16.mxu1 %v11912_v6  ;;  %v3529_v6 = vld [vmem:[#allocation9 + $0xd48] sm:$0xff] }
 0x327   :  { %9740 = vmatpush2.bf16.msra.mxu0 %v12039_v2  ;;  %v3533_v2 = vld [vmem:[#allocation9 + $0xd68] sm:$0xff] }
 0x328   :  { %9741 = vmatprep.subr.bf16.mxu0 %v12032_v12  ;;  %v12128_v12 = vcombine.high %v3409_v17, %v3413_v8  ;;  %v3405_v36 = vld [vmem:[#allocation9 + $0x968] sm:$0xff]  ;;  %v12247_v24 = vcombine.low %v3529_v6, %v3533_v2 }
 0x329   :  { %9699 = vmatpush2.bf16.msra.mxu1 %v11911_v63  ;;  %v3521_v47 = vld [vmem:[#allocation9 + $0xd08] sm:$0xff]  ;;  %v12119_v46 = vcombine.low %v3401_v15, %v3405_v36 }
 0x32a   :  { %9700 = vmatprep.subr.bf16.mxu1 %v11904_v60  ;;  %v3393_v58 = vld [vmem:[#allocation9 + $0x908] sm:$0xff] }
 0x32b   :  { %9742 = vmatpush2.bf16.msra.mxu0 %v12031_v62  ;;  %v9462_v9 = vpop.f32.mrf.mxu1  ;;  %v12248_v62 = vcombine.high %v3529_v6, %v3533_v2  ;;  %v3513_v4 = vld [vmem:[#allocation9 + $0xcc8] sm:$0xff] }
 0x32c   :  { %9743 = vmatprep.subr.bf16.mxu0 %v12024_v31  ;;  %v9463_v42 = vadd.f32 %v9462_v9, %v15729_v19  ;;  %v3541_v19 = vld [vmem:[#allocation9 + $0xda8] sm:$0xff] }
 0x32d   :  { %9701 = vmatpush2.bf16.msra.mxu1 %v11903_v27  ;;  %v9464_v21 = vpop.f32.mrf.mxu1  ;;  %v12256_v34 = vcombine.high %v3537_v43, %v3541_v19  ;;  %v12255_v63 = vcombine.low %v3537_v43, %v3541_v19  ;;  %v3525_v31 = vld [vmem:[#allocation9 + $0xd28] sm:$0xff]  ;;  %v12120_v27 = vcombine.high %v3401_v15, %v3405_v36 }
 0x32e   :  { %9702 = vmatprep.subr.bf16.mxu1 %v11896_v25  ;;  %v9465_v20 = vadd.f32 %v9464_v21, %v15738_v39  ;;  %v3397_v25 = vld [vmem:[#allocation9 + $0x928] sm:$0xff] }
 0x32f   :  { %9744 = vmatpush2.bf16.msra.mxu0 %v12023_v37  ;;  %v9466_v54 = vpop.f32.mrf.mxu1  ;;  %v12240_v37 = vcombine.high %v3521_v47, %v3525_v31  ;;  %v3517_v9 = vld [vmem:[#allocation9 + $0xce8] sm:$0xff]  ;;  %v12111_v21 = vcombine.low %v3393_v58, %v3397_v25 }
 0x330   :  { %9745 = vmatprep.subr.bf16.mxu0 %v12016_v13  ;;  %v12112_v13 = vcombine.high %v3393_v58, %v3397_v25  ;;  %v3389_v55 = vld [vmem:[#allocation9 + $0x8e8] sm:$0xff]  ;;  %v12232_v57 = vcombine.high %v3513_v4, %v3517_v9  ;;  %v12231_v45 = vcombine.low %v3513_v4, %v3517_v9 }
 0x331   :  { %9703 = vmatpush2.bf16.msra.mxu1 %v11895_v18  ;;  %v9467_v29 = vpop.f32.mrf.mxu1  ;;  %v3385_v18 = vld [vmem:[#allocation9 + $0x8c8] sm:$0xff] }
 0x332   :  { %9704 = vmatprep.subr.bf16.mxu1 %v11888_v28  ;;  %v9503_v3 = vpop.f32.mrf.mxu0  ;;  %v3505_v28 = vld [vmem:[#allocation9 + $0xc88] sm:$0xff] }
 0x333   :  { %9746 = vmatpush2.bf16.msra.mxu0 %v12015_v32  ;;  %v15749_v39 = vadd.f32 %v9503_v3, %v9463_v42  ;;  %v12239_v42 = vcombine.low %v3521_v47, %v3525_v31  ;;  %v12104_v32 = vcombine.high %v3385_v18, %v3389_v55  ;;  %v3377_v61 = vld [vmem:[#allocation9 + $0x888] sm:$0xff] }
 0x334   :  { %9797 = vmatprep.subr.bf16.mxu0 %v12264_v49  ;;  %v9505_v38 = vpop.f32.mrf.mxu0  ;;  %v3381_v54 = vld [vmem:[#allocation9 + $0x8a8] sm:$0xff] }
 0x335   :  { %9705 = vmatpush2.bf16.msra.mxu1 %v11887_v30  ;;  %v15751_v40 = vadd.f32 %v9505_v38, %v9465_v20  ;;  %v3509_v20 = vld [vmem:[#allocation9 + $0xca8] sm:$0xff]  ;;  %v12103_v30 = vcombine.low %v3385_v18, %v3389_v55  ;;  %v12096_v29 = vcombine.high %v3377_v61, %v3381_v54  ;;  %v12095_v8 = vcombine.low %v3377_v61, %v3381_v54 }
 0x336   :  { %9748 = vmatmul.mubr.bf16.vlgmr.msra.gmra.mxu0 %v15675_v5  ;;  %9756 = vmatprep.subr.bf16.mxu1 %v12136_v26  ;;  %v9507_v35 = vpop.f32.mrf.mxu0  ;;  %v12224_v49 = vcombine.high %v3505_v28, %v3509_v20  ;;  %v3497_v43 = vld [vmem:[#allocation9 + $0xc48] sm:$0xff]  ;;  %v12223_v3 = vcombine.low %v3505_v28, %v3509_v20 }
 0x337   :  { %9798 = vmatpush1.bf16.msra.mxu0 %v12263_v52  ;;  %9829 = vmatprep.mubr.bf16.mxu0 %v15679_v22  ;;  %v3501_v19 = vld [vmem:[#allocation9 + $0xc68] sm:$0xff] }
 0x338   :  { %9707 = vmatmul.mubr.bf16.vlgmr.msra.gmra.mxu1 %v15667_v0  ;;  %9799 = vmatprep.subr.bf16.mxu0 %v12256_v34  ;;  %v9508_v60 = vpop.f32.mrf.mxu0  ;;  %v3369_v26 = vld [vmem:[#allocation9 + $0x848] sm:$0xff]  ;;  %v12216_v17 = vcombine.high %v3497_v43, %v3501_v19  ;;  %v12215_v6 = vcombine.low %v3497_v43, %v3501_v19 }
 0x339   :  { %9757 = vmatpush1.bf16.msra.mxu1 %v12135_v51  ;;  %9788 = vmatprep.mubr.bf16.mxu1 %v15681_v53  ;;  %v3373_v52 = vld [vmem:[#allocation9 + $0x868] sm:$0xff] }
 0x33a   :  { %9758 = vmatprep.subr.bf16.mxu1 %v12128_v12  ;;  %v3489_v38 = vld [vmem:[#allocation9 + $0xc08] sm:$0xff]  ;;  %v12088_v51 = vcombine.high %v3369_v26, %v3373_v52 }
 0x33b   :  { %9800 = vmatpush1.bf16.msra.mxu0 %v12255_v63  ;;  %v3493_v34 = vld [vmem:[#allocation9 + $0xc28] sm:$0xff]  ;;  %v12087_v63 = vcombine.low %v3369_v26, %v3373_v52 }
 0x33c   :  { %9801 = vmatprep.subr.bf16.mxu0 %v12248_v62  ;;  %v3361_v2 = vld [vmem:[#allocation9 + $0x808] sm:$0xff]  ;;  %v12208_v12 = vcombine.high %v3489_v38, %v3493_v34  ;;  %v12207_v62 = vcombine.low %v3489_v38, %v3493_v34 }
 0x33d   :  { %9759 = vmatpush1.bf16.msra.mxu1 %v12127_v44  ;;  %v3365_v35 = vld [vmem:[#allocation9 + $0x828] sm:$0xff] }
 0x33e   :  { %9760 = vmatprep.subr.bf16.mxu1 %v12120_v27  ;;  %v3609_v15 = vld [vmem:[#allocation9 + $0xfc8] sm:$0xff]  ;;  %v12080_v60 = vcombine.high %v3361_v2, %v3365_v35  ;;  %v12079_v27 = vcombine.low %v3361_v2, %v3365_v35 }
 0x33f   :  { %9802 = vmatpush1.bf16.msra.mxu0 %v12247_v24  ;;  %v3613_v36 = vld [vmem:[#allocation9 + $0xfe8] sm:$0xff] }
 0x340   :  { %9803 = vmatprep.subr.bf16.mxu0 %v12240_v37  ;;  %v3481_v44 = vld [vmem:[#allocation9 + $0xbc8] sm:$0xff]  ;;  %v12328_v31 = vcombine.high %v3609_v15, %v3613_v36  ;;  %v12327_v37 = vcombine.low %v3609_v15, %v3613_v36 }
 0x341   :  { %9761 = vmatpush1.bf16.msra.mxu1 %v12119_v46  ;;  %v3485_v47 = vld [vmem:[#allocation9 + $0xbe8] sm:$0xff] }
 0x342   :  { %9762 = vmatprep.subr.bf16.mxu1 %v12112_v13  ;;  %v3601_v24 = vld [vmem:[#allocation9 + $0xf88] sm:$0xff]  ;;  %v12200_v25 = vcombine.high %v3481_v44, %v3485_v47  ;;  %v12199_v13 = vcombine.low %v3481_v44, %v3485_v47 }
 0x343   :  { %9804 = vmatpush1.bf16.msra.mxu0 %v12239_v42  ;;  %v3605_v58 = vld [vmem:[#allocation9 + $0xfa8] sm:$0xff] }
 0x344   :  { %9805 = vmatprep.subr.bf16.mxu0 %v12232_v57  ;;  %v3473_v46 = vld [vmem:[#allocation9 + $0xb88] sm:$0xff]  ;;  %v12320_v9 = vcombine.high %v3601_v24, %v3605_v58  ;;  %v12319_v57 = vcombine.low %v3601_v24, %v3605_v58 }
 0x345   :  { %9763 = vmatpush1.bf16.msra.mxu1 %v12111_v21  ;;  %v3477_v4 = vld [vmem:[#allocation9 + $0xba8] sm:$0xff] }
 0x346   :  { %9764 = vmatprep.subr.bf16.mxu1 %v12104_v32  ;;  %v3593_v42 = vld [vmem:[#allocation9 + $0xf48] sm:$0xff]  ;;  %v12192_v55 = vcombine.high %v3473_v46, %v3477_v4  ;;  %v12191_v32 = vcombine.low %v3473_v46, %v3477_v4 }
 0x347   :  { %9806 = vmatpush1.bf16.msra.mxu0 %v12231_v45  ;;  %v3597_v18 = vld [vmem:[#allocation9 + $0xf68] sm:$0xff] }
 0x348   :  { %9807 = vmatprep.subr.bf16.mxu0 %v12224_v49  ;;  %v3465_v21 = vld [vmem:[#allocation9 + $0xb48] sm:$0xff]  ;;  %v12312_v20 = vcombine.high %v3593_v42, %v3597_v18  ;;  %v12311_v49 = vcombine.low %v3593_v42, %v3597_v18 }
 0x349   :  { %9765 = vmatpush1.bf16.msra.mxu1 %v12103_v30  ;;  %v3469_v28 = vld [vmem:[#allocation9 + $0xb68] sm:$0xff] }
 0x34a   :  { %9766 = vmatprep.subr.bf16.mxu1 %v12096_v29  ;;  %v3585_v45 = vld [vmem:[#allocation9 + $0xf08] sm:$0xff]  ;;  %v12184_v54 = vcombine.high %v3465_v21, %v3469_v28  ;;  %v12183_v29 = vcombine.low %v3465_v21, %v3469_v28 }
 0x34b   :  { %9808 = vmatpush1.bf16.msra.mxu0 %v12223_v3  ;;  %v3589_v61 = vld [vmem:[#allocation9 + $0xf28] sm:$0xff] }
 0x34c   :  { %9809 = vmatprep.subr.bf16.mxu0 %v12216_v17  ;;  %v3457_v30 = vld [vmem:[#allocation9 + $0xb08] sm:$0xff]  ;;  %v12304_v19 = vcombine.high %v3585_v45, %v3589_v61  ;;  %v12303_v17 = vcombine.low %v3585_v45, %v3589_v61 }
 0x34d   :  { %9767 = vmatpush1.bf16.msra.mxu1 %v12095_v8  ;;  %v3461_v43 = vld [vmem:[#allocation9 + $0xb28] sm:$0xff] }
 0x34e   :  { %9768 = vmatprep.subr.bf16.mxu1 %v12088_v51  ;;  %v3577_v3 = vld [vmem:[#allocation9 + $0xec8] sm:$0xff]  ;;  %v12176_v52 = vcombine.high %v3457_v30, %v3461_v43  ;;  %v12175_v51 = vcombine.low %v3457_v30, %v3461_v43 }
 0x34f   :  { %9810 = vmatpush1.bf16.msra.mxu0 %v12215_v6  ;;  %v3581_v26 = vld [vmem:[#allocation9 + $0xee8] sm:$0xff] }
 0x350   :  { %9811 = vmatprep.subr.bf16.mxu0 %v12208_v12  ;;  %v3449_v8 = vld [vmem:[#allocation9 + $0xac8] sm:$0xff]  ;;  %v12296_v34 = vcombine.high %v3577_v3, %v3581_v26  ;;  %v12295_v12 = vcombine.low %v3577_v3, %v3581_v26 }
 0x351   :  { %9769 = vmatpush1.bf16.msra.mxu1 %v12087_v63  ;;  %v3453_v38 = vld [vmem:[#allocation9 + $0xae8] sm:$0xff] }
 0x352   :  { %9770 = vmatprep.subr.bf16.mxu1 %v12080_v60  ;;  %v3569_v6 = vld [vmem:[#allocation9 + $0xe88] sm:$0xff]  ;;  %v12168_v35 = vcombine.high %v3449_v8, %v3453_v38  ;;  %v12167_v60 = vcombine.low %v3449_v8, %v3453_v38 }
 0x353   :  { %9812 = vmatpush1.bf16.msra.mxu0 %v12207_v62  ;;  %v3573_v2 = vld [vmem:[#allocation9 + $0xea8] sm:$0xff] }
 0x354   :  { %9813 = vmatprep.subr.bf16.mxu0 %v12328_v31  ;;  %v3441_v63 = vld [vmem:[#allocation9 + $0xa88] sm:$0xff]  ;;  %v12288_v36 = vcombine.high %v3569_v6, %v3573_v2  ;;  %v12287_v31 = vcombine.low %v3569_v6, %v3573_v2 }
 0x355   :  { %9771 = vmatpush1.bf16.msra.mxu1 %v12079_v27  ;;  %v3445_v15 = vld [vmem:[#allocation9 + $0xaa8] sm:$0xff] }
 0x356   :  { %9772 = vmatprep.subr.bf16.mxu1 %v12200_v25  ;;  %v3561_v62 = vld [vmem:[#allocation9 + $0xe48] sm:$0xff]  ;;  %v12160_v47 = vcombine.high %v3441_v63, %v3445_v15  ;;  %v12159_v25 = vcombine.low %v3441_v63, %v3445_v15 }
 0x357   :  { %9814 = vmatpush2.bf16.msra.mxu0 %v12327_v37  ;;  %v3565_v44 = vld [vmem:[#allocation9 + $0xe68] sm:$0xff] }
 0x358   :  { %9815 = vmatprep.subr.bf16.mxu0 %v12320_v9  ;;  %v3433_v27 = vld [vmem:[#allocation9 + $0xa48] sm:$0xff]  ;;  %v12280_v58 = vcombine.high %v3561_v62, %v3565_v44  ;;  %v12279_v9 = vcombine.low %v3561_v62, %v3565_v44 }
 0x359   :  { %9773 = vmatpush2.bf16.msra.mxu1 %v12199_v13  ;;  %v3437_v24 = vld [vmem:[#allocation9 + $0xa68] sm:$0xff] }
 0x35a   :  { %9774 = vmatprep.subr.bf16.mxu1 %v12192_v55  ;;  %v3553_v37 = vld [vmem:[#allocation9 + $0xe08] sm:$0xff]  ;;  %v12152_v4 = vcombine.high %v3433_v27, %v3437_v24  ;;  %v12151_v21 = vcombine.low %v3433_v27, %v3437_v24 }
 0x35b   :  { %9816 = vmatpush2.bf16.msra.mxu0 %v12319_v57  ;;  %v3557_v46 = vld [vmem:[#allocation9 + $0xe28] sm:$0xff] }
 0x35c   :  { %9817 = vmatprep.subr.bf16.mxu0 %v12312_v20  ;;  %v3425_v13 = vld [vmem:[#allocation9 + $0xa08] sm:$0xff]  ;;  %v12272_v55 = vcombine.high %v3553_v37, %v3557_v46 }
 0x35d   :  { %9775 = vmatpush2.bf16.msra.mxu1 %v12191_v32  ;;  %v3429_v42 = vld [vmem:[#allocation9 + $0xa28] sm:$0xff] }
 0x35e   :  { %9776 = vmatprep.subr.bf16.mxu1 %v12184_v54  ;;  %v3801_v28 = vld [vmem:[#allocation9 + $0x15c8] sm:$0xff]  ;;  %v12144_v45 = vcombine.high %v3425_v13, %v3429_v42  ;;  %v12271_v54 = vcombine.low %v3553_v37, %v3557_v46 }
 0x35f   :  { %9818 = vmatpush2.bf16.msra.mxu0 %v12311_v49  ;;  %v3805_v20 = vld [vmem:[#allocation9 + $0x15e8] sm:$0xff] }
 0x360   :  { %9819 = vmatprep.subr.bf16.mxu0 %v12304_v19  ;;  %v3673_v49 = vld [vmem:[#allocation9 + $0x11c8] sm:$0xff]  ;;  %v12520_v19 = vcombine.high %v3801_v28, %v3805_v20  ;;  %v12519_v8 = vcombine.low %v3801_v28, %v3805_v20 }
 0x361   :  { %9777 = vmatpush2.bf16.msra.mxu1 %v12183_v29  ;;  %v3677_v30 = vld [vmem:[#allocation9 + $0x11e8] sm:$0xff]  ;;  %v12143_v29 = vcombine.low %v3425_v13, %v3429_v42 }
 0x362   :  { %9778 = vmatprep.subr.bf16.mxu1 %v12176_v52  ;;  %v3793_v3 = vld [vmem:[#allocation9 + $0x1588] sm:$0xff]  ;;  %v12391_v2 = vcombine.low %v3673_v49, %v3677_v30 }
 0x363   :  { %9820 = vmatpush2.bf16.msra.mxu0 %v12303_v17  ;;  %v12392_v17 = vcombine.high %v3673_v49, %v3677_v30  ;;  %v3665_v38 = vld [vmem:[#allocation9 + $0x1188] sm:$0xff] }
 0x364   :  { %9821 = vmatprep.subr.bf16.mxu0 %v12296_v34  ;;  %v3669_v34 = vld [vmem:[#allocation9 + $0x11a8] sm:$0xff] }
 0x365   :  { %9779 = vmatpush2.bf16.msra.mxu1 %v12175_v51  ;;  %v3657_v62 = vld [vmem:[#allocation9 + $0x1148] sm:$0xff]  ;;  %v12383_v27 = vcombine.low %v3665_v38, %v3669_v34 }
 0x366   :  { %9780 = vmatprep.subr.bf16.mxu1 %v12168_v35  ;;  %v3785_v35 = vld [vmem:[#allocation9 + $0x1548] sm:$0xff] }
 0x367   :  { %9822 = vmatpush2.bf16.msra.mxu0 %v12295_v12  ;;  %v3789_v12 = vld [vmem:[#allocation9 + $0x1568] sm:$0xff] }
 0x368   :  { %9823 = vmatprep.subr.bf16.mxu0 %v12288_v36  ;;  %v12384_v36 = vcombine.high %v3665_v38, %v3669_v34  ;;  %v3661_v44 = vld [vmem:[#allocation9 + $0x1168] sm:$0xff]  ;;  %v12503_v37 = vcombine.low %v3785_v35, %v3789_v12 }
 0x369   :  { %9781 = vmatpush2.bf16.msra.mxu1 %v12167_v60  ;;  %v3777_v24 = vld [vmem:[#allocation9 + $0x1508] sm:$0xff]  ;;  %v12375_v13 = vcombine.low %v3657_v62, %v3661_v44 }
 0x36a   :  { %9782 = vmatprep.subr.bf16.mxu1 %v12160_v47  ;;  %v3649_v46 = vld [vmem:[#allocation9 + $0x1108] sm:$0xff] }
 0x36b   :  { %9824 = vmatpush2.bf16.msra.mxu0 %v12287_v31  ;;  %v9544_v18 = vpop.f32.mrf.mxu1  ;;  %v12504_v31 = vcombine.high %v3785_v35, %v3789_v12  ;;  %v3769_v42 = vld [vmem:[#allocation9 + $0x14c8] sm:$0xff] }
 0x36c   :  { %9825 = vmatprep.subr.bf16.mxu0 %v12280_v58  ;;  %v9545_v57 = vadd.f32 %v9544_v18, %v15749_v39  ;;  %v3797_v39 = vld [vmem:[#allocation9 + $0x15a8] sm:$0xff] }
 0x36d   :  { %9783 = vmatpush2.bf16.msra.mxu1 %v12159_v25  ;;  %v9546_v32 = vpop.f32.mrf.mxu1  ;;  %v12512_v6 = vcombine.high %v3793_v3, %v3797_v39  ;;  %v12511_v60 = vcombine.low %v3793_v3, %v3797_v39  ;;  %v3781_v58 = vld [vmem:[#allocation9 + $0x1528] sm:$0xff]  ;;  %v12376_v25 = vcombine.high %v3657_v62, %v3661_v44 }
 0x36e   :  { %9784 = vmatprep.subr.bf16.mxu1 %v12152_v4  ;;  %v9547_v61 = vadd.f32 %v9546_v32, %v15751_v40  ;;  %v3653_v4 = vld [vmem:[#allocation9 + $0x1128] sm:$0xff] }
 0x36f   :  { %9826 = vmatpush2.bf16.msra.mxu0 %v12279_v9  ;;  %v9548_v43 = vpop.f32.mrf.mxu1  ;;  %v12496_v9 = vcombine.high %v3777_v24, %v3781_v58  ;;  %v3773_v18 = vld [vmem:[#allocation9 + $0x14e8] sm:$0xff]  ;;  %v12367_v32 = vcombine.low %v3649_v46, %v3653_v4 }
 0x370   :  { %9827 = vmatprep.subr.bf16.mxu0 %v12272_v55  ;;  %v12368_v55 = vcombine.high %v3649_v46, %v3653_v4  ;;  %v3645_v28 = vld [vmem:[#allocation9 + $0x10e8] sm:$0xff]  ;;  %v12488_v20 = vcombine.high %v3769_v42, %v3773_v18  ;;  %v12487_v49 = vcombine.low %v3769_v42, %v3773_v18 }
 0x371   :  { %9785 = vmatpush2.bf16.msra.mxu1 %v12151_v21  ;;  %v9549_v26 = vpop.f32.mrf.mxu1  ;;  %v3641_v21 = vld [vmem:[#allocation9 + $0x10c8] sm:$0xff] }
 0x372   :  { %9786 = vmatprep.subr.bf16.mxu1 %v12144_v45  ;;  %v9585_v52 = vpop.f32.mrf.mxu0  ;;  %v3761_v45 = vld [vmem:[#allocation9 + $0x1488] sm:$0xff] }
 0x373   :  { %9828 = vmatpush2.bf16.msra.mxu0 %v12271_v54  ;;  %v15759_v40 = vadd.f32 %v9585_v52, %v9545_v57  ;;  %v12495_v57 = vcombine.low %v3777_v24, %v3781_v58  ;;  %v12360_v54 = vcombine.high %v3641_v21, %v3645_v28  ;;  %v3633_v30 = vld [vmem:[#allocation9 + $0x1088] sm:$0xff] }
 0x374   :  { %9879 = vmatprep.subr.bf16.mxu0 %v12520_v19  ;;  %v9587_v51 = vpop.f32.mrf.mxu0  ;;  %v3637_v43 = vld [vmem:[#allocation9 + $0x10a8] sm:$0xff] }
 0x375   :  { %9787 = vmatpush2.bf16.msra.mxu1 %v12143_v29  ;;  %v15761_v63 = vadd.f32 %v9587_v51, %v9547_v61  ;;  %v3765_v61 = vld [vmem:[#allocation9 + $0x14a8] sm:$0xff]  ;;  %v12359_v29 = vcombine.low %v3641_v21, %v3645_v28  ;;  %v12352_v26 = vcombine.high %v3633_v30, %v3637_v43  ;;  %v12351_v34 = vcombine.low %v3633_v30, %v3637_v43 }
 0x376   :  { %9830 = vmatmul.mubr.bf16.vlgmr.msra.gmra.mxu0 %v15692_v7  ;;  %9838 = vmatprep.subr.bf16.mxu1 %v12392_v17  ;;  %v9589_v15 = vpop.f32.mrf.mxu0  ;;  %v12480_v19 = vcombine.high %v3761_v45, %v3765_v61  ;;  %v3753_v3 = vld [vmem:[#allocation9 + $0x1448] sm:$0xff]  ;;  %v12479_v52 = vcombine.low %v3761_v45, %v3765_v61 }
 0x377   :  { %9880 = vmatpush1.bf16.msra.mxu0 %v12519_v8  ;;  %9911 = vmatprep.mubr.bf16.mxu0 %v15701_v14  ;;  %v3757_v39 = vld [vmem:[#allocation9 + $0x1468] sm:$0xff] }
 0x378   :  { %9789 = vmatmul.mubr.bf16.vlgmr.msra.gmra.mxu1 %v15689_v50  ;;  %9881 = vmatprep.subr.bf16.mxu0 %v12512_v6  ;;  %v9590_v47 = vpop.f32.mrf.mxu0  ;;  %v3625_v17 = vld [vmem:[#allocation9 + $0x1048] sm:$0xff]  ;;  %v12472_v38 = vcombine.high %v3753_v3, %v3757_v39  ;;  %v12471_v35 = vcombine.low %v3753_v3, %v3757_v39 }
 0x379   :  { %9839 = vmatpush1.bf16.msra.mxu1 %v12391_v2  ;;  %9870 = vmatprep.mubr.bf16.mxu1 %v15703_v11  ;;  %v3629_v8 = vld [vmem:[#allocation9 + $0x1068] sm:$0xff] }
 0x37a   :  { %9840 = vmatprep.subr.bf16.mxu1 %v12384_v36  ;;  %v3745_v51 = vld [vmem:[#allocation9 + $0x1408] sm:$0xff]  ;;  %v12344_v2 = vcombine.high %v3625_v17, %v3629_v8 }
 0x37b   :  { %9882 = vmatpush1.bf16.msra.mxu0 %v12511_v60  ;;  %v3749_v6 = vld [vmem:[#allocation9 + $0x1428] sm:$0xff]  ;;  %v12343_v60 = vcombine.low %v3625_v17, %v3629_v8 }
 0x37c   :  { %9883 = vmatprep.subr.bf16.mxu0 %v12504_v31  ;;  %v3617_v12 = vld [vmem:[#allocation9 + $0x1008] sm:$0xff]  ;;  %v12464_v36 = vcombine.high %v3745_v51, %v3749_v6  ;;  %v12463_v31 = vcombine.low %v3745_v51, %v3749_v6 }
 0x37d   :  { %9841 = vmatpush1.bf16.msra.mxu1 %v12383_v27  ;;  %v3621_v15 = vld [vmem:[#allocation9 + $0x1028] sm:$0xff] }
 0x37e   :  { %9842 = vmatprep.subr.bf16.mxu1 %v12376_v25  ;;  %v3865_v62 = vld [vmem:[#allocation9 + $0x17c8] sm:$0xff]  ;;  %v12336_v47 = vcombine.high %v3617_v12, %v3621_v15  ;;  %v12335_v25 = vcombine.low %v3617_v12, %v3621_v15 }
 0x37f   :  { %9884 = vmatpush1.bf16.msra.mxu0 %v12503_v37  ;;  %v3869_v44 = vld [vmem:[#allocation9 + $0x17e8] sm:$0xff] }
 0x380   :  { %9885 = vmatprep.subr.bf16.mxu0 %v12496_v9  ;;  %v3737_v27 = vld [vmem:[#allocation9 + $0x13c8] sm:$0xff]  ;;  %v12584_v58 = vcombine.high %v3865_v62, %v3869_v44  ;;  %v12583_v9 = vcombine.low %v3865_v62, %v3869_v44 }
 0x381   :  { %9843 = vmatpush1.bf16.msra.mxu1 %v12375_v13  ;;  %v3741_v24 = vld [vmem:[#allocation9 + $0x13e8] sm:$0xff] }
 0x382   :  { %9844 = vmatprep.subr.bf16.mxu1 %v12368_v55  ;;  %v3857_v37 = vld [vmem:[#allocation9 + $0x1788] sm:$0xff]  ;;  %v12456_v4 = vcombine.high %v3737_v27, %v3741_v24  ;;  %v12455_v55 = vcombine.low %v3737_v27, %v3741_v24 }
 0x383   :  { %9886 = vmatpush1.bf16.msra.mxu0 %v12495_v57  ;;  %v3861_v46 = vld [vmem:[#allocation9 + $0x17a8] sm:$0xff] }
 0x384   :  { %9887 = vmatprep.subr.bf16.mxu0 %v12488_v20  ;;  %v3729_v13 = vld [vmem:[#allocation9 + $0x1388] sm:$0xff]  ;;  %v12576_v18 = vcombine.high %v3857_v37, %v3861_v46  ;;  %v12575_v20 = vcombine.low %v3857_v37, %v3861_v46 }
 0x385   :  { %9845 = vmatpush1.bf16.msra.mxu1 %v12367_v32  ;;  %v3733_v42 = vld [vmem:[#allocation9 + $0x13a8] sm:$0xff] }
 0x386   :  { %9846 = vmatprep.subr.bf16.mxu1 %v12360_v54  ;;  %v3849_v57 = vld [vmem:[#allocation9 + $0x1748] sm:$0xff]  ;;  %v12448_v28 = vcombine.high %v3729_v13, %v3733_v42  ;;  %v12447_v54 = vcombine.low %v3729_v13, %v3733_v42 }
 0x387   :  { %9888 = vmatpush1.bf16.msra.mxu0 %v12487_v49  ;;  %v3853_v21 = vld [vmem:[#allocation9 + $0x1768] sm:$0xff] }
 0x388   :  { %9889 = vmatprep.subr.bf16.mxu0 %v12480_v19  ;;  %v3721_v32 = vld [vmem:[#allocation9 + $0x1348] sm:$0xff]  ;;  %v12568_v61 = vcombine.high %v3849_v57, %v3853_v21  ;;  %v12567_v19 = vcombine.low %v3849_v57, %v3853_v21 }
 0x389   :  { %9847 = vmatpush1.bf16.msra.mxu1 %v12359_v29  ;;  %v3725_v45 = vld [vmem:[#allocation9 + $0x1368] sm:$0xff] }
 0x38a   :  { %9848 = vmatprep.subr.bf16.mxu1 %v12352_v26  ;;  %v3841_v49 = vld [vmem:[#allocation9 + $0x1708] sm:$0xff]  ;;  %v12440_v43 = vcombine.high %v3721_v32, %v3725_v45  ;;  %v12439_v26 = vcombine.low %v3721_v32, %v3725_v45 }
 0x38b   :  { %9890 = vmatpush1.bf16.msra.mxu0 %v12479_v52  ;;  %v3845_v30 = vld [vmem:[#allocation9 + $0x1728] sm:$0xff] }
 0x38c   :  { %9891 = vmatprep.subr.bf16.mxu0 %v12472_v38  ;;  %v3713_v29 = vld [vmem:[#allocation9 + $0x1308] sm:$0xff]  ;;  %v12560_v39 = vcombine.high %v3841_v49, %v3845_v30  ;;  %v12559_v38 = vcombine.low %v3841_v49, %v3845_v30 }
 0x38d   :  { %9849 = vmatpush1.bf16.msra.mxu1 %v12351_v34  ;;  %v3717_v3 = vld [vmem:[#allocation9 + $0x1328] sm:$0xff] }
 0x38e   :  { %9850 = vmatprep.subr.bf16.mxu1 %v12344_v2  ;;  %v3833_v52 = vld [vmem:[#allocation9 + $0x16c8] sm:$0xff]  ;;  %v12432_v8 = vcombine.high %v3713_v29, %v3717_v3  ;;  %v12431_v2 = vcombine.low %v3713_v29, %v3717_v3 }
 0x38f   :  { %9892 = vmatpush1.bf16.msra.mxu0 %v12471_v35  ;;  %v3837_v17 = vld [vmem:[#allocation9 + $0x16e8] sm:$0xff] }
 0x390   :  { %9893 = vmatprep.subr.bf16.mxu0 %v12464_v36  ;;  %v3705_v34 = vld [vmem:[#allocation9 + $0x12c8] sm:$0xff]  ;;  %v12552_v6 = vcombine.high %v3833_v52, %v3837_v17  ;;  %v12551_v36 = vcombine.low %v3833_v52, %v3837_v17 }
 0x391   :  { %9851 = vmatpush1.bf16.msra.mxu1 %v12343_v60  ;;  %v3709_v51 = vld [vmem:[#allocation9 + $0x12e8] sm:$0xff] }
 0x392   :  { %9852 = vmatprep.subr.bf16.mxu1 %v12336_v47  ;;  %v3825_v35 = vld [vmem:[#allocation9 + $0x1688] sm:$0xff]  ;;  %v12424_v15 = vcombine.high %v3705_v34, %v3709_v51  ;;  %v12423_v47 = vcombine.low %v3705_v34, %v3709_v51 }
 0x393   :  { %9894 = vmatpush1.bf16.msra.mxu0 %v12463_v31  ;;  %v3829_v12 = vld [vmem:[#allocation9 + $0x16a8] sm:$0xff] }
 0x394   :  { %9895 = vmatprep.subr.bf16.mxu0 %v12584_v58  ;;  %v3697_v60 = vld [vmem:[#allocation9 + $0x1288] sm:$0xff]  ;;  %v12544_v44 = vcombine.high %v3825_v35, %v3829_v12  ;;  %v12543_v58 = vcombine.low %v3825_v35, %v3829_v12 }
 0x395   :  { %9853 = vmatpush1.bf16.msra.mxu1 %v12335_v25  ;;  %v3701_v62 = vld [vmem:[#allocation9 + $0x12a8] sm:$0xff] }
 0x396   :  { %9854 = vmatprep.subr.bf16.mxu1 %v12456_v4  ;;  %v3817_v31 = vld [vmem:[#allocation9 + $0x1648] sm:$0xff]  ;;  %v12416_v24 = vcombine.high %v3697_v60, %v3701_v62  ;;  %v12415_v4 = vcombine.low %v3697_v60, %v3701_v62 }
 0x397   :  { %9896 = vmatpush2.bf16.msra.mxu0 %v12583_v9  ;;  %v3821_v27 = vld [vmem:[#allocation9 + $0x1668] sm:$0xff] }
 0x398   :  { %9897 = vmatprep.subr.bf16.mxu0 %v12576_v18  ;;  %v3689_v25 = vld [vmem:[#allocation9 + $0x1248] sm:$0xff]  ;;  %v12536_v46 = vcombine.high %v3817_v31, %v3821_v27  ;;  %v12535_v18 = vcombine.low %v3817_v31, %v3821_v27 }
 0x399   :  { %9855 = vmatpush2.bf16.msra.mxu1 %v12455_v55  ;;  %v3693_v37 = vld [vmem:[#allocation9 + $0x1268] sm:$0xff] }
 0x39a   :  { %9856 = vmatprep.subr.bf16.mxu1 %v12448_v28  ;;  %v3809_v9 = vld [vmem:[#allocation9 + $0x1608] sm:$0xff]  ;;  %v12408_v42 = vcombine.high %v3689_v25, %v3693_v37  ;;  %v12407_v28 = vcombine.low %v3689_v25, %v3693_v37 }
 0x39b   :  { %9898 = vmatpush2.bf16.msra.mxu0 %v12575_v20  ;;  %v3813_v13 = vld [vmem:[#allocation9 + $0x1628] sm:$0xff] }
 0x39c   :  { %9899 = vmatprep.subr.bf16.mxu0 %v12568_v61  ;;  %v3681_v55 = vld [vmem:[#allocation9 + $0x1208] sm:$0xff]  ;;  %v12528_v21 = vcombine.high %v3809_v9, %v3813_v13  ;;  %v12527_v61 = vcombine.low %v3809_v9, %v3813_v13 }
 0x39d   :  { %9857 = vmatpush2.bf16.msra.mxu1 %v12447_v54  ;;  %v3685_v57 = vld [vmem:[#allocation9 + $0x1228] sm:$0xff] }
 0x39e   :  { %9858 = vmatprep.subr.bf16.mxu1 %v12440_v43  ;;  %v4057_v20 = vld [vmem:[#allocation9 + $0x1dc8] sm:$0xff]  ;;  %v12400_v45 = vcombine.high %v3681_v55, %v3685_v57  ;;  %v12399_v43 = vcombine.low %v3681_v55, %v3685_v57 }
 0x39f   :  { %9900 = vmatpush2.bf16.msra.mxu0 %v12567_v19  ;;  %v4061_v32 = vld [vmem:[#allocation9 + $0x1de8] sm:$0xff] }
 0x3a0   :  { %9901 = vmatprep.subr.bf16.mxu0 %v12560_v39  ;;  %v3929_v54 = vld [vmem:[#allocation9 + $0x19c8] sm:$0xff]  ;;  %v12776_v30 = vcombine.high %v4057_v20, %v4061_v32  ;;  %v12775_v39 = vcombine.low %v4057_v20, %v4061_v32 }
 0x3a1   :  { %9859 = vmatpush2.bf16.msra.mxu1 %v12439_v26  ;;  %v3933_v49 = vld [vmem:[#allocation9 + $0x19e8] sm:$0xff] }
 0x3a2   :  { %9860 = vmatprep.subr.bf16.mxu1 %v12432_v8  ;;  %v4049_v19 = vld [vmem:[#allocation9 + $0x1d88] sm:$0xff]  ;;  %v12648_v3 = vcombine.high %v3929_v54, %v3933_v49  ;;  %v12647_v8 = vcombine.low %v3929_v54, %v3933_v49 }
 0x3a3   :  { %9902 = vmatpush2.bf16.msra.mxu0 %v12559_v38  ;;  %v4053_v29 = vld [vmem:[#allocation9 + $0x1da8] sm:$0xff] }
 0x3a4   :  { %9903 = vmatprep.subr.bf16.mxu0 %v12552_v6  ;;  %v3921_v26 = vld [vmem:[#allocation9 + $0x1988] sm:$0xff]  ;;  %v12768_v17 = vcombine.high %v4049_v19, %v4053_v29 }
 0x3a5   :  { %9861 = vmatpush2.bf16.msra.mxu1 %v12431_v2  ;;  %v3925_v52 = vld [vmem:[#allocation9 + $0x19a8] sm:$0xff]  ;;  %v12767_v2 = vcombine.low %v4049_v19, %v4053_v29 }
 0x3a6   :  { %9862 = vmatprep.subr.bf16.mxu1 %v12424_v15  ;;  %v4041_v38 = vld [vmem:[#allocation9 + $0x1d48] sm:$0xff]  ;;  %v12640_v6 = vcombine.high %v3921_v26, %v3925_v52 }
 0x3a7   :  { %9904 = vmatpush2.bf16.msra.mxu0 %v12551_v36  ;;  %v4045_v34 = vld [vmem:[#allocation9 + $0x1d68] sm:$0xff] }
 0x3a8   :  { %9905 = vmatprep.subr.bf16.mxu0 %v12544_v44  ;;  %v3913_v35 = vld [vmem:[#allocation9 + $0x1948] sm:$0xff]  ;;  %v12760_v60 = vcombine.high %v4041_v38, %v4045_v34  ;;  %v12639_v44 = vcombine.low %v3921_v26, %v3925_v52 }
 0x3a9   :  { %9863 = vmatpush2.bf16.msra.mxu1 %v12423_v47  ;;  %v3917_v12 = vld [vmem:[#allocation9 + $0x1968] sm:$0xff] }
 0x3aa   :  { %9864 = vmatprep.subr.bf16.mxu1 %v12416_v24  ;;  %v4033_v47 = vld [vmem:[#allocation9 + $0x1d08] sm:$0xff]  ;;  %v12631_v55 = vcombine.low %v3913_v35, %v3917_v12 }
 0x3ab   :  { %9906 = vmatpush2.bf16.msra.mxu0 %v12543_v58  ;;  %v4037_v31 = vld [vmem:[#allocation9 + $0x1d28] sm:$0xff]  ;;  %v12632_v58 = vcombine.high %v3913_v35, %v3917_v12 }
 0x3ac   :  { %9907 = vmatprep.subr.bf16.mxu0 %v12536_v46  ;;  %v12759_v46 = vcombine.low %v4041_v38, %v4045_v34  ;;  %v3909_v9 = vld [vmem:[#allocation9 + $0x1928] sm:$0xff]  ;;  %v12751_v32 = vcombine.low %v4033_v47, %v4037_v31 }
 0x3ad   :  { %9865 = vmatpush2.bf16.msra.mxu1 %v12415_v4  ;;  %v3905_v4 = vld [vmem:[#allocation9 + $0x1908] sm:$0xff] }
 0x3ae   :  { %9866 = vmatprep.subr.bf16.mxu1 %v12408_v42  ;;  %v12752_v42 = vcombine.high %v4033_v47, %v4037_v31  ;;  %v4025_v57 = vld [vmem:[#allocation9 + $0x1cc8] sm:$0xff]  ;;  %v12624_v20 = vcombine.high %v3905_v4, %v3909_v9  ;;  %v12623_v54 = vcombine.low %v3905_v4, %v3909_v9 }
 0x3af   :  { %9908 = vmatpush2.bf16.msra.mxu0 %v12535_v18  ;;  %v4017_v49 = vld [vmem:[#allocation9 + $0x1c88] sm:$0xff] }
 0x3b0   :  { %9909 = vmatprep.subr.bf16.mxu0 %v12528_v21  ;;  %v4029_v21 = vld [vmem:[#allocation9 + $0x1ce8] sm:$0xff] }
 0x3b1   :  { %9867 = vmatpush2.bf16.msra.mxu1 %v12407_v28  ;;  %v12743_v19 = vcombine.low %v4025_v57, %v4029_v21  ;;  %v3889_v29 = vld [vmem:[#allocation9 + $0x1888] sm:$0xff] }
 0x3b2   :  { %9868 = vmatprep.subr.bf16.mxu1 %v12400_v45  ;;  %v3901_v45 = vld [vmem:[#allocation9 + $0x18e8] sm:$0xff] }
 0x3b3   :  { %9910 = vmatpush2.bf16.msra.mxu0 %v12527_v61  ;;  %v12744_v61 = vcombine.high %v4025_v57, %v4029_v21  ;;  %v4009_v52 = vld [vmem:[#allocation9 + $0x1c48] sm:$0xff] }
 0x3b4   :  { %9961 = vmatprep.subr.bf16.mxu0 %v12776_v30  ;;  %v4021_v30 = vld [vmem:[#allocation9 + $0x1ca8] sm:$0xff] }
 0x3b5   :  { %9869 = vmatpush2.bf16.msra.mxu1 %v12399_v43  ;;  %v12735_v38 = vcombine.low %v4017_v49, %v4021_v30  ;;  %v3881_v34 = vld [vmem:[#allocation9 + $0x1848] sm:$0xff] }
 0x3b6   :  { %v9667_v51 = vpop.f32.mrf.mxu0  ;;  %9912 = vmatmul.mubr.bf16.vlgmr.msra.gmra.mxu0 %v15714_v48  ;;  %9920 = vmatprep.subr.bf16.mxu1 %v12648_v3  ;;  %v3893_v3 = vld [vmem:[#allocation9 + $0x18a8] sm:$0xff] }
 0x3b7   :  { %9962 = vmatpush1.bf16.msra.mxu0 %v12775_v39  ;;  %9993 = vmatprep.mubr.bf16.mxu0 %v15727_v59  ;;  %v12736_v39 = vcombine.high %v4017_v49, %v4021_v30  ;;  %v4001_v35 = vld [vmem:[#allocation9 + $0x1c08] sm:$0xff] }
 0x3b8   :  { %v9626_v15 = vpop.f32.mrf.mxu1  ;;  %v9669_v36 = vpop.f32.mrf.mxu0  ;;  %9871 = vmatmul.mubr.bf16.vlgmr.msra.gmra.mxu1 %v15711_v10  ;;  %9963 = vmatprep.subr.bf16.mxu0 %v12768_v17  ;;  %v4013_v17 = vld [vmem:[#allocation9 + $0x1c68] sm:$0xff] }
 0x3b9   :  { %v9627_v62 = vadd.f32 %v9626_v15, %v15759_v40  ;;  %9921 = vmatpush1.bf16.msra.mxu1 %v12647_v8  ;;  %9952 = vmatprep.mubr.bf16.mxu1 %v15733_v56  ;;  %v12608_v8 = vcombine.high %v3889_v29, %v3893_v3  ;;  %v4005_v12 = vld [vmem:[#allocation9 + $0x1c28] sm:$0xff] }
 0x3ba   :  { %v9628_v27 = vpop.f32.mrf.mxu1  ;;  %v9671_v24 = vpop.f32.mrf.mxu0  ;;  %9922 = vmatprep.subr.bf16.mxu1 %v12640_v6  ;;  %v12728_v6 = vcombine.high %v4009_v52, %v4013_v17  ;;  %v4121_v31 = vld [vmem:[#allocation9 + $0x1fc8] sm:$0xff] }
 0x3bb   :  { %v15772_v25 = vadd.f32 %v9667_v51, %v9627_v62  ;;  %v9629_v37 = vadd.f32 %v9628_v27, %v15761_v63  ;;  %9964 = vmatpush1.bf16.msra.mxu0 %v12767_v2  ;;  %v3897_v63 = vld [vmem:[#allocation9 + $0x18c8] sm:$0xff]  ;;  %v12607_v2 = vcombine.low %v3889_v29, %v3893_v3 }
 0x3bc   :  { %v9630_v13 = vpop.f32.mrf.mxu1  ;;  %v9672_v40 = vpop.f32.mrf.mxu0  ;;  %9965 = vmatprep.subr.bf16.mxu0 %v12760_v60  ;;  %v12616_v43 = vcombine.high %v3897_v63, %v3901_v45  ;;  %v12615_v26 = vcombine.low %v3897_v63, %v3901_v45  ;;  %v3885_v51 = vld [vmem:[#allocation9 + $0x1868] sm:$0xff] }
 0x3bd   :  { %v15775_v18 = vadd.f32 %v9669_v36, %v9629_v37  ;;  %9923 = vmatpush1.bf16.msra.mxu1 %v12639_v44  ;;  %v12600_v15 = vcombine.high %v3881_v34, %v3885_v51  ;;  %v12727_v36 = vcombine.low %v4009_v52, %v4013_v17  ;;  %v3873_v60 = vld [vmem:[#allocation9 + $0x1808] sm:$0xff]  ;;  %v12720_v44 = vcombine.high %v4001_v35, %v4005_v12 }
 0x3be   :  { %v9631_v28 = vpop.f32.mrf.mxu1  ;;  %9924 = vmatprep.subr.bf16.mxu1 %v12632_v58  ;;  %v3877_v62 = vld [vmem:[#allocation9 + $0x1828] sm:$0xff]  ;;  %v12599_v47 = vcombine.low %v3881_v34, %v3885_v51  ;;  %v12719_v58 = vcombine.low %v4001_v35, %v4005_v12 }
 0x3bf   :  { %9966 = vmatpush1.bf16.msra.mxu0 %v12759_v46  ;;  %v4125_v27 = vld [vmem:[#allocation9 + $0x1fe8] sm:$0xff]  ;;  %v12592_v24 = vcombine.high %v3873_v60, %v3877_v62  ;;  %v12591_v9 = vcombine.low %v3873_v60, %v3877_v62 }
 0x3c0   :  { %9967 = vmatprep.subr.bf16.mxu0 %v12752_v42  ;;  %v3993_v37 = vld [vmem:[#allocation9 + $0x1bc8] sm:$0xff]  ;;  %v12840_v4 = vcombine.high %v4121_v31, %v4125_v27 }
 0x3c1   :  { %9925 = vmatpush1.bf16.msra.mxu1 %v12631_v55  ;;  %v3997_v46 = vld [vmem:[#allocation9 + $0x1be8] sm:$0xff]  ;;  %v12839_v55 = vcombine.low %v4121_v31, %v4125_v27 }
 0x3c2   :  { %9926 = vmatprep.subr.bf16.mxu1 %v12624_v20  ;;  %v4113_v13 = vld [vmem:[#allocation9 + $0x1f88] sm:$0xff]  ;;  %v12712_v42 = vcombine.high %v3993_v37, %v3997_v46  ;;  %v12711_v20 = vcombine.low %v3993_v37, %v3997_v46 }
 0x3c3   :  { %9968 = vmatpush1.bf16.msra.mxu0 %v12751_v32  ;;  %v4117_v40 = vld [vmem:[#allocation9 + $0x1fa8] sm:$0xff] }
 0x3c4   :  { %9969 = vmatprep.subr.bf16.mxu0 %v12744_v61  ;;  %v3985_v57 = vld [vmem:[#allocation9 + $0x1b88] sm:$0xff]  ;;  %v12832_v28 = vcombine.high %v4113_v13, %v4117_v40  ;;  %v12831_v61 = vcombine.low %v4113_v13, %v4117_v40 }
 0x3c5   :  { %9927 = vmatpush1.bf16.msra.mxu1 %v12623_v54  ;;  %v3989_v21 = vld [vmem:[#allocation9 + $0x1ba8] sm:$0xff] }
 0x3c6   :  { %9928 = vmatprep.subr.bf16.mxu1 %v12616_v43  ;;  %v4105_v32 = vld [vmem:[#allocation9 + $0x1f48] sm:$0xff]  ;;  %v12704_v45 = vcombine.high %v3985_v57, %v3989_v21  ;;  %v12703_v43 = vcombine.low %v3985_v57, %v3989_v21 }
 0x3c7   :  { %9970 = vmatpush1.bf16.msra.mxu0 %v12743_v19  ;;  %v4109_v63 = vld [vmem:[#allocation9 + $0x1f68] sm:$0xff] }
 0x3c8   :  { %9971 = vmatprep.subr.bf16.mxu0 %v12736_v39  ;;  %v3977_v54 = vld [vmem:[#allocation9 + $0x1b48] sm:$0xff]  ;;  %v12824_v30 = vcombine.high %v4105_v32, %v4109_v63  ;;  %v12823_v39 = vcombine.low %v4105_v32, %v4109_v63 }
 0x3c9   :  { %9929 = vmatpush1.bf16.msra.mxu1 %v12615_v26  ;;  %v3981_v49 = vld [vmem:[#allocation9 + $0x1b68] sm:$0xff] }
 0x3ca   :  { %9930 = vmatprep.subr.bf16.mxu1 %v12608_v8  ;;  %v4097_v19 = vld [vmem:[#allocation9 + $0x1f08] sm:$0xff]  ;;  %v12696_v3 = vcombine.high %v3977_v54, %v3981_v49  ;;  %v12695_v8 = vcombine.low %v3977_v54, %v3981_v49  ;;  %v3294_v54 = vld [vmem:[#allocation9 + $0x5f0] sm:$0xff] }
 0x3cb   :  { %9972 = vmatpush1.bf16.msra.mxu0 %v12735_v38  ;;  %v4101_v29 = vld [vmem:[#allocation9 + $0x1f28] sm:$0xff] }
 0x3cc   :  { %9973 = vmatprep.subr.bf16.mxu0 %v12728_v6  ;;  %v3969_v26 = vld [vmem:[#allocation9 + $0x1b08] sm:$0xff]  ;;  %v12816_v17 = vcombine.high %v4097_v19, %v4101_v29  ;;  %v12815_v6 = vcombine.low %v4097_v19, %v4101_v29  ;;  %v3166_v19 = vld [vmem:[#allocation9 + $0x1f0] sm:$0xff] }
 0x3cd   :  { %9931 = vmatpush1.bf16.msra.mxu1 %v12607_v2  ;;  %v3973_v52 = vld [vmem:[#allocation9 + $0x1b28] sm:$0xff] }
 0x3ce   :  { %9932 = vmatprep.subr.bf16.mxu1 %v12600_v15  ;;  %v4089_v38 = vld [vmem:[#allocation9 + $0x1ec8] sm:$0xff]  ;;  %v12688_v51 = vcombine.high %v3969_v26, %v3973_v52  ;;  %v12687_v15 = vcombine.low %v3969_v26, %v3973_v52  ;;  %v3282_v26 = vld [vmem:[#allocation9 + $0x590] sm:$0xff] }
 0x3cf   :  { %9974 = vmatpush1.bf16.msra.mxu0 %v12727_v36  ;;  %v4093_v34 = vld [vmem:[#allocation9 + $0x1ee8] sm:$0xff]  ;;  %v3286_v52 = vld [vmem:[#allocation9 + $0x5b0] sm:$0xff] }
 0x3d0   :  { %9975 = vmatprep.subr.bf16.mxu0 %v12720_v44  ;;  %v3961_v2 = vld [vmem:[#allocation9 + $0x1ac8] sm:$0xff]  ;;  %v12808_v12 = vcombine.high %v4089_v38, %v4093_v34  ;;  %v12807_v44 = vcombine.low %v4089_v38, %v4093_v34  ;;  %v4144_v38 = vsub.s32 3, %v15721_v16  ;;  %v3154_v34 = vld [vmem:[#allocation9 + $0x190] sm:$0xff] }
 0x3d1   :  { %9933 = vmatpush1.bf16.msra.mxu1 %v12599_v47  ;;  %v3965_v35 = vld [vmem:[#allocation9 + $0x1ae8] sm:$0xff] }
 0x3d2   :  { %9934 = vmatprep.subr.bf16.mxu1 %v12592_v24  ;;  %v4081_v36 = vld [vmem:[#allocation9 + $0x1e88] sm:$0xff]  ;;  %v12680_v62 = vcombine.high %v3961_v2, %v3965_v35  ;;  %v12679_v24 = vcombine.low %v3961_v2, %v3965_v35  ;;  %v13285_v2 = vld [vmem:[#allocation10] sm:$0xff] }
 0x3d3   :  { %9976 = vmatpush1.bf16.msra.mxu0 %v12719_v58  ;;  %v4085_v60 = vld [vmem:[#allocation9 + $0x1ea8] sm:$0xff] }
 0x3d4   :  { %9977 = vmatprep.subr.bf16.mxu0 %v12840_v4  ;;  %v3953_v47 = vld [vmem:[#allocation9 + $0x1a88] sm:$0xff]  ;;  %v12800_v27 = vcombine.high %v4081_v36, %v4085_v60  ;;  %v12799_v4 = vcombine.low %v4081_v36, %v4085_v60  ;;  %v3278_v36 = vld [vmem:[#allocation9 + $0x570] sm:$0xff] }
 0x3d5   :  { %9935 = vmatpush1.bf16.msra.mxu1 %v12591_v9  ;;  %v3957_v31 = vld [vmem:[#allocation9 + $0x1aa8] sm:$0xff] }
 0x3d6   :  { %9936 = vmatprep.subr.bf16.mxu1 %v12712_v42  ;;  %v4073_v58 = vld [vmem:[#allocation9 + $0x1e48] sm:$0xff]  ;;  %v12672_v46 = vcombine.high %v3953_v47, %v3957_v31  ;;  %v12671_v42 = vcombine.low %v3953_v47, %v3957_v31  ;;  %v12001_v47 = vcombine.low %v3282_v26, %v3286_v52  ;;  %v3146_v31 = vld [vmem:[#allocation9 + $0x150] sm:$0xff] }
 0x3d7   :  { %9978 = vmatpush2.bf16.msra.mxu0 %v12839_v55  ;;  %v4077_v37 = vld [vmem:[#allocation9 + $0x1e68] sm:$0xff] }
 0x3d8   :  { %9979 = vmatprep.subr.bf16.mxu0 %v12832_v28  ;;  %v3945_v9 = vld [vmem:[#allocation9 + $0x1a48] sm:$0xff]  ;;  %v12792_v40 = vcombine.high %v4073_v58, %v4077_v37  ;;  %v12791_v28 = vcombine.low %v4073_v58, %v4077_v37 }
 0x3d9   :  { %9937 = vmatpush2.bf16.msra.mxu1 %v12711_v20  ;;  %v3949_v13 = vld [vmem:[#allocation9 + $0x1a68] sm:$0xff] }
 0x3da   :  { %9938 = vmatprep.subr.bf16.mxu1 %v12704_v45  ;;  %v4065_v55 = vld [vmem:[#allocation9 + $0x1e08] sm:$0xff]  ;;  %v12664_v21 = vcombine.high %v3945_v9, %v3949_v13  ;;  %v12663_v45 = vcombine.low %v3945_v9, %v3949_v13  ;;  %v3266_v9 = vld [vmem:[#allocation9 + $0x510] sm:$0xff] }
 0x3db   :  { %9980 = vmatpush2.bf16.msra.mxu0 %v12831_v61  ;;  %v4069_v57 = vld [vmem:[#allocation9 + $0x1e28] sm:$0xff]  ;;  %v3290_v61 = vld [vmem:[#allocation9 + $0x5d0] sm:$0xff] }
 0x3dc   :  { %9981 = vmatprep.subr.bf16.mxu0 %v12824_v30  ;;  %v3937_v20 = vld [vmem:[#allocation9 + $0x1a08] sm:$0xff]  ;;  %v12784_v63 = vcombine.high %v4065_v55, %v4069_v57  ;;  %v12783_v30 = vcombine.low %v4065_v55, %v4069_v57  ;;  %v12010_v29 = vcombine.high %v3290_v61, %v3294_v54  ;;  %v3270_v13 = vld [vmem:[#allocation9 + $0x530] sm:$0xff] }
 0x3dd   :  { %9939 = vmatpush2.bf16.msra.mxu1 %v12703_v43  ;;  %v3941_v32 = vld [vmem:[#allocation9 + $0x1a28] sm:$0xff]  ;;  %v3162_v43 = vld [vmem:[#allocation9 + $0x1d0] sm:$0xff] }
 0x3de   :  { %9940 = vmatprep.subr.bf16.mxu1 %v12696_v3  ;;  %v12656_v49 = vcombine.high %v3937_v20, %v3941_v32  ;;  %v12655_v3 = vcombine.low %v3937_v20, %v3941_v32  ;;  %v3142_v20 = vld [vmem:[#allocation9 + $0x130] sm:$0xff] }
 0x3df   :  { %9982 = vmatpush2.bf16.msra.mxu0 %v12823_v39  ;;  %v4140_v39 = vsub.s32 2, %v15721_v16 }
 0x3e0   :  { %9983 = vmatprep.subr.bf16.mxu0 %v12816_v17  ;;  %v11882_v17 = vcombine.high %v3162_v43, %v3166_v19 }
 0x3e1   :  { %9941 = vmatpush2.bf16.msra.mxu1 %v12695_v8  ;;  %v12009_v8 = vcombine.low %v3290_v61, %v3294_v54  ;;  %v4141_v35 = vrot.slane %v13285_v2, %v4140_v39  ;;  %v11986_v61 = vcombine.high %v3266_v9, %v3270_v13  ;;  %v3130_v39 = vld [vmem:[#allocation9 + $0xd0] sm:$0xff] }
 0x3e2   :  { %9942 = vmatprep.subr.bf16.mxu1 %v12688_v51  ;;  %v3158_v51 = vld [vmem:[#allocation9 + $0x1b0] sm:$0xff] }
 0x3e3   :  { %9984 = vmatpush2.bf16.msra.mxu0 %v12815_v6  ;;  %v12002_v6 = vcombine.high %v3282_v26, %v3286_v52  ;;  %v3134_v26 = vld [vmem:[#allocation9 + $0xf0] sm:$0xff] }
 0x3e4   :  { %9985 = vmatprep.subr.bf16.mxu0 %v12808_v12  ;;  %v11881_v12 = vcombine.low %v3162_v43, %v3166_v19 }
 0x3e5   :  { %9943 = vmatpush2.bf16.msra.mxu1 %v12687_v15  ;;  %v3274_v15 = vld [vmem:[#allocation9 + $0x550] sm:$0xff] }
 0x3e6   :  { %9944 = vmatprep.subr.bf16.mxu1 %v12680_v62  ;;  %v11874_v62 = vcombine.high %v3154_v34, %v3158_v51  ;;  %v11994_v37 = vcombine.high %v3274_v15, %v3278_v36 }
 0x3e7   :  { %9986 = vmatpush2.bf16.msra.mxu0 %v12807_v44  ;;  %v4145_v44 = vrot.slane %v13285_v2, %v4144_v38  ;;  %v3254_v38 = vld [vmem:[#allocation9 + $0x4b0] sm:$0xff] }
 0x3e8   :  { %9987 = vmatprep.subr.bf16.mxu0 %v12800_v27  ;;  %v3150_v27 = vld [vmem:[#allocation9 + $0x170] sm:$0xff] }
 0x3e9   :  { %9945 = vmatpush2.bf16.msra.mxu1 %v12679_v24  ;;  %v11866_v55 = vcombine.high %v3146_v31, %v3150_v27  ;;  %v11865_v54 = vcombine.low %v3146_v31, %v3150_v27  ;;  %v3126_v2 = vld [vmem:[#allocation9 + $0xb0] sm:$0xff] }
 0x3ea   :  { %9946 = vmatprep.subr.bf16.mxu1 %v12672_v46 }
 0x3eb   :  { %9988 = vmatpush2.bf16.msra.mxu0 %v12799_v4  ;;  %v11873_v4 = vcombine.low %v3154_v34, %v3158_v51  ;;  %v11850_v34 = vcombine.high %v3130_v39, %v3134_v26 }
 0x3ec   :  { %9989 = vmatprep.subr.bf16.mxu0 %v12792_v40 }
 0x3ed   :  { %9947 = vmatpush2.bf16.msra.mxu1 %v12671_v42 }
 0x3ee   :  { %9948 = vmatprep.subr.bf16.mxu1 %v12664_v21  ;;  %v11993_v21 = vcombine.low %v3274_v15, %v3278_v36  ;;  %v3242_v15 = vld [vmem:[#allocation9 + $0x450] sm:$0xff] }
 0x3ef   :  { %9990 = vmatpush2.bf16.msra.mxu0 %v12791_v28  ;;  %v3138_v28 = vld [vmem:[#allocation9 + $0x110] sm:$0xff] }
 0x3f0   :  { %9991 = vmatprep.subr.bf16.mxu0 %v12784_v63  ;;  %v3246_v36 = vld [vmem:[#allocation9 + $0x470] sm:$0xff] }
 0x3f1   :  { %9949 = vmatpush2.bf16.msra.mxu1 %v12663_v45  ;;  %v11962_v31 = vcombine.high %v3242_v15, %v3246_v36 }
 0x3f2   :  { %9950 = vmatprep.subr.bf16.mxu1 %v12656_v49  ;;  %v3258_v49 = vld [vmem:[#allocation9 + $0x4d0] sm:$0xff] }
 0x3f3   :  { %9992 = vmatpush2.bf16.msra.mxu0 %v12783_v30  ;;  %v3262_v30 = vld [vmem:[#allocation9 + $0x4f0] sm:$0xff] }
 0x3f4   :  { %10043 = vmatprep.subr.bf16.mxu0 %v12010_v29  ;;  %v11858_v29 = vcombine.high %v3138_v28, %v3142_v20  ;;  %v11978_v52 = vcombine.high %v3258_v49, %v3262_v30  ;;  %v11977_v51 = vcombine.low %v3258_v49, %v3262_v30 }
 0x3f5   :  { %9951 = vmatpush2.bf16.msra.mxu1 %v12655_v3  ;;  %v11985_v3 = vcombine.low %v3266_v9, %v3270_v13  ;;  %v3110_v9 = vld [vmem:[#allocation9 + $0x30] sm:$0xff] }
 0x3f6   :  { %v9749_v60 = vpop.f32.mrf.mxu0  ;;  %9994 = vmatmul.mubr.bf16.vlgmr.msra.gmra.mxu0 %v15731_v41  ;;  %10002 = vmatprep.subr.bf16.mxu1 %v11882_v17  ;;  %v11857_v17 = vcombine.low %v3138_v28, %v3142_v20  ;;  %v3226_v28 = vld [vmem:[#allocation9 + $0x3d0] sm:$0xff] }
 0x3f7   :  { %10044 = vmatpush1.bf16.msra.mxu0 %v12009_v8  ;;  %10075 = vmatprep.mubr.bf16.mxu0 %v15663_v23  ;;  %v3250_v8 = vld [vmem:[#allocation9 + $0x490] sm:$0xff] }
 0x3f8   :  { %v9708_v24 = vpop.f32.mrf.mxu1  ;;  %v9751_v58 = vpop.f32.mrf.mxu0  ;;  %9953 = vmatmul.mubr.bf16.vlgmr.msra.gmra.mxu1 %v15740_v33  ;;  %10045 = vmatprep.subr.bf16.mxu0 %v12002_v6  ;;  %v3122_v6 = vld [vmem:[#allocation9 + $0x90] sm:$0xff] }
 0x3f9   :  { %v9709_v46 = vadd.f32 %v9708_v24, %v4141_v35  ;;  %10003 = vmatpush1.bf16.msra.mxu1 %v11881_v12  ;;  %10034 = vmatprep.mubr.bf16.mxu1 %v15656_v1  ;;  %v11970_v35 = vcombine.high %v3250_v8, %v3254_v38  ;;  %v11849_v12 = vcombine.low %v3130_v39, %v3134_v26  ;;  %v3234_v24 = vld [vmem:[#allocation9 + $0x410] sm:$0xff] }
 0x3fa   :  { %v9710_v40 = vpop.f32.mrf.mxu1  ;;  %v9753_v42 = vpop.f32.mrf.mxu0  ;;  %10004 = vmatprep.subr.bf16.mxu1 %v11874_v62  ;;  %v11969_v62 = vcombine.low %v3250_v8, %v3254_v38  ;;  %v11841_v27 = vcombine.low %v3122_v6, %v3126_v2  ;;  %v3230_v20 = vld [vmem:[#allocation9 + $0x3f0] sm:$0xff] }
 0x3fb   :  { %v9711_v57 = vadd.f32 %v9710_v40, %v4145_v44  ;;  %10046 = vmatpush1.bf16.msra.mxu0 %v12001_v47  ;;  %v15783_v32 = vadd.f32 %v9749_v60, %v9709_v46  ;;  %v11842_v60 = vcombine.high %v3122_v6, %v3126_v2  ;;  %v3114_v44 = vld [vmem:[#allocation9 + $0x50] sm:$0xff]  ;;  %v11961_v46 = vcombine.low %v3242_v15, %v3246_v36 }
 0x3fc   :  { %v9712_v63 = vpop.f32.mrf.mxu1  ;;  %v9754_v45 = vpop.f32.mrf.mxu0  ;;  %10047 = vmatprep.subr.bf16.mxu0 %v11994_v37  ;;  %v3118_v47 = vld [vmem:[#allocation9 + $0x70] sm:$0xff]  ;;  %v11946_v49 = vcombine.high %v3226_v28, %v3230_v20  ;;  %v11945_v39 = vcombine.low %v3226_v28, %v3230_v20 }
 0x3fd   :  { %10005 = vmatpush1.bf16.msra.mxu1 %v11873_v4  ;;  %v15785_v43 = vadd.f32 %v9751_v58, %v9711_v57  ;;  %v3238_v58 = vld [vmem:[#allocation9 + $0x430] sm:$0xff]  ;;  %v11834_v37 = vcombine.high %v3114_v44, %v3118_v47  ;;  %v11833_v40 = vcombine.low %v3114_v44, %v3118_v47 }
 0x3fe   :  { %v9713_v19 = vpop.f32.mrf.mxu1  ;;  %10006 = vmatprep.subr.bf16.mxu1 %v11866_v55  ;;  %v3106_v4 = vld [vmem:[#allocation9 + $0x10] sm:$0xff]  ;;  %v11954_v13 = vcombine.high %v3234_v24, %v3238_v58 }
 0x3ff   :  { %10048 = vmatpush1.bf16.msra.mxu0 %v11993_v21  ;;  %v3354_v42 = vld [vmem:[#allocation9 + $0x7d0] sm:$0xff]  ;;  %v11826_v57 = vcombine.high %v3106_v4, %v3110_v9  ;;  %v11953_v21 = vcombine.low %v3234_v24, %v3238_v58  ;;  %v11825_v45 = vcombine.low %v3106_v4, %v3110_v9 }
 0x400   :  { %10049 = vmatprep.subr.bf16.mxu0 %v11986_v61  ;;  %v3358_v55 = vld [vmem:[#allocation9 + $0x7f0] sm:$0xff] }
 0x401   :  { %10007 = vmatpush1.bf16.msra.mxu1 %v11865_v54  ;;  %v12074_v63 = vcombine.high %v3354_v42, %v3358_v55  ;;  %v3346_v61 = vld [vmem:[#allocation9 + $0x790] sm:$0xff]  ;;  %v12073_v30 = vcombine.low %v3354_v42, %v3358_v55 }
 0x402   :  { %10008 = vmatprep.subr.bf16.mxu1 %v11858_v29  ;;  %v3350_v54 = vld [vmem:[#allocation9 + $0x7b0] sm:$0xff] }
 0x403   :  { %10050 = vmatpush1.bf16.msra.mxu0 %v11985_v3  ;;  %v3218_v19 = vld [vmem:[#allocation9 + $0x390] sm:$0xff]  ;;  %v12066_v3 = vcombine.high %v3346_v61, %v3350_v54  ;;  %v12065_v8 = vcombine.low %v3346_v61, %v3350_v54 }
 0x404   :  { %10051 = vmatprep.subr.bf16.mxu0 %v11978_v52  ;;  %v3222_v29 = vld [vmem:[#allocation9 + $0x3b0] sm:$0xff] }
 0x405   :  { %10009 = vmatpush1.bf16.msra.mxu1 %v11857_v17  ;;  %v3338_v26 = vld [vmem:[#allocation9 + $0x750] sm:$0xff]  ;;  %v11938_v17 = vcombine.high %v3218_v19, %v3222_v29  ;;  %v11937_v6 = vcombine.low %v3218_v19, %v3222_v29 }
 0x406   :  { %10010 = vmatprep.subr.bf16.mxu1 %v11850_v34  ;;  %v3342_v52 = vld [vmem:[#allocation9 + $0x770] sm:$0xff] }
 0x407   :  { %10052 = vmatpush1.bf16.msra.mxu0 %v11977_v51  ;;  %v3210_v38 = vld [vmem:[#allocation9 + $0x350] sm:$0xff]  ;;  %v12058_v51 = vcombine.high %v3338_v26, %v3342_v52  ;;  %v12057_v15 = vcombine.low %v3338_v26, %v3342_v52 }
 0x408   :  { %10053 = vmatprep.subr.bf16.mxu0 %v11970_v35  ;;  %v3214_v34 = vld [vmem:[#allocation9 + $0x370] sm:$0xff] }
 0x409   :  { %10011 = vmatpush1.bf16.msra.mxu1 %v11849_v12  ;;  %v3330_v2 = vld [vmem:[#allocation9 + $0x710] sm:$0xff]  ;;  %v11930_v12 = vcombine.high %v3210_v38, %v3214_v34  ;;  %v11929_v44 = vcombine.low %v3210_v38, %v3214_v34 }
 0x40a   :  { %10012 = vmatprep.subr.bf16.mxu1 %v11842_v60  ;;  %v3334_v35 = vld [vmem:[#allocation9 + $0x730] sm:$0xff] }
 0x40b   :  { %10054 = vmatpush1.bf16.msra.mxu0 %v11969_v62  ;;  %v3202_v36 = vld [vmem:[#allocation9 + $0x310] sm:$0xff]  ;;  %v12050_v62 = vcombine.high %v3330_v2, %v3334_v35  ;;  %v12049_v24 = vcombine.low %v3330_v2, %v3334_v35 }
 0x40c   :  { %10055 = vmatprep.subr.bf16.mxu0 %v11962_v31  ;;  %v3206_v60 = vld [vmem:[#allocation9 + $0x330] sm:$0xff] }
 0x40d   :  { %10013 = vmatpush1.bf16.msra.mxu1 %v11841_v27  ;;  %v3322_v47 = vld [vmem:[#allocation9 + $0x6d0] sm:$0xff]  ;;  %v11922_v27 = vcombine.high %v3202_v36, %v3206_v60  ;;  %v11921_v4 = vcombine.low %v3202_v36, %v3206_v60 }
 0x40e   :  { %10014 = vmatprep.subr.bf16.mxu1 %v11834_v37  ;;  %v3326_v31 = vld [vmem:[#allocation9 + $0x6f0] sm:$0xff] }
 0x40f   :  { %10056 = vmatpush1.bf16.msra.mxu0 %v11961_v46  ;;  %v3194_v58 = vld [vmem:[#allocation9 + $0x2d0] sm:$0xff]  ;;  %v12042_v46 = vcombine.high %v3322_v47, %v3326_v31  ;;  %v12041_v42 = vcombine.low %v3322_v47, %v3326_v31 }
 0x410   :  { %10057 = vmatprep.subr.bf16.mxu0 %v11954_v13  ;;  %v3198_v37 = vld [vmem:[#allocation9 + $0x2f0] sm:$0xff] }
 0x411   :  { %10015 = vmatpush1.bf16.msra.mxu1 %v11833_v40  ;;  %v3314_v9 = vld [vmem:[#allocation9 + $0x690] sm:$0xff]  ;;  %v11914_v40 = vcombine.high %v3194_v58, %v3198_v37  ;;  %v11913_v28 = vcombine.low %v3194_v58, %v3198_v37 }
 0x412   :  { %10016 = vmatprep.subr.bf16.mxu1 %v11826_v57  ;;  %v3318_v13 = vld [vmem:[#allocation9 + $0x6b0] sm:$0xff] }
 0x413   :  { %10058 = vmatpush1.bf16.msra.mxu0 %v11953_v21  ;;  %v3186_v55 = vld [vmem:[#allocation9 + $0x290] sm:$0xff]  ;;  %v12034_v21 = vcombine.high %v3314_v9, %v3318_v13  ;;  %v12033_v61 = vcombine.low %v3314_v9, %v3318_v13 }
 0x414   :  { %10059 = vmatprep.subr.bf16.mxu0 %v12074_v63  ;;  %v3190_v57 = vld [vmem:[#allocation9 + $0x2b0] sm:$0xff] }
 0x415   :  { %10017 = vmatpush1.bf16.msra.mxu1 %v11825_v45  ;;  %v3306_v20 = vld [vmem:[#allocation9 + $0x650] sm:$0xff]  ;;  %v11906_v45 = vcombine.high %v3186_v55, %v3190_v57  ;;  %v11905_v19 = vcombine.low %v3186_v55, %v3190_v57 }
 0x416   :  { %10018 = vmatprep.subr.bf16.mxu1 %v11946_v49  ;;  %v3310_v63 = vld [vmem:[#allocation9 + $0x670] sm:$0xff] }
 0x417   :  { %10060 = vmatpush2.bf16.msra.mxu0 %v12073_v30  ;;  %v3178_v54 = vld [vmem:[#allocation9 + $0x250] sm:$0xff]  ;;  %v12026_v30 = vcombine.high %v3306_v20, %v3310_v63  ;;  %v12025_v26 = vcombine.low %v3306_v20, %v3310_v63 }
 0x418   :  { %10061 = vmatprep.subr.bf16.mxu0 %v12066_v3  ;;  %v3182_v49 = vld [vmem:[#allocation9 + $0x270] sm:$0xff] }
 0x419   :  { %10019 = vmatpush2.bf16.msra.mxu1 %v11945_v39  ;;  %v3298_v29 = vld [vmem:[#allocation9 + $0x610] sm:$0xff]  ;;  %v11898_v39 = vcombine.high %v3178_v54, %v3182_v49  ;;  %v11897_v38 = vcombine.low %v3178_v54, %v3182_v49 }
 0x41a   :  { %10020 = vmatprep.subr.bf16.mxu1 %v11938_v17  ;;  %v3302_v3 = vld [vmem:[#allocation9 + $0x630] sm:$0xff] }
 0x41b   :  { %10062 = vmatpush2.bf16.msra.mxu0 %v12065_v8  ;;  %v3170_v52 = vld [vmem:[#allocation9 + $0x210] sm:$0xff]  ;;  %v12018_v8 = vcombine.high %v3298_v29, %v3302_v3  ;;  %v12017_v2 = vcombine.low %v3298_v29, %v3302_v3 }
 0x41c   :  { %10063 = vmatprep.subr.bf16.mxu0 %v12058_v51  ;;  %v3174_v17 = vld [vmem:[#allocation9 + $0x230] sm:$0xff] }
 0x41d   :  { %10021 = vmatpush2.bf16.msra.mxu1 %v11937_v6  ;;  %v3546_v34 = vld [vmem:[#allocation9 + $0xdd0] sm:$0xff]  ;;  %v11890_v6 = vcombine.high %v3170_v52, %v3174_v17  ;;  %v11889_v36 = vcombine.low %v3170_v52, %v3174_v17 }
 0x41e   :  { %10022 = vmatprep.subr.bf16.mxu1 %v11930_v12  ;;  %v3550_v51 = vld [vmem:[#allocation9 + $0xdf0] sm:$0xff] }
 0x41f   :  { %10064 = vmatpush2.bf16.msra.mxu0 %v12057_v15  ;;  %v3418_v35 = vld [vmem:[#allocation9 + $0x9d0] sm:$0xff]  ;;  %v12266_v15 = vcombine.high %v3546_v34, %v3550_v51  ;;  %v12265_v47 = vcombine.low %v3546_v34, %v3550_v51 }
 0x420   :  { %10065 = vmatprep.subr.bf16.mxu0 %v12050_v62  ;;  %v3422_v12 = vld [vmem:[#allocation9 + $0x9f0] sm:$0xff] }
 0x421   :  { %10023 = vmatpush2.bf16.msra.mxu1 %v11929_v44  ;;  %v3538_v60 = vld [vmem:[#allocation9 + $0xd90] sm:$0xff]  ;;  %v12138_v44 = vcombine.high %v3418_v35, %v3422_v12  ;;  %v12137_v58 = vcombine.low %v3418_v35, %v3422_v12 }
 0x422   :  { %10024 = vmatprep.subr.bf16.mxu1 %v11922_v27  ;;  %v3542_v62 = vld [vmem:[#allocation9 + $0xdb0] sm:$0xff] }
 0x423   :  { %10066 = vmatpush2.bf16.msra.mxu0 %v12049_v24  ;;  %v3410_v31 = vld [vmem:[#allocation9 + $0x990] sm:$0xff]  ;;  %v12258_v24 = vcombine.high %v3538_v60, %v3542_v62  ;;  %v12257_v13 = vcombine.low %v3538_v60, %v3542_v62 }
 0x424   :  { %10067 = vmatprep.subr.bf16.mxu0 %v12042_v46  ;;  %v3414_v27 = vld [vmem:[#allocation9 + $0x9b0] sm:$0xff] }
 0x425   :  { %10025 = vmatpush2.bf16.msra.mxu1 %v11921_v4  ;;  %v3530_v37 = vld [vmem:[#allocation9 + $0xd50] sm:$0xff]  ;;  %v12130_v9 = vcombine.high %v3410_v31, %v3414_v27  ;;  %v12129_v20 = vcombine.low %v3410_v31, %v3414_v27 }
 0x426   :  { %10026 = vmatprep.subr.bf16.mxu1 %v11914_v40  ;;  %v3534_v46 = vld [vmem:[#allocation9 + $0xd70] sm:$0xff] }
 0x427   :  { %10068 = vmatpush2.bf16.msra.mxu0 %v12041_v42  ;;  %v3402_v40 = vld [vmem:[#allocation9 + $0x950] sm:$0xff] }
 0x428   :  { %10069 = vmatprep.subr.bf16.mxu0 %v12034_v21  ;;  %v3406_v42 = vld [vmem:[#allocation9 + $0x970] sm:$0xff]  ;;  %v12250_v21 = vcombine.high %v3530_v37, %v3534_v46 }
 0x429   :  { %10027 = vmatpush2.bf16.msra.mxu1 %v11913_v28  ;;  %v3522_v63 = vld [vmem:[#allocation9 + $0xd10] sm:$0xff]  ;;  %v12122_v49 = vcombine.high %v3402_v40, %v3406_v42  ;;  %v12121_v17 = vcombine.low %v3402_v40, %v3406_v42 }
 0x42a   :  { %10028 = vmatprep.subr.bf16.mxu1 %v11906_v45  ;;  %v3526_v45 = vld [vmem:[#allocation9 + $0xd30] sm:$0xff] }
 0x42b   :  { %10070 = vmatpush2.bf16.msra.mxu0 %v12033_v61  ;;  %v3394_v29 = vld [vmem:[#allocation9 + $0x910] sm:$0xff]  ;;  %v12242_v52 = vcombine.high %v3522_v63, %v3526_v45 }
 0x42c   :  { %10071 = vmatprep.subr.bf16.mxu0 %v12026_v30  ;;  %v3398_v3 = vld [vmem:[#allocation9 + $0x930] sm:$0xff] }
 0x42d   :  { %10029 = vmatpush2.bf16.msra.mxu1 %v11905_v19  ;;  %v12249_v19 = vcombine.low %v3530_v37, %v3534_v46  ;;  %v3390_v35 = vld [vmem:[#allocation9 + $0x8f0] sm:$0xff] }
 0x42e   :  { %10030 = vmatprep.subr.bf16.mxu1 %v11898_v39  ;;  %v3510_v60 = vld [vmem:[#allocation9 + $0xcb0] sm:$0xff] }
 0x42f   :  { %10072 = vmatpush2.bf16.msra.mxu0 %v12025_v26  ;;  %v3382_v31 = vld [vmem:[#allocation9 + $0x8b0] sm:$0xff] }
 0x430   :  { %10073 = vmatprep.subr.bf16.mxu0 %v12018_v8  ;;  %v3514_v8 = vld [vmem:[#allocation9 + $0xcd0] sm:$0xff] }
 0x431   :  { %10031 = vmatpush2.bf16.msra.mxu1 %v11897_v38  ;;  %v3518_v38 = vld [vmem:[#allocation9 + $0xcf0] sm:$0xff] }
 0x432   :  { %10032 = vmatprep.subr.bf16.mxu1 %v11890_v6  ;;  %v12114_v6 = vcombine.high %v3394_v29, %v3398_v3  ;;  %v12234_v12 = vcombine.high %v3514_v8, %v3518_v38  ;;  %v3502_v37 = vld [vmem:[#allocation9 + $0xc70] sm:$0xff] }
 0x433   :  { %10074 = vmatpush2.bf16.msra.mxu0 %v12017_v2  ;;  %v3386_v2 = vld [vmem:[#allocation9 + $0x8d0] sm:$0xff] }
 0x434   :  { %10125 = vmatprep.subr.bf16.mxu0 %v12266_v15  ;;  %v12113_v15 = vcombine.low %v3394_v29, %v3398_v3  ;;  %v12106_v62 = vcombine.high %v3386_v2, %v3390_v35  ;;  %v3482_v29 = vld [vmem:[#allocation9 + $0xbd0] sm:$0xff] }
 0x435   :  { %10033 = vmatpush2.bf16.msra.mxu1 %v11889_v36  ;;  %v3506_v36 = vld [vmem:[#allocation9 + $0xc90] sm:$0xff] }
 0x436   :  { %v9831_v4 = vpop.f32.mrf.mxu0  ;;  %10076 = vmatmul.mubr.bf16.vlgmr.msra.gmra.mxu0 %v15675_v5  ;;  %10084 = vmatprep.subr.bf16.mxu1 %v12138_v44  ;;  %v12233_v44 = vcombine.low %v3514_v8, %v3518_v38  ;;  %v12226_v27 = vcombine.high %v3506_v36, %v3510_v60  ;;  %v3486_v3 = vld [vmem:[#allocation9 + $0xbf0] sm:$0xff] }
 0x437   :  { %10126 = vmatpush1.bf16.msra.mxu0 %v12265_v47  ;;  %10157 = vmatprep.mubr.bf16.mxu0 %v15679_v22  ;;  %v3378_v47 = vld [vmem:[#allocation9 + $0x890] sm:$0xff]  ;;  %v12202_v8 = vcombine.high %v3482_v29, %v3486_v3 }
 0x438   :  { %v9790_v55 = vpop.f32.mrf.mxu1  ;;  %v9833_v57 = vpop.f32.mrf.mxu0  ;;  %10035 = vmatmul.mubr.bf16.vlgmr.msra.gmra.mxu1 %v15667_v0  ;;  %10127 = vmatprep.subr.bf16.mxu0 %v12258_v24  ;;  %v12105_v24 = vcombine.low %v3386_v2, %v3390_v35  ;;  %v12098_v46 = vcombine.high %v3378_v47, %v3382_v31  ;;  %v12097_v42 = vcombine.low %v3378_v47, %v3382_v31  ;;  %v3594_v35 = vld [vmem:[#allocation9 + $0xf50] sm:$0xff] }
 0x439   :  { %v9791_v28 = vadd.f32 %v9790_v55, %v15783_v32  ;;  %10085 = vmatpush1.bf16.msra.mxu1 %v12137_v58  ;;  %10116 = vmatprep.mubr.bf16.mxu1 %v15681_v53  ;;  %v3498_v58 = vld [vmem:[#allocation9 + $0xc50] sm:$0xff]  ;;  %v12201_v2 = vcombine.low %v3482_v29, %v3486_v3 }
 0x43a   :  { %v9792_v61 = vpop.f32.mrf.mxu1  ;;  %v9835_v54 = vpop.f32.mrf.mxu0  ;;  %10086 = vmatprep.subr.bf16.mxu1 %v12130_v9  ;;  %v3370_v9 = vld [vmem:[#allocation9 + $0x850] sm:$0xff]  ;;  %v12218_v40 = vcombine.high %v3498_v58, %v3502_v37 }
 0x43b   :  { %v9793_v30 = vadd.f32 %v9792_v61, %v15785_v43  ;;  %10128 = vmatpush1.bf16.msra.mxu0 %v12257_v13  ;;  %v15793_v39 = vadd.f32 %v9831_v4, %v9791_v28  ;;  %v12241_v43 = vcombine.low %v3522_v63, %v3526_v45  ;;  %v12225_v4 = vcombine.low %v3506_v36, %v3510_v60  ;;  %v3374_v13 = vld [vmem:[#allocation9 + $0x870] sm:$0xff] }
 0x43c   :  { %v9794_v26 = vpop.f32.mrf.mxu1  ;;  %v9836_v32 = vpop.f32.mrf.mxu0  ;;  %10129 = vmatprep.subr.bf16.mxu0 %v12250_v21  ;;  %v3490_v55 = vld [vmem:[#allocation9 + $0xc10] sm:$0xff]  ;;  %v12090_v21 = vcombine.high %v3370_v9, %v3374_v13  ;;  %v12217_v28 = vcombine.low %v3498_v58, %v3502_v37  ;;  %v12089_v61 = vcombine.low %v3370_v9, %v3374_v13 }
 0x43d   :  { %10087 = vmatpush1.bf16.msra.mxu1 %v12129_v20  ;;  %v15795_v34 = vadd.f32 %v9833_v57, %v9793_v30  ;;  %v3494_v57 = vld [vmem:[#allocation9 + $0xc30] sm:$0xff] }
 0x43e   :  { %v9795_v51 = vpop.f32.mrf.mxu1  ;;  %10088 = vmatprep.subr.bf16.mxu1 %v12122_v49  ;;  %v3362_v20 = vld [vmem:[#allocation9 + $0x810] sm:$0xff]  ;;  %v12210_v45 = vcombine.high %v3490_v55, %v3494_v57 }
 0x43f   :  { %10130 = vmatpush1.bf16.msra.mxu0 %v12249_v19  ;;  %v3366_v63 = vld [vmem:[#allocation9 + $0x830] sm:$0xff]  ;;  %v12209_v19 = vcombine.low %v3490_v55, %v3494_v57 }
 0x440   :  { %10131 = vmatprep.subr.bf16.mxu0 %v12242_v52  ;;  %v3610_v54 = vld [vmem:[#allocation9 + $0xfd0] sm:$0xff]  ;;  %v12082_v30 = vcombine.high %v3362_v20, %v3366_v63  ;;  %v12081_v32 = vcombine.low %v3362_v20, %v3366_v63 }
 0x441   :  { %10089 = vmatpush1.bf16.msra.mxu1 %v12121_v17  ;;  %v3614_v49 = vld [vmem:[#allocation9 + $0xff0] sm:$0xff] }
 0x442   :  { %10090 = vmatprep.subr.bf16.mxu1 %v12114_v6  ;;  %v12330_v26 = vcombine.high %v3610_v54, %v3614_v49  ;;  %v3602_v52 = vld [vmem:[#allocation9 + $0xf90] sm:$0xff]  ;;  %v12329_v38 = vcombine.low %v3610_v54, %v3614_v49 }
 0x443   :  { %10132 = vmatpush1.bf16.msra.mxu0 %v12241_v43  ;;  %v3606_v17 = vld [vmem:[#allocation9 + $0xfb0] sm:$0xff] }
 0x444   :  { %10133 = vmatprep.subr.bf16.mxu0 %v12234_v12  ;;  %v3474_v51 = vld [vmem:[#allocation9 + $0xb90] sm:$0xff]  ;;  %v12322_v43 = vcombine.high %v3602_v52, %v3606_v17  ;;  %v12321_v36 = vcombine.low %v3602_v52, %v3606_v17 }
 0x445   :  { %10091 = vmatpush1.bf16.msra.mxu1 %v12113_v15  ;;  %v3478_v6 = vld [vmem:[#allocation9 + $0xbb0] sm:$0xff] }
 0x446   :  { %10092 = vmatprep.subr.bf16.mxu1 %v12106_v62  ;;  %v3598_v12 = vld [vmem:[#allocation9 + $0xf70] sm:$0xff]  ;;  %v12194_v15 = vcombine.high %v3474_v51, %v3478_v6  ;;  %v12193_v47 = vcombine.low %v3474_v51, %v3478_v6 }
 0x447   :  { %10134 = vmatpush1.bf16.msra.mxu0 %v12233_v44  ;;  %v3466_v60 = vld [vmem:[#allocation9 + $0xb50] sm:$0xff]  ;;  %v12314_v44 = vcombine.high %v3594_v35, %v3598_v12  ;;  %v12313_v58 = vcombine.low %v3594_v35, %v3598_v12 }
 0x448   :  { %10135 = vmatprep.subr.bf16.mxu0 %v12226_v27  ;;  %v3470_v62 = vld [vmem:[#allocation9 + $0xb70] sm:$0xff] }
 0x449   :  { %10093 = vmatpush1.bf16.msra.mxu1 %v12105_v24  ;;  %v3586_v31 = vld [vmem:[#allocation9 + $0xf10] sm:$0xff]  ;;  %v12186_v24 = vcombine.high %v3466_v60, %v3470_v62  ;;  %v12185_v9 = vcombine.low %v3466_v60, %v3470_v62 }
 0x44a   :  { %10094 = vmatprep.subr.bf16.mxu1 %v12098_v46  ;;  %v3590_v27 = vld [vmem:[#allocation9 + $0xf30] sm:$0xff] }
 0x44b   :  { %10136 = vmatpush1.bf16.msra.mxu0 %v12225_v4  ;;  %v3458_v37 = vld [vmem:[#allocation9 + $0xb10] sm:$0xff]  ;;  %v12306_v4 = vcombine.high %v3586_v31, %v3590_v27  ;;  %v12305_v55 = vcombine.low %v3586_v31, %v3590_v27 }
 0x44c   :  { %10137 = vmatprep.subr.bf16.mxu0 %v12218_v40  ;;  %v3462_v46 = vld [vmem:[#allocation9 + $0xb30] sm:$0xff] }
 0x44d   :  { %10095 = vmatpush1.bf16.msra.mxu1 %v12097_v42  ;;  %v3578_v13 = vld [vmem:[#allocation9 + $0xed0] sm:$0xff]  ;;  %v12178_v42 = vcombine.high %v3458_v37, %v3462_v46  ;;  %v12177_v20 = vcombine.low %v3458_v37, %v3462_v46 }
 0x44e   :  { %10096 = vmatprep.subr.bf16.mxu1 %v12090_v21  ;;  %v3582_v40 = vld [vmem:[#allocation9 + $0xef0] sm:$0xff] }
 0x44f   :  { %10138 = vmatpush1.bf16.msra.mxu0 %v12217_v28  ;;  %v3450_v57 = vld [vmem:[#allocation9 + $0xad0] sm:$0xff]  ;;  %v12298_v28 = vcombine.high %v3578_v13, %v3582_v40  ;;  %v12297_v54 = vcombine.low %v3578_v13, %v3582_v40 }
 0x450   :  { %10139 = vmatprep.subr.bf16.mxu0 %v12210_v45  ;;  %v3454_v21 = vld [vmem:[#allocation9 + $0xaf0] sm:$0xff] }
 0x451   :  { %10097 = vmatpush1.bf16.msra.mxu1 %v12089_v61  ;;  %v3570_v63 = vld [vmem:[#allocation9 + $0xe90] sm:$0xff]  ;;  %v12170_v61 = vcombine.high %v3450_v57, %v3454_v21  ;;  %v12169_v29 = vcombine.low %v3450_v57, %v3454_v21 }
 0x452   :  { %10098 = vmatprep.subr.bf16.mxu1 %v12082_v30  ;;  %v3574_v45 = vld [vmem:[#allocation9 + $0xeb0] sm:$0xff] }
 0x453   :  { %10140 = vmatpush1.bf16.msra.mxu0 %v12209_v19  ;;  %v3442_v49 = vld [vmem:[#allocation9 + $0xa90] sm:$0xff]  ;;  %v12290_v19 = vcombine.high %v3570_v63, %v3574_v45  ;;  %v12289_v52 = vcombine.low %v3570_v63, %v3574_v45 }
 0x454   :  { %10141 = vmatprep.subr.bf16.mxu0 %v12330_v26  ;;  %v3446_v30 = vld [vmem:[#allocation9 + $0xab0] sm:$0xff] }
 0x455   :  { %10099 = vmatpush1.bf16.msra.mxu1 %v12081_v32  ;;  %v3562_v3 = vld [vmem:[#allocation9 + $0xe50] sm:$0xff]  ;;  %v12162_v32 = vcombine.high %v3442_v49, %v3446_v30  ;;  %v12161_v51 = vcombine.low %v3442_v49, %v3446_v30 }
 0x456   :  { %10100 = vmatprep.subr.bf16.mxu1 %v12202_v8  ;;  %v3566_v26 = vld [vmem:[#allocation9 + $0xe70] sm:$0xff] }
 0x457   :  { %10142 = vmatpush2.bf16.msra.mxu0 %v12329_v38  ;;  %v3434_v17 = vld [vmem:[#allocation9 + $0xa50] sm:$0xff]  ;;  %v12282_v38 = vcombine.high %v3562_v3, %v3566_v26  ;;  %v12281_v35 = vcombine.low %v3562_v3, %v3566_v26 }
 0x458   :  { %10143 = vmatprep.subr.bf16.mxu0 %v12322_v43  ;;  %v3438_v8 = vld [vmem:[#allocation9 + $0xa70] sm:$0xff] }
 0x459   :  { %10101 = vmatpush2.bf16.msra.mxu1 %v12201_v2  ;;  %v3554_v6 = vld [vmem:[#allocation9 + $0xe10] sm:$0xff]  ;;  %v12154_v2 = vcombine.high %v3434_v17, %v3438_v8  ;;  %v12153_v60 = vcombine.low %v3434_v17, %v3438_v8 }
 0x45a   :  { %10102 = vmatprep.subr.bf16.mxu1 %v12194_v15  ;;  %v3558_v43 = vld [vmem:[#allocation9 + $0xe30] sm:$0xff] }
 0x45b   :  { %10144 = vmatpush2.bf16.msra.mxu0 %v12321_v36  ;;  %v3426_v12 = vld [vmem:[#allocation9 + $0xa10] sm:$0xff]  ;;  %v12274_v36 = vcombine.high %v3554_v6, %v3558_v43  ;;  %v12273_v31 = vcombine.low %v3554_v6, %v3558_v43 }
 0x45c   :  { %10145 = vmatprep.subr.bf16.mxu0 %v12314_v44  ;;  %v3430_v15 = vld [vmem:[#allocation9 + $0xa30] sm:$0xff] }
 0x45d   :  { %10103 = vmatpush2.bf16.msra.mxu1 %v12193_v47  ;;  %v3802_v62 = vld [vmem:[#allocation9 + $0x15d0] sm:$0xff]  ;;  %v12146_v47 = vcombine.high %v3426_v12, %v3430_v15  ;;  %v12145_v37 = vcombine.low %v3426_v12, %v3430_v15 }
 0x45e   :  { %10104 = vmatprep.subr.bf16.mxu1 %v12186_v24  ;;  %v3806_v44 = vld [vmem:[#allocation9 + $0x15f0] sm:$0xff] }
 0x45f   :  { %10146 = vmatpush2.bf16.msra.mxu0 %v12313_v58  ;;  %v3674_v27 = vld [vmem:[#allocation9 + $0x11d0] sm:$0xff]  ;;  %v12522_v58 = vcombine.high %v3802_v62, %v3806_v44  ;;  %v12521_v13 = vcombine.low %v3802_v62, %v3806_v44 }
 0x460   :  { %10147 = vmatprep.subr.bf16.mxu0 %v12306_v4  ;;  %v3678_v24 = vld [vmem:[#allocation9 + $0x11f0] sm:$0xff] }
 0x461   :  { %10105 = vmatpush2.bf16.msra.mxu1 %v12185_v9  ;;  %v3794_v46 = vld [vmem:[#allocation9 + $0x1590] sm:$0xff]  ;;  %v12394_v9 = vcombine.high %v3674_v27, %v3678_v24  ;;  %v12393_v57 = vcombine.low %v3674_v27, %v3678_v24 }
 0x462   :  { %10106 = vmatprep.subr.bf16.mxu1 %v12178_v42  ;;  %v3798_v4 = vld [vmem:[#allocation9 + $0x15b0] sm:$0xff] }
 0x463   :  { %10148 = vmatpush2.bf16.msra.mxu0 %v12305_v55  ;;  %v3666_v40 = vld [vmem:[#allocation9 + $0x1190] sm:$0xff]  ;;  %v12514_v55 = vcombine.high %v3794_v46, %v3798_v4  ;;  %v12513_v45 = vcombine.low %v3794_v46, %v3798_v4 }
 0x464   :  { %10149 = vmatprep.subr.bf16.mxu0 %v12298_v28  ;;  %v3670_v42 = vld [vmem:[#allocation9 + $0x11b0] sm:$0xff] }
 0x465   :  { %10107 = vmatpush2.bf16.msra.mxu1 %v12177_v20  ;;  %v3786_v21 = vld [vmem:[#allocation9 + $0x1550] sm:$0xff]  ;;  %v12386_v63 = vcombine.high %v3666_v40, %v3670_v42  ;;  %v12385_v3 = vcombine.low %v3666_v40, %v3670_v42 }
 0x466   :  { %10108 = vmatprep.subr.bf16.mxu1 %v12170_v61  ;;  %v3790_v28 = vld [vmem:[#allocation9 + $0x1570] sm:$0xff] }
 0x467   :  { %10150 = vmatpush2.bf16.msra.mxu0 %v12297_v54  ;;  %v3658_v61 = vld [vmem:[#allocation9 + $0x1150] sm:$0xff] }
 0x468   :  { %10151 = vmatprep.subr.bf16.mxu0 %v12290_v19  ;;  %v3662_v54 = vld [vmem:[#allocation9 + $0x1170] sm:$0xff]  ;;  %v12506_v19 = vcombine.high %v3786_v21, %v3790_v28 }
 0x469   :  { %10109 = vmatpush2.bf16.msra.mxu1 %v12169_v29  ;;  %v3778_v26 = vld [vmem:[#allocation9 + $0x1510] sm:$0xff]  ;;  %v12378_v8 = vcombine.high %v3658_v61, %v3662_v54  ;;  %v12377_v15 = vcombine.low %v3658_v61, %v3662_v54 }
 0x46a   :  { %10110 = vmatprep.subr.bf16.mxu1 %v12162_v32  ;;  %v3782_v32 = vld [vmem:[#allocation9 + $0x1530] sm:$0xff] }
 0x46b   :  { %10152 = vmatpush2.bf16.msra.mxu0 %v12289_v52  ;;  %v3650_v6 = vld [vmem:[#allocation9 + $0x1110] sm:$0xff]  ;;  %v12498_v12 = vcombine.high %v3778_v26, %v3782_v32 }
 0x46c   :  { %10153 = vmatprep.subr.bf16.mxu0 %v12282_v38  ;;  %v3654_v43 = vld [vmem:[#allocation9 + $0x1130] sm:$0xff] }
 0x46d   :  { %10111 = vmatpush2.bf16.msra.mxu1 %v12161_v51  ;;  %v12505_v51 = vcombine.low %v3786_v21, %v3790_v28  ;;  %v3646_v27 = vld [vmem:[#allocation9 + $0x10f0] sm:$0xff] }
 0x46e   :  { %10112 = vmatprep.subr.bf16.mxu1 %v12154_v2  ;;  %v3766_v46 = vld [vmem:[#allocation9 + $0x14b0] sm:$0xff] }
 0x46f   :  { %10154 = vmatpush2.bf16.msra.mxu0 %v12281_v35  ;;  %v3638_v40 = vld [vmem:[#allocation9 + $0x10b0] sm:$0xff] }
 0x470   :  { %10155 = vmatprep.subr.bf16.mxu0 %v12274_v36  ;;  %v3770_v36 = vld [vmem:[#allocation9 + $0x14d0] sm:$0xff] }
 0x471   :  { %10113 = vmatpush2.bf16.msra.mxu1 %v12153_v60  ;;  %v3774_v60 = vld [vmem:[#allocation9 + $0x14f0] sm:$0xff] }
 0x472   :  { %10114 = vmatprep.subr.bf16.mxu1 %v12146_v47  ;;  %v12370_v47 = vcombine.high %v3650_v6, %v3654_v43  ;;  %v12490_v24 = vcombine.high %v3770_v36, %v3774_v60  ;;  %v3758_v21 = vld [vmem:[#allocation9 + $0x1470] sm:$0xff] }
 0x473   :  { %10156 = vmatpush2.bf16.msra.mxu0 %v12273_v31  ;;  %v3642_v31 = vld [vmem:[#allocation9 + $0x10d0] sm:$0xff] }
 0x474   :  { %10207 = vmatprep.subr.bf16.mxu0 %v12522_v58  ;;  %v12369_v58 = vcombine.low %v3650_v6, %v3654_v43  ;;  %v12362_v4 = vcombine.high %v3642_v31, %v3646_v27  ;;  %v3738_v6 = vld [vmem:[#allocation9 + $0x13d0] sm:$0xff] }
 0x475   :  { %10115 = vmatpush2.bf16.msra.mxu1 %v12145_v37  ;;  %v3762_v37 = vld [vmem:[#allocation9 + $0x1490] sm:$0xff] }
 0x476   :  { %v9913_v20 = vpop.f32.mrf.mxu0  ;;  %10158 = vmatmul.mubr.bf16.vlgmr.msra.gmra.mxu0 %v15692_v7  ;;  %10166 = vmatprep.subr.bf16.mxu1 %v12394_v9  ;;  %v12489_v9 = vcombine.low %v3770_v36, %v3774_v60  ;;  %v12482_v42 = vcombine.high %v3762_v37, %v3766_v46  ;;  %v3742_v43 = vld [vmem:[#allocation9 + $0x13f0] sm:$0xff] }
 0x477   :  { %10208 = vmatpush1.bf16.msra.mxu0 %v12521_v13  ;;  %10239 = vmatprep.mubr.bf16.mxu0 %v15701_v14  ;;  %v3634_v13 = vld [vmem:[#allocation9 + $0x1090] sm:$0xff]  ;;  %v12458_v36 = vcombine.high %v3738_v6, %v3742_v43 }
 0x478   :  { %v9872_v49 = vpop.f32.mrf.mxu1  ;;  %v9915_v30 = vpop.f32.mrf.mxu0  ;;  %10117 = vmatmul.mubr.bf16.vlgmr.msra.gmra.mxu1 %v15689_v50  ;;  %10209 = vmatprep.subr.bf16.mxu0 %v12514_v55  ;;  %v12361_v55 = vcombine.low %v3642_v31, %v3646_v27  ;;  %v12354_v28 = vcombine.high %v3634_v13, %v3638_v40  ;;  %v12353_v54 = vcombine.low %v3634_v13, %v3638_v40  ;;  %v3850_v27 = vld [vmem:[#allocation9 + $0x1750] sm:$0xff] }
 0x479   :  { %v9873_v29 = vadd.f32 %v9872_v49, %v15793_v39  ;;  %10167 = vmatpush1.bf16.msra.mxu1 %v12393_v57  ;;  %10198 = vmatprep.mubr.bf16.mxu1 %v15703_v11  ;;  %v3754_v57 = vld [vmem:[#allocation9 + $0x1450] sm:$0xff]  ;;  %v12457_v31 = vcombine.low %v3738_v6, %v3742_v43 }
 0x47a   :  { %v9874_v52 = vpop.f32.mrf.mxu1  ;;  %v9917_v17 = vpop.f32.mrf.mxu0  ;;  %10168 = vmatprep.subr.bf16.mxu1 %v12386_v63  ;;  %v3626_v63 = vld [vmem:[#allocation9 + $0x1050] sm:$0xff]  ;;  %v12474_v61 = vcombine.high %v3754_v57, %v3758_v21 }
 0x47b   :  { %v9875_v38 = vadd.f32 %v9874_v52, %v15795_v34  ;;  %10210 = vmatpush1.bf16.msra.mxu0 %v12513_v45  ;;  %v15803_v2 = vadd.f32 %v9913_v20, %v9873_v29  ;;  %v12497_v34 = vcombine.low %v3778_v26, %v3782_v32  ;;  %v12481_v20 = vcombine.low %v3762_v37, %v3766_v46  ;;  %v3630_v45 = vld [vmem:[#allocation9 + $0x1070] sm:$0xff] }
 0x47c   :  { %v9876_v35 = vpop.f32.mrf.mxu1  ;;  %v9918_v39 = vpop.f32.mrf.mxu0  ;;  %10211 = vmatprep.subr.bf16.mxu0 %v12506_v19  ;;  %v3746_v49 = vld [vmem:[#allocation9 + $0x1410] sm:$0xff]  ;;  %v12346_v19 = vcombine.high %v3626_v63, %v3630_v45  ;;  %v12473_v29 = vcombine.low %v3754_v57, %v3758_v21  ;;  %v12345_v52 = vcombine.low %v3626_v63, %v3630_v45 }
 0x47d   :  { %10169 = vmatpush1.bf16.msra.mxu1 %v12385_v3  ;;  %v15805_v62 = vadd.f32 %v9915_v30, %v9875_v38  ;;  %v3750_v30 = vld [vmem:[#allocation9 + $0x1430] sm:$0xff] }
 0x47e   :  { %v9877_v44 = vpop.f32.mrf.mxu1  ;;  %10170 = vmatprep.subr.bf16.mxu1 %v12378_v8  ;;  %v3618_v3 = vld [vmem:[#allocation9 + $0x1010] sm:$0xff]  ;;  %v12466_v32 = vcombine.high %v3746_v49, %v3750_v30 }
 0x47f   :  { %10212 = vmatpush1.bf16.msra.mxu0 %v12505_v51  ;;  %v3622_v26 = vld [vmem:[#allocation9 + $0x1030] sm:$0xff]  ;;  %v12465_v51 = vcombine.low %v3746_v49, %v3750_v30 }
 0x480   :  { %10213 = vmatprep.subr.bf16.mxu0 %v12498_v12  ;;  %v3866_v17 = vld [vmem:[#allocation9 + $0x17d0] sm:$0xff]  ;;  %v12338_v38 = vcombine.high %v3618_v3, %v3622_v26  ;;  %v12337_v39 = vcombine.low %v3618_v3, %v3622_v26 }
 0x481   :  { %10171 = vmatpush1.bf16.msra.mxu1 %v12377_v15  ;;  %v3870_v8 = vld [vmem:[#allocation9 + $0x17f0] sm:$0xff] }
 0x482   :  { %10172 = vmatprep.subr.bf16.mxu1 %v12370_v47  ;;  %v12586_v35 = vcombine.high %v3866_v17, %v3870_v8  ;;  %v3858_v12 = vld [vmem:[#allocation9 + $0x1790] sm:$0xff]  ;;  %v12585_v60 = vcombine.low %v3866_v17, %v3870_v8 }
 0x483   :  { %10214 = vmatpush1.bf16.msra.mxu0 %v12497_v34  ;;  %v3862_v15 = vld [vmem:[#allocation9 + $0x17b0] sm:$0xff] }
 0x484   :  { %10215 = vmatprep.subr.bf16.mxu0 %v12490_v24  ;;  %v3730_v44 = vld [vmem:[#allocation9 + $0x1390] sm:$0xff]  ;;  %v12578_v34 = vcombine.high %v3858_v12, %v3862_v15  ;;  %v12577_v37 = vcombine.low %v3858_v12, %v3862_v15 }
 0x485   :  { %10173 = vmatpush1.bf16.msra.mxu1 %v12369_v58  ;;  %v3734_v47 = vld [vmem:[#allocation9 + $0x13b0] sm:$0xff] }
 0x486   :  { %10174 = vmatprep.subr.bf16.mxu1 %v12362_v4  ;;  %v3854_v24 = vld [vmem:[#allocation9 + $0x1770] sm:$0xff]  ;;  %v12450_v58 = vcombine.high %v3730_v44, %v3734_v47  ;;  %v12449_v13 = vcombine.low %v3730_v44, %v3734_v47 }
 0x487   :  { %10216 = vmatpush1.bf16.msra.mxu0 %v12489_v9  ;;  %v3722_v46 = vld [vmem:[#allocation9 + $0x1350] sm:$0xff]  ;;  %v12570_v9 = vcombine.high %v3850_v27, %v3854_v24  ;;  %v12569_v57 = vcombine.low %v3850_v27, %v3854_v24 }
 0x488   :  { %10217 = vmatprep.subr.bf16.mxu0 %v12482_v42  ;;  %v3726_v4 = vld [vmem:[#allocation9 + $0x1370] sm:$0xff] }
 0x489   :  { %10175 = vmatpush1.bf16.msra.mxu1 %v12361_v55  ;;  %v3842_v40 = vld [vmem:[#allocation9 + $0x1710] sm:$0xff]  ;;  %v12442_v55 = vcombine.high %v3722_v46, %v3726_v4  ;;  %v12441_v63 = vcombine.low %v3722_v46, %v3726_v4 }
 0x48a   :  { %10176 = vmatprep.subr.bf16.mxu1 %v12354_v28  ;;  %v3846_v42 = vld [vmem:[#allocation9 + $0x1730] sm:$0xff] }
 0x48b   :  { %10218 = vmatpush1.bf16.msra.mxu0 %v12481_v20  ;;  %v3714_v21 = vld [vmem:[#allocation9 + $0x1310] sm:$0xff]  ;;  %v12562_v20 = vcombine.high %v3842_v40, %v3846_v42  ;;  %v12561_v49 = vcombine.low %v3842_v40, %v3846_v42 }
 0x48c   :  { %10219 = vmatprep.subr.bf16.mxu0 %v12474_v61  ;;  %v3718_v28 = vld [vmem:[#allocation9 + $0x1330] sm:$0xff] }
 0x48d   :  { %10177 = vmatpush1.bf16.msra.mxu1 %v12353_v54  ;;  %v3834_v45 = vld [vmem:[#allocation9 + $0x16d0] sm:$0xff]  ;;  %v12434_v54 = vcombine.high %v3714_v21, %v3718_v28  ;;  %v12433_v3 = vcombine.low %v3714_v21, %v3718_v28 }
 0x48e   :  { %10178 = vmatprep.subr.bf16.mxu1 %v12346_v19  ;;  %v3838_v61 = vld [vmem:[#allocation9 + $0x16f0] sm:$0xff] }
 0x48f   :  { %10220 = vmatpush1.bf16.msra.mxu0 %v12473_v29  ;;  %v3706_v30 = vld [vmem:[#allocation9 + $0x12d0] sm:$0xff]  ;;  %v12554_v29 = vcombine.high %v3834_v45, %v3838_v61  ;;  %v12553_v17 = vcombine.low %v3834_v45, %v3838_v61 }
 0x490   :  { %10221 = vmatprep.subr.bf16.mxu0 %v12466_v32  ;;  %v3710_v19 = vld [vmem:[#allocation9 + $0x12f0] sm:$0xff] }
 0x491   :  { %10179 = vmatpush1.bf16.msra.mxu1 %v12345_v52  ;;  %v3826_v26 = vld [vmem:[#allocation9 + $0x1690] sm:$0xff]  ;;  %v12426_v52 = vcombine.high %v3706_v30, %v3710_v19  ;;  %v12425_v6 = vcombine.low %v3706_v30, %v3710_v19 }
 0x492   :  { %10180 = vmatprep.subr.bf16.mxu1 %v12338_v38  ;;  %v3830_v32 = vld [vmem:[#allocation9 + $0x16b0] sm:$0xff] }
 0x493   :  { %10222 = vmatpush1.bf16.msra.mxu0 %v12465_v51  ;;  %v3698_v8 = vld [vmem:[#allocation9 + $0x1290] sm:$0xff]  ;;  %v12546_v51 = vcombine.high %v3826_v26, %v3830_v32  ;;  %v12545_v12 = vcombine.low %v3826_v26, %v3830_v32 }
 0x494   :  { %10223 = vmatprep.subr.bf16.mxu0 %v12586_v35  ;;  %v3702_v38 = vld [vmem:[#allocation9 + $0x12b0] sm:$0xff] }
 0x495   :  { %10181 = vmatpush1.bf16.msra.mxu1 %v12337_v39  ;;  %v3818_v43 = vld [vmem:[#allocation9 + $0x1650] sm:$0xff]  ;;  %v12418_v39 = vcombine.high %v3698_v8, %v3702_v38  ;;  %v12417_v44 = vcombine.low %v3698_v8, %v3702_v38 }
 0x496   :  { %10182 = vmatprep.subr.bf16.mxu1 %v12458_v36  ;;  %v3822_v35 = vld [vmem:[#allocation9 + $0x1670] sm:$0xff] }
 0x497   :  { %10224 = vmatpush2.bf16.msra.mxu0 %v12585_v60  ;;  %v3690_v15 = vld [vmem:[#allocation9 + $0x1250] sm:$0xff]  ;;  %v12538_v60 = vcombine.high %v3818_v43, %v3822_v35  ;;  %v12537_v27 = vcombine.low %v3818_v43, %v3822_v35 }
 0x498   :  { %10225 = vmatprep.subr.bf16.mxu0 %v12578_v34  ;;  %v3694_v36 = vld [vmem:[#allocation9 + $0x1270] sm:$0xff] }
 0x499   :  { %10183 = vmatpush2.bf16.msra.mxu1 %v12457_v31  ;;  %v3810_v47 = vld [vmem:[#allocation9 + $0x1610] sm:$0xff]  ;;  %v12410_v31 = vcombine.high %v3690_v15, %v3694_v36  ;;  %v12409_v46 = vcombine.low %v3690_v15, %v3694_v36 }
 0x49a   :  { %10184 = vmatprep.subr.bf16.mxu1 %v12450_v58  ;;  %v3814_v34 = vld [vmem:[#allocation9 + $0x1630] sm:$0xff] }
 0x49b   :  { %10226 = vmatpush2.bf16.msra.mxu0 %v12577_v37  ;;  %v3682_v24 = vld [vmem:[#allocation9 + $0x1210] sm:$0xff]  ;;  %v12530_v37 = vcombine.high %v3810_v47, %v3814_v34  ;;  %v12529_v40 = vcombine.low %v3810_v47, %v3814_v34 }
 0x49c   :  { %10227 = vmatprep.subr.bf16.mxu0 %v12570_v9  ;;  %v3686_v58 = vld [vmem:[#allocation9 + $0x1230] sm:$0xff] }
 0x49d   :  { %10185 = vmatpush2.bf16.msra.mxu1 %v12449_v13  ;;  %v4058_v4 = vld [vmem:[#allocation9 + $0x1dd0] sm:$0xff]  ;;  %v12402_v13 = vcombine.high %v3682_v24, %v3686_v58  ;;  %v12401_v21 = vcombine.low %v3682_v24, %v3686_v58 }
 0x49e   :  { %10186 = vmatprep.subr.bf16.mxu1 %v12442_v55  ;;  %v4062_v9 = vld [vmem:[#allocation9 + $0x1df0] sm:$0xff] }
 0x49f   :  { %10228 = vmatpush2.bf16.msra.mxu0 %v12569_v57  ;;  %v3930_v42 = vld [vmem:[#allocation9 + $0x19d0] sm:$0xff]  ;;  %v12778_v57 = vcombine.high %v4058_v4, %v4062_v9  ;;  %v12777_v45 = vcombine.low %v4058_v4, %v4062_v9 }
 0x4a0   :  { %10229 = vmatprep.subr.bf16.mxu0 %v12562_v20  ;;  %v3934_v55 = vld [vmem:[#allocation9 + $0x19f0] sm:$0xff] }
 0x4a1   :  { %10187 = vmatpush2.bf16.msra.mxu1 %v12441_v63  ;;  %v4050_v28 = vld [vmem:[#allocation9 + $0x1d90] sm:$0xff]  ;;  %v12650_v63 = vcombine.high %v3930_v42, %v3934_v55  ;;  %v12649_v30 = vcombine.low %v3930_v42, %v3934_v55 }
 0x4a2   :  { %10188 = vmatprep.subr.bf16.mxu1 %v12434_v54  ;;  %v4054_v20 = vld [vmem:[#allocation9 + $0x1db0] sm:$0xff] }
 0x4a3   :  { %10230 = vmatpush2.bf16.msra.mxu0 %v12561_v49  ;;  %v3922_v61 = vld [vmem:[#allocation9 + $0x1990] sm:$0xff]  ;;  %v12770_v49 = vcombine.high %v4050_v28, %v4054_v20  ;;  %v12769_v32 = vcombine.low %v4050_v28, %v4054_v20 }
 0x4a4   :  { %10231 = vmatprep.subr.bf16.mxu0 %v12554_v29  ;;  %v3926_v54 = vld [vmem:[#allocation9 + $0x19b0] sm:$0xff] }
 0x4a5   :  { %10189 = vmatpush2.bf16.msra.mxu1 %v12433_v3  ;;  %v4042_v19 = vld [vmem:[#allocation9 + $0x1d50] sm:$0xff]  ;;  %v12642_v26 = vcombine.high %v3922_v61, %v3926_v54  ;;  %v12641_v43 = vcombine.low %v3922_v61, %v3926_v54 }
 0x4a6   :  { %10190 = vmatprep.subr.bf16.mxu1 %v12426_v52  ;;  %v4046_v29 = vld [vmem:[#allocation9 + $0x1d70] sm:$0xff] }
 0x4a7   :  { %10232 = vmatpush2.bf16.msra.mxu0 %v12553_v17  ;;  %v3914_v52 = vld [vmem:[#allocation9 + $0x1950] sm:$0xff]  ;;  %v12761_v47 = vcombine.low %v4042_v19, %v4046_v29 }
 0x4a8   :  { %10233 = vmatprep.subr.bf16.mxu0 %v12546_v51  ;;  %v3918_v17 = vld [vmem:[#allocation9 + $0x1970] sm:$0xff]  ;;  %v12762_v51 = vcombine.high %v4042_v19, %v4046_v29 }
 0x4a9   :  { %10191 = vmatpush2.bf16.msra.mxu1 %v12425_v6  ;;  %v4034_v35 = vld [vmem:[#allocation9 + $0x1d10] sm:$0xff]  ;;  %v12634_v36 = vcombine.high %v3914_v52, %v3918_v17 }
 0x4aa   :  { %10192 = vmatprep.subr.bf16.mxu1 %v12418_v39  ;;  %v4038_v39 = vld [vmem:[#allocation9 + $0x1d30] sm:$0xff] }
 0x4ab   :  { %10234 = vmatpush2.bf16.msra.mxu0 %v12545_v12  ;;  %v3906_v34 = vld [vmem:[#allocation9 + $0x1910] sm:$0xff]  ;;  %v12754_v24 = vcombine.high %v4034_v35, %v4038_v39 }
 0x4ac   :  { %10235 = vmatprep.subr.bf16.mxu0 %v12538_v60  ;;  %v4030_v4 = vld [vmem:[#allocation9 + $0x1cf0] sm:$0xff] }
 0x4ad   :  { %10193 = vmatpush2.bf16.msra.mxu1 %v12417_v44  ;;  %v3902_v42 = vld [vmem:[#allocation9 + $0x18f0] sm:$0xff] }
 0x4ae   :  { %10194 = vmatprep.subr.bf16.mxu1 %v12410_v31  ;;  %v3910_v31 = vld [vmem:[#allocation9 + $0x1930] sm:$0xff] }
 0x4af   :  { %10236 = vmatpush2.bf16.msra.mxu0 %v12537_v27  ;;  %v4022_v28 = vld [vmem:[#allocation9 + $0x1cb0] sm:$0xff] }
 0x4b0   :  { %10237 = vmatprep.subr.bf16.mxu0 %v12530_v37  ;;  %v12633_v37 = vcombine.low %v3914_v52, %v3918_v17  ;;  %v3894_v61 = vld [vmem:[#allocation9 + $0x18b0] sm:$0xff] }
 0x4b1   :  { %10195 = vmatpush2.bf16.msra.mxu1 %v12409_v46  ;;  %v4026_v46 = vld [vmem:[#allocation9 + $0x1cd0] sm:$0xff] }
 0x4b2   :  { %10196 = vmatprep.subr.bf16.mxu1 %v12402_v13  ;;  %v12626_v13 = vcombine.high %v3906_v34, %v3910_v31  ;;  %v12746_v55 = vcombine.high %v4026_v46, %v4030_v4  ;;  %v4014_v19 = vld [vmem:[#allocation9 + $0x1c70] sm:$0xff] }
 0x4b3   :  { %10238 = vmatpush2.bf16.msra.mxu0 %v12529_v40  ;;  %v12753_v40 = vcombine.low %v4034_v35, %v4038_v39  ;;  %v3878_v35 = vld [vmem:[#allocation9 + $0x1830] sm:$0xff] }
 0x4b4   :  { %10289 = vmatprep.subr.bf16.mxu0 %v12778_v57  ;;  %v12625_v57 = vcombine.low %v3906_v34, %v3910_v31  ;;  %v3994_v34 = vld [vmem:[#allocation9 + $0x1bd0] sm:$0xff] }
 0x4b5   :  { %10197 = vmatpush2.bf16.msra.mxu1 %v12401_v21  ;;  %v4018_v21 = vld [vmem:[#allocation9 + $0x1c90] sm:$0xff] }
 0x4b6   :  { %v9995_v3 = vpop.f32.mrf.mxu0  ;;  %10240 = vmatmul.mubr.bf16.vlgmr.msra.gmra.mxu0 %v15714_v48  ;;  %10248 = vmatprep.subr.bf16.mxu1 %v12650_v63  ;;  %v12745_v63 = vcombine.low %v4026_v46, %v4030_v4  ;;  %v12738_v54 = vcombine.high %v4018_v21, %v4022_v28  ;;  %v3998_v31 = vld [vmem:[#allocation9 + $0x1bf0] sm:$0xff] }
 0x4b7   :  { %10290 = vmatpush1.bf16.msra.mxu0 %v12777_v45  ;;  %10321 = vmatprep.mubr.bf16.mxu0 %v15727_v59  ;;  %v3890_v45 = vld [vmem:[#allocation9 + $0x1890] sm:$0xff]  ;;  %v12714_v46 = vcombine.high %v3994_v34, %v3998_v31 }
 0x4b8   :  { %v9954_v8 = vpop.f32.mrf.mxu1  ;;  %v9997_v38 = vpop.f32.mrf.mxu0  ;;  %10199 = vmatmul.mubr.bf16.vlgmr.msra.gmra.mxu1 %v15711_v10  ;;  %10291 = vmatprep.subr.bf16.mxu0 %v12770_v49  ;;  %v12610_v29 = vcombine.high %v3890_v45, %v3894_v61  ;;  %v12609_v17 = vcombine.low %v3890_v45, %v3894_v61  ;;  %v4098_v61 = vld [vmem:[#allocation9 + $0x1f10] sm:$0xff] }
 0x4b9   :  { %v9955_v6 = vadd.f32 %v9954_v8, %v15803_v2  ;;  %10249 = vmatpush1.bf16.msra.mxu1 %v12649_v30  ;;  %10280 = vmatprep.mubr.bf16.mxu1 %v15733_v56  ;;  %v4010_v30 = vld [vmem:[#allocation9 + $0x1c50] sm:$0xff] }
 0x4ba   :  { %v9956_v12 = vpop.f32.mrf.mxu1  ;;  %v9999_v15 = vpop.f32.mrf.mxu0  ;;  %10250 = vmatprep.subr.bf16.mxu1 %v12642_v26  ;;  %v3882_v26 = vld [vmem:[#allocation9 + $0x1850] sm:$0xff]  ;;  %v12730_v52 = vcombine.high %v4010_v30, %v4014_v19 }
 0x4bb   :  { %v15812_v60 = vadd.f32 %v9995_v3, %v9955_v6  ;;  %v9957_v44 = vadd.f32 %v9956_v12, %v15805_v62  ;;  %10292 = vmatpush1.bf16.msra.mxu0 %v12769_v32  ;;  %v3898_v62 = vld [vmem:[#allocation9 + $0x18d0] sm:$0xff]  ;;  %v12737_v3 = vcombine.low %v4018_v21, %v4022_v28  ;;  %v12729_v6 = vcombine.low %v4010_v30, %v4014_v19 }
 0x4bc   :  { %v9958_v27 = vpop.f32.mrf.mxu1  ;;  %v10000_v2 = vpop.f32.mrf.mxu0  ;;  %10293 = vmatprep.subr.bf16.mxu0 %v12762_v51  ;;  %v12618_v20 = vcombine.high %v3898_v62, %v3902_v42  ;;  %v12617_v49 = vcombine.low %v3898_v62, %v3902_v42  ;;  %v3886_v32 = vld [vmem:[#allocation9 + $0x1870] sm:$0xff]  ;;  %v12713_v62 = vcombine.low %v3994_v34, %v3998_v31 }
 0x4bd   :  { %v15815_v58 = vadd.f32 %v9997_v38, %v9957_v44  ;;  %10251 = vmatpush1.bf16.msra.mxu1 %v12641_v43  ;;  %v4002_v8 = vld [vmem:[#allocation9 + $0x1c10] sm:$0xff]  ;;  %v12602_v51 = vcombine.high %v3882_v26, %v3886_v32  ;;  %v12601_v12 = vcombine.low %v3882_v26, %v3886_v32 }
 0x4be   :  { %v9959_v9 = vpop.f32.mrf.mxu1  ;;  %10252 = vmatprep.subr.bf16.mxu1 %v12634_v36  ;;  %v4006_v38 = vld [vmem:[#allocation9 + $0x1c30] sm:$0xff] }
 0x4bf   :  { %10294 = vmatpush1.bf16.msra.mxu0 %v12761_v47  ;;  %v3874_v43 = vld [vmem:[#allocation9 + $0x1810] sm:$0xff]  ;;  %v12722_v39 = vcombine.high %v4002_v8, %v4006_v38  ;;  %v12721_v47 = vcombine.low %v4002_v8, %v4006_v38 }
 0x4c0   :  { %10295 = vmatprep.subr.bf16.mxu0 %v12754_v24  ;;  %v4122_v15 = vld [vmem:[#allocation9 + $0x1fd0] sm:$0xff]  ;;  %v12594_v44 = vcombine.high %v3874_v43, %v3878_v35  ;;  %v12593_v2 = vcombine.low %v3874_v43, %v3878_v35 }
 0x4c1   :  { %10253 = vmatpush1.bf16.msra.mxu1 %v12633_v37  ;;  %v4126_v36 = vld [vmem:[#allocation9 + $0x1ff0] sm:$0xff] }
 0x4c2   :  { %10254 = vmatprep.subr.bf16.mxu1 %v12626_v13  ;;  %v12842_v27 = vcombine.high %v4122_v15, %v4126_v36  ;;  %v4114_v24 = vld [vmem:[#allocation9 + $0x1f90] sm:$0xff]  ;;  %v12841_v4 = vcombine.low %v4122_v15, %v4126_v36 }
 0x4c3   :  { %10296 = vmatpush1.bf16.msra.mxu0 %v12753_v40  ;;  %v4118_v37 = vld [vmem:[#allocation9 + $0x1fb0] sm:$0xff] }
 0x4c4   :  { %10297 = vmatprep.subr.bf16.mxu0 %v12746_v55  ;;  %v3986_v9 = vld [vmem:[#allocation9 + $0x1b90] sm:$0xff]  ;;  %v12834_v40 = vcombine.high %v4114_v24, %v4118_v37  ;;  %v12833_v21 = vcombine.low %v4114_v24, %v4118_v37 }
 0x4c5   :  { %10255 = vmatpush1.bf16.msra.mxu1 %v12625_v57  ;;  %v3990_v13 = vld [vmem:[#allocation9 + $0x1bb0] sm:$0xff] }
 0x4c6   :  { %10256 = vmatprep.subr.bf16.mxu1 %v12618_v20  ;;  %v4106_v42 = vld [vmem:[#allocation9 + $0x1f50] sm:$0xff]  ;;  %v12706_v57 = vcombine.high %v3986_v9, %v3990_v13  ;;  %v12705_v45 = vcombine.low %v3986_v9, %v3990_v13 }
 0x4c7   :  { %10298 = vmatpush1.bf16.msra.mxu0 %v12745_v63  ;;  %v4110_v55 = vld [vmem:[#allocation9 + $0x1f70] sm:$0xff] }
 0x4c8   :  { %10299 = vmatprep.subr.bf16.mxu0 %v12738_v54  ;;  %v3978_v28 = vld [vmem:[#allocation9 + $0x1b50] sm:$0xff]  ;;  %v12826_v63 = vcombine.high %v4106_v42, %v4110_v55  ;;  %v12825_v30 = vcombine.low %v4106_v42, %v4110_v55 }
 0x4c9   :  { %10257 = vmatpush1.bf16.msra.mxu1 %v12617_v49  ;;  %v3982_v20 = vld [vmem:[#allocation9 + $0x1b70] sm:$0xff] }
 0x4ca   :  { %10258 = vmatprep.subr.bf16.mxu1 %v12610_v29  ;;  %v4102_v54 = vld [vmem:[#allocation9 + $0x1f30] sm:$0xff]  ;;  %v12698_v49 = vcombine.high %v3978_v28, %v3982_v20  ;;  %v12697_v26 = vcombine.low %v3978_v28, %v3982_v20  ;;  %v3291_v20 = vld [vmem:[#allocation9 + $0x5d8] sm:$0xff] }
 0x4cb   :  { %10300 = vmatpush1.bf16.msra.mxu0 %v12737_v3  ;;  %v3970_v19 = vld [vmem:[#allocation9 + $0x1b10] sm:$0xff]  ;;  %v12818_v3 = vcombine.high %v4098_v61, %v4102_v54  ;;  %v12817_v8 = vcombine.low %v4098_v61, %v4102_v54  ;;  %v3163_v54 = vld [vmem:[#allocation9 + $0x1d8] sm:$0xff] }
 0x4cc   :  { %10301 = vmatprep.subr.bf16.mxu0 %v12730_v52  ;;  %v3974_v29 = vld [vmem:[#allocation9 + $0x1b30] sm:$0xff] }
 0x4cd   :  { %10259 = vmatpush1.bf16.msra.mxu1 %v12609_v17  ;;  %v4090_v32 = vld [vmem:[#allocation9 + $0x1ed0] sm:$0xff]  ;;  %v12690_v17 = vcombine.high %v3970_v19, %v3974_v29  ;;  %v12689_v43 = vcombine.low %v3970_v19, %v3974_v29  ;;  %v4148_v29 = vsub.s32 4, %v15721_v16 }
 0x4ce   :  { %10260 = vmatprep.subr.bf16.mxu1 %v12602_v51  ;;  %v4094_v52 = vld [vmem:[#allocation9 + $0x1ef0] sm:$0xff] }
 0x4cf   :  { %10302 = vmatpush1.bf16.msra.mxu0 %v12729_v6  ;;  %v3962_v38 = vld [vmem:[#allocation9 + $0x1ad0] sm:$0xff]  ;;  %v12810_v6 = vcombine.high %v4090_v32, %v4094_v52  ;;  %v12809_v15 = vcombine.low %v4090_v32, %v4094_v52 }
 0x4d0   :  { %10303 = vmatprep.subr.bf16.mxu0 %v12722_v39  ;;  %v3966_v51 = vld [vmem:[#allocation9 + $0x1af0] sm:$0xff] }
 0x4d1   :  { %10261 = vmatpush1.bf16.msra.mxu1 %v12601_v12  ;;  %v4082_v35 = vld [vmem:[#allocation9 + $0x1e90] sm:$0xff]  ;;  %v12682_v12 = vcombine.high %v3962_v38, %v3966_v51  ;;  %v12681_v34 = vcombine.low %v3962_v38, %v3966_v51  ;;  %v3159_v38 = vld [vmem:[#allocation9 + $0x1b8] sm:$0xff] }
 0x4d2   :  { %10262 = vmatprep.subr.bf16.mxu1 %v12594_v44  ;;  %v4086_v39 = vld [vmem:[#allocation9 + $0x1eb0] sm:$0xff] }
 0x4d3   :  { %10304 = vmatpush1.bf16.msra.mxu0 %v12721_v47  ;;  %v3954_v36 = vld [vmem:[#allocation9 + $0x1a90] sm:$0xff]  ;;  %v12802_v47 = vcombine.high %v4082_v35, %v4086_v39  ;;  %v12801_v24 = vcombine.low %v4082_v35, %v4086_v39  ;;  %v3275_v39 = vld [vmem:[#allocation9 + $0x558] sm:$0xff] }
 0x4d4   :  { %10305 = vmatprep.subr.bf16.mxu0 %v12842_v27  ;;  %v3958_v44 = vld [vmem:[#allocation9 + $0x1ab0] sm:$0xff] }
 0x4d5   :  { %10263 = vmatpush1.bf16.msra.mxu1 %v12593_v2  ;;  %v4074_v31 = vld [vmem:[#allocation9 + $0x1e50] sm:$0xff]  ;;  %v12674_v2 = vcombine.high %v3954_v36, %v3958_v44  ;;  %v12673_v9 = vcombine.low %v3954_v36, %v3958_v44 }
 0x4d6   :  { %10264 = vmatprep.subr.bf16.mxu1 %v12714_v46  ;;  %v4078_v27 = vld [vmem:[#allocation9 + $0x1e70] sm:$0xff] }
 0x4d7   :  { %10306 = vmatpush2.bf16.msra.mxu0 %v12841_v4  ;;  %v3946_v37 = vld [vmem:[#allocation9 + $0x1a50] sm:$0xff]  ;;  %v12794_v4 = vcombine.high %v4074_v31, %v4078_v27  ;;  %v12793_v42 = vcombine.low %v4074_v31, %v4078_v27  ;;  %v3151_v31 = vld [vmem:[#allocation9 + $0x178] sm:$0xff] }
 0x4d8   :  { %10307 = vmatprep.subr.bf16.mxu0 %v12834_v40  ;;  %v3950_v46 = vld [vmem:[#allocation9 + $0x1a70] sm:$0xff] }
 0x4d9   :  { %10265 = vmatpush2.bf16.msra.mxu1 %v12713_v62  ;;  %v4066_v13 = vld [vmem:[#allocation9 + $0x1e10] sm:$0xff]  ;;  %v12666_v62 = vcombine.high %v3946_v37, %v3950_v46  ;;  %v12665_v28 = vcombine.low %v3946_v37, %v3950_v46 }
 0x4da   :  { %10266 = vmatprep.subr.bf16.mxu1 %v12706_v57  ;;  %v4070_v40 = vld [vmem:[#allocation9 + $0x1e30] sm:$0xff] }
 0x4db   :  { %10308 = vmatpush2.bf16.msra.mxu0 %v12833_v21  ;;  %v3938_v55 = vld [vmem:[#allocation9 + $0x1a10] sm:$0xff]  ;;  %v12786_v21 = vcombine.high %v4066_v13, %v4070_v40  ;;  %v12785_v61 = vcombine.low %v4066_v13, %v4070_v40 }
 0x4dc   :  { %10309 = vmatprep.subr.bf16.mxu0 %v12826_v63  ;;  %v3942_v57 = vld [vmem:[#allocation9 + $0x1a30] sm:$0xff]  ;;  %v3295_v63 = vld [vmem:[#allocation9 + $0x5f8] sm:$0xff] }
 0x4dd   :  { %10267 = vmatpush2.bf16.msra.mxu1 %v12705_v45  ;;  %v12658_v45 = vcombine.high %v3938_v55, %v3942_v57  ;;  %v12657_v19 = vcombine.low %v3938_v55, %v3942_v57  ;;  %v12011_v52 = vcombine.low %v3291_v20, %v3295_v63  ;;  %v3139_v55 = vld [vmem:[#allocation9 + $0x118] sm:$0xff] }
 0x4de   :  { %10268 = vmatprep.subr.bf16.mxu1 %v12698_v49  ;;  %v3167_v49 = vld [vmem:[#allocation9 + $0x1f8] sm:$0xff] }
 0x4df   :  { %10310 = vmatpush2.bf16.msra.mxu0 %v12825_v30  ;;  %v12012_v30 = vcombine.high %v3291_v20, %v3295_v63  ;;  %v11884_v32 = vcombine.high %v3163_v54, %v3167_v49  ;;  %v11883_v35 = vcombine.low %v3163_v54, %v3167_v49  ;;  %v3143_v57 = vld [vmem:[#allocation9 + $0x138] sm:$0xff] }
 0x4e0   :  { %10311 = vmatprep.subr.bf16.mxu0 %v12818_v3  ;;  %v3283_v3 = vld [vmem:[#allocation9 + $0x598] sm:$0xff] }
 0x4e1   :  { %10269 = vmatpush2.bf16.msra.mxu1 %v12697_v26  ;;  %v3287_v26 = vld [vmem:[#allocation9 + $0x5b8] sm:$0xff] }
 0x4e2   :  { %10270 = vmatprep.subr.bf16.mxu1 %v12690_v17  ;;  %v4152_v17 = vsub.s32 5, %v15721_v16  ;;  %v12004_v51 = vcombine.high %v3283_v3, %v3287_v26 }
 0x4e3   :  { %10312 = vmatpush2.bf16.msra.mxu0 %v12817_v8  ;;  %v3155_v8 = vld [vmem:[#allocation9 + $0x198] sm:$0xff] }
 0x4e4   :  { %10313 = vmatprep.subr.bf16.mxu0 %v12810_v6  ;;  %v13286_v6 = vld [vmem:[#allocation10] sm:$0xff]  ;;  %v11876_v36 = vcombine.high %v3155_v8, %v3159_v38  ;;  %v11875_v46 = vcombine.low %v3155_v8, %v3159_v38 }
 0x4e5   :  { %10271 = vmatpush2.bf16.msra.mxu1 %v12689_v43  ;;  %v4149_v43 = vrot.slane %v13286_v6, %v4148_v29  ;;  %v4153_v44 = vrot.slane %v13286_v6, %v4152_v17  ;;  %v3131_v29 = vld [vmem:[#allocation9 + $0xd8] sm:$0xff] }
 0x4e6   :  { %10272 = vmatprep.subr.bf16.mxu1 %v12682_v12  ;;  %v3279_v12 = vld [vmem:[#allocation9 + $0x578] sm:$0xff] }
 0x4e7   :  { %10314 = vmatpush2.bf16.msra.mxu0 %v12809_v15  ;;  %v3255_v17 = vld [vmem:[#allocation9 + $0x4b8] sm:$0xff] }
 0x4e8   :  { %10315 = vmatprep.subr.bf16.mxu0 %v12802_v47  ;;  %v12003_v47 = vcombine.low %v3283_v3, %v3287_v26  ;;  %v3135_v3 = vld [vmem:[#allocation9 + $0xf8] sm:$0xff] }
 0x4e9   :  { %10273 = vmatpush2.bf16.msra.mxu1 %v12681_v34  ;;  %v3147_v34 = vld [vmem:[#allocation9 + $0x158] sm:$0xff]  ;;  %v11852_v8 = vcombine.high %v3131_v29, %v3135_v3 }
 0x4ea   :  { %10274 = vmatprep.subr.bf16.mxu1 %v12674_v2  ;;  %v3127_v6 = vld [vmem:[#allocation9 + $0xb8] sm:$0xff] }
 0x4eb   :  { %10316 = vmatpush2.bf16.msra.mxu0 %v12801_v24  ;;  %v11996_v24 = vcombine.high %v3275_v39, %v3279_v12 }
 0x4ec   :  { %10317 = vmatprep.subr.bf16.mxu0 %v12794_v4  ;;  %v3267_v4 = vld [vmem:[#allocation9 + $0x518] sm:$0xff] }
 0x4ed   :  { %10275 = vmatpush2.bf16.msra.mxu1 %v12673_v9  ;;  %v3271_v9 = vld [vmem:[#allocation9 + $0x538] sm:$0xff] }
 0x4ee   :  { %10276 = vmatprep.subr.bf16.mxu1 %v12666_v62  ;;  %v11988_v63 = vcombine.high %v3267_v4, %v3271_v9 }
 0x4ef   :  { %10318 = vmatpush2.bf16.msra.mxu0 %v12793_v42  ;;  %v11995_v42 = vcombine.low %v3275_v39, %v3279_v12  ;;  %v3243_v39 = vld [vmem:[#allocation9 + $0x458] sm:$0xff] }
 0x4f0   :  { %10319 = vmatprep.subr.bf16.mxu0 %v12786_v21  ;;  %v3247_v12 = vld [vmem:[#allocation9 + $0x478] sm:$0xff] }
 0x4f1   :  { %10277 = vmatpush2.bf16.msra.mxu1 %v12665_v28 }
 0x4f2   :  { %10278 = vmatprep.subr.bf16.mxu1 %v12658_v45  ;;  %v3259_v45 = vld [vmem:[#allocation9 + $0x4d8] sm:$0xff] }
 0x4f3   :  { %10320 = vmatpush2.bf16.msra.mxu0 %v12785_v61  ;;  %v3263_v61 = vld [vmem:[#allocation9 + $0x4f8] sm:$0xff] }
 0x4f4   :  { %10371 = vmatprep.subr.bf16.mxu0 %v12012_v30  ;;  %v11860_v30 = vcombine.high %v3139_v55, %v3143_v57  ;;  %v11980_v26 = vcombine.high %v3259_v45, %v3263_v61  ;;  %v11979_v38 = vcombine.low %v3259_v45, %v3263_v61 }
 0x4f5   :  { %10279 = vmatpush2.bf16.msra.mxu1 %v12657_v19  ;;  %v11987_v19 = vcombine.low %v3267_v4, %v3271_v9  ;;  %v3111_v4 = vld [vmem:[#allocation9 + $0x38] sm:$0xff] }
 0x4f6   :  { %v10077_v15 = vpop.f32.mrf.mxu0  ;;  %10322 = vmatmul.mubr.bf16.vlgmr.msra.gmra.mxu0 %v15731_v41  ;;  %10330 = vmatprep.subr.bf16.mxu1 %v11884_v32  ;;  %v11859_v32 = vcombine.low %v3139_v55, %v3143_v57  ;;  %v3227_v55 = vld [vmem:[#allocation9 + $0x3d8] sm:$0xff] }
 0x4f7   :  { %10372 = vmatpush1.bf16.msra.mxu0 %v12011_v52  ;;  %10403 = vmatprep.mubr.bf16.mxu0 %v15663_v23  ;;  %v11868_v23 = vcombine.high %v3147_v34, %v3151_v31  ;;  %v3251_v52 = vld [vmem:[#allocation9 + $0x498] sm:$0xff] }
 0x4f8   :  { %v10036_v27 = vpop.f32.mrf.mxu1  ;;  %v10079_v2 = vpop.f32.mrf.mxu0  ;;  %10281 = vmatmul.mubr.bf16.vlgmr.msra.gmra.mxu1 %v15740_v33  ;;  %10373 = vmatprep.subr.bf16.mxu0 %v12004_v51  ;;  %v3123_v51 = vld [vmem:[#allocation9 + $0x98] sm:$0xff] }
 0x4f9   :  { %v10037_v37 = vadd.f32 %v10036_v27, %v4149_v43  ;;  %10331 = vmatpush1.bf16.msra.mxu1 %v11883_v35  ;;  %10362 = vmatprep.mubr.bf16.mxu1 %v15656_v1  ;;  %v11867_v1 = vcombine.low %v3147_v34, %v3151_v31  ;;  %v11972_v43 = vcombine.high %v3251_v52, %v3255_v17  ;;  %v3235_v27 = vld [vmem:[#allocation9 + $0x418] sm:$0xff] }
 0x4fa   :  { %v10038_v13 = vpop.f32.mrf.mxu1  ;;  %v10081_v40 = vpop.f32.mrf.mxu0  ;;  %10332 = vmatprep.subr.bf16.mxu1 %v11876_v36  ;;  %v11851_v35 = vcombine.low %v3131_v29, %v3135_v3  ;;  %v11971_v36 = vcombine.low %v3251_v52, %v3255_v17  ;;  %v11964_v34 = vcombine.high %v3243_v39, %v3247_v12  ;;  %v11843_v31 = vcombine.low %v3123_v51, %v3127_v6  ;;  %v3231_v57 = vld [vmem:[#allocation9 + $0x3f8] sm:$0xff] }
 0x4fb   :  { %v10039_v62 = vadd.f32 %v10038_v13, %v4153_v44  ;;  %10374 = vmatpush1.bf16.msra.mxu0 %v12003_v47  ;;  %v15823_v21 = vadd.f32 %v10077_v15, %v10037_v37  ;;  %v11844_v15 = vcombine.high %v3123_v51, %v3127_v6  ;;  %v3115_v44 = vld [vmem:[#allocation9 + $0x58] sm:$0xff]  ;;  %v11963_v37 = vcombine.low %v3243_v39, %v3247_v12 }
 0x4fc   :  { %v10040_v28 = vpop.f32.mrf.mxu1  ;;  %v10082_v20 = vpop.f32.mrf.mxu0  ;;  %10375 = vmatprep.subr.bf16.mxu0 %v11996_v24  ;;  %v3119_v47 = vld [vmem:[#allocation9 + $0x78] sm:$0xff]  ;;  %v11948_v45 = vcombine.high %v3227_v55, %v3231_v57  ;;  %v11947_v29 = vcombine.low %v3227_v55, %v3231_v57 }
 0x4fd   :  { %10333 = vmatpush1.bf16.msra.mxu1 %v11875_v46  ;;  %v15825_v54 = vadd.f32 %v10079_v2, %v10039_v62  ;;  %v3239_v2 = vld [vmem:[#allocation9 + $0x438] sm:$0xff]  ;;  %v11836_v24 = vcombine.high %v3115_v44, %v3119_v47  ;;  %v11835_v13 = vcombine.low %v3115_v44, %v3119_v47 }
 0x4fe   :  { %v10041_v49 = vpop.f32.mrf.mxu1  ;;  %10334 = vmatprep.subr.bf16.mxu1 %v11868_v23  ;;  %v3107_v46 = vld [vmem:[#allocation9 + $0x18] sm:$0xff]  ;;  %v11956_v9 = vcombine.high %v3235_v27, %v3239_v2 }
 0x4ff   :  { %10376 = vmatpush1.bf16.msra.mxu0 %v11995_v42  ;;  %v3355_v40 = vld [vmem:[#allocation9 + $0x7d8] sm:$0xff]  ;;  %v11828_v62 = vcombine.high %v3107_v46, %v3111_v4  ;;  %v11955_v42 = vcombine.low %v3235_v27, %v3239_v2  ;;  %v11827_v20 = vcombine.low %v3107_v46, %v3111_v4 }
 0x500   :  { %10377 = vmatprep.subr.bf16.mxu0 %v11988_v63  ;;  %v3359_v23 = vld [vmem:[#allocation9 + $0x7f8] sm:$0xff] }
 0x501   :  { %10335 = vmatpush1.bf16.msra.mxu1 %v11867_v1  ;;  %v12076_v28 = vcombine.high %v3355_v40, %v3359_v23  ;;  %v3347_v63 = vld [vmem:[#allocation9 + $0x798] sm:$0xff]  ;;  %v12075_v61 = vcombine.low %v3355_v40, %v3359_v23 }
 0x502   :  { %10336 = vmatprep.subr.bf16.mxu1 %v11860_v30  ;;  %v3351_v1 = vld [vmem:[#allocation9 + $0x7b8] sm:$0xff] }
 0x503   :  { %10378 = vmatpush1.bf16.msra.mxu0 %v11987_v19  ;;  %v3219_v49 = vld [vmem:[#allocation9 + $0x398] sm:$0xff]  ;;  %v12068_v19 = vcombine.high %v3347_v63, %v3351_v1  ;;  %v12067_v52 = vcombine.low %v3347_v63, %v3351_v1 }
 0x504   :  { %10379 = vmatprep.subr.bf16.mxu0 %v11980_v26  ;;  %v3223_v30 = vld [vmem:[#allocation9 + $0x3b8] sm:$0xff] }
 0x505   :  { %10337 = vmatpush1.bf16.msra.mxu1 %v11859_v32  ;;  %v3339_v3 = vld [vmem:[#allocation9 + $0x758] sm:$0xff]  ;;  %v11940_v32 = vcombine.high %v3219_v49, %v3223_v30  ;;  %v11939_v51 = vcombine.low %v3219_v49, %v3223_v30 }
 0x506   :  { %10338 = vmatprep.subr.bf16.mxu1 %v11852_v8  ;;  %v3343_v26 = vld [vmem:[#allocation9 + $0x778] sm:$0xff] }
 0x507   :  { %10380 = vmatpush1.bf16.msra.mxu0 %v11979_v38  ;;  %v3211_v17 = vld [vmem:[#allocation9 + $0x358] sm:$0xff]  ;;  %v12060_v38 = vcombine.high %v3339_v3, %v3343_v26  ;;  %v12059_v39 = vcombine.low %v3339_v3, %v3343_v26 }
 0x508   :  { %10381 = vmatprep.subr.bf16.mxu0 %v11972_v43  ;;  %v3215_v8 = vld [vmem:[#allocation9 + $0x378] sm:$0xff] }
 0x509   :  { %10339 = vmatpush1.bf16.msra.mxu1 %v11851_v35  ;;  %v3331_v6 = vld [vmem:[#allocation9 + $0x718] sm:$0xff]  ;;  %v11932_v35 = vcombine.high %v3211_v17, %v3215_v8  ;;  %v11931_v44 = vcombine.low %v3211_v17, %v3215_v8 }
 0x50a   :  { %10340 = vmatprep.subr.bf16.mxu1 %v11844_v15  ;;  %v3335_v43 = vld [vmem:[#allocation9 + $0x738] sm:$0xff] }
 0x50b   :  { %10382 = vmatpush1.bf16.msra.mxu0 %v11971_v36  ;;  %v3203_v12 = vld [vmem:[#allocation9 + $0x318] sm:$0xff]  ;;  %v12052_v36 = vcombine.high %v3331_v6, %v3335_v43  ;;  %v12051_v27 = vcombine.low %v3331_v6, %v3335_v43 }
 0x50c   :  { %10383 = vmatprep.subr.bf16.mxu0 %v11964_v34  ;;  %v3207_v15 = vld [vmem:[#allocation9 + $0x338] sm:$0xff] }
 0x50d   :  { %10341 = vmatpush1.bf16.msra.mxu1 %v11843_v31  ;;  %v3323_v47 = vld [vmem:[#allocation9 + $0x6d8] sm:$0xff]  ;;  %v11924_v31 = vcombine.high %v3203_v12, %v3207_v15  ;;  %v11923_v46 = vcombine.low %v3203_v12, %v3207_v15 }
 0x50e   :  { %10342 = vmatprep.subr.bf16.mxu1 %v11836_v24  ;;  %v3327_v34 = vld [vmem:[#allocation9 + $0x6f8] sm:$0xff] }
 0x50f   :  { %10384 = vmatpush1.bf16.msra.mxu0 %v11963_v37  ;;  %v3195_v2 = vld [vmem:[#allocation9 + $0x2d8] sm:$0xff]  ;;  %v12044_v37 = vcombine.high %v3323_v47, %v3327_v34  ;;  %v12043_v40 = vcombine.low %v3323_v47, %v3327_v34 }
 0x510   :  { %10385 = vmatprep.subr.bf16.mxu0 %v11956_v9  ;;  %v3199_v24 = vld [vmem:[#allocation9 + $0x2f8] sm:$0xff] }
 0x511   :  { %10343 = vmatpush1.bf16.msra.mxu1 %v11835_v13  ;;  %v3315_v4 = vld [vmem:[#allocation9 + $0x698] sm:$0xff]  ;;  %v11916_v13 = vcombine.high %v3195_v2, %v3199_v24  ;;  %v11915_v55 = vcombine.low %v3195_v2, %v3199_v24 }
 0x512   :  { %10344 = vmatprep.subr.bf16.mxu1 %v11828_v62  ;;  %v3319_v9 = vld [vmem:[#allocation9 + $0x6b8] sm:$0xff] }
 0x513   :  { %10386 = vmatpush1.bf16.msra.mxu0 %v11955_v42  ;;  %v3187_v23 = vld [vmem:[#allocation9 + $0x298] sm:$0xff]  ;;  %v12036_v42 = vcombine.high %v3315_v4, %v3319_v9  ;;  %v12035_v63 = vcombine.low %v3315_v4, %v3319_v9 }
 0x514   :  { %10387 = vmatprep.subr.bf16.mxu0 %v12076_v28  ;;  %v3191_v62 = vld [vmem:[#allocation9 + $0x2b8] sm:$0xff] }
 0x515   :  { %10345 = vmatpush1.bf16.msra.mxu1 %v11827_v20  ;;  %v3307_v57 = vld [vmem:[#allocation9 + $0x658] sm:$0xff]  ;;  %v11908_v20 = vcombine.high %v3187_v23, %v3191_v62  ;;  %v11907_v49 = vcombine.low %v3187_v23, %v3191_v62 }
 0x516   :  { %10346 = vmatprep.subr.bf16.mxu1 %v11948_v45  ;;  %v3311_v28 = vld [vmem:[#allocation9 + $0x678] sm:$0xff] }
 0x517   :  { %10388 = vmatpush2.bf16.msra.mxu0 %v12075_v61  ;;  %v3179_v1 = vld [vmem:[#allocation9 + $0x258] sm:$0xff]  ;;  %v12028_v61 = vcombine.high %v3307_v57, %v3311_v28  ;;  %v12027_v3 = vcombine.low %v3307_v57, %v3311_v28 }
 0x518   :  { %10389 = vmatprep.subr.bf16.mxu0 %v12068_v19  ;;  %v3183_v45 = vld [vmem:[#allocation9 + $0x278] sm:$0xff] }
 0x519   :  { %10347 = vmatpush2.bf16.msra.mxu1 %v11947_v29  ;;  %v3299_v30 = vld [vmem:[#allocation9 + $0x618] sm:$0xff]  ;;  %v11900_v29 = vcombine.high %v3179_v1, %v3183_v45  ;;  %v11899_v17 = vcombine.low %v3179_v1, %v3183_v45 }
 0x51a   :  { %10348 = vmatprep.subr.bf16.mxu1 %v11940_v32  ;;  %v3303_v19 = vld [vmem:[#allocation9 + $0x638] sm:$0xff] }
 0x51b   :  { %10390 = vmatpush2.bf16.msra.mxu0 %v12067_v52  ;;  %v3171_v26 = vld [vmem:[#allocation9 + $0x218] sm:$0xff]  ;;  %v12020_v52 = vcombine.high %v3299_v30, %v3303_v19  ;;  %v12019_v6 = vcombine.low %v3299_v30, %v3303_v19 }
 0x51c   :  { %10391 = vmatprep.subr.bf16.mxu0 %v12060_v38  ;;  %v3175_v32 = vld [vmem:[#allocation9 + $0x238] sm:$0xff] }
 0x51d   :  { %10349 = vmatpush2.bf16.msra.mxu1 %v11939_v51  ;;  %v3547_v8 = vld [vmem:[#allocation9 + $0xdd8] sm:$0xff]  ;;  %v11892_v51 = vcombine.high %v3171_v26, %v3175_v32  ;;  %v11891_v12 = vcombine.low %v3171_v26, %v3175_v32 }
 0x51e   :  { %10350 = vmatprep.subr.bf16.mxu1 %v11932_v35  ;;  %v3551_v38 = vld [vmem:[#allocation9 + $0xdf8] sm:$0xff] }
 0x51f   :  { %10392 = vmatpush2.bf16.msra.mxu0 %v12059_v39  ;;  %v3419_v43 = vld [vmem:[#allocation9 + $0x9d8] sm:$0xff]  ;;  %v12268_v39 = vcombine.high %v3547_v8, %v3551_v38  ;;  %v12267_v47 = vcombine.low %v3547_v8, %v3551_v38 }
 0x520   :  { %10393 = vmatprep.subr.bf16.mxu0 %v12052_v36  ;;  %v3423_v35 = vld [vmem:[#allocation9 + $0x9f8] sm:$0xff] }
 0x521   :  { %10351 = vmatpush2.bf16.msra.mxu1 %v11931_v44  ;;  %v3539_v15 = vld [vmem:[#allocation9 + $0xd98] sm:$0xff]  ;;  %v12140_v44 = vcombine.high %v3419_v43, %v3423_v35  ;;  %v12139_v2 = vcombine.low %v3419_v43, %v3423_v35 }
 0x522   :  { %10352 = vmatprep.subr.bf16.mxu1 %v11924_v31  ;;  %v3543_v36 = vld [vmem:[#allocation9 + $0xdb8] sm:$0xff] }
 0x523   :  { %10394 = vmatpush2.bf16.msra.mxu0 %v12051_v27  ;;  %v3411_v34 = vld [vmem:[#allocation9 + $0x998] sm:$0xff]  ;;  %v12260_v27 = vcombine.high %v3539_v15, %v3543_v36  ;;  %v12259_v9 = vcombine.low %v3539_v15, %v3543_v36 }
 0x524   :  { %10395 = vmatprep.subr.bf16.mxu0 %v12044_v37  ;;  %v3415_v31 = vld [vmem:[#allocation9 + $0x9b8] sm:$0xff] }
 0x525   :  { %10353 = vmatpush2.bf16.msra.mxu1 %v11923_v46  ;;  %v3531_v24 = vld [vmem:[#allocation9 + $0xd58] sm:$0xff]  ;;  %v12132_v4 = vcombine.high %v3411_v34, %v3415_v31 }
 0x526   :  { %10354 = vmatprep.subr.bf16.mxu1 %v11916_v13  ;;  %v3535_v37 = vld [vmem:[#allocation9 + $0xd78] sm:$0xff] }
 0x527   :  { %10396 = vmatpush2.bf16.msra.mxu0 %v12043_v40  ;;  %v3403_v13 = vld [vmem:[#allocation9 + $0x958] sm:$0xff]  ;;  %v12251_v45 = vcombine.low %v3531_v24, %v3535_v37 }
 0x528   :  { %10397 = vmatprep.subr.bf16.mxu0 %v12036_v42  ;;  %v3407_v40 = vld [vmem:[#allocation9 + $0x978] sm:$0xff]  ;;  %v12252_v42 = vcombine.high %v3531_v24, %v3535_v37 }
 0x529   :  { %10355 = vmatpush2.bf16.msra.mxu1 %v11915_v55  ;;  %v3523_v57 = vld [vmem:[#allocation9 + $0xd18] sm:$0xff] }
 0x52a   :  { %10356 = vmatprep.subr.bf16.mxu1 %v11908_v20  ;;  %v3527_v28 = vld [vmem:[#allocation9 + $0xd38] sm:$0xff] }
 0x52b   :  { %10398 = vmatpush2.bf16.msra.mxu0 %v12035_v63  ;;  %v12244_v19 = vcombine.high %v3523_v57, %v3527_v28  ;;  %v3391_v8 = vld [vmem:[#allocation9 + $0x8f8] sm:$0xff] }
 0x52c   :  { %10399 = vmatprep.subr.bf16.mxu0 %v12028_v61  ;;  %v3395_v61 = vld [vmem:[#allocation9 + $0x918] sm:$0xff] }
 0x52d   :  { %10357 = vmatpush2.bf16.msra.mxu1 %v11907_v49  ;;  %v3511_v43 = vld [vmem:[#allocation9 + $0xcb8] sm:$0xff] }
 0x52e   :  { %10358 = vmatprep.subr.bf16.mxu1 %v11900_v29  ;;  %v3515_v29 = vld [vmem:[#allocation9 + $0xcd8] sm:$0xff] }
 0x52f   :  { %10400 = vmatpush2.bf16.msra.mxu0 %v12027_v3  ;;  %v3519_v3 = vld [vmem:[#allocation9 + $0xcf8] sm:$0xff] }
 0x530   :  { %10401 = vmatprep.subr.bf16.mxu0 %v12020_v52  ;;  %v12236_v38 = vcombine.high %v3515_v29, %v3519_v3  ;;  %v3383_v15 = vld [vmem:[#allocation9 + $0x8b8] sm:$0xff] }
 0x531   :  { %10359 = vmatpush2.bf16.msra.mxu1 %v11899_v17  ;;  %v3387_v17 = vld [vmem:[#allocation9 + $0x8d8] sm:$0xff] }
 0x532   :  { %10360 = vmatprep.subr.bf16.mxu1 %v11892_v51  ;;  %v12108_v35 = vcombine.high %v3387_v17, %v3391_v8  ;;  %v3375_v24 = vld [vmem:[#allocation9 + $0x878] sm:$0xff] }
 0x533   :  { %10402 = vmatpush2.bf16.msra.mxu0 %v12019_v6  ;;  %v3507_v6 = vld [vmem:[#allocation9 + $0xc98] sm:$0xff] }
 0x534   :  { %10453 = vmatprep.subr.bf16.mxu0 %v12268_v39  ;;  %v12235_v39 = vcombine.low %v3515_v29, %v3519_v3  ;;  %v12228_v36 = vcombine.high %v3507_v6, %v3511_v43 }
 0x535   :  { %10361 = vmatpush2.bf16.msra.mxu1 %v11891_v12  ;;  %v3379_v12 = vld [vmem:[#allocation9 + $0x898] sm:$0xff] }
 0x536   :  { %v10159_v46 = vpop.f32.mrf.mxu0  ;;  %10404 = vmatmul.mubr.bf16.vlgmr.msra.gmra.mxu0 %v15675_v5  ;;  %10412 = vmatprep.subr.bf16.mxu1 %v12140_v44  ;;  %v12131_v5 = vcombine.low %v3411_v34, %v3415_v31  ;;  %v12107_v44 = vcombine.low %v3387_v17, %v3391_v8  ;;  %v3503_v34 = vld [vmem:[#allocation9 + $0xc78] sm:$0xff]  ;;  %v12100_v31 = vcombine.high %v3379_v12, %v3383_v15 }
 0x537   :  { %10454 = vmatpush1.bf16.msra.mxu0 %v12267_v47  ;;  %10485 = vmatprep.mubr.bf16.mxu0 %v15679_v22  ;;  %v12124_v22 = vcombine.high %v3403_v13, %v3407_v40  ;;  %v3499_v47 = vld [vmem:[#allocation9 + $0xc58] sm:$0xff] }
 0x538   :  { %v10118_v23 = vpop.f32.mrf.mxu1  ;;  %v10161_v62 = vpop.f32.mrf.mxu0  ;;  %10363 = vmatmul.mubr.bf16.vlgmr.msra.gmra.mxu1 %v15667_v0  ;;  %10455 = vmatprep.subr.bf16.mxu0 %v12260_v27  ;;  %v3399_v0 = vld [vmem:[#allocation9 + $0x938] sm:$0xff]  ;;  %v12227_v27 = vcombine.low %v3507_v6, %v3511_v43  ;;  %v12220_v37 = vcombine.high %v3499_v47, %v3503_v34 }
 0x539   :  { %v10119_v55 = vadd.f32 %v10118_v23, %v15823_v21  ;;  %10413 = vmatpush1.bf16.msra.mxu1 %v12139_v2  ;;  %10444 = vmatprep.mubr.bf16.mxu1 %v15681_v53  ;;  %v12123_v53 = vcombine.low %v3403_v13, %v3407_v40  ;;  %v12116_v52 = vcombine.high %v3395_v61, %v3399_v0  ;;  %v3371_v2 = vld [vmem:[#allocation9 + $0x858] sm:$0xff] }
 0x53a   :  { %v10120_v20 = vpop.f32.mrf.mxu1  ;;  %v10163_v63 = vpop.f32.mrf.mxu0  ;;  %10414 = vmatprep.subr.bf16.mxu1 %v12132_v4  ;;  %v12115_v51 = vcombine.low %v3395_v61, %v3399_v0  ;;  %v3491_v4 = vld [vmem:[#allocation9 + $0xc18] sm:$0xff]  ;;  %v12092_v13 = vcombine.high %v3371_v2, %v3375_v24  ;;  %v12219_v40 = vcombine.low %v3499_v47, %v3503_v34 }
 0x53b   :  { %v10121_v1 = vadd.f32 %v10120_v20, %v15825_v54  ;;  %10456 = vmatpush1.bf16.msra.mxu0 %v12259_v9  ;;  %v15833_v49 = vadd.f32 %v10159_v46, %v10119_v55  ;;  %v12243_v54 = vcombine.low %v3523_v57, %v3527_v28  ;;  %v12099_v46 = vcombine.low %v3379_v12, %v3383_v15  ;;  %v3495_v9 = vld [vmem:[#allocation9 + $0xc38] sm:$0xff] }
 0x53c   :  { %v10122_v30 = vpop.f32.mrf.mxu1  ;;  %v10164_v21 = vpop.f32.mrf.mxu0  ;;  %10457 = vmatprep.subr.bf16.mxu0 %v12252_v42  ;;  %v3363_v23 = vld [vmem:[#allocation9 + $0x818] sm:$0xff]  ;;  %v12212_v42 = vcombine.high %v3491_v4, %v3495_v9  ;;  %v12091_v55 = vcombine.low %v3371_v2, %v3375_v24  ;;  %v12211_v20 = vcombine.low %v3491_v4, %v3495_v9 }
 0x53d   :  { %10415 = vmatpush1.bf16.msra.mxu1 %v12131_v5  ;;  %v15835_v26 = vadd.f32 %v10161_v62, %v10121_v1  ;;  %v3367_v62 = vld [vmem:[#allocation9 + $0x838] sm:$0xff] }
 0x53e   :  { %v10123_v32 = vpop.f32.mrf.mxu1  ;;  %10416 = vmatprep.subr.bf16.mxu1 %v12124_v22  ;;  %v3611_v5 = vld [vmem:[#allocation9 + $0xfd8] sm:$0xff]  ;;  %v12084_v28 = vcombine.high %v3363_v23, %v3367_v62 }
 0x53f   :  { %10458 = vmatpush1.bf16.msra.mxu0 %v12251_v45  ;;  %v3615_v57 = vld [vmem:[#allocation9 + $0xff8] sm:$0xff]  ;;  %v12083_v45 = vcombine.low %v3363_v23, %v3367_v62 }
 0x540   :  { %10459 = vmatprep.subr.bf16.mxu0 %v12244_v19  ;;  %v3483_v63 = vld [vmem:[#allocation9 + $0xbd8] sm:$0xff]  ;;  %v12332_v1 = vcombine.high %v3611_v5, %v3615_v57  ;;  %v12331_v21 = vcombine.low %v3611_v5, %v3615_v57 }
 0x541   :  { %10417 = vmatpush1.bf16.msra.mxu1 %v12123_v53  ;;  %v3487_v22 = vld [vmem:[#allocation9 + $0xbf8] sm:$0xff] }
 0x542   :  { %10418 = vmatprep.subr.bf16.mxu1 %v12116_v52  ;;  %v3603_v61 = vld [vmem:[#allocation9 + $0xf98] sm:$0xff]  ;;  %v12204_v30 = vcombine.high %v3483_v63, %v3487_v22  ;;  %v12203_v3 = vcombine.low %v3483_v63, %v3487_v22 }
 0x543   :  { %10460 = vmatpush1.bf16.msra.mxu0 %v12243_v54  ;;  %v3607_v0 = vld [vmem:[#allocation9 + $0xfb8] sm:$0xff] }
 0x544   :  { %10461 = vmatprep.subr.bf16.mxu0 %v12236_v38  ;;  %v3475_v19 = vld [vmem:[#allocation9 + $0xb98] sm:$0xff]  ;;  %v12324_v29 = vcombine.high %v3603_v61, %v3607_v0  ;;  %v12323_v17 = vcombine.low %v3603_v61, %v3607_v0 }
 0x545   :  { %10419 = vmatpush1.bf16.msra.mxu1 %v12115_v51  ;;  %v3479_v53 = vld [vmem:[#allocation9 + $0xbb8] sm:$0xff] }
 0x546   :  { %10420 = vmatprep.subr.bf16.mxu1 %v12108_v35  ;;  %v3595_v32 = vld [vmem:[#allocation9 + $0xf58] sm:$0xff]  ;;  %v12196_v54 = vcombine.high %v3475_v19, %v3479_v53  ;;  %v12195_v6 = vcombine.low %v3475_v19, %v3479_v53 }
 0x547   :  { %10462 = vmatpush1.bf16.msra.mxu0 %v12235_v39  ;;  %v3599_v52 = vld [vmem:[#allocation9 + $0xf78] sm:$0xff] }
 0x548   :  { %10463 = vmatprep.subr.bf16.mxu0 %v12228_v36  ;;  %v3467_v8 = vld [vmem:[#allocation9 + $0xb58] sm:$0xff]  ;;  %v12316_v51 = vcombine.high %v3595_v32, %v3599_v52  ;;  %v12315_v12 = vcombine.low %v3595_v32, %v3599_v52 }
 0x549   :  { %10421 = vmatpush1.bf16.msra.mxu1 %v12107_v44  ;;  %v3471_v38 = vld [vmem:[#allocation9 + $0xb78] sm:$0xff] }
 0x54a   :  { %10422 = vmatprep.subr.bf16.mxu1 %v12100_v31  ;;  %v3587_v43 = vld [vmem:[#allocation9 + $0xf18] sm:$0xff]  ;;  %v12188_v39 = vcombine.high %v3467_v8, %v3471_v38  ;;  %v12187_v47 = vcombine.low %v3467_v8, %v3471_v38 }
 0x54b   :  { %10464 = vmatpush1.bf16.msra.mxu0 %v12227_v27  ;;  %v3591_v35 = vld [vmem:[#allocation9 + $0xf38] sm:$0xff] }
 0x54c   :  { %10465 = vmatprep.subr.bf16.mxu0 %v12220_v37  ;;  %v3459_v15 = vld [vmem:[#allocation9 + $0xb18] sm:$0xff]  ;;  %v12308_v44 = vcombine.high %v3587_v43, %v3591_v35  ;;  %v12307_v2 = vcombine.low %v3587_v43, %v3591_v35 }
 0x54d   :  { %10423 = vmatpush1.bf16.msra.mxu1 %v12099_v46  ;;  %v3463_v36 = vld [vmem:[#allocation9 + $0xb38] sm:$0xff] }
 0x54e   :  { %10424 = vmatprep.subr.bf16.mxu1 %v12092_v13  ;;  %v3579_v34 = vld [vmem:[#allocation9 + $0xed8] sm:$0xff]  ;;  %v12180_v27 = vcombine.high %v3459_v15, %v3463_v36  ;;  %v12179_v4 = vcombine.low %v3459_v15, %v3463_v36 }
 0x54f   :  { %10466 = vmatpush1.bf16.msra.mxu0 %v12219_v40  ;;  %v3583_v31 = vld [vmem:[#allocation9 + $0xef8] sm:$0xff] }
 0x550   :  { %10467 = vmatprep.subr.bf16.mxu0 %v12212_v42  ;;  %v3451_v24 = vld [vmem:[#allocation9 + $0xad8] sm:$0xff]  ;;  %v12300_v46 = vcombine.high %v3579_v34, %v3583_v31  ;;  %v12299_v23 = vcombine.low %v3579_v34, %v3583_v31 }
 0x551   :  { %10425 = vmatpush1.bf16.msra.mxu1 %v12091_v55  ;;  %v3455_v37 = vld [vmem:[#allocation9 + $0xaf8] sm:$0xff] }
 0x552   :  { %10426 = vmatprep.subr.bf16.mxu1 %v12084_v28  ;;  %v3571_v9 = vld [vmem:[#allocation9 + $0xe98] sm:$0xff]  ;;  %v12172_v40 = vcombine.high %v3451_v24, %v3455_v37  ;;  %v12171_v5 = vcombine.low %v3451_v24, %v3455_v37 }
 0x553   :  { %10468 = vmatpush1.bf16.msra.mxu0 %v12211_v20  ;;  %v3575_v13 = vld [vmem:[#allocation9 + $0xeb8] sm:$0xff] }
 0x554   :  { %10469 = vmatprep.subr.bf16.mxu0 %v12332_v1  ;;  %v3443_v62 = vld [vmem:[#allocation9 + $0xa98] sm:$0xff]  ;;  %v12292_v55 = vcombine.high %v3571_v9, %v3575_v13  ;;  %v12291_v63 = vcombine.low %v3571_v9, %v3575_v13 }
 0x555   :  { %10427 = vmatpush1.bf16.msra.mxu1 %v12083_v45  ;;  %v3447_v42 = vld [vmem:[#allocation9 + $0xab8] sm:$0xff] }
 0x556   :  { %10428 = vmatprep.subr.bf16.mxu1 %v12204_v30  ;;  %v3563_v57 = vld [vmem:[#allocation9 + $0xe58] sm:$0xff]  ;;  %v12164_v20 = vcombine.high %v3443_v62, %v3447_v42  ;;  %v12163_v61 = vcombine.low %v3443_v62, %v3447_v42 }
 0x557   :  { %10470 = vmatpush2.bf16.msra.mxu0 %v12331_v21  ;;  %v3567_v28 = vld [vmem:[#allocation9 + $0xe78] sm:$0xff] }
 0x558   :  { %10471 = vmatprep.subr.bf16.mxu0 %v12324_v29  ;;  %v3435_v22 = vld [vmem:[#allocation9 + $0xa58] sm:$0xff]  ;;  %v12284_v45 = vcombine.high %v3563_v57, %v3567_v28  ;;  %v12283_v19 = vcombine.low %v3563_v57, %v3567_v28 }
 0x559   :  { %10429 = vmatpush2.bf16.msra.mxu1 %v12203_v3  ;;  %v3439_v1 = vld [vmem:[#allocation9 + $0xa78] sm:$0xff] }
 0x55a   :  { %10430 = vmatprep.subr.bf16.mxu1 %v12196_v54  ;;  %v3555_v0 = vld [vmem:[#allocation9 + $0xe18] sm:$0xff]  ;;  %v12156_v21 = vcombine.high %v3435_v22, %v3439_v1  ;;  %v12155_v32 = vcombine.low %v3435_v22, %v3439_v1 }
 0x55b   :  { %10472 = vmatpush2.bf16.msra.mxu0 %v12323_v17  ;;  %v3559_v30 = vld [vmem:[#allocation9 + $0xe38] sm:$0xff] }
 0x55c   :  { %10473 = vmatprep.subr.bf16.mxu0 %v12316_v51  ;;  %v3427_v53 = vld [vmem:[#allocation9 + $0xa18] sm:$0xff]  ;;  %v12276_v3 = vcombine.high %v3555_v0, %v3559_v30  ;;  %v12275_v8 = vcombine.low %v3555_v0, %v3559_v30 }
 0x55d   :  { %10431 = vmatpush2.bf16.msra.mxu1 %v12195_v6  ;;  %v3431_v29 = vld [vmem:[#allocation9 + $0xa38] sm:$0xff] }
 0x55e   :  { %10432 = vmatprep.subr.bf16.mxu1 %v12188_v39  ;;  %v3803_v52 = vld [vmem:[#allocation9 + $0x15d8] sm:$0xff]  ;;  %v12148_v17 = vcombine.high %v3427_v53, %v3431_v29  ;;  %v12147_v43 = vcombine.low %v3427_v53, %v3431_v29 }
 0x55f   :  { %10474 = vmatpush2.bf16.msra.mxu0 %v12315_v12  ;;  %v3807_v54 = vld [vmem:[#allocation9 + $0x15f8] sm:$0xff] }
 0x560   :  { %10475 = vmatprep.subr.bf16.mxu0 %v12308_v44  ;;  %v3675_v38 = vld [vmem:[#allocation9 + $0x11d8] sm:$0xff]  ;;  %v12524_v6 = vcombine.high %v3803_v52, %v3807_v54  ;;  %v12523_v15 = vcombine.low %v3803_v52, %v3807_v54 }
 0x561   :  { %10433 = vmatpush2.bf16.msra.mxu1 %v12187_v47  ;;  %v3679_v51 = vld [vmem:[#allocation9 + $0x11f8] sm:$0xff] }
 0x562   :  { %10434 = vmatprep.subr.bf16.mxu1 %v12180_v27  ;;  %v3795_v35 = vld [vmem:[#allocation9 + $0x1598] sm:$0xff]  ;;  %v12396_v12 = vcombine.high %v3675_v38, %v3679_v51  ;;  %v12395_v34 = vcombine.low %v3675_v38, %v3679_v51 }
 0x563   :  { %10476 = vmatpush2.bf16.msra.mxu0 %v12307_v2  ;;  %v3799_v39 = vld [vmem:[#allocation9 + $0x15b8] sm:$0xff] }
 0x564   :  { %10477 = vmatprep.subr.bf16.mxu0 %v12300_v46  ;;  %v3667_v36 = vld [vmem:[#allocation9 + $0x1198] sm:$0xff]  ;;  %v12516_v47 = vcombine.high %v3795_v35, %v3799_v39  ;;  %v12515_v37 = vcombine.low %v3795_v35, %v3799_v39 }
 0x565   :  { %10435 = vmatpush2.bf16.msra.mxu1 %v12179_v4  ;;  %v3671_v44 = vld [vmem:[#allocation9 + $0x11b8] sm:$0xff] }
 0x566   :  { %10436 = vmatprep.subr.bf16.mxu1 %v12172_v40  ;;  %v3787_v31 = vld [vmem:[#allocation9 + $0x1558] sm:$0xff]  ;;  %v12388_v24 = vcombine.high %v3667_v36, %v3671_v44 }
 0x567   :  { %10478 = vmatpush2.bf16.msra.mxu0 %v12299_v23  ;;  %v3791_v27 = vld [vmem:[#allocation9 + $0x1578] sm:$0xff] }
 0x568   :  { %10479 = vmatprep.subr.bf16.mxu0 %v12292_v55  ;;  %v3659_v46 = vld [vmem:[#allocation9 + $0x1158] sm:$0xff]  ;;  %v12508_v40 = vcombine.high %v3787_v31, %v3791_v27  ;;  %v12507_v28 = vcombine.low %v3787_v31, %v3791_v27 }
 0x569   :  { %10437 = vmatpush2.bf16.msra.mxu1 %v12171_v5  ;;  %v3663_v4 = vld [vmem:[#allocation9 + $0x1178] sm:$0xff] }
 0x56a   :  { %10438 = vmatprep.subr.bf16.mxu1 %v12164_v20  ;;  %v3779_v62 = vld [vmem:[#allocation9 + $0x1518] sm:$0xff] }
 0x56b   :  { %10480 = vmatpush2.bf16.msra.mxu0 %v12291_v63  ;;  %v3783_v42 = vld [vmem:[#allocation9 + $0x1538] sm:$0xff] }
 0x56c   :  { %10481 = vmatprep.subr.bf16.mxu0 %v12284_v45  ;;  %v3651_v20 = vld [vmem:[#allocation9 + $0x1118] sm:$0xff]  ;;  %v12500_v1 = vcombine.high %v3779_v62, %v3783_v42 }
 0x56d   :  { %10439 = vmatpush2.bf16.msra.mxu1 %v12163_v61  ;;  %v3771_v45 = vld [vmem:[#allocation9 + $0x14d8] sm:$0xff] }
 0x56e   :  { %10440 = vmatprep.subr.bf16.mxu1 %v12156_v21  ;;  %v3775_v61 = vld [vmem:[#allocation9 + $0x14f8] sm:$0xff] }
 0x56f   :  { %10482 = vmatpush2.bf16.msra.mxu0 %v12283_v19  ;;  %v3643_v19 = vld [vmem:[#allocation9 + $0x10d8] sm:$0xff]  ;;  %v12492_v29 = vcombine.high %v3771_v45, %v3775_v61 }
 0x570   :  { %10483 = vmatprep.subr.bf16.mxu0 %v12276_v3  ;;  %v3647_v53 = vld [vmem:[#allocation9 + $0x10f8] sm:$0xff] }
 0x571   :  { %10441 = vmatpush2.bf16.msra.mxu1 %v12155_v32  ;;  %v3763_v32 = vld [vmem:[#allocation9 + $0x1498] sm:$0xff]  ;;  %v12364_v54 = vcombine.high %v3643_v19, %v3647_v53 }
 0x572   :  { %10442 = vmatprep.subr.bf16.mxu1 %v12148_v17  ;;  %v3767_v52 = vld [vmem:[#allocation9 + $0x14b8] sm:$0xff]  ;;  %v12491_v17 = vcombine.low %v3771_v45, %v3775_v61 }
 0x573   :  { %10484 = vmatpush2.bf16.msra.mxu0 %v12275_v8  ;;  %v3635_v8 = vld [vmem:[#allocation9 + $0x1098] sm:$0xff]  ;;  %v12484_v51 = vcombine.high %v3763_v32, %v3767_v52 }
 0x574   :  { %10535 = vmatprep.subr.bf16.mxu0 %v12524_v6  ;;  %v3639_v38 = vld [vmem:[#allocation9 + $0x10b8] sm:$0xff]  ;;  %v12363_v6 = vcombine.low %v3643_v19, %v3647_v53 }
 0x575   :  { %10443 = vmatpush2.bf16.msra.mxu1 %v12147_v43  ;;  %v3755_v43 = vld [vmem:[#allocation9 + $0x1458] sm:$0xff]  ;;  %v12356_v39 = vcombine.high %v3635_v8, %v3639_v38 }
 0x576   :  { %v10241_v2 = vpop.f32.mrf.mxu0  ;;  %10486 = vmatmul.mubr.bf16.vlgmr.msra.gmra.mxu0 %v15692_v7  ;;  %10494 = vmatprep.subr.bf16.mxu1 %v12396_v12  ;;  %v12387_v7 = vcombine.low %v3667_v36, %v3671_v44  ;;  %v3759_v35 = vld [vmem:[#allocation9 + $0x1478] sm:$0xff]  ;;  %v12483_v12 = vcombine.low %v3763_v32, %v3767_v52 }
 0x577   :  { %10536 = vmatpush1.bf16.msra.mxu0 %v12523_v15  ;;  %10567 = vmatprep.mubr.bf16.mxu0 %v15701_v14  ;;  %v12380_v14 = vcombine.high %v3659_v46, %v3663_v4  ;;  %v3627_v15 = vld [vmem:[#allocation9 + $0x1058] sm:$0xff]  ;;  %v12476_v44 = vcombine.high %v3755_v43, %v3759_v35 }
 0x578   :  { %v10200_v9 = vpop.f32.mrf.mxu1  ;;  %v10243_v13 = vpop.f32.mrf.mxu0  ;;  %10445 = vmatmul.mubr.bf16.vlgmr.msra.gmra.mxu1 %v15689_v50  ;;  %10537 = vmatprep.subr.bf16.mxu0 %v12516_v47  ;;  %v3655_v50 = vld [vmem:[#allocation9 + $0x1138] sm:$0xff]  ;;  %v12355_v47 = vcombine.low %v3635_v8, %v3639_v38 }
 0x579   :  { %v10201_v23 = vadd.f32 %v10200_v9, %v15833_v49  ;;  %10495 = vmatpush1.bf16.msra.mxu1 %v12395_v34  ;;  %10526 = vmatprep.mubr.bf16.mxu1 %v15703_v11  ;;  %v12379_v11 = vcombine.low %v3659_v46, %v3663_v4  ;;  %v12372_v21 = vcombine.high %v3651_v20, %v3655_v50  ;;  %v3631_v36 = vld [vmem:[#allocation9 + $0x1078] sm:$0xff] }
 0x57a   :  { %v10202_v55 = vpop.f32.mrf.mxu1  ;;  %v10245_v5 = vpop.f32.mrf.mxu0  ;;  %10496 = vmatprep.subr.bf16.mxu1 %v12388_v24  ;;  %v12371_v3 = vcombine.low %v3651_v20, %v3655_v50  ;;  %v3747_v34 = vld [vmem:[#allocation9 + $0x1418] sm:$0xff]  ;;  %v12348_v27 = vcombine.high %v3627_v15, %v3631_v36  ;;  %v12347_v4 = vcombine.low %v3627_v15, %v3631_v36 }
 0x57b   :  { %v10203_v57 = vadd.f32 %v10202_v55, %v15835_v26  ;;  %10538 = vmatpush1.bf16.msra.mxu0 %v12515_v37  ;;  %v15843_v63 = vadd.f32 %v10241_v2, %v10201_v23  ;;  %v12499_v26 = vcombine.low %v3779_v62, %v3783_v42  ;;  %v3751_v31 = vld [vmem:[#allocation9 + $0x1438] sm:$0xff]  ;;  %v12475_v2 = vcombine.low %v3755_v43, %v3759_v35 }
 0x57c   :  { %v10204_v22 = vpop.f32.mrf.mxu1  ;;  %v10246_v49 = vpop.f32.mrf.mxu0  ;;  %10539 = vmatprep.subr.bf16.mxu0 %v12508_v40  ;;  %v3619_v24 = vld [vmem:[#allocation9 + $0x1018] sm:$0xff]  ;;  %v12468_v46 = vcombine.high %v3747_v34, %v3751_v31  ;;  %v12467_v23 = vcombine.low %v3747_v34, %v3751_v31 }
 0x57d   :  { %10497 = vmatpush1.bf16.msra.mxu1 %v12387_v7  ;;  %v15845_v0 = vadd.f32 %v10243_v13, %v10203_v57  ;;  %v3623_v37 = vld [vmem:[#allocation9 + $0x1038] sm:$0xff] }
 0x57e   :  { %v10205_v30 = vpop.f32.mrf.mxu1  ;;  %10498 = vmatprep.subr.bf16.mxu1 %v12380_v14  ;;  %v3867_v9 = vld [vmem:[#allocation9 + $0x17d8] sm:$0xff]  ;;  %v12340_v40 = vcombine.high %v3619_v24, %v3623_v37  ;;  %v12339_v55 = vcombine.low %v3619_v24, %v3623_v37 }
 0x57f   :  { %10540 = vmatpush1.bf16.msra.mxu0 %v12507_v28  ;;  %v3871_v13 = vld [vmem:[#allocation9 + $0x17f8] sm:$0xff] }
 0x580   :  { %10541 = vmatprep.subr.bf16.mxu0 %v12500_v1  ;;  %v3739_v7 = vld [vmem:[#allocation9 + $0x13d8] sm:$0xff]  ;;  %v12588_v42 = vcombine.high %v3867_v9, %v3871_v13  ;;  %v12587_v28 = vcombine.low %v3867_v9, %v3871_v13 }
 0x581   :  { %10499 = vmatpush1.bf16.msra.mxu1 %v12379_v11  ;;  %v3743_v62 = vld [vmem:[#allocation9 + $0x13f8] sm:$0xff] }
 0x582   :  { %10500 = vmatprep.subr.bf16.mxu1 %v12372_v21  ;;  %v3859_v5 = vld [vmem:[#allocation9 + $0x1798] sm:$0xff]  ;;  %v12460_v57 = vcombine.high %v3739_v7, %v3743_v62  ;;  %v12459_v49 = vcombine.low %v3739_v7, %v3743_v62 }
 0x583   :  { %10542 = vmatpush1.bf16.msra.mxu0 %v12499_v26  ;;  %v3863_v14 = vld [vmem:[#allocation9 + $0x17b8] sm:$0xff] }
 0x584   :  { %10543 = vmatprep.subr.bf16.mxu0 %v12492_v29  ;;  %v3731_v20 = vld [vmem:[#allocation9 + $0x1398] sm:$0xff]  ;;  %v12580_v22 = vcombine.high %v3859_v5, %v3863_v14  ;;  %v12579_v61 = vcombine.low %v3859_v5, %v3863_v14 }
 0x585   :  { %10501 = vmatpush1.bf16.msra.mxu1 %v12371_v3  ;;  %v3735_v50 = vld [vmem:[#allocation9 + $0x13b8] sm:$0xff] }
 0x586   :  { %10502 = vmatprep.subr.bf16.mxu1 %v12364_v54  ;;  %v3851_v1 = vld [vmem:[#allocation9 + $0x1758] sm:$0xff]  ;;  %v12452_v45 = vcombine.high %v3731_v20, %v3735_v50  ;;  %v12451_v19 = vcombine.low %v3731_v20, %v3735_v50 }
 0x587   :  { %10544 = vmatpush1.bf16.msra.mxu0 %v12491_v17  ;;  %v3855_v11 = vld [vmem:[#allocation9 + $0x1778] sm:$0xff] }
 0x588   :  { %10545 = vmatprep.subr.bf16.mxu0 %v12484_v51  ;;  %v3723_v30 = vld [vmem:[#allocation9 + $0x1358] sm:$0xff]  ;;  %v12572_v26 = vcombine.high %v3851_v1, %v3855_v11  ;;  %v12571_v32 = vcombine.low %v3851_v1, %v3855_v11 }
 0x589   :  { %10503 = vmatpush1.bf16.msra.mxu1 %v12363_v6  ;;  %v3727_v21 = vld [vmem:[#allocation9 + $0x1378] sm:$0xff] }
 0x58a   :  { %10504 = vmatprep.subr.bf16.mxu1 %v12356_v39  ;;  %v3843_v53 = vld [vmem:[#allocation9 + $0x1718] sm:$0xff]  ;;  %v12444_v3 = vcombine.high %v3723_v30, %v3727_v21  ;;  %v12443_v8 = vcombine.low %v3723_v30, %v3727_v21 }
 0x58b   :  { %10546 = vmatpush1.bf16.msra.mxu0 %v12483_v12  ;;  %v3847_v29 = vld [vmem:[#allocation9 + $0x1738] sm:$0xff] }
 0x58c   :  { %10547 = vmatprep.subr.bf16.mxu0 %v12476_v44  ;;  %v3715_v52 = vld [vmem:[#allocation9 + $0x1318] sm:$0xff]  ;;  %v12564_v17 = vcombine.high %v3843_v53, %v3847_v29  ;;  %v12563_v43 = vcombine.low %v3843_v53, %v3847_v29 }
 0x58d   :  { %10505 = vmatpush1.bf16.msra.mxu1 %v12355_v47  ;;  %v3719_v54 = vld [vmem:[#allocation9 + $0x1338] sm:$0xff] }
 0x58e   :  { %10506 = vmatprep.subr.bf16.mxu1 %v12348_v27  ;;  %v3835_v38 = vld [vmem:[#allocation9 + $0x16d8] sm:$0xff]  ;;  %v12436_v6 = vcombine.high %v3715_v52, %v3719_v54  ;;  %v12435_v15 = vcombine.low %v3715_v52, %v3719_v54 }
 0x58f   :  { %10548 = vmatpush1.bf16.msra.mxu0 %v12475_v2  ;;  %v3839_v51 = vld [vmem:[#allocation9 + $0x16f8] sm:$0xff] }
 0x590   :  { %10549 = vmatprep.subr.bf16.mxu0 %v12468_v46  ;;  %v3707_v35 = vld [vmem:[#allocation9 + $0x12d8] sm:$0xff]  ;;  %v12556_v12 = vcombine.high %v3835_v38, %v3839_v51  ;;  %v12555_v34 = vcombine.low %v3835_v38, %v3839_v51 }
 0x591   :  { %10507 = vmatpush1.bf16.msra.mxu1 %v12347_v4  ;;  %v3711_v39 = vld [vmem:[#allocation9 + $0x12f8] sm:$0xff] }
 0x592   :  { %10508 = vmatprep.subr.bf16.mxu1 %v12340_v40  ;;  %v3827_v36 = vld [vmem:[#allocation9 + $0x1698] sm:$0xff]  ;;  %v12428_v47 = vcombine.high %v3707_v35, %v3711_v39  ;;  %v12427_v24 = vcombine.low %v3707_v35, %v3711_v39 }
 0x593   :  { %10550 = vmatpush1.bf16.msra.mxu0 %v12467_v23  ;;  %v3831_v44 = vld [vmem:[#allocation9 + $0x16b8] sm:$0xff] }
 0x594   :  { %10551 = vmatprep.subr.bf16.mxu0 %v12588_v42  ;;  %v3699_v31 = vld [vmem:[#allocation9 + $0x1298] sm:$0xff]  ;;  %v12548_v2 = vcombine.high %v3827_v36, %v3831_v44  ;;  %v12547_v9 = vcombine.low %v3827_v36, %v3831_v44 }
 0x595   :  { %10509 = vmatpush1.bf16.msra.mxu1 %v12339_v55  ;;  %v3703_v27 = vld [vmem:[#allocation9 + $0x12b8] sm:$0xff] }
 0x596   :  { %10510 = vmatprep.subr.bf16.mxu1 %v12460_v57  ;;  %v3819_v37 = vld [vmem:[#allocation9 + $0x1658] sm:$0xff]  ;;  %v12420_v4 = vcombine.high %v3699_v31, %v3703_v27  ;;  %v12419_v7 = vcombine.low %v3699_v31, %v3703_v27 }
 0x597   :  { %10552 = vmatpush2.bf16.msra.mxu0 %v12587_v28  ;;  %v3823_v46 = vld [vmem:[#allocation9 + $0x1678] sm:$0xff] }
 0x598   :  { %10553 = vmatprep.subr.bf16.mxu0 %v12580_v22  ;;  %v3691_v13 = vld [vmem:[#allocation9 + $0x1258] sm:$0xff]  ;;  %v12540_v23 = vcombine.high %v3819_v37, %v3823_v46  ;;  %v12539_v5 = vcombine.low %v3819_v37, %v3823_v46 }
 0x599   :  { %10511 = vmatpush2.bf16.msra.mxu1 %v12459_v49  ;;  %v3695_v40 = vld [vmem:[#allocation9 + $0x1278] sm:$0xff] }
 0x59a   :  { %10512 = vmatprep.subr.bf16.mxu1 %v12452_v45  ;;  %v3811_v62 = vld [vmem:[#allocation9 + $0x1618] sm:$0xff]  ;;  %v12412_v55 = vcombine.high %v3691_v13, %v3695_v40  ;;  %v12411_v20 = vcombine.low %v3691_v13, %v3695_v40 }
 0x59b   :  { %10554 = vmatpush2.bf16.msra.mxu0 %v12579_v61  ;;  %v3815_v42 = vld [vmem:[#allocation9 + $0x1638] sm:$0xff] }
 0x59c   :  { %10555 = vmatprep.subr.bf16.mxu0 %v12572_v26  ;;  %v3683_v14 = vld [vmem:[#allocation9 + $0x1218] sm:$0xff]  ;;  %v12532_v28 = vcombine.high %v3811_v62, %v3815_v42  ;;  %v12531_v1 = vcombine.low %v3811_v62, %v3815_v42 }
 0x59d   :  { %10513 = vmatpush2.bf16.msra.mxu1 %v12451_v19  ;;  %v3687_v57 = vld [vmem:[#allocation9 + $0x1238] sm:$0xff] }
 0x59e   :  { %10514 = vmatprep.subr.bf16.mxu1 %v12444_v3  ;;  %v4059_v50 = vld [vmem:[#allocation9 + $0x1dd8] sm:$0xff]  ;;  %v12404_v49 = vcombine.high %v3683_v14, %v3687_v57  ;;  %v12403_v30 = vcombine.low %v3683_v14, %v3687_v57 }
 0x59f   :  { %10556 = vmatpush2.bf16.msra.mxu0 %v12571_v32  ;;  %v4063_v22 = vld [vmem:[#allocation9 + $0x1df8] sm:$0xff] }
 0x5a0   :  { %10557 = vmatprep.subr.bf16.mxu0 %v12564_v17  ;;  %v3931_v11 = vld [vmem:[#allocation9 + $0x19d8] sm:$0xff]  ;;  %v12780_v61 = vcombine.high %v4059_v50, %v4063_v22  ;;  %v12779_v53 = vcombine.low %v4059_v50, %v4063_v22 }
 0x5a1   :  { %10515 = vmatpush2.bf16.msra.mxu1 %v12443_v8  ;;  %v3935_v45 = vld [vmem:[#allocation9 + $0x19f8] sm:$0xff] }
 0x5a2   :  { %10516 = vmatprep.subr.bf16.mxu1 %v12436_v6  ;;  %v4051_v21 = vld [vmem:[#allocation9 + $0x1d98] sm:$0xff]  ;;  %v12652_v19 = vcombine.high %v3931_v11, %v3935_v45  ;;  %v12651_v52 = vcombine.low %v3931_v11, %v3935_v45 }
 0x5a3   :  { %10558 = vmatpush2.bf16.msra.mxu0 %v12563_v43  ;;  %v4055_v26 = vld [vmem:[#allocation9 + $0x1db8] sm:$0xff] }
 0x5a4   :  { %10559 = vmatprep.subr.bf16.mxu0 %v12556_v12  ;;  %v3923_v29 = vld [vmem:[#allocation9 + $0x1998] sm:$0xff]  ;;  %v12772_v32 = vcombine.high %v4051_v21, %v4055_v26  ;;  %v12771_v51 = vcombine.low %v4051_v21, %v4055_v26 }
 0x5a5   :  { %10517 = vmatpush2.bf16.msra.mxu1 %v12435_v15  ;;  %v3927_v3 = vld [vmem:[#allocation9 + $0x19b8] sm:$0xff] }
 0x5a6   :  { %10518 = vmatprep.subr.bf16.mxu1 %v12428_v47  ;;  %v4043_v54 = vld [vmem:[#allocation9 + $0x1d58] sm:$0xff]  ;;  %v12644_v38 = vcombine.high %v3923_v29, %v3927_v3 }
 0x5a7   :  { %10560 = vmatpush2.bf16.msra.mxu0 %v12555_v34  ;;  %v4047_v17 = vld [vmem:[#allocation9 + $0x1d78] sm:$0xff] }
 0x5a8   :  { %10561 = vmatprep.subr.bf16.mxu0 %v12548_v2  ;;  %v3915_v6 = vld [vmem:[#allocation9 + $0x1958] sm:$0xff]  ;;  %v12764_v12 = vcombine.high %v4043_v54, %v4047_v17 }
 0x5a9   :  { %10519 = vmatpush2.bf16.msra.mxu1 %v12427_v24  ;;  %v3919_v43 = vld [vmem:[#allocation9 + $0x1978] sm:$0xff] }
 0x5aa   :  { %10520 = vmatprep.subr.bf16.mxu1 %v12420_v4  ;;  %v4035_v36 = vld [vmem:[#allocation9 + $0x1d18] sm:$0xff]  ;;  %v12635_v4 = vcombine.low %v3915_v6, %v3919_v43 }
 0x5ab   :  { %10562 = vmatpush2.bf16.msra.mxu0 %v12547_v9  ;;  %v4039_v44 = vld [vmem:[#allocation9 + $0x1d38] sm:$0xff] }
 0x5ac   :  { %10563 = vmatprep.subr.bf16.mxu0 %v12540_v23  ;;  %v3907_v2 = vld [vmem:[#allocation9 + $0x1918] sm:$0xff]  ;;  %v12756_v46 = vcombine.high %v4035_v36, %v4039_v44 }
 0x5ad   :  { %10521 = vmatpush2.bf16.msra.mxu1 %v12419_v7  ;;  %v3911_v24 = vld [vmem:[#allocation9 + $0x1938] sm:$0xff]  ;;  %v12755_v7 = vcombine.low %v4035_v36, %v4039_v44 }
 0x5ae   :  { %10522 = vmatprep.subr.bf16.mxu1 %v12412_v55  ;;  %v4027_v9 = vld [vmem:[#allocation9 + $0x1cd8] sm:$0xff]  ;;  %v12628_v23 = vcombine.high %v3907_v2, %v3911_v24  ;;  %v12627_v55 = vcombine.low %v3907_v2, %v3911_v24 }
 0x5af   :  { %10564 = vmatpush2.bf16.msra.mxu0 %v12539_v5  ;;  %v4031_v13 = vld [vmem:[#allocation9 + $0x1cf8] sm:$0xff] }
 0x5b0   :  { %10565 = vmatprep.subr.bf16.mxu0 %v12532_v28  ;;  %v3903_v62 = vld [vmem:[#allocation9 + $0x18f8] sm:$0xff]  ;;  %v12748_v42 = vcombine.high %v4027_v9, %v4031_v13  ;;  %v12747_v28 = vcombine.low %v4027_v9, %v4031_v13 }
 0x5b1   :  { %10523 = vmatpush2.bf16.msra.mxu1 %v12411_v20  ;;  %v4019_v5 = vld [vmem:[#allocation9 + $0x1c98] sm:$0xff] }
 0x5b2   :  { %10524 = vmatprep.subr.bf16.mxu1 %v12404_v49  ;;  %v4023_v14 = vld [vmem:[#allocation9 + $0x1cb8] sm:$0xff] }
 0x5b3   :  { %10566 = vmatpush2.bf16.msra.mxu0 %v12531_v1  ;;  %v3891_v20 = vld [vmem:[#allocation9 + $0x1898] sm:$0xff]  ;;  %v12740_v22 = vcombine.high %v4019_v5, %v4023_v14 }
 0x5b4   :  { %10617 = vmatprep.subr.bf16.mxu0 %v12780_v61  ;;  %v3895_v50 = vld [vmem:[#allocation9 + $0x18b8] sm:$0xff]  ;;  %v12739_v61 = vcombine.low %v4019_v5, %v4023_v14 }
 0x5b5   :  { %10525 = vmatpush2.bf16.msra.mxu1 %v12403_v30  ;;  %v4011_v1 = vld [vmem:[#allocation9 + $0x1c58] sm:$0xff]  ;;  %v12612_v45 = vcombine.high %v3891_v20, %v3895_v50 }
 0x5b6   :  { %v10323_v8 = vpop.f32.mrf.mxu0  ;;  %10568 = vmatmul.mubr.bf16.vlgmr.msra.gmra.mxu0 %v15714_v48  ;;  %10576 = vmatprep.subr.bf16.mxu1 %v12652_v19  ;;  %v12643_v48 = vcombine.low %v3923_v29, %v3927_v3  ;;  %v4015_v11 = vld [vmem:[#allocation9 + $0x1c78] sm:$0xff]  ;;  %v12611_v19 = vcombine.low %v3891_v20, %v3895_v50 }
 0x5b7   :  { %10618 = vmatpush1.bf16.msra.mxu0 %v12779_v53  ;;  %10649 = vmatprep.mubr.bf16.mxu0 %v15727_v59  ;;  %v12636_v59 = vcombine.high %v3915_v6, %v3919_v43  ;;  %v3883_v30 = vld [vmem:[#allocation9 + $0x1858] sm:$0xff]  ;;  %v12732_v26 = vcombine.high %v4011_v1, %v4015_v11 }
 0x5b8   :  { %v10282_v35 = vpop.f32.mrf.mxu1  ;;  %v10325_v39 = vpop.f32.mrf.mxu0  ;;  %10527 = vmatmul.mubr.bf16.vlgmr.msra.gmra.mxu1 %v15711_v10  ;;  %10619 = vmatprep.subr.bf16.mxu0 %v12772_v32  ;;  %v12763_v10 = vcombine.low %v4043_v54, %v4047_v17  ;;  %v3887_v21 = vld [vmem:[#allocation9 + $0x1878] sm:$0xff]  ;;  %v12731_v32 = vcombine.low %v4011_v1, %v4015_v11 }
 0x5b9   :  { %v10283_v15 = vadd.f32 %v10282_v35, %v15843_v63  ;;  %10577 = vmatpush1.bf16.msra.mxu1 %v12651_v52  ;;  %10608 = vmatprep.mubr.bf16.mxu1 %v15733_v56  ;;  %v4003_v53 = vld [vmem:[#allocation9 + $0x1c18] sm:$0xff]  ;;  %v12604_v3 = vcombine.high %v3883_v30, %v3887_v21 }
 0x5ba   :  { %v10284_v47 = vpop.f32.mrf.mxu1  ;;  %v10327_v34 = vpop.f32.mrf.mxu0  ;;  %10578 = vmatprep.subr.bf16.mxu1 %v12644_v38  ;;  %v4007_v29 = vld [vmem:[#allocation9 + $0x1c38] sm:$0xff] }
 0x5bb   :  { %v15852_v31 = vadd.f32 %v10323_v8, %v10283_v15  ;;  %v10285_v27 = vadd.f32 %v10284_v47, %v15845_v0  ;;  %10620 = vmatpush1.bf16.msra.mxu0 %v12771_v51  ;;  %v3899_v0 = vld [vmem:[#allocation9 + $0x18d8] sm:$0xff]  ;;  %v12724_v17 = vcombine.high %v4003_v53, %v4007_v29  ;;  %v12603_v8 = vcombine.low %v3883_v30, %v3887_v21 }
 0x5bc   :  { %v10286_v37 = vpop.f32.mrf.mxu1  ;;  %v10328_v63 = vpop.f32.mrf.mxu0  ;;  %10621 = vmatprep.subr.bf16.mxu0 %v12764_v12  ;;  %v12620_v57 = vcombine.high %v3899_v0, %v3903_v62  ;;  %v12619_v49 = vcombine.low %v3899_v0, %v3903_v62  ;;  %v3875_v52 = vld [vmem:[#allocation9 + $0x1818] sm:$0xff]  ;;  %v12723_v43 = vcombine.low %v4003_v53, %v4007_v29 }
 0x5bd   :  { %v15855_v56 = vadd.f32 %v10325_v39, %v10285_v27  ;;  %10579 = vmatpush1.bf16.msra.mxu1 %v12643_v48  ;;  %v3879_v54 = vld [vmem:[#allocation9 + $0x1838] sm:$0xff] }
 0x5be   :  { %v10287_v40 = vpop.f32.mrf.mxu1  ;;  %10580 = vmatprep.subr.bf16.mxu1 %v12636_v59  ;;  %v4123_v38 = vld [vmem:[#allocation9 + $0x1fd8] sm:$0xff]  ;;  %v12596_v6 = vcombine.high %v3875_v52, %v3879_v54  ;;  %v12595_v15 = vcombine.low %v3875_v52, %v3879_v54 }
 0x5bf   :  { %10622 = vmatpush1.bf16.msra.mxu0 %v12763_v10  ;;  %v4127_v51 = vld [vmem:[#allocation9 + $0x1ff8] sm:$0xff] }
 0x5c0   :  { %10623 = vmatprep.subr.bf16.mxu0 %v12756_v46  ;;  %v3995_v35 = vld [vmem:[#allocation9 + $0x1bd8] sm:$0xff]  ;;  %v12844_v12 = vcombine.high %v4123_v38, %v4127_v51  ;;  %v12843_v47 = vcombine.low %v4123_v38, %v4127_v51 }
 0x5c1   :  { %10581 = vmatpush1.bf16.msra.mxu1 %v12635_v4  ;;  %v3999_v39 = vld [vmem:[#allocation9 + $0x1bf8] sm:$0xff] }
 0x5c2   :  { %10582 = vmatprep.subr.bf16.mxu1 %v12628_v23  ;;  %v4115_v48 = vld [vmem:[#allocation9 + $0x1f98] sm:$0xff]  ;;  %v12716_v44 = vcombine.high %v3995_v35, %v3999_v39  ;;  %v12715_v10 = vcombine.low %v3995_v35, %v3999_v39 }
 0x5c3   :  { %10624 = vmatpush1.bf16.msra.mxu0 %v12755_v7  ;;  %v4119_v36 = vld [vmem:[#allocation9 + $0x1fb8] sm:$0xff] }
 0x5c4   :  { %10625 = vmatprep.subr.bf16.mxu0 %v12748_v42  ;;  %v3987_v34 = vld [vmem:[#allocation9 + $0x1b98] sm:$0xff]  ;;  %v12836_v27 = vcombine.high %v4115_v48, %v4119_v36  ;;  %v12835_v63 = vcombine.low %v4115_v48, %v4119_v36 }
 0x5c5   :  { %10583 = vmatpush1.bf16.msra.mxu1 %v12627_v55  ;;  %v3991_v59 = vld [vmem:[#allocation9 + $0x1bb8] sm:$0xff] }
 0x5c6   :  { %10584 = vmatprep.subr.bf16.mxu1 %v12620_v57  ;;  %v4107_v2 = vld [vmem:[#allocation9 + $0x1f58] sm:$0xff]  ;;  %v12708_v37 = vcombine.high %v3987_v34, %v3991_v59  ;;  %v12707_v13 = vcombine.low %v3987_v34, %v3991_v59  ;;  %v10661_v34 = vmax.f32 %v15815_v58, 0.0 }
 0x5c7   :  { %10626 = vmatpush1.bf16.msra.mxu0 %v12747_v28  ;;  %v4111_v24 = vld [vmem:[#allocation9 + $0x1f78] sm:$0xff] }
 0x5c8   :  { %10627 = vmatprep.subr.bf16.mxu0 %v12740_v22  ;;  %v3979_v46 = vld [vmem:[#allocation9 + $0x1b58] sm:$0xff]  ;;  %v12828_v9 = vcombine.high %v4107_v2, %v4111_v24  ;;  %v12827_v0 = vcombine.low %v4107_v2, %v4111_v24  ;;  %v10659_v2 = vmax.f32 %v15775_v18, 0.0  ;;  %v13221_v24 = vld [vmem:[#allocation12 + $0xb8] sm:$0xff]  }
 0x5c9   :  { %10585 = vmatpush1.bf16.msra.mxu1 %v12619_v49  ;;  %v3983_v4 = vld [vmem:[#allocation9 + $0x1b78] sm:$0xff] }
 0x5ca   :  { %10586 = vmatprep.subr.bf16.mxu1 %v12612_v45  ;;  %v4099_v40 = vld [vmem:[#allocation9 + $0x1f18] sm:$0xff]  ;;  %v12700_v7 = vcombine.high %v3979_v46, %v3983_v4  ;;  %v12699_v5 = vcombine.low %v3979_v46, %v3983_v4  ;;  %v10669_v46 = vpack.c.bf16 %v10661_v34, %v10661_v34  ;;  %v13287_v4 = vld [vmem:[#allocation10] sm:$0xff] }
 0x5cb   :  { %10628 = vmatpush1.bf16.msra.mxu0 %v12739_v61  ;;  %v4103_v23 = vld [vmem:[#allocation9 + $0x1f38] sm:$0xff] }
 0x5cc   :  { %10629 = vmatprep.subr.bf16.mxu0 %v12732_v26  ;;  %v3971_v62 = vld [vmem:[#allocation9 + $0x1b18] sm:$0xff]  ;;  %v12820_v55 = vcombine.high %v4099_v40, %v4103_v23  ;;  %v12819_v20 = vcombine.low %v4099_v40, %v4103_v23  ;;  %v10667_v23 = vpack.c.bf16 %v10659_v2, %v10659_v2 }
 0x5cd   :  { %10587 = vmatpush1.bf16.msra.mxu1 %v12611_v19  ;;  %v3975_v42 = vld [vmem:[#allocation9 + $0x1b38] sm:$0xff] }
 0x5ce   :  { %10588 = vmatprep.subr.bf16.mxu1 %v12604_v3  ;;  %v4091_v14 = vld [vmem:[#allocation9 + $0x1ed8] sm:$0xff]  ;;  %v12692_v28 = vcombine.high %v3971_v62, %v3975_v42  ;;  %v12691_v1 = vcombine.low %v3971_v62, %v3975_v42 }
 0x5cf   :  { %10630 = vmatpush1.bf16.msra.mxu0 %v12731_v32  ;;  %v4095_v57 = vld [vmem:[#allocation9 + $0x1ef8] sm:$0xff] }
 0x5d0   :  { %10631 = vmatprep.subr.bf16.mxu0 %v12724_v17  ;;  %v3963_v50 = vld [vmem:[#allocation9 + $0x1ad8] sm:$0xff]  ;;  %v12812_v49 = vcombine.high %v4091_v14, %v4095_v57  ;;  %v12811_v30 = vcombine.low %v4091_v14, %v4095_v57 }
 0x5d1   :  { %10589 = vmatpush1.bf16.msra.mxu1 %v12603_v8  ;;  %v3967_v22 = vld [vmem:[#allocation9 + $0x1af8] sm:$0xff] }
 0x5d2   :  { %10590 = vmatprep.subr.bf16.mxu1 %v12596_v6  ;;  %v4083_v11 = vld [vmem:[#allocation9 + $0x1e98] sm:$0xff]  ;;  %v12684_v61 = vcombine.high %v3963_v50, %v3967_v22  ;;  %v12683_v53 = vcombine.low %v3963_v50, %v3967_v22 }
 0x5d3   :  { %10632 = vmatpush1.bf16.msra.mxu0 %v12723_v43  ;;  %v4087_v45 = vld [vmem:[#allocation9 + $0x1eb8] sm:$0xff] }
 0x5d4   :  { %10633 = vmatprep.subr.bf16.mxu0 %v12844_v12  ;;  %v3955_v21 = vld [vmem:[#allocation9 + $0x1a98] sm:$0xff]  ;;  %v12804_v19 = vcombine.high %v4083_v11, %v4087_v45  ;;  %v12803_v52 = vcombine.low %v4083_v11, %v4087_v45  ;;  %v13234_v45 = vld [vmem:[#allocation12 + $0x60] sm:$0xff]  }
 0x5d5   :  { %10591 = vmatpush1.bf16.msra.mxu1 %v12595_v15  ;;  %v3959_v26 = vld [vmem:[#allocation9 + $0x1ab8] sm:$0xff] }
 0x5d6   :  { %10592 = vmatprep.subr.bf16.mxu1 %v12716_v44  ;;  %v4075_v29 = vld [vmem:[#allocation9 + $0x1e58] sm:$0xff]  ;;  %v12676_v32 = vcombine.high %v3955_v21, %v3959_v26  ;;  %v12675_v38 = vcombine.low %v3955_v21, %v3959_v26  ;;  %v13235_v21 = vld [vmem:[#allocation12 + $0x20] sm:$0xff]   ;;  %v13238_v26 = vld [vmem:[#allocation12 + $0x58] sm:$0xff]  }
 0x5d7   :  { %10634 = vmatpush2.bf16.msra.mxu0 %v12843_v47  ;;  %v4079_v3 = vld [vmem:[#allocation9 + $0x1e78] sm:$0xff]  ;;  %v13220_v47 = vld [vmem:[#allocation12 + $0xf8] sm:$0xff]  }
 0x5d8   :  { %10635 = vmatprep.subr.bf16.mxu0 %v12836_v27  ;;  %v3947_v54 = vld [vmem:[#allocation9 + $0x1a58] sm:$0xff]  ;;  %v12796_v8 = vcombine.high %v4075_v29, %v4079_v3  ;;  %v12795_v35 = vcombine.low %v4075_v29, %v4079_v3  ;;  %v4156_v27 = vsub.s32 6, %v15721_v16  ;;  %v13239_v29 = vld [vmem:[#allocation12 + $0x18] sm:$0xff]  }
 0x5d9   :  { %10593 = vmatpush2.bf16.msra.mxu1 %v12715_v10  ;;  %v3951_v17 = vld [vmem:[#allocation9 + $0x1a78] sm:$0xff]  ;;  %v13222_v10 = vld [vmem:[#allocation12 + $0x78] sm:$0xff]  }
 0x5da   :  { %10594 = vmatprep.subr.bf16.mxu1 %v12708_v37  ;;  %v4067_v51 = vld [vmem:[#allocation9 + $0x1e18] sm:$0xff]  ;;  %v12668_v43 = vcombine.high %v3947_v54, %v3951_v17  ;;  %v12667_v48 = vcombine.low %v3947_v54, %v3951_v17  ;;  %v4160_v37 = vsub.s32 7, %v15721_v16  ;;  %v13228_v16 = vld [vmem:[#allocation12 + $0xe8] sm:$0xff]  }
 0x5db   :  { %10636 = vmatpush2.bf16.msra.mxu0 %v12835_v63  ;;  %v4071_v6 = vld [vmem:[#allocation9 + $0x1e38] sm:$0xff]  ;;  %v13246_v17 = vld [vmem:[#allocation12 + $0x48] sm:$0xff]  }
 0x5dc   :  { %10637 = vmatprep.subr.bf16.mxu0 %v12828_v9  ;;  %v3939_v39 = vld [vmem:[#allocation9 + $0x1a18] sm:$0xff]  ;;  %v12788_v15 = vcombine.high %v4067_v51, %v4071_v6  ;;  %v12787_v44 = vcombine.low %v4067_v51, %v4071_v6  ;;  %v4157_v9 = vrot.slane %v13287_v4, %v4156_v27  ;;  %v4161_v18 = vrot.slane %v13287_v4, %v4160_v37  ;;  %v13247_v51 = vld [vmem:[#allocation12 + $0x8] sm:$0xff]   ;;  %v13250_v6 = vld [vmem:[#allocation12 + $0x40] sm:$0xff]  }
 0x5dd   :  { %10595 = vmatpush2.bf16.msra.mxu1 %v12707_v13  ;;  %v3943_v12 = vld [vmem:[#allocation9 + $0x1a38] sm:$0xff]  ;;  %v13223_v13 = vld [vmem:[#allocation12 + $0x38] sm:$0xff]   ;;  %v13273_v37 = vld [vmem:[#allocation12 + $0x1a8] sm:$0xff]  }
 0x5de   :  { %10596 = vmatprep.subr.bf16.mxu1 %v12700_v7  ;;  %v12660_v36 = vcombine.high %v3939_v39, %v3943_v12  ;;  %v12659_v59 = vcombine.low %v3939_v39, %v3943_v12  ;;  %v13224_v63 = vld [vmem:[#allocation12 + $0xf0] sm:$0xff]   ;;  %v13268_v39 = vld [vmem:[#allocation12 + $0x1f8] sm:$0xff]   ;;  %v13251_v12 = vld [vmem:[#allocation12] sm:$0xff]  }
 0x5df   :  { %10638 = vmatpush2.bf16.msra.mxu0 %v12827_v0  ;;  %v13226_v40 = vld [vmem:[#allocation12 + $0x70] sm:$0xff]   ;;  %v13258_v4 = vld [vmem:[#allocation12 + $0x160] sm:$0xff]  }
 0x5e0   :  { %10639 = vmatprep.subr.bf16.mxu0 %v12820_v55  ;;  %v13225_v7 = vld [vmem:[#allocation12 + $0xb0] sm:$0xff]  }
 0x5e1   :  { %10597 = vmatpush2.bf16.msra.mxu1 %v12699_v5  ;;  %v13227_v55 = vld [vmem:[#allocation12 + $0x30] sm:$0xff]  }
 0x5e2   :  { %10598 = vmatprep.subr.bf16.mxu1 %v12692_v28  ;;  %v13229_v28 = vld [vmem:[#allocation12 + $0xa8] sm:$0xff]   ;;  %v13242_v3 = vld [vmem:[#allocation12 + $0x50] sm:$0xff]  }
 0x5e3   :  { %10640 = vmatpush2.bf16.msra.mxu0 %v12819_v20  ;;  %v13243_v54 = vld [vmem:[#allocation12 + $0x10] sm:$0xff]  }
 0x5e4   :  { %10641 = vmatprep.subr.bf16.mxu0 %v12812_v49  ;;  %v13232_v49 = vld [vmem:[#allocation12 + $0xe0] sm:$0xff]   ;;  %v13270_v34 = vld [vmem:[#allocation12 + $0x1f0] sm:$0xff]  }
 0x5e5   :  { %10599 = vmatpush2.bf16.msra.mxu1 %v12691_v1  ;;  %v13271_v2 = vld [vmem:[#allocation12 + $0x1b0] sm:$0xff]  }
 0x5e6   :  { %10600 = vmatprep.subr.bf16.mxu1 %v12684_v61  ;;  %v13233_v61 = vld [vmem:[#allocation12 + $0xa0] sm:$0xff]  }
 0x5e7   :  { %10642 = vmatpush2.bf16.msra.mxu0 %v12811_v30  ;;  %v13236_v30 = vld [vmem:[#allocation12 + $0xd8] sm:$0xff]  }
 0x5e8   :  { %10643 = vmatprep.subr.bf16.mxu0 %v12804_v19  ;;  %v13237_v19 = vld [vmem:[#allocation12 + $0x98] sm:$0xff]  }
 0x5e9   :  { %10601 = vmatpush2.bf16.msra.mxu1 %v12683_v53  ;;  %v13240_v53 = vld [vmem:[#allocation12 + $0xd0] sm:$0xff]  }
 0x5ea   :  { %10602 = vmatprep.subr.bf16.mxu1 %v12676_v32  ;;  %v13241_v32 = vld [vmem:[#allocation12 + $0x90] sm:$0xff]  }
 0x5eb   :  { %10644 = vmatpush2.bf16.msra.mxu0 %v12803_v52  ;;  %v13244_v52 = vld [vmem:[#allocation12 + $0xc8] sm:$0xff]  }
 0x5ec   :  { %10645 = vmatprep.subr.bf16.mxu0 %v12796_v8  ;;  %v13245_v8 = vld [vmem:[#allocation12 + $0x88] sm:$0xff]  }
 0x5ed   :  { %10603 = vmatpush2.bf16.msra.mxu1 %v12675_v38  ;;  %v13248_v38 = vld [vmem:[#allocation12 + $0xc0] sm:$0xff]  }
 0x5ee   :  { %10604 = vmatprep.subr.bf16.mxu1 %v12668_v43  ;;  %v13249_v43 = vld [vmem:[#allocation12 + $0x80] sm:$0xff]  }
 0x5ef   :  { %10646 = vmatpush2.bf16.msra.mxu0 %v12795_v35  ;;  %v10660_v35 = vmax.f32 %v15812_v60, 0.0  ;;  %v13254_v60 = vld [vmem:[#allocation12 + $0x170] sm:$0xff]  }
 0x5f0   :  { %10647 = vmatprep.subr.bf16.mxu0 %v12788_v15  ;;  %v10658_v15 = vmax.f32 %v15772_v25, 0.0  ;;  %v13272_v25 = vld [vmem:[#allocation12 + $0x1e8] sm:$0xff]  }
 0x5f1   :  { %10605 = vmatpush2.bf16.msra.mxu1 %v12667_v48  ;;  %v13252_v48 = vld [vmem:[#allocation12 + $0x178] sm:$0xff]  }
 0x5f2   :  { %10606 = vmatprep.subr.bf16.mxu1 %v12660_v36  ;;  %v10663_v36 = vmax.f32 %v15855_v56, 0.0  ;;  %v10666_v27 = vpack.c.bf16 %v10658_v15, %v10658_v15  ;;  %v13255_v56 = vld [vmem:[#allocation12 + $0x130] sm:$0xff]  }
 0x5f3   :  { %10648 = vmatpush2.bf16.msra.mxu0 %v12787_v44  ;;  %v13269_v44 = vld [vmem:[#allocation12 + $0x1b8] sm:$0xff]  }
 0x5f4   :  { %13116 = vmatprep.subr.bf16.mxu0 %v13220_v47  ;;  %v10668_v47 = vpack.c.bf16 %v10660_v35, %v10660_v35 }
 0x5f5   :  { %10607 = vmatpush2.bf16.msra.mxu1 %v12659_v59  ;;  %v13253_v59 = vld [vmem:[#allocation12 + $0x138] sm:$0xff]  }
 0x5f6   :  { %v10405_v58 = vpop.f32.mrf.mxu0  ;;  %10650 = vmatmul.mubr.bf16.vlgmr.msra.gmra.mxu0 %v15731_v41  ;;  %13094 = vmatprep.subr.bf16.mxu1 %v13222_v10  ;;  %v13230_v41 = vld [vmem:[#allocation12 + $0x68] sm:$0xff]   ;;  %v10671_v10 = vpack.c.bf16 %v10663_v36, %v10663_v36 }
 0x5f7   :  { %13117 = vmatpush3.bf16.msra.mxu0 %v13221_v24  ;;  %11265 = vmatprep.mubr.bf16.mxu0 %v10669_v46  ;;  %v13256_v24 = vld [vmem:[#allocation12 + $0x168] sm:$0xff]  }
 0x5f8   :  { %v10364_v0 = vpop.f32.mrf.mxu1  ;;  %v10407_v62 = vpop.f32.mrf.mxu0  ;;  %10609 = vmatmul.mubr.bf16.vlgmr.msra.gmra.mxu1 %v15740_v33  ;;  %13118 = vmatprep.subr.bf16.mxu0 %v13224_v63  ;;  %v13231_v33 = vld [vmem:[#allocation12 + $0x28] sm:$0xff]   ;;  %v13274_v63 = vld [vmem:[#allocation12 + $0x1e0] sm:$0xff]  }
 0x5f9   :  { %v10365_v42 = vadd.f32 %v10364_v0, %v4157_v9  ;;  %13095 = vmatpush3.bf16.msra.mxu1 %v13223_v13  ;;  %11225 = vmatprep.mubr.bf16.mxu1 %v10667_v23  ;;  %v13257_v46 = vld [vmem:[#allocation12 + $0x128] sm:$0xff]   ;;  %v13275_v9 = vld [vmem:[#allocation12 + $0x1a0] sm:$0xff]   ;;  %v13276_v13 = vld [vmem:[#allocation12 + $0x1d8] sm:$0xff]  }
 0x5fa   :  { %v10366_v5 = vpop.f32.mrf.mxu1  ;;  %v10409_v14 = vpop.f32.mrf.mxu0  ;;  %13096 = vmatprep.subr.bf16.mxu1 %v13226_v40  ;;  %v13260_v40 = vld [vmem:[#allocation12 + $0x158] sm:$0xff]   ;;  %v13263_v0 = vld [vmem:[#allocation12 + $0x110] sm:$0xff]  }
 0x5fb   :  { %v10367_v57 = vadd.f32 %v10366_v5, %v4161_v18  ;;  %13119 = vmatpush3.bf16.msra.mxu0 %v13225_v7  ;;  %v15863_v20 = vadd.f32 %v10405_v58, %v10365_v42  ;;  %v13259_v58 = vld [vmem:[#allocation12 + $0x120] sm:$0xff]   ;;  %v13277_v23 = vld [vmem:[#allocation12 + $0x198] sm:$0xff]   ;;  %v13262_v7 = vld [vmem:[#allocation12 + $0x150] sm:$0xff]   ;;  %v10662_v5 = vmax.f32 %v15852_v31, 0.0 }
 0x5fc   :  { %v10368_v50 = vpop.f32.mrf.mxu1  ;;  %v10410_v22 = vpop.f32.mrf.mxu0  ;;  %13120 = vmatprep.subr.bf16.mxu0 %v13228_v16  ;;  %v13261_v18 = vld [vmem:[#allocation12 + $0x118] sm:$0xff]   ;;  %v13265_v16 = vld [vmem:[#allocation12 + $0x108] sm:$0xff]   ;;  %v13266_v42 = vld [vmem:[#allocation12 + $0x140] sm:$0xff]  }
 0x5fd   :  { %13097 = vmatpush3.bf16.msra.mxu1 %v13227_v55  ;;  %v15865_v1 = vadd.f32 %v10407_v62, %v10367_v57  ;;  %v13264_v62 = vld [vmem:[#allocation12 + $0x148] sm:$0xff]   ;;  %v13267_v55 = vld [vmem:[#allocation12 + $0x100] sm:$0xff]   ;;  %v10670_v14 = vpack.c.bf16 %v10662_v5, %v10662_v5 }
 0x5fe   :  { %v10369_v11 = vpop.f32.mrf.mxu1  ;;  %13098 = vmatprep.subr.bf16.mxu1 %v13230_v41 }
 0x5ff   :  { %13121 = vmatpush3.bf16.msra.mxu0 %v13229_v28 }
 0x600   :  { %13122 = vmatprep.subr.bf16.mxu0 %v13232_v49 }
 0x601   :  { %13099 = vmatpush3.bf16.msra.mxu1 %v13231_v33 }
 0x602   :  { %13100 = vmatprep.subr.bf16.mxu1 %v13234_v45  ;;  %v13278_v45 = vld [vmem:[#allocation12 + $0x1d0] sm:$0xff]  }
 0x603   :  { %13123 = vmatpush3.bf16.msra.mxu0 %v13233_v61 }
 0x604   :  { %13124 = vmatprep.subr.bf16.mxu0 %v13236_v30 }
 0x605   :  { %13101 = vmatpush3.bf16.msra.mxu1 %v13235_v21  ;;  %v13279_v21 = vld [vmem:[#allocation12 + $0x190] sm:$0xff]  }
 0x606   :  { %13102 = vmatprep.subr.bf16.mxu1 %v13238_v26 }
 0x607   :  { %13125 = vmatpush3.bf16.msra.mxu0 %v13237_v19  ;;  %v13280_v19 = vld [vmem:[#allocation12 + $0x1c8] sm:$0xff]  }
 0x608   :  { %13126 = vmatprep.subr.bf16.mxu0 %v13240_v53  ;;  %v13281_v53 = vld [vmem:[#allocation12 + $0x188] sm:$0xff]  }
 0x609   :  { %13103 = vmatpush3.bf16.msra.mxu1 %v13239_v29  ;;  %v13282_v29 = vld [vmem:[#allocation12 + $0x1c0] sm:$0xff]  }
 0x60a   :  { %13104 = vmatprep.subr.bf16.mxu1 %v13242_v3  ;;  %v13283_v3 = vld [vmem:[#allocation12 + $0x180] sm:$0xff]  }
 0x60b   :  { %13127 = vmatpush3.bf16.msra.mxu0 %v13241_v32 }
 0x60c   :  { %13128 = vmatprep.subr.bf16.mxu0 %v13244_v52 }
 0x60d   :  { %13105 = vmatpush3.bf16.msra.mxu1 %v13243_v54 }
 0x60e   :  { %13106 = vmatprep.subr.bf16.mxu1 %v13246_v17 }
 0x60f   :  { %13129 = vmatpush3.bf16.msra.mxu0 %v13245_v8 }
 0x610   :  { %13130 = vmatprep.subr.bf16.mxu0 %v13248_v38 }
 0x611   :  { %13107 = vmatpush3.bf16.msra.mxu1 %v13247_v51 }
 0x612   :  { %13108 = vmatprep.subr.bf16.mxu1 %v13250_v6 }
 0x613   :  { %13131 = vmatpush3.bf16.msra.mxu0 %v13249_v43 }
 0x614   :  { %13160 = vmatprep.subr.bf16.mxu0 %v13268_v39 }
 0x615   :  { %13109 = vmatpush3.bf16.msra.mxu1 %v13251_v12 }
 0x616   :  { %11266 = vmatmul.mubr.bf16.vlgmr.msra.gmra.mxu0 %v10668_v47  ;;  %13138 = vmatprep.subr.bf16.mxu1 %v13252_v48 }
 0x617   :  { %13161 = vmatpush3.bf16.msra.mxu0 %v13269_v44 }
 0x618   :  { %11226 = vmatmul.mubr.bf16.vlgmr.msra.gmra.mxu1 %v10666_v27  ;;  %13162 = vmatprep.subr.bf16.mxu0 %v13270_v34 }
 0x619   :  { %13139 = vmatpush3.bf16.msra.mxu1 %v13253_v59  ;;  %11305 = vmatprep.mubr.bf16.mxu1 %v10671_v10 }
 0x61a   :  { %13140 = vmatprep.subr.bf16.mxu1 %v13254_v60 }
 0x61b   :  { %13163 = vmatpush3.bf16.msra.mxu0 %v13271_v2 }
 0x61c   :  { %13164 = vmatprep.subr.bf16.mxu0 %v13272_v25 }
 0x61d   :  { %13141 = vmatpush3.bf16.msra.mxu1 %v13255_v56 }
 0x61e   :  { %13142 = vmatprep.subr.bf16.mxu1 %v13256_v24 }
 0x61f   :  { %13165 = vmatpush3.bf16.msra.mxu0 %v13273_v37 }
 0x620   :  { %13166 = vmatprep.subr.bf16.mxu0 %v13274_v63 }
 0x621   :  { %13143 = vmatpush3.bf16.msra.mxu1 %v13257_v46 }
 0x622   :  { %13144 = vmatprep.subr.bf16.mxu1 %v13258_v4 }
 0x623   :  { %13167 = vmatpush3.bf16.msra.mxu0 %v13275_v9  ;;  %v12845_v9 = vld [vmem:[#allocation13] ss:$0 sm:$0xff] }
 0x624   :  { %13168 = vmatprep.subr.bf16.mxu0 %v13276_v13 }
 0x625   :  { %13145 = vmatpush3.bf16.msra.mxu1 %v13259_v58 }
 0x626   :  { %13146 = vmatprep.subr.bf16.mxu1 %v13260_v40 }
 0x627   :  { %13169 = vmatpush3.bf16.msra.mxu0 %v13277_v23 }
 0x628   :  { %13170 = vmatprep.subr.bf16.mxu0 %v13278_v45 }
 0x629   :  { %13147 = vmatpush3.bf16.msra.mxu1 %v13261_v18 }
 0x62a   :  { %13148 = vmatprep.subr.bf16.mxu1 %v13262_v7 }
 0x62b   :  { %13171 = vmatpush3.bf16.msra.mxu0 %v13279_v21 }
 0x62c   :  { %13172 = vmatprep.subr.bf16.mxu0 %v13280_v19 }
 0x62d   :  { %13149 = vmatpush3.bf16.msra.mxu1 %v13263_v0 }
 0x62e   :  { %13150 = vmatprep.subr.bf16.mxu1 %v13264_v62 }
 0x62f   :  { %13173 = vmatpush3.bf16.msra.mxu0 %v13281_v53 }
 0x630   :  { %13174 = vmatprep.subr.bf16.mxu0 %v13282_v29 }
 0x631   :  { %13151 = vmatpush3.bf16.msra.mxu1 %v13265_v16 }
 0x632   :  { %13152 = vmatprep.subr.bf16.mxu1 %v13266_v42 }
 0x633   :  { %13175 = vmatpush3.bf16.msra.mxu0 %v13283_v3 }
 0x635   :  { %13153 = vmatpush3.bf16.msra.mxu1 %v13267_v55 }
 0x636   :  { %v10487_v41 = vpop.f32.mrf.mxu0 }
 0x638   :  { %v10446_v57 = vpop.f32.mrf.mxu1  ;;  %v10489_v28 = vpop.f32.mrf.mxu0  ;;  %11306 = vmatmul.mubr.bf16.vlgmr.msra.gmra.mxu1 %v10670_v14 }
 0x639   :  { %v10447_v50 = vadd.f32 %v10446_v57, %v15863_v20 }
 0x63a   :  { %v10448_v22 = vpop.f32.mrf.mxu1  ;;  %v10491_v49 = vpop.f32.mrf.mxu0 }
 0x63b   :  { %v10449_v33 = vadd.f32 %v10448_v22, %v15865_v1  ;;  %v10488_v11 = vadd.f32 %v10487_v41, %v10447_v50 }
 0x63c   :  { %v10450_v61 = vpop.f32.mrf.mxu1  ;;  %v10492_v30 = vpop.f32.mrf.mxu0 }
 0x63d   :  { %v10490_v26 = vadd.f32 %v10489_v28, %v10449_v33 }
 0x63e   :  { %v10451_v31 = vpop.f32.mrf.mxu1 }
 0x676   :  { %v10569_v20 = vpop.f32.mrf.mxu0 }
 0x678   :  { %v10528_v32 = vpop.f32.mrf.mxu1  ;;  %v10571_v1 = vpop.f32.mrf.mxu0 }
 0x679   :  { %v10529_v52 = vadd.f32 %v10528_v32, %v10488_v11 }
 0x67a   :  { %v10530_v54 = vpop.f32.mrf.mxu1  ;;  %v10573_v17 = vpop.f32.mrf.mxu0 }
 0x67b   :  { %v10531_v8 = vadd.f32 %v10530_v54, %v10490_v26  ;;  %v10570_v38 = vadd.f32 %v10569_v20, %v10529_v52 }
 0x67c   :  { %v10532_v51 = vpop.f32.mrf.mxu1  ;;  %v10574_v6 = vpop.f32.mrf.mxu0 }
 0x67d   :  { %v10572_v43 = vadd.f32 %v10571_v1, %v10531_v8 }
 0x67e   :  { %v10533_v35 = vpop.f32.mrf.mxu1 }
 0x6b6   :  { %v10651_v39 = vpop.f32.mrf.mxu0 }
 0x6b8   :  { %v10610_v12 = vpop.f32.mrf.mxu1  ;;  %v10653_v15 = vpop.f32.mrf.mxu0 }
 0x6b9   :  { %v10611_v48 = vadd.f32 %v10610_v12, %v10570_v38 }
 0x6ba   :  { %v10612_v36 = vpop.f32.mrf.mxu1  ;;  %v10655_v44 = vpop.f32.mrf.mxu0 }
 0x6bb   :  { %v10652_v47 = vadd.f32 %v10651_v39, %v10611_v48  ;;  %v10613_v34 = vadd.f32 %v10612_v36, %v10572_v43 }
 0x6bc   :  { %v10614_v59 = vpop.f32.mrf.mxu1  ;;  %v10656_v27 = vpop.f32.mrf.mxu0 }
 0x6bd   :  { %v10654_v60 = vadd.f32 %v10653_v15, %v10613_v34  ;;  %v10664_v10 = vmax.f32 %v10652_v47, 0.0 }
 0x6be   :  { %v10615_v2 = vpop.f32.mrf.mxu1 }
 0x6bf   :  { %v10665_v25 = vmax.f32 %v10654_v60, 0.0  ;;  %v10672_v24 = vpack.c.bf16 %v10664_v10, %v10664_v10 }
 0x6c1   :  { %v10673_v56 = vpack.c.bf16 %v10665_v25, %v10665_v25 }
 0x6c3   :  { %11345 = vmatprep.mubr.bf16.mxu0 %v10673_v56 }
 0x6c4   :  { %11346 = vmatmul.mubr.bf16.vlgmr.msra.gmra.mxu0 %v10672_v24 }
 0x6d6   :  { %v13132_v37 = vpop.f32.mrf.mxu0 }
 0x6d8   :  { %v13110_v63 = vpop.f32.mrf.mxu1  ;;  %v13133_v46 = vpop.f32.mrf.mxu0 }
 0x6d9   :  { %v13134_v4 = vadd.f32 %v13133_v46, %v13132_v37 }
 0x6da   :  { %v13111_v13 = vpop.f32.mrf.mxu1  ;;  %v13135_v58 = vpop.f32.mrf.mxu0 }
 0x6db   :  { %v13112_v40 = vadd.f32 %v13111_v13, %v13110_v63 }
 0x6dc   :  { %v13113_v23 = vpop.f32.mrf.mxu1  ;;  %v13136_v18 = vpop.f32.mrf.mxu0 }
 0x6dd   :  { %v11228_v7 = vadd.f32 %v13112_v40, %v12845_v9 }
 0x6de   :  { %v13114_v0 = vpop.f32.mrf.mxu1 }
 0x6df   :  { %v11268_v62 = vadd.f32 %v13134_v4, %v11228_v7 }
 0x6f8   :  { %v13154_v16 = vpop.f32.mrf.mxu1 }
 0x6fa   :  { %v13155_v42 = vpop.f32.mrf.mxu1 }
 0x6fb   :  { %v13156_v55 = vadd.f32 %v13155_v42, %v13154_v16 }
 0x6fc   :  { %v13157_v5 = vpop.f32.mrf.mxu1 }
 0x6fd   :  { %v11308_v14 = vadd.f32 %v13156_v55, %v11268_v62 }
 0x6fe   :  { %v13158_v41 = vpop.f32.mrf.mxu1 }
 0x784   :  { %v13176_v57 = vpop.f32.mrf.mxu0 }
 0x786   :  { %v13177_v28 = vpop.f32.mrf.mxu0 }
 0x787   :  { %v13178_v50 = vadd.f32 %v13177_v28, %v13176_v57 }
 0x788   :  { %v13179_v22 = vpop.f32.mrf.mxu0 }
 0x789   :  { %v11348_v49 = vadd.f32 %v13178_v50, %v11308_v14 }
 0x78a   :  { %v13180_v33 = vpop.f32.mrf.mxu0 }
 0x78b   :  { %11353 = vst [vmem:[#allocation15] sm:$0xff] %v11348_v49 }
 0x78c   :  { %13419 = shalt.err (!%p13416_p6)
}
 0x78d   :  { %11363 = dma.vmem_to_hbm [thread:$0]  %s11361_s22, 128, %s15883_s7, [#allocation6]  }
 0x78e   :  { %13436 = dma.done.wait [#allocation6], 128  }
 0x78f   :  { %13437 = vsyncadd [#allocation6], 4294967168 }
 0x790   :  { %11367 = vsyncpa [#allocation5], 1 }
 0x791   :  { %11368 = vsyncpa [#allocation8], 1 }
 0x792   :  { %11369 = vsyncpa [#allocation11], 1 }
 0x793   :  { %11370 = vsyncpa [#allocation14], 1 }
 0x794   :  { %11371 = vsyncpa [#allocation6], 1 }

</bundles_post_ra>
